<compile_context>
chip_gen: v6e
topology: v6e:2x2x1
jax: 0.10.0
libtpu: 0.0.40
codegen_flags: <defaults>
</compile_context>

<pallas_src>
import jax
import jax.numpy as jnp
from jax.experimental import pallas as pl
from jax.experimental.pallas import tpu as pltpu

C_LANE = 128  # internal channel width = TPU lane width


# ----------------------------------------------------------------------------
# Fused kernel: conv3x3+ReLU -> conv3x3+ReLU -> global average pool.
#   x_ref     : (BT, H, W, CIN) f32     narrow NHWC input tile (no channel pad)
#   w1_ref    : (9*C_LANE, C_LANE) bf16 im2col weight matrix, layer 1
#   b1_ref    : (1, C_LANE) f32
#   w2_ref    : (9*C_LANE, C_LANE) bf16 im2col weight matrix, layer 2
#   b2_ref    : (1, C_LANE) f32
#   feat_ref  : (BT, COUT_SUB, H*W) f32 channels-first, lane-dense feature tile
#   avg_ref   : (BT, 1, C_LANE) f32     global average (padded channels)
#   pad_ref   : VMEM (BT, H+2, W+2, C_LANE) f32 — zero-halo staging buffer
#   patch_ref : VMEM (BT*H*W, 9*C_LANE) bf16    — im2col patch matrix
# ----------------------------------------------------------------------------
def fused_encoder_kernel(x_ref, w1_ref, b1_ref, w2_ref, b2_ref,
                         feat_ref, avg_ref, pad_ref, patch_ref):
    BT, H, W, CIN = x_ref.shape
    C = pad_ref.shape[-1]
    HW = H * W
    M = BT * HW
    COUT_SUB = feat_ref.shape[1]

    # Zero the halo scratch every step (megacore-safe; also re-zeros the
    # interior lanes >= CIN that layer 1's narrow store does not touch).
    pad_ref[...] = jnp.zeros_like(pad_ref)

    # Stage the narrow input in VMEM: masked store of CIN lanes into the
    # 128-lane interior; remaining lanes stay zero. No HBM channel-pad pass.
    pad_ref[:, 1:H + 1, 1:W + 1, :CIN] = x_ref[...]

    def conv3x3_relu(w_ref, b_ref):
        # im2col: 9 shifted views written straight into the bf16 patch scratch
        # (lane-aligned stores, no concatenate copy). bf16 cast happens once
        # per tap here; MXU sees bf16 operands, accumulates in f32.
        for k in range(9):
            dy, dx = divmod(k, 3)
            view = pad_ref[:, dy:dy + H, dx:dx + W, :]          # (BT,H,W,C) f32
            patch_ref[:, k * C:(k + 1) * C] = (
                view.reshape(M, C).astype(patch_ref.dtype))
        acc = jnp.dot(patch_ref[...], w_ref[...],
                      preferred_element_type=jnp.float32)        # (M, C) f32
        return jnp.maximum(acc + b_ref[...], 0.0)

    h1 = conv3x3_relu(w1_ref, b1_ref)                            # (M, C) f32
    # Layer-2 input: reuse the same halo buffer (border is still zero).
    pad_ref[:, 1:H + 1, 1:W + 1, :] = h1.reshape(BT, H, W, C)
    h2 = conv3x3_relu(w2_ref, b2_ref)                            # (M, C) f32

    inv_hw = 1.0 / float(HW)
    for b in range(BT):
        hb = h2[b * HW:(b + 1) * HW, :]                          # (HW, C) f32
        # Lane-dense channels-first feature tile: (COUT_SUB sublanes, HW lanes).
        feat_ref[b] = jnp.transpose(hb)[:COUT_SUB, :].astype(feat_ref.dtype)
        # Fused AdaptiveAvgPool2d(1): sublane reduction, channels stay on lanes.
        avg_ref[b] = (jnp.sum(hb, axis=0, keepdims=True) * inv_hw
                      ).astype(avg_ref.dtype)


# ----------------------------------------------------------------------------
# Parameter prep: pad channel dims to 128 lanes, reshape 3x3 weights to im2col
# matrices, cast weights to bf16 (biases stay f32).
# ----------------------------------------------------------------------------
def _prep_params(params):
    w1, b1 = params["w1"], params["b1"]
    w2, b2 = params["w2"], params["b2"]
    cin, cmid = w1.shape[2], w1.shape[3]
    cout = w2.shape[3]
    assert max(cin, cmid, cout) <= C_LANE, "channel dims must be <= 128 here"

    w1p = jnp.zeros((3, 3, C_LANE, C_LANE), jnp.float32).at[:, :, :cin, :cmid].set(w1)
    w2p = jnp.zeros((3, 3, C_LANE, C_LANE), jnp.float32).at[:, :, :cmid, :cout].set(w2)
    w1m = w1p.reshape(9 * C_LANE, C_LANE).astype(jnp.bfloat16)
    w2m = w2p.reshape(9 * C_LANE, C_LANE).astype(jnp.bfloat16)
    b1p = jnp.zeros((1, C_LANE), jnp.float32).at[0, :cmid].set(b1)
    b2p = jnp.zeros((1, C_LANE), jnp.float32).at[0, :cout].set(b2)
    return w1m, b1p, w2m, b2p, cout


def _pick_batch_tile(n):
    # Fold up to 4 images into one grid step (M = BT*H*W) to amortize the
    # per-step pipeline overhead; grid length stays n // BT.
    for bt in (4, 2, 1):
        if n % bt == 0:
            return bt
    return 1


def init_encoder_params(key, c_in=4, c_mid=8, feat_dim=16):
    k1, k2, k3, k4 = jax.random.split(key, 4)
    return {
        "w1": jax.random.normal(k1, (3, 3, c_in, c_mid), jnp.float32) * 0.1,
        "b1": jax.random.normal(k2, (c_mid,), jnp.float32) * 0.01,
        "w2": jax.random.normal(k3, (3, 3, c_mid, feat_dim), jnp.float32) * 0.1,
        "b2": jax.random.normal(k4, (feat_dim,), jnp.float32) * 0.01,
    }


# ----------------------------------------------------------------------------
# Encoder forward (mirrors Encoder.forward).
# Returns (encoded_image [N, feat_dim, H, W], average_feat [N, feat_dim]).
# ----------------------------------------------------------------------------
@jax.jit
def encoder_forward(img_nchw, params):
    N, CIN, H, W = img_nchw.shape
    w1m, b1p, w2m, b2p, cout = _prep_params(params)
    cout_sub = ((cout + 7) // 8) * 8          # sublane-aligned output channels
    BT = _pick_batch_tile(N)
    HW = H * W

    # NCHW -> NHWC at the module boundary only; channels stay narrow (CIN).
    x = jnp.transpose(img_nchw, (0, 2, 3, 1))                    # (N,H,W,CIN)

    feat_p, avg_p = pl.pallas_call(
        fused_encoder_kernel,
        out_shape=(
            jax.ShapeDtypeStruct((N, cout_sub, HW), jnp.float32),
            jax.ShapeDtypeStruct((N, 1, C_LANE), jnp.float32),
        ),
        grid_spec=pltpu.PrefetchScalarGridSpec(
            num_scalar_prefetch=0,
            grid=(N // BT,),
            in_specs=[
                pl.BlockSpec((BT, H, W, CIN), lambda n: (n, 0, 0, 0)),
                pl.BlockSpec((9 * C_LANE, C_LANE), lambda n: (0, 0)),
                pl.BlockSpec((1, C_LANE), lambda n: (0, 0)),
                pl.BlockSpec((9 * C_LANE, C_LANE), lambda n: (0, 0)),
                pl.BlockSpec((1, C_LANE), lambda n: (0, 0)),
            ],
            out_specs=[
                pl.BlockSpec((BT, cout_sub, HW), lambda n: (n, 0, 0)),
                pl.BlockSpec((BT, 1, C_LANE), lambda n: (n, 0, 0)),
            ],
            scratch_shapes=[
                pltpu.VMEM((BT, H + 2, W + 2, C_LANE), jnp.float32),
                pltpu.VMEM((BT * HW, 9 * C_LANE), jnp.bfloat16),
            ],
        ),
        compiler_params=pltpu.CompilerParams(
            dimension_semantics=("parallel",),
            vmem_limit_bytes=16 * 1024 * 1024,
        ),
    )(x, w1m, b1p, w2m, b2p)

    # feat_p is already channels-first: NCHW is just a (free) reshape.
    encoded_image = feat_p[:, :cout, :].reshape(N, cout, H, W)
    average_feat = avg_p[:, 0, :cout]                            # (N, feat_dim)
    return encoded_image, average_feat


# ----------------------------------------------------------------------------
# Pure-JAX reference (same bf16-operand / f32-accumulate numerics).
# ----------------------------------------------------------------------------
def reference_forward(img_nchw, params):
    x = jnp.transpose(img_nchw, (0, 2, 3, 1)).astype(jnp.bfloat16)

    def conv(xin, w, b):
        y = jax.lax.conv_general_dilated(
            xin, w.astype(jnp.bfloat16), window_strides=(1, 1), padding="SAME",
            dimension_numbers=("NHWC", "HWIO", "NHWC"),
            preferred_element_type=jnp.float32)
        return jnp.maximum(y + b, 0.0)

    h1 = conv(x, params["w1"], params["b1"]).astype(jnp.bfloat16)
    h2 = conv(h1, params["w2"], params["b2"])
    avg = jnp.mean(h2, axis=(1, 2))
    return jnp.transpose(h2, (0, 3, 1, 2)), avg


if __name__ == "__main__":
    key = jax.random.PRNGKey(0)
    k_img, k_par = jax.random.split(key)

    N, C_in, H, W = 2, 4, 16, 16
    img = jax.random.normal(k_img, (N, C_in, H, W), jnp.float32)
    params = init_encoder_params(k_par, c_in=C_in, c_mid=8, feat_dim=16)

    encoded_image, average_feat = encoder_forward(img, params)
    jax.block_until_ready((encoded_image, average_feat))

    assert encoded_image.shape == (N, 16, H, W)
    assert average_feat.shape == (N, 16)

    ref_feat, ref_avg = reference_forward(img, params)
    assert jnp.allclose(encoded_image, ref_feat, atol=1e-2, rtol=1e-2)
    assert jnp.allclose(average_feat, ref_avg, atol=1e-2, rtol=1e-2)

    print("KERNEL_OK")
</pallas_src>

<mosaic_0001>
module attributes {stable_mosaic.version = 11 : i64} {
  func.func @fused_encoder_kernel(%arg0: i32, %arg1: memref<2x16x16x4xf32, #tpu.memory_space<vmem>>, %arg2: memref<1152x128xbf16, #tpu.memory_space<vmem>>, %arg3: memref<1x128xf32, #tpu.memory_space<vmem>>, %arg4: memref<1152x128xbf16, #tpu.memory_space<vmem>>, %arg5: memref<1x128xf32, #tpu.memory_space<vmem>>, %arg6: memref<2x16x256xf32, #tpu.memory_space<vmem>>, %arg7: memref<2x1x128xf32, #tpu.memory_space<vmem>>, %arg8: memref<2x18x18x128xf32, #tpu.memory_space<vmem>>, %arg9: memref<512x1152xbf16, #tpu.memory_space<vmem>>) attributes {dimension_semantics = [#tpu.dimension_semantics<parallel>], iteration_bounds = array<i64: 1>, scalar_prefetch = 0 : i64, scratch_operands = 2 : i64, tpu.core_type = #tpu.core_type<tc>, window_params = [{transform_indices = @transform_0, window_bounds = array<i64: 2, 16, 16, 4>}, {pipeline_mode = #tpu.pipeline_mode<synchronous>, transform_indices = @transform_1, window_bounds = array<i64: 1152, 128>}, {pipeline_mode = #tpu.pipeline_mode<synchronous>, transform_indices = @transform_2, window_bounds = array<i64: 1, 128>}, {pipeline_mode = #tpu.pipeline_mode<synchronous>, transform_indices = @transform_3, window_bounds = array<i64: 1152, 128>}, {pipeline_mode = #tpu.pipeline_mode<synchronous>, transform_indices = @transform_4, window_bounds = array<i64: 1, 128>}, {transform_indices = @transform_5, window_bounds = array<i64: 2, 16, 256>}, {transform_indices = @transform_6, window_bounds = array<i64: 2, 1, 128>}]} {
    %cst = arith.constant 0.000000e+00 : f32
    %0 = vector.broadcast %cst : f32 to vector<2x18x18x128xf32>
    %c0 = arith.constant 0 : index
    %c0_0 = arith.constant 0 : index
    %c0_1 = arith.constant 0 : index
    %c0_2 = arith.constant 0 : index
    %1 = vector.load %arg8[%c0, %c0_0, %c0_1, %c0_2] : memref<2x18x18x128xf32, #tpu.memory_space<vmem>>, vector<2x18x18x128xf32>
    tpu.vector_store %arg8[%c0, %c0_0, %c0_1, %c0_2], %0 {strides = array<i32>} : memref<2x18x18x128xf32, #tpu.memory_space<vmem>>, vector<2x18x18x128xf32>,
    %c0_3 = arith.constant 0 : index
    %c0_4 = arith.constant 0 : index
    %c0_5 = arith.constant 0 : index
    %c0_6 = arith.constant 0 : index
    %2 = vector.load %arg1[%c0_3, %c0_4, %c0_5, %c0_6] : memref<2x16x16x4xf32, #tpu.memory_space<vmem>>, vector<2x16x16x4xf32>
    %c0_7 = arith.constant 0 : index
    %c1 = arith.constant 1 : index
    %c1_8 = arith.constant 1 : index
    %c0_9 = arith.constant 0 : index
    %3 = vector.load %arg8[%c0_7, %c1, %c1_8, %c0_9] : memref<2x18x18x128xf32, #tpu.memory_space<vmem>>, vector<2x16x16x4xf32>
    tpu.vector_store %arg8[%c0_7, %c1, %c1_8, %c0_9], %2 {strides = array<i32>} : memref<2x18x18x128xf32, #tpu.memory_space<vmem>>, vector<2x16x16x4xf32>,
    %c0_10 = arith.constant 0 : index
    %c0_11 = arith.constant 0 : index
    %c0_12 = arith.constant 0 : index
    %c0_13 = arith.constant 0 : index
    %4 = vector.load %arg8[%c0_10, %c0_11, %c0_12, %c0_13] : memref<2x18x18x128xf32, #tpu.memory_space<vmem>>, vector<2x16x16x128xf32>
    %5 = vector.shape_cast %4 : vector<2x16x16x128xf32> to vector<512x128xf32>
    %6 = arith.truncf %5 : vector<512x128xf32> to vector<512x128xbf16>
    %c0_14 = arith.constant 0 : index
    %c0_15 = arith.constant 0 : index
    %7 = vector.load %arg9[%c0_14, %c0_15] : memref<512x1152xbf16, #tpu.memory_space<vmem>>, vector<512x128xbf16>
    tpu.vector_store %arg9[%c0_14, %c0_15], %6 {strides = array<i32>} : memref<512x1152xbf16, #tpu.memory_space<vmem>>, vector<512x128xbf16>,
    %c0_16 = arith.constant 0 : index
    %c0_17 = arith.constant 0 : index
    %c1_18 = arith.constant 1 : index
    %c0_19 = arith.constant 0 : index
    %8 = vector.load %arg8[%c0_16, %c0_17, %c1_18, %c0_19] : memref<2x18x18x128xf32, #tpu.memory_space<vmem>>, vector<2x16x16x128xf32>
    %9 = vector.shape_cast %8 : vector<2x16x16x128xf32> to vector<512x128xf32>
    %10 = arith.truncf %9 : vector<512x128xf32> to vector<512x128xbf16>
    %c0_20 = arith.constant 0 : index
    %c128 = arith.constant 128 : index
    %11 = vector.load %arg9[%c0_20, %c128] : memref<512x1152xbf16, #tpu.memory_space<vmem>>, vector<512x128xbf16>
    tpu.vector_store %arg9[%c0_20, %c128], %10 {strides = array<i32>} : memref<512x1152xbf16, #tpu.memory_space<vmem>>, vector<512x128xbf16>,
    %c0_21 = arith.constant 0 : index
    %c0_22 = arith.constant 0 : index
    %c2 = arith.constant 2 : index
    %c0_23 = arith.constant 0 : index
    %12 = vector.load %arg8[%c0_21, %c0_22, %c2, %c0_23] : memref<2x18x18x128xf32, #tpu.memory_space<vmem>>, vector<2x16x16x128xf32>
    %13 = vector.shape_cast %12 : vector<2x16x16x128xf32> to vector<512x128xf32>
    %14 = arith.truncf %13 : vector<512x128xf32> to vector<512x128xbf16>
    %c0_24 = arith.constant 0 : index
    %c256 = arith.constant 256 : index
    %15 = vector.load %arg9[%c0_24, %c256] : memref<512x1152xbf16, #tpu.memory_space<vmem>>, vector<512x128xbf16>
    tpu.vector_store %arg9[%c0_24, %c256], %14 {strides = array<i32>} : memref<512x1152xbf16, #tpu.memory_space<vmem>>, vector<512x128xbf16>,
    %c0_25 = arith.constant 0 : index
    %c1_26 = arith.constant 1 : index
    %c0_27 = arith.constant 0 : index
    %c0_28 = arith.constant 0 : index
    %16 = vector.load %arg8[%c0_25, %c1_26, %c0_27, %c0_28] : memref<2x18x18x128xf32, #tpu.memory_space<vmem>>, vector<2x16x16x128xf32>
    %17 = vector.shape_cast %16 : vector<2x16x16x128xf32> to vector<512x128xf32>
    %18 = arith.truncf %17 : vector<512x128xf32> to vector<512x128xbf16>
    %c0_29 = arith.constant 0 : index
    %c384 = arith.constant 384 : index
    %19 = vector.load %arg9[%c0_29, %c384] : memref<512x1152xbf16, #tpu.memory_space<vmem>>, vector<512x128xbf16>
    tpu.vector_store %arg9[%c0_29, %c384], %18 {strides = array<i32>} : memref<512x1152xbf16, #tpu.memory_space<vmem>>, vector<512x128xbf16>,
    %c0_30 = arith.constant 0 : index
    %c1_31 = arith.constant 1 : index
    %c1_32 = arith.constant 1 : index
    %c0_33 = arith.constant 0 : index
    %20 = vector.load %arg8[%c0_30, %c1_31, %c1_32, %c0_33] : memref<2x18x18x128xf32, #tpu.memory_space<vmem>>, vector<2x16x16x128xf32>
    %21 = vector.shape_cast %20 : vector<2x16x16x128xf32> to vector<512x128xf32>
    %22 = arith.truncf %21 : vector<512x128xf32> to vector<512x128xbf16>
    %c0_34 = arith.constant 0 : index
    %c512 = arith.constant 512 : index
    %23 = vector.load %arg9[%c0_34, %c512] : memref<512x1152xbf16, #tpu.memory_space<vmem>>, vector<512x128xbf16>
    tpu.vector_store %arg9[%c0_34, %c512], %22 {strides = array<i32>} : memref<512x1152xbf16, #tpu.memory_space<vmem>>, vector<512x128xbf16>,
    %c0_35 = arith.constant 0 : index
    %c1_36 = arith.constant 1 : index
    %c2_37 = arith.constant 2 : index
    %c0_38 = arith.constant 0 : index
    %24 = vector.load %arg8[%c0_35, %c1_36, %c2_37, %c0_38] : memref<2x18x18x128xf32, #tpu.memory_space<vmem>>, vector<2x16x16x128xf32>
    %25 = vector.shape_cast %24 : vector<2x16x16x128xf32> to vector<512x128xf32>
    %26 = arith.truncf %25 : vector<512x128xf32> to vector<512x128xbf16>
    %c0_39 = arith.constant 0 : index
    %c640 = arith.constant 640 : index
    %27 = vector.load %arg9[%c0_39, %c640] : memref<512x1152xbf16, #tpu.memory_space<vmem>>, vector<512x128xbf16>
    tpu.vector_store %arg9[%c0_39, %c640], %26 {strides = array<i32>} : memref<512x1152xbf16, #tpu.memory_space<vmem>>, vector<512x128xbf16>,
    %c0_40 = arith.constant 0 : index
    %c2_41 = arith.constant 2 : index
    %c0_42 = arith.constant 0 : index
    %c0_43 = arith.constant 0 : index
    %28 = vector.load %arg8[%c0_40, %c2_41, %c0_42, %c0_43] : memref<2x18x18x128xf32, #tpu.memory_space<vmem>>, vector<2x16x16x128xf32>
    %29 = vector.shape_cast %28 : vector<2x16x16x128xf32> to vector<512x128xf32>
    %30 = arith.truncf %29 : vector<512x128xf32> to vector<512x128xbf16>
    %c0_44 = arith.constant 0 : index
    %c768 = arith.constant 768 : index
    %31 = vector.load %arg9[%c0_44, %c768] : memref<512x1152xbf16, #tpu.memory_space<vmem>>, vector<512x128xbf16>
    tpu.vector_store %arg9[%c0_44, %c768], %30 {strides = array<i32>} : memref<512x1152xbf16, #tpu.memory_space<vmem>>, vector<512x128xbf16>,
    %c0_45 = arith.constant 0 : index
    %c2_46 = arith.constant 2 : index
    %c1_47 = arith.constant 1 : index
    %c0_48 = arith.constant 0 : index
    %32 = vector.load %arg8[%c0_45, %c2_46, %c1_47, %c0_48] : memref<2x18x18x128xf32, #tpu.memory_space<vmem>>, vector<2x16x16x128xf32>
    %33 = vector.shape_cast %32 : vector<2x16x16x128xf32> to vector<512x128xf32>
    %34 = arith.truncf %33 : vector<512x128xf32> to vector<512x128xbf16>
    %c0_49 = arith.constant 0 : index
    %c896 = arith.constant 896 : index
    %35 = vector.load %arg9[%c0_49, %c896] : memref<512x1152xbf16, #tpu.memory_space<vmem>>, vector<512x128xbf16>
    tpu.vector_store %arg9[%c0_49, %c896], %34 {strides = array<i32>} : memref<512x1152xbf16, #tpu.memory_space<vmem>>, vector<512x128xbf16>,
    %c0_50 = arith.constant 0 : index
    %c2_51 = arith.constant 2 : index
    %c2_52 = arith.constant 2 : index
    %c0_53 = arith.constant 0 : index
    %36 = vector.load %arg8[%c0_50, %c2_51, %c2_52, %c0_53] : memref<2x18x18x128xf32, #tpu.memory_space<vmem>>, vector<2x16x16x128xf32>
    %37 = vector.shape_cast %36 : vector<2x16x16x128xf32> to vector<512x128xf32>
    %38 = arith.truncf %37 : vector<512x128xf32> to vector<512x128xbf16>
    %c0_54 = arith.constant 0 : index
    %c1024 = arith.constant 1024 : index
    %39 = vector.load %arg9[%c0_54, %c1024] : memref<512x1152xbf16, #tpu.memory_space<vmem>>, vector<512x128xbf16>
    tpu.vector_store %arg9[%c0_54, %c1024], %38 {strides = array<i32>} : memref<512x1152xbf16, #tpu.memory_space<vmem>>, vector<512x128xbf16>,
    %c0_55 = arith.constant 0 : index
    %c0_56 = arith.constant 0 : index
    %40 = vector.load %arg9[%c0_55, %c0_56] : memref<512x1152xbf16, #tpu.memory_space<vmem>>, vector<512x1152xbf16>
    %c0_57 = arith.constant 0 : index
    %c0_58 = arith.constant 0 : index
    %41 = vector.load %arg2[%c0_57, %c0_58] : memref<1152x128xbf16, #tpu.memory_space<vmem>>, vector<1152x128xbf16>
    %cst_59 = arith.constant dense<0.000000e+00> : vector<512x128xf32>
    %42 = tpu.matmul %40, %41, %cst_59 {dimension_numbers = #tpu.dot_dimension_numbers<[1], [0], [0], [1], [0, 0, 1, 1], [], []>} : vector<512x1152xbf16>, vector<1152x128xbf16>, vector<512x128xf32> -> vector<512x128xf32>
    %c0_60 = arith.constant 0 : index
    %c0_61 = arith.constant 0 : index
    %43 = vector.load %arg3[%c0_60, %c0_61] : memref<1x128xf32, #tpu.memory_space<vmem>>, vector<1x128xf32>
    %44 = vector.broadcast %43 : vector<1x128xf32> to vector<512x128xf32>
    %45 = arith.addf %42, %44 : vector<512x128xf32>
    %cst_62 = arith.constant 0.000000e+00 : f32
    %46 = vector.broadcast %cst_62 : f32 to vector<512x128xf32>
    %47 = arith.maximumf %45, %46 : vector<512x128xf32>
    %48 = vector.shape_cast %47 : vector<512x128xf32> to vector<2x16x16x128xf32>
    %c0_63 = arith.constant 0 : index
    %c1_64 = arith.constant 1 : index
    %c1_65 = arith.constant 1 : index
    %c0_66 = arith.constant 0 : index
    %49 = vector.load %arg8[%c0_63, %c1_64, %c1_65, %c0_66] : memref<2x18x18x128xf32, #tpu.memory_space<vmem>>, vector<2x16x16x128xf32>
    tpu.vector_store %arg8[%c0_63, %c1_64, %c1_65, %c0_66], %48 {strides = array<i32>} : memref<2x18x18x128xf32, #tpu.memory_space<vmem>>, vector<2x16x16x128xf32>,
    %c0_67 = arith.constant 0 : index
    %c0_68 = arith.constant 0 : index
    %c0_69 = arith.constant 0 : index
    %c0_70 = arith.constant 0 : index
    %50 = vector.load %arg8[%c0_67, %c0_68, %c0_69, %c0_70] : memref<2x18x18x128xf32, #tpu.memory_space<vmem>>, vector<2x16x16x128xf32>
    %51 = vector.shape_cast %50 : vector<2x16x16x128xf32> to vector<512x128xf32>
    %52 = arith.truncf %51 : vector<512x128xf32> to vector<512x128xbf16>
    %c0_71 = arith.constant 0 : index
    %c0_72 = arith.constant 0 : index
    %53 = vector.load %arg9[%c0_71, %c0_72] : memref<512x1152xbf16, #tpu.memory_space<vmem>>, vector<512x128xbf16>
    tpu.vector_store %arg9[%c0_71, %c0_72], %52 {strides = array<i32>} : memref<512x1152xbf16, #tpu.memory_space<vmem>>, vector<512x128xbf16>,
    %c0_73 = arith.constant 0 : index
    %c0_74 = arith.constant 0 : index
    %c1_75 = arith.constant 1 : index
    %c0_76 = arith.constant 0 : index
    %54 = vector.load %arg8[%c0_73, %c0_74, %c1_75, %c0_76] : memref<2x18x18x128xf32, #tpu.memory_space<vmem>>, vector<2x16x16x128xf32>
    %55 = vector.shape_cast %54 : vector<2x16x16x128xf32> to vector<512x128xf32>
    %56 = arith.truncf %55 : vector<512x128xf32> to vector<512x128xbf16>
    %c0_77 = arith.constant 0 : index
    %c128_78 = arith.constant 128 : index
    %57 = vector.load %arg9[%c0_77, %c128_78] : memref<512x1152xbf16, #tpu.memory_space<vmem>>, vector<512x128xbf16>
    tpu.vector_store %arg9[%c0_77, %c128_78], %56 {strides = array<i32>} : memref<512x1152xbf16, #tpu.memory_space<vmem>>, vector<512x128xbf16>,
    %c0_79 = arith.constant 0 : index
    %c0_80 = arith.constant 0 : index
    %c2_81 = arith.constant 2 : index
    %c0_82 = arith.constant 0 : index
    %58 = vector.load %arg8[%c0_79, %c0_80, %c2_81, %c0_82] : memref<2x18x18x128xf32, #tpu.memory_space<vmem>>, vector<2x16x16x128xf32>
    %59 = vector.shape_cast %58 : vector<2x16x16x128xf32> to vector<512x128xf32>
    %60 = arith.truncf %59 : vector<512x128xf32> to vector<512x128xbf16>
    %c0_83 = arith.constant 0 : index
    %c256_84 = arith.constant 256 : index
    %61 = vector.load %arg9[%c0_83, %c256_84] : memref<512x1152xbf16, #tpu.memory_space<vmem>>, vector<512x128xbf16>
    tpu.vector_store %arg9[%c0_83, %c256_84], %60 {strides = array<i32>} : memref<512x1152xbf16, #tpu.memory_space<vmem>>, vector<512x128xbf16>,
    %c0_85 = arith.constant 0 : index
    %c1_86 = arith.constant 1 : index
    %c0_87 = arith.constant 0 : index
    %c0_88 = arith.constant 0 : index
    %62 = vector.load %arg8[%c0_85, %c1_86, %c0_87, %c0_88] : memref<2x18x18x128xf32, #tpu.memory_space<vmem>>, vector<2x16x16x128xf32>
    %63 = vector.shape_cast %62 : vector<2x16x16x128xf32> to vector<512x128xf32>
    %64 = arith.truncf %63 : vector<512x128xf32> to vector<512x128xbf16>
    %c0_89 = arith.constant 0 : index
    %c384_90 = arith.constant 384 : index
    %65 = vector.load %arg9[%c0_89, %c384_90] : memref<512x1152xbf16, #tpu.memory_space<vmem>>, vector<512x128xbf16>
    tpu.vector_store %arg9[%c0_89, %c384_90], %64 {strides = array<i32>} : memref<512x1152xbf16, #tpu.memory_space<vmem>>, vector<512x128xbf16>,
    %c0_91 = arith.constant 0 : index
    %c1_92 = arith.constant 1 : index
    %c1_93 = arith.constant 1 : index
    %c0_94 = arith.constant 0 : index
    %66 = vector.load %arg8[%c0_91, %c1_92, %c1_93, %c0_94] : memref<2x18x18x128xf32, #tpu.memory_space<vmem>>, vector<2x16x16x128xf32>
    %67 = vector.shape_cast %66 : vector<2x16x16x128xf32> to vector<512x128xf32>
    %68 = arith.truncf %67 : vector<512x128xf32> to vector<512x128xbf16>
    %c0_95 = arith.constant 0 : index
    %c512_96 = arith.constant 512 : index
    %69 = vector.load %arg9[%c0_95, %c512_96] : memref<512x1152xbf16, #tpu.memory_space<vmem>>, vector<512x128xbf16>
    tpu.vector_store %arg9[%c0_95, %c512_96], %68 {strides = array<i32>} : memref<512x1152xbf16, #tpu.memory_space<vmem>>, vector<512x128xbf16>,
    %c0_97 = arith.constant 0 : index
    %c1_98 = arith.constant 1 : index
    %c2_99 = arith.constant 2 : index
    %c0_100 = arith.constant 0 : index
    %70 = vector.load %arg8[%c0_97, %c1_98, %c2_99, %c0_100] : memref<2x18x18x128xf32, #tpu.memory_space<vmem>>, vector<2x16x16x128xf32>
    %71 = vector.shape_cast %70 : vector<2x16x16x128xf32> to vector<512x128xf32>
    %72 = arith.truncf %71 : vector<512x128xf32> to vector<512x128xbf16>
    %c0_101 = arith.constant 0 : index
    %c640_102 = arith.constant 640 : index
    %73 = vector.load %arg9[%c0_101, %c640_102] : memref<512x1152xbf16, #tpu.memory_space<vmem>>, vector<512x128xbf16>
    tpu.vector_store %arg9[%c0_101, %c640_102], %72 {strides = array<i32>} : memref<512x1152xbf16, #tpu.memory_space<vmem>>, vector<512x128xbf16>,
    %c0_103 = arith.constant 0 : index
    %c2_104 = arith.constant 2 : index
    %c0_105 = arith.constant 0 : index
    %c0_106 = arith.constant 0 : index
    %74 = vector.load %arg8[%c0_103, %c2_104, %c0_105, %c0_106] : memref<2x18x18x128xf32, #tpu.memory_space<vmem>>, vector<2x16x16x128xf32>
    %75 = vector.shape_cast %74 : vector<2x16x16x128xf32> to vector<512x128xf32>
    %76 = arith.truncf %75 : vector<512x128xf32> to vector<512x128xbf16>
    %c0_107 = arith.constant 0 : index
    %c768_108 = arith.constant 768 : index
    %77 = vector.load %arg9[%c0_107, %c768_108] : memref<512x1152xbf16, #tpu.memory_space<vmem>>, vector<512x128xbf16>
    tpu.vector_store %arg9[%c0_107, %c768_108], %76 {strides = array<i32>} : memref<512x1152xbf16, #tpu.memory_space<vmem>>, vector<512x128xbf16>,
    %c0_109 = arith.constant 0 : index
    %c2_110 = arith.constant 2 : index
    %c1_111 = arith.constant 1 : index
    %c0_112 = arith.constant 0 : index
    %78 = vector.load %arg8[%c0_109, %c2_110, %c1_111, %c0_112] : memref<2x18x18x128xf32, #tpu.memory_space<vmem>>, vector<2x16x16x128xf32>
    %79 = vector.shape_cast %78 : vector<2x16x16x128xf32> to vector<512x128xf32>
    %80 = arith.truncf %79 : vector<512x128xf32> to vector<512x128xbf16>
    %c0_113 = arith.constant 0 : index
    %c896_114 = arith.constant 896 : index
    %81 = vector.load %arg9[%c0_113, %c896_114] : memref<512x1152xbf16, #tpu.memory_space<vmem>>, vector<512x128xbf16>
    tpu.vector_store %arg9[%c0_113, %c896_114], %80 {strides = array<i32>} : memref<512x1152xbf16, #tpu.memory_space<vmem>>, vector<512x128xbf16>,
    %c0_115 = arith.constant 0 : index
    %c2_116 = arith.constant 2 : index
    %c2_117 = arith.constant 2 : index
    %c0_118 = arith.constant 0 : index
    %82 = vector.load %arg8[%c0_115, %c2_116, %c2_117, %c0_118] : memref<2x18x18x128xf32, #tpu.memory_space<vmem>>, vector<2x16x16x128xf32>
    %83 = vector.shape_cast %82 : vector<2x16x16x128xf32> to vector<512x128xf32>
    %84 = arith.truncf %83 : vector<512x128xf32> to vector<512x128xbf16>
    %c0_119 = arith.constant 0 : index
    %c1024_120 = arith.constant 1024 : index
    %85 = vector.load %arg9[%c0_119, %c1024_120] : memref<512x1152xbf16, #tpu.memory_space<vmem>>, vector<512x128xbf16>
    tpu.vector_store %arg9[%c0_119, %c1024_120], %84 {strides = array<i32>} : memref<512x1152xbf16, #tpu.memory_space<vmem>>, vector<512x128xbf16>,
    %c0_121 = arith.constant 0 : index
    %c0_122 = arith.constant 0 : index
    %86 = vector.load %arg9[%c0_121, %c0_122] : memref<512x1152xbf16, #tpu.memory_space<vmem>>, vector<512x1152xbf16>
    %c0_123 = arith.constant 0 : index
    %c0_124 = arith.constant 0 : index
    %87 = vector.load %arg4[%c0_123, %c0_124] : memref<1152x128xbf16, #tpu.memory_space<vmem>>, vector<1152x128xbf16>
    %cst_125 = arith.constant dense<0.000000e+00> : vector<512x128xf32>
    %88 = tpu.matmul %86, %87, %cst_125 {dimension_numbers = #tpu.dot_dimension_numbers<[1], [0], [0], [1], [0, 0, 1, 1], [], []>} : vector<512x1152xbf16>, vector<1152x128xbf16>, vector<512x128xf32> -> vector<512x128xf32>
    %c0_126 = arith.constant 0 : index
    %c0_127 = arith.constant 0 : index
    %89 = vector.load %arg5[%c0_126, %c0_127] : memref<1x128xf32, #tpu.memory_space<vmem>>, vector<1x128xf32>
    %90 = vector.broadcast %89 : vector<1x128xf32> to vector<512x128xf32>
    %91 = arith.addf %88, %90 : vector<512x128xf32>
    %cst_128 = arith.constant 0.000000e+00 : f32
    %92 = vector.broadcast %cst_128 : f32 to vector<512x128xf32>
    %93 = arith.maximumf %91, %92 : vector<512x128xf32>
    %94 = vector.extract_strided_slice %93 {offsets = [0, 0], sizes = [256, 128], strides = [1, 1]} : vector<512x128xf32> to vector<256x128xf32>
    %95 = tpu.transpose %94, [1, 0] : vector<256x128xf32> -> vector<128x256xf32>
    %96 = vector.extract_strided_slice %95 {offsets = [0, 0], sizes = [16, 256], strides = [1, 1]} : vector<128x256xf32> to vector<16x256xf32>
    %c0_129 = arith.constant 0 : index
    %c0_130 = arith.constant 0 : index
    %c0_131 = arith.constant 0 : index
    %97 = vector.load %arg6[%c0_129, %c0_130, %c0_131] : memref<2x16x256xf32, #tpu.memory_space<vmem>>, vector<1x16x256xf32>
    %98 = vector.shape_cast %97 : vector<1x16x256xf32> to vector<16x256xf32>
    %99 = vector.shape_cast %96 : vector<16x256xf32> to vector<1x16x256xf32>
    tpu.vector_store %arg6[%c0_129, %c0_130, %c0_131], %99 {strides = array<i32>} : memref<2x16x256xf32, #tpu.memory_space<vmem>>, vector<1x16x256xf32>,
    %cst_132 = arith.constant dense<0.000000e+00> : vector<128xf32>
    %100 = vector.multi_reduction <add>, %94, %cst_132 [0] : vector<256x128xf32> to vector<128xf32>
    %101 = vector.shape_cast %100 : vector<128xf32> to vector<1x128xf32>
    %cst_133 = arith.constant 3.906250e-03 : f32
    %102 = vector.broadcast %cst_133 : f32 to vector<1x128xf32>
    %103 = arith.mulf %101, %102 : vector<1x128xf32>
    %c0_134 = arith.constant 0 : index
    %c0_135 = arith.constant 0 : index
    %c0_136 = arith.constant 0 : index
    %104 = vector.load %arg7[%c0_134, %c0_135, %c0_136] : memref<2x1x128xf32, #tpu.memory_space<vmem>>, vector<1x1x128xf32>
    %105 = vector.shape_cast %104 : vector<1x1x128xf32> to vector<1x128xf32>
    %106 = vector.shape_cast %103 : vector<1x128xf32> to vector<1x1x128xf32>
    tpu.vector_store %arg7[%c0_134, %c0_135, %c0_136], %106 {strides = array<i32>} : memref<2x1x128xf32, #tpu.memory_space<vmem>>, vector<1x1x128xf32>,
    %107 = vector.extract_strided_slice %93 {offsets = [256, 0], sizes = [256, 128], strides = [1, 1]} : vector<512x128xf32> to vector<256x128xf32>
    %108 = tpu.transpose %107, [1, 0] : vector<256x128xf32> -> vector<128x256xf32>
    %109 = vector.extract_strided_slice %108 {offsets = [0, 0], sizes = [16, 256], strides = [1, 1]} : vector<128x256xf32> to vector<16x256xf32>
    %c1_137 = arith.constant 1 : index
    %c0_138 = arith.constant 0 : index
    %c0_139 = arith.constant 0 : index
    %110 = vector.load %arg6[%c1_137, %c0_138, %c0_139] : memref<2x16x256xf32, #tpu.memory_space<vmem>>, vector<1x16x256xf32>
    %111 = vector.shape_cast %110 : vector<1x16x256xf32> to vector<16x256xf32>
    %112 = vector.shape_cast %109 : vector<16x256xf32> to vector<1x16x256xf32>
    tpu.vector_store %arg6[%c1_137, %c0_138, %c0_139], %112 {strides = array<i32>} : memref<2x16x256xf32, #tpu.memory_space<vmem>>, vector<1x16x256xf32>,
    %cst_140 = arith.constant dense<0.000000e+00> : vector<128xf32>
    %113 = vector.multi_reduction <add>, %107, %cst_140 [0] : vector<256x128xf32> to vector<128xf32>
    %114 = vector.shape_cast %113 : vector<128xf32> to vector<1x128xf32>
    %cst_141 = arith.constant 3.906250e-03 : f32
    %115 = vector.broadcast %cst_141 : f32 to vector<1x128xf32>
    %116 = arith.mulf %114, %115 : vector<1x128xf32>
    %c1_142 = arith.constant 1 : index
    %c0_143 = arith.constant 0 : index
    %c0_144 = arith.constant 0 : index
    %117 = vector.load %arg7[%c1_142, %c0_143, %c0_144] : memref<2x1x128xf32, #tpu.memory_space<vmem>>, vector<1x1x128xf32>
    %118 = vector.shape_cast %117 : vector<1x1x128xf32> to vector<1x128xf32>
    %119 = vector.shape_cast %116 : vector<1x128xf32> to vector<1x1x128xf32>
    tpu.vector_store %arg7[%c1_142, %c0_143, %c0_144], %119 {strides = array<i32>} : memref<2x1x128xf32, #tpu.memory_space<vmem>>, vector<1x1x128xf32>,
    return
  }
  func.func @transform_0(%arg0: i32) -> (i32, i32, i32, i32) {
    %c0_i32 = arith.constant 0 : i32
    %c0_i32_0 = arith.constant 0 : i32
    %c0_i32_1 = arith.constant 0 : i32
    %c0_i32_2 = arith.constant 0 : i32
    return %arg0, %c0_i32, %c0_i32_0, %c0_i32_1 : i32, i32, i32, i32
  }
  func.func @transform_1(%arg0: i32) -> (i32, i32) {
    %c0_i32 = arith.constant 0 : i32
    %c0_i32_0 = arith.constant 0 : i32
    %c0_i32_1 = arith.constant 0 : i32
    return %c0_i32, %c0_i32_0 : i32, i32
  }
  func.func @transform_2(%arg0: i32) -> (i32, i32) {
    %c0_i32 = arith.constant 0 : i32
    %c0_i32_0 = arith.constant 0 : i32
    %c0_i32_1 = arith.constant 0 : i32
    return %c0_i32, %c0_i32_0 : i32, i32
  }
  func.func @transform_3(%arg0: i32) -> (i32, i32) {
    %c0_i32 = arith.constant 0 : i32
    %c0_i32_0 = arith.constant 0 : i32
    %c0_i32_1 = arith.constant 0 : i32
    return %c0_i32, %c0_i32_0 : i32, i32
  }
  func.func @transform_4(%arg0: i32) -> (i32, i32) {
    %c0_i32 = arith.constant 0 : i32
    %c0_i32_0 = arith.constant 0 : i32
    %c0_i32_1 = arith.constant 0 : i32
    return %c0_i32, %c0_i32_0 : i32, i32
  }
  func.func @transform_5(%arg0: i32) -> (i32, i32, i32) {
    %c0_i32 = arith.constant 0 : i32
    %c0_i32_0 = arith.constant 0 : i32
    %c0_i32_1 = arith.constant 0 : i32
    return %arg0, %c0_i32, %c0_i32_0 : i32, i32, i32
  }
  func.func @transform_6(%arg0: i32) -> (i32, i32, i32) {
    %c0_i32 = arith.constant 0 : i32
    %c0_i32_0 = arith.constant 0 : i32
    %c0_i32_1 = arith.constant 0 : i32
    return %arg0, %c0_i32, %c0_i32_0 : i32, i32, i32
  }
}

</mosaic_0001>

<bundles_post_ra>
// kernel: encoder_forward.1
= control target key start
LH: loop header
LB: loop body
LE: loop exit
PB: predicated region body
PF: predicated region fallthrough
CT: control target
= control target key end

     0   :  { %v21683_v1 = vmov 0   ;;  %v19520_v4 = vmov 0.0   ;;  %v19521_v6 = vmov 0.0|0.0   ;;  %vm197_vm0 = vcmask 31744   ;;  %s21676_s0 = inlined_call_operand.vmem [shape: f32[2,16,16,4], index: 0, kind: input, shape index: {}]   ;;  %s21677_s1 = inlined_call_operand.vmem [shape: bf16[1152,128], index: 1, kind: input, shape index: {}]   ;;  %s21678_s2 = inlined_call_operand.vmem [shape: f32[1,128], index: 2, kind: input, shape index: {}]   ;;  %s21679_s3 = inlined_call_operand.vmem [shape: bf16[1152,128], index: 3, kind: input, shape index: {}]   ;;  %s21680_s4 = inlined_call_operand.vmem [shape: f32[1,128], index: 4, kind: input, shape index: {}]   ;;  %s21681_s5 = inlined_call_operand.vmem [shape: f32[2,16,256], index: 5, kind: output, shape index: {0}]   ;;  %s21682_s6 = inlined_call_operand.hbm [shape: f32[2,1,128], index: 6, kind: output, shape index: {1}]  }
   0x1   :  { %v18518_v0 = vld [vmem:[%s21677_s1 + $0x38] sm:$0xff]   ;;  %6094 = vmatprep.subr.bf16.mxu0 %v21683_v1  ;;  %6383 = vmatprep.subr.bf16.mxu1 %v21683_v1  ;;  %v19573_v3 = vld [vmem:[%s21677_s1 + $0x30] sm:$0xff]   ;;  %24 = vst [vmem:[#allocation2] sm:$0xff] %v19520_v4  ;;  %25 = vst [vmem:[#allocation2 + $0x8] sm:$0xff] %v19520_v4 }
   0x2   :  { %v19568_v2 = vld [vmem:[%s21677_s1 + $0xb8] sm:$0xff]   ;;  %6095 = vmatpush1.bf16.msra.mxu0 %v18518_v0  ;;  %26 = vst [vmem:[#allocation2 + $0x10] sm:$0x3] %v19520_v4  ;;  %27 = vst [vmem:[#allocation2 + $0x18] sm:$0xff] %v19520_v4  ;;  %v18521_v5 = vld [vmem:[%s21677_s1 + $0xb0] sm:$0xff]  }
   0x3   :  { %28 = vst [vmem:[#allocation2 + $0x20] sm:$0xff] %v19520_v4  ;;  %29 = vst [vmem:[#allocation2 + $0x28] sm:$0x3] %v19520_v4  ;;  %6384 = vmatpush1.bf16.msra.mxu1 %v19568_v2  ;;  %6096 = vmatprep.subr.bf16.mxu0 %v21683_v1  ;;  %v18522_v7 = vld [vmem:[%s21677_s1 + $0x28] sm:$0xff]   ;;  %v18524_v9 = vld [vmem:[%s21677_s1 + $0x20] sm:$0xff]  }
   0x4   :  { %30 = vst [vmem:[#allocation2 + $0x30] sm:$0xff] %v19520_v4  ;;  %31 = vst [vmem:[#allocation2 + $0x38] sm:$0xff] %v19520_v4  ;;  %6385 = vmatprep.subr.bf16.mxu1 %v21683_v1  ;;  %v18523_v8 = vld [vmem:[%s21677_s1 + $0xa8] sm:$0xff]   ;;  %v18525_v10 = vld [vmem:[%s21677_s1 + $0xa0] sm:$0xff]  }
   0x5   :  { %32 = vst [vmem:[#allocation2 + $0x40] sm:$0x3] %v19520_v4  ;;  %33 = vst [vmem:[#allocation2 + $0x48] sm:$0xff] %v19520_v4  ;;  %v18526_v11 = vld [vmem:[%s21677_s1 + $0x18] sm:$0xff]   ;;  %v18528_v13 = vld [vmem:[%s21677_s1 + $0x10] sm:$0xff]  }
   0x6   :  { %34 = vst [vmem:[#allocation2 + $0x50] sm:$0xff] %v19520_v4  ;;  %35 = vst [vmem:[#allocation2 + $0x58] sm:$0x3] %v19520_v4  ;;  %6097 = vmatpush1.bf16.msra.mxu0 %v19573_v3  ;;  %v18527_v12 = vld [vmem:[%s21677_s1 + $0x98] sm:$0xff]   ;;  %v18529_v14 = vld [vmem:[%s21677_s1 + $0x90] sm:$0xff]  }
   0x7   :  { %36 = vst [vmem:[#allocation2 + $0x60] sm:$0xff] %v19520_v4  ;;  %37 = vst [vmem:[#allocation2 + $0x68] sm:$0xff] %v19520_v4  ;;  %6386 = vmatpush1.bf16.msra.mxu1 %v18521_v5  ;;  %6098 = vmatprep.subr.bf16.mxu0 %v21683_v1  ;;  %v18530_v15 = vld [vmem:[%s21677_s1 + $0x8] sm:$0xff]   ;;  %v18532_v17 = vld [vmem:[%s21677_s1] sm:$0xff]  }
   0x8   :  { %38 = vst [vmem:[#allocation2 + $0x70] sm:$0x3] %v19520_v4  ;;  %39 = vst [vmem:[#allocation2 + $0x78] sm:$0xff] %v19520_v4  ;;  %6387 = vmatprep.subr.bf16.mxu1 %v21683_v1  ;;  %v18531_v16 = vld [vmem:[%s21677_s1 + $0x88] sm:$0xff]   ;;  %v18533_v18 = vld [vmem:[%s21677_s1 + $0x80] sm:$0xff]  }
   0x9   :  { %40 = vst [vmem:[#allocation2 + $0x80] sm:$0xff] %v19520_v4  ;;  %41 = vst [vmem:[#allocation2 + $0x88] sm:$0x3] %v19520_v4  ;;  %v18534_v19 = vld [vmem:[%s21677_s1 + $0x78] sm:$0xff]   ;;  %v646_v21 = vld [vmem:[#allocation2 + $0x1] sm:$0xff] }
   0xa   :  { %42 = vst [vmem:[#allocation2 + $0x90] sm:$0xff] %v19520_v4  ;;  %43 = vst [vmem:[#allocation2 + $0x98] sm:$0xff] %v19520_v4  ;;  %6099 = vmatpush1.bf16.msra.mxu0 %v18522_v7  ;;  %v18535_v20 = vld [vmem:[%s21677_s1 + $0xf8] sm:$0xff]   ;;  %v647_v22 = vld [vmem:[#allocation2 + $0x9] sm:$0xff]  ;;  %v17185_v24 = vpack.c.bf16 %v646_v21, %v646_v21 }
   0xb   :  { %44 = vst [vmem:[#allocation2 + $0xa0] sm:$0x3] %v19520_v4  ;;  %45 = vst [vmem:[#allocation2 + $0xa8] sm:$0xff] %v19520_v4  ;;  %6388 = vmatpush1.bf16.msra.mxu1 %v18523_v8  ;;  %6100 = vmatprep.subr.bf16.mxu0 %v21683_v1  ;;  %v18536_v23 = vld [vmem:[%s21677_s1 + $0x70] sm:$0xff]   ;;  %v17186_v25 = vpack.c.bf16 %v647_v22, %v647_v22  ;;  %v132_v26 = vld [vmem:[%s21676_s0] sm:$0xff] }
   0xc   :  { %46 = vst [vmem:[#allocation2 + $0xb0] sm:$0xff] %v19520_v4  ;;  %47 = vst [vmem:[#allocation2 + $0xb8] sm:$0x3] %v19520_v4  ;;  %6389 = vmatprep.subr.bf16.mxu1 %v21683_v1  ;;  %v133_v27 = vld [vmem:[%s21676_s0 + $0x8] sm:$0xff]  ;;  %v18537_v30 = vld [vmem:[%s21677_s1 + $0xf0] sm:$0xff]  }
   0xd   :  { %48 = vst [vmem:[#allocation2 + $0xc0] sm:$0xff] %v19520_v4  ;;  %49 = vst [vmem:[#allocation2 + $0xc8] sm:$0xff] %v19520_v4  ;;  %v1030_v28 = vld [vmem:[#allocation2 + $0x2] sm:$0xff]  ;;  %v1031_v29 = vld [vmem:[#allocation2 + $0xa] sm:$0xff] }
   0xe   :  { %50 = vst [vmem:[#allocation2 + $0xd0] sm:$0x3] %v19520_v4  ;;  %51 = vst [vmem:[#allocation2 + $0xd8] sm:$0xff] %v19520_v4  ;;  %6101 = vmatpush1.bf16.msra.mxu0 %v18524_v9  ;;  %v19762_v31 = vpack.c.bf16 %v1030_v28, %v1030_v28  ;;  %v19764_v32 = vpack.c.bf16 %v1031_v29, %v1031_v29  ;;  %v134_v33 = vld [vmem:[%s21676_s0 + $0x10] sm:$0xff]  ;;  %v135_v34 = vld [vmem:[%s21676_s0 + $0x18] sm:$0xff] }
   0xf   :  { %52 = vst [vmem:[#allocation2 + $0xe0] sm:$0xff] %v19520_v4  ;;  %53 = vst [vmem:[#allocation2 + $0xe8] sm:$0x3] %v19520_v4  ;;  %6390 = vmatpush1.bf16.msra.mxu1 %v18525_v10  ;;  %6102 = vmatprep.subr.bf16.mxu0 %v21683_v1  ;;  %v136_v35 = vld [vmem:[%s21676_s0 + $0x20] sm:$0xff]  ;;  %v137_v36 = vld [vmem:[%s21676_s0 + $0x28] sm:$0xff] }
  0x10   :  { %54 = vst [vmem:[#allocation2 + $0xf0] sm:$0xff] %v19520_v4  ;;  %55 = vst [vmem:[#allocation2 + $0xf8] sm:$0xff] %v19520_v4  ;;  %6391 = vmatprep.subr.bf16.mxu1 %v21683_v1  ;;  %v18538_v37 = vld [vmem:[%s21677_s1 + $0x68] sm:$0xff]   ;;  %v138_v38 = vld [vmem:[%s21676_s0 + $0x30] sm:$0xff] }
  0x11   :  { %56 = vst [vmem:[#allocation2 + $0x100] sm:$0x3] %v19520_v4  ;;  %57 = vst [vmem:[#allocation2 + $0x108] sm:$0xff] %v19520_v4  ;;  %v139_v39 = vld [vmem:[%s21676_s0 + $0x38] sm:$0xff]  ;;  %v140_v40 = vld [vmem:[%s21676_s0 + $0x40] sm:$0xff] }
  0x12   :  { %58 = vst [vmem:[#allocation2 + $0x110] sm:$0xff] %v19520_v4  ;;  %59 = vst [vmem:[#allocation2 + $0x118] sm:$0x3] %v19520_v4  ;;  %6103 = vmatpush1.bf16.msra.mxu0 %v18526_v11  ;;  %v141_v41 = vld [vmem:[%s21676_s0 + $0x48] sm:$0xff]  ;;  %v142_v43 = vld [vmem:[%s21676_s0 + $0x50] sm:$0xff] }
  0x13   :  { %60 = vst [vmem:[#allocation2 + $0x120] sm:$0xff] %v19520_v4  ;;  %61 = vst [vmem:[#allocation2 + $0x128] sm:$0xff] %v19520_v4  ;;  %6392 = vmatpush1.bf16.msra.mxu1 %v18527_v12  ;;  %6104 = vmatprep.subr.bf16.mxu0 %v21683_v1  ;;  %v18539_v42 = vld [vmem:[%s21677_s1 + $0xe8] sm:$0xff]   ;;  %v143_v46 = vld [vmem:[%s21676_s0 + $0x58] sm:$0xff] }
  0x14   :  { %62 = vst [vmem:[#allocation2 + $0x130] sm:$0x3] %v19520_v4  ;;  %63 = vst [vmem:[#allocation2 + $0x138] sm:$0xff] %v19520_v4  ;;  %6393 = vmatprep.subr.bf16.mxu1 %v21683_v1  ;;  %v18540_v47 = vld [vmem:[%s21677_s1 + $0x60] sm:$0xff]   ;;  %v19831_v61 = vld [vmem:[%s21677_s1 + $0x58] sm:$0xff]  }
  0x15   :  { %64 = vst [vmem:[#allocation2 + $0x140] sm:$0xff] %v19520_v4  ;;  %65 = vst [vmem:[#allocation2 + $0x148] sm:$0x3] %v19520_v4  ;;  %v18541_v48 = vld [vmem:[%s21677_s1 + $0xe0] sm:$0xff]   ;;  %v19836_v5 = vld [vmem:[%s21677_s1 + $0xd8] sm:$0xff]  }
  0x16   :  { %66 = vst [vmem:[#allocation2 + $0x150] sm:$0xff] %v19520_v4  ;;  %67 = vst [vmem:[#allocation2 + $0x158] sm:$0xff] %v19520_v4  ;;  %6105 = vmatpush1.bf16.msra.mxu0 %v18528_v13 }
  0x17   :  { %68 = vst [vmem:[#allocation2 + $0x160] sm:$0x3] %v19520_v4  ;;  %69 = vst [vmem:[#allocation2 + $0x168] sm:$0xff] %v19520_v4  ;;  %6394 = vmatpush1.bf16.msra.mxu1 %v18529_v14  ;;  %6106 = vmatprep.subr.bf16.mxu0 %v21683_v1 }
  0x18   :  { %70 = vst [vmem:[#allocation2 + $0x170] sm:$0xff] %v19520_v4  ;;  %71 = vst [vmem:[#allocation2 + $0x178] sm:$0x3] %v19520_v4  ;;  %6395 = vmatprep.subr.bf16.mxu1 %v21683_v1 }
  0x19   :  { %72 = vst [vmem:[#allocation2 + $0x180] sm:$0xff] %v19520_v4  ;;  %73 = vst [vmem:[#allocation2 + $0x188] sm:$0xff] %v19520_v4 }
  0x1a   :  { %74 = vst [vmem:[#allocation2 + $0x190] sm:$0x3] %v19520_v4  ;;  %75 = vst [vmem:[#allocation2 + $0x198] sm:$0xff] %v19520_v4  ;;  %6107 = vmatpush1.bf16.msra.mxu0 %v18530_v15 }
  0x1b   :  { %76 = vst [vmem:[#allocation2 + $0x1a0] sm:$0xff] %v19520_v4  ;;  %77 = vst [vmem:[#allocation2 + $0x1a8] sm:$0x3] %v19520_v4  ;;  %6396 = vmatpush1.bf16.msra.mxu1 %v18531_v16  ;;  %6108 = vmatprep.subr.bf16.mxu0 %v21683_v1 }
  0x1c   :  { %78 = vst [vmem:[#allocation2 + $0x1b0] sm:$0xff] %v19520_v4  ;;  %79 = vst [vmem:[#allocation2 + $0x1b8] sm:$0xff] %v19520_v4  ;;  %6397 = vmatprep.subr.bf16.mxu1 %v21683_v1 }
  0x1d   :  { %80 = vst [vmem:[#allocation2 + $0x1c0] sm:$0x3] %v19520_v4  ;;  %81 = vst [vmem:[#allocation2 + $0x1c8] sm:$0xff] %v19520_v4 }
  0x1e   :  { %82 = vst [vmem:[#allocation2 + $0x1d0] sm:$0xff] %v19520_v4  ;;  %83 = vst [vmem:[#allocation2 + $0x1d8] sm:$0x3] %v19520_v4  ;;  %6109 = vmatpush1.bf16.msra.mxu0 %v18532_v17 }
  0x1f   :  { %84 = vst [vmem:[#allocation2 + $0x1e0] sm:$0xff] %v19520_v4  ;;  %85 = vst [vmem:[#allocation2 + $0x1e8] sm:$0xff] %v19520_v4  ;;  %6398 = vmatpush1.bf16.msra.mxu1 %v18533_v18  ;;  %6110 = vmatprep.subr.bf16.mxu0 %v21683_v1 }
  0x20   :  { %86 = vst [vmem:[#allocation2 + $0x1f0] sm:$0x3] %v19520_v4  ;;  %87 = vst [vmem:[#allocation2 + $0x1f8] sm:$0xff] %v19520_v4  ;;  %6399 = vmatprep.subr.bf16.mxu1 %v21683_v1 }
  0x21   :  { %88 = vst [vmem:[#allocation2 + $0x200] sm:$0xff] %v19520_v4  ;;  %89 = vst [vmem:[#allocation2 + $0x208] sm:$0x3] %v19520_v4 }
  0x22   :  { %90 = vst [vmem:[#allocation2 + $0x210] sm:$0xff] %v19520_v4  ;;  %91 = vst [vmem:[#allocation2 + $0x218] sm:$0xff] %v19520_v4  ;;  %6111 = vmatpush2.bf16.msra.mxu0 %v18534_v19 }
  0x23   :  { %92 = vst [vmem:[#allocation2 + $0x220] sm:$0x3] %v19520_v4  ;;  %93 = vst [vmem:[#allocation2 + $0x228] sm:$0xff] %v19520_v4  ;;  %6400 = vmatpush2.bf16.msra.mxu1 %v18535_v20  ;;  %6112 = vmatprep.subr.bf16.mxu0 %v21683_v1 }
  0x24   :  { %94 = vst [vmem:[#allocation2 + $0x230] sm:$0xff] %v19520_v4  ;;  %95 = vst [vmem:[#allocation2 + $0x238] sm:$0x3] %v19520_v4  ;;  %6401 = vmatprep.subr.bf16.mxu1 %v21683_v1 }
  0x25   :  { %96 = vst [vmem:[#allocation2 + $0x240] sm:$0xff] %v19520_v4  ;;  %97 = vst [vmem:[#allocation2 + $0x248] sm:$0xff] %v19520_v4 }
  0x26   :  { %98 = vst [vmem:[#allocation2 + $0x250] sm:$0x3] %v19520_v4  ;;  %99 = vst [vmem:[#allocation2 + $0x258] sm:$0xff] %v19520_v4  ;;  %6113 = vmatpush2.bf16.msra.mxu0 %v18536_v23 }
  0x27   :  { %100 = vst [vmem:[#allocation2 + $0x260] sm:$0xff] %v19520_v4  ;;  %101 = vst [vmem:[#allocation2 + $0x268] sm:$0x3] %v19520_v4  ;;  %6402 = vmatpush2.bf16.msra.mxu1 %v18537_v30  ;;  %6114 = vmatprep.subr.bf16.mxu0 %v21683_v1 }
  0x28   :  { %102 = vst [vmem:[#allocation2 + $0x270] sm:$0xff] %v19520_v4  ;;  %103 = vst [vmem:[#allocation2 + $0x278] sm:$0xff] %v19520_v4  ;;  %6403 = vmatprep.subr.bf16.mxu1 %v21683_v1 }
  0x29   :  { %104 = vst [vmem:[#allocation2 + $0x280] sm:$0x3] %v19520_v4  ;;  %105 = vst [vmem:[#allocation2 + $0x288] sm:$0xff] %v19520_v4 }
  0x2a   :  { %106 = vst [vmem:[#allocation2 + $0x290] sm:$0xff] %v19520_v4  ;;  %107 = vst [vmem:[#allocation2 + $0x298] sm:$0x3] %v19520_v4  ;;  %6115 = vmatpush2.bf16.msra.mxu0 %v18538_v37 }
  0x2b   :  { %108 = vst [vmem:[#allocation2 + $0x2a0] sm:$0xff] %v19520_v4  ;;  %109 = vst [vmem:[#allocation2 + $0x2a8] sm:$0xff] %v19520_v4  ;;  %6404 = vmatpush2.bf16.msra.mxu1 %v18539_v42  ;;  %6116 = vmatprep.subr.bf16.mxu0 %v21683_v1 }
  0x2c   :  { %110 = vst [vmem:[#allocation2 + $0x2b0] sm:$0x3] %v19520_v4  ;;  %111 = vst [vmem:[#allocation2 + $0x2b8] sm:$0xff] %v19520_v4  ;;  %6405 = vmatprep.subr.bf16.mxu1 %v21683_v1 }
  0x2d   :  { %112 = vst [vmem:[#allocation2 + $0x2c0] sm:$0xff] %v19520_v4  ;;  %113 = vst [vmem:[#allocation2 + $0x2c8] sm:$0x3] %v19520_v4 }
  0x2e   :  { %114 = vst [vmem:[#allocation2 + $0x2d0] sm:$0xff] %v19520_v4  ;;  %115 = vst [vmem:[#allocation2 + $0x2d8] sm:$0xff] %v19520_v4  ;;  %6117 = vmatpush2.bf16.msra.mxu0 %v18540_v47 }
  0x2f   :  { %116 = vst [vmem:[#allocation2 + $0x2e0] sm:$0x3] %v19520_v4  ;;  %117 = vst [vmem:[#allocation2 + $0x2e8] sm:$0xff] %v19520_v4  ;;  %6406 = vmatpush2.bf16.msra.mxu1 %v18541_v48  ;;  %6118 = vmatprep.subr.bf16.mxu0 %v21683_v1 }
  0x30   :  { %118 = vst [vmem:[#allocation2 + $0x2f0] sm:$0xff] %v19520_v4  ;;  %119 = vst [vmem:[#allocation2 + $0x2f8] sm:$0x3] %v19520_v4  ;;  %6407 = vmatprep.subr.bf16.mxu1 %v21683_v1 }
  0x31   :  { %120 = vst [vmem:[#allocation2 + $0x300] sm:$0xff] %v19520_v4  ;;  %121 = vst [vmem:[#allocation2 + $0x308] sm:$0xff] %v19520_v4 }
  0x32   :  { %122 = vst [vmem:[#allocation2 + $0x310] sm:$0x3] %v19520_v4  ;;  %123 = vst [vmem:[#allocation2 + $0x318] sm:$0xff] %v19520_v4  ;;  %6119 = vmatpush2.bf16.msra.mxu0 %v19831_v61 }
  0x33   :  { %124 = vst [vmem:[#allocation2 + $0x320] sm:$0xff] %v19520_v4  ;;  %125 = vst [vmem:[#allocation2 + $0x328] sm:$0x3] %v19520_v4  ;;  %6408 = vmatpush2.bf16.msra.mxu1 %v19836_v5  ;;  %6120 = vmatprep.subr.bf16.mxu0 %v21683_v1 }
  0x34   :  { %126 = vst [vmem:[#allocation2 + $0x330] sm:$0xff] %v19520_v4  ;;  %127 = vst [vmem:[#allocation2 + $0x338] sm:$0xff] %v19520_v4  ;;  %6409 = vmatprep.subr.bf16.mxu1 %v21683_v1 }
  0x35   :  { %128 = vst [vmem:[#allocation2 + $0x340] sm:$0x3] %v19520_v4  ;;  %129 = vst [vmem:[#allocation2 + $0x348] sm:$0xff] %v19520_v4 }
  0x36   :  { %130 = vst [vmem:[#allocation2 + $0x350] sm:$0xff] %v19520_v4  ;;  %131 = vst [vmem:[#allocation2 + $0x358] sm:$0x3] %v19520_v4 }
  0x37   :  { %582 = vst [vmem:[#allocation3] sm:$0xf] %v19521_v6  ;;  %583 = vst [vmem:[#allocation3 + $0x24] sm:$0xf] %v19521_v6 }
  0x38   :  { %198 = vst.msk [vmem:[#allocation2 + $0x19] sm:$0xff] %vm197_vm0, %v132_v26  ;;  %966 = vst [vmem:[#allocation3 + $0x4] sm:$0xf] %v17185_v24 }
  0x39   :  { %967 = vst [vmem:[#allocation3 + $0x28] sm:$0xf] %v17186_v25  ;;  %199 = vst.msk [vmem:[#allocation2 + $0x21] sm:$0xff] %vm197_vm0, %v133_v27 }
  0x3a   :  { %1350 = vst [vmem:[#allocation3 + $0x8] sm:$0xf] %v19762_v31  ;;  %1351 = vst [vmem:[#allocation3 + $0x2c] sm:$0xf] %v19764_v32 }
  0x3b   :  { %200 = vst.msk [vmem:[#allocation2 + $0x31] sm:$0xff] %vm197_vm0, %v134_v33  ;;  %201 = vst.msk [vmem:[#allocation2 + $0x39] sm:$0xff] %vm197_vm0, %v135_v34 }
  0x3c   :  { %202 = vst.msk [vmem:[#allocation2 + $0x49] sm:$0xff] %vm197_vm0, %v136_v35  ;;  %203 = vst.msk [vmem:[#allocation2 + $0x51] sm:$0xff] %vm197_vm0, %v137_v36 }
  0x3d   :  { %204 = vst.msk [vmem:[#allocation2 + $0x61] sm:$0xff] %vm197_vm0, %v138_v38  ;;  %205 = vst.msk [vmem:[#allocation2 + $0x69] sm:$0xff] %vm197_vm0, %v139_v39 }
  0x3e   :  { %206 = vst.msk [vmem:[#allocation2 + $0x79] sm:$0xff] %vm197_vm0, %v140_v40  ;;  %207 = vst.msk [vmem:[#allocation2 + $0x81] sm:$0xff] %vm197_vm0, %v141_v41  ;;  %v18545_v40 = vld [vmem:[%s21677_s1 + $0xd0] sm:$0xff]  }
  0x3f   :  { %v1414_v44 = vld [vmem:[#allocation2 + $0x18] sm:$0xff]  ;;  %208 = vst.msk [vmem:[#allocation2 + $0x91] sm:$0xff] %vm197_vm0, %v142_v43  ;;  %209 = vst.msk [vmem:[#allocation2 + $0x99] sm:$0xff] %vm197_vm0, %v143_v46  ;;  %6410 = vmatpush2.bf16.msra.mxu1 %v18545_v40 }
  0x40   :  { %v648_v45 = vld [vmem:[#allocation2 + $0x19] sm:$0xff]  ;;  %v18549_v49 = vld [vmem:[#allocation3 + $0x4] ss:$36 sps:$4 sm:$0xff]   ;;  %v17313_v50 = vpack.c.bf16 %v1414_v44, %v1414_v44  ;;  %7987 = vst [vmem:[#allocation3] sm:$0xf] %v19521_v6  ;;  %6411 = vmatprep.subr.bf16.mxu1 %v21683_v1 }
  0x41   :  { %v17187_v51 = vpack.c.bf16 %v648_v45, %v648_v45  ;;  %7988 = vst [vmem:[#allocation3 + $0x24] sm:$0xf] %v19521_v6  ;;  %8371 = vst [vmem:[#allocation3 + $0x4] sm:$0xf] %v17185_v24  ;;  %v1415_v52 = vld [vmem:[#allocation2 + $0x20] sm:$0xff]  ;;  %6126 = vmatprep.mubr.bf16.mxu0 %v18549_v49 }
  0x42   :  { %8372 = vst [vmem:[#allocation3 + $0x28] sm:$0xf] %v17186_v25  ;;  %v649_v53 = vld [vmem:[#allocation2 + $0x21] sm:$0xff]  ;;  %v17314_v55 = vpack.c.bf16 %v1415_v52, %v1415_v52  ;;  %1734 = vst [vmem:[#allocation3 + $0xc] sm:$0xf] %v17313_v50  ;;  %v1416_v59 = vld [vmem:[#allocation2 + $0x30] sm:$0xff] }
  0x43   :  { %v1032_v54 = vld [vmem:[#allocation2 + $0x1a] sm:$0xff]  ;;  %584 = vst [vmem:[#allocation3 + $0x48] sm:$0xf] %v17313_v50  ;;  %v17188_v56 = vpack.c.bf16 %v649_v53, %v649_v53  ;;  %968 = vst [vmem:[#allocation3 + $0x4c] sm:$0xf] %v17187_v51  ;;  %v1033_v57 = vld [vmem:[#allocation2 + $0x22] sm:$0xff]  ;;  %v17315_v63 = vpack.c.bf16 %v1416_v59, %v1416_v59 }
  0x44   :  { %v17251_v58 = vpack.c.bf16 %v1032_v54, %v1032_v54  ;;  %v1417_v60 = vld [vmem:[#allocation2 + $0x38] sm:$0xff]  ;;  %v17252_v62 = vpack.c.bf16 %v1033_v57, %v1033_v57  ;;  %1735 = vst [vmem:[#allocation3 + $0x30] sm:$0xf] %v17314_v55  ;;  %585 = vst [vmem:[#allocation3 + $0x6c] sm:$0xf] %v17314_v55  ;;  %v1418_v11 = vld [vmem:[#allocation2 + $0x48] sm:$0xff] }
  0x45   :  { %v17316_v0 = vpack.c.bf16 %v1417_v60, %v1417_v60  ;;  %v650_v2 = vld [vmem:[#allocation2 + $0x31] sm:$0xff]  ;;  %v651_v3 = vld [vmem:[#allocation2 + $0x39] sm:$0xff]  ;;  %969 = vst [vmem:[#allocation3 + $0x70] sm:$0xf] %v17188_v56  ;;  %1736 = vst [vmem:[#allocation3 + $0x54] sm:$0xf] %v17315_v63  ;;  %v17317_v14 = vpack.c.bf16 %v1418_v11, %v1418_v11 }
  0x46   :  { %v1034_v4 = vld [vmem:[#allocation2 + $0x32] sm:$0xff]  ;;  %1352 = vst [vmem:[#allocation3 + $0x50] sm:$0xf] %v17251_v58  ;;  %v17189_v7 = vpack.c.bf16 %v650_v2, %v650_v2  ;;  %v17190_v8 = vpack.c.bf16 %v651_v3, %v651_v3  ;;  %v1035_v9 = vld [vmem:[#allocation2 + $0x3a] sm:$0xff]  ;;  %1353 = vst [vmem:[#allocation3 + $0x74] sm:$0xf] %v17252_v62 }
  0x47   :  { %v17253_v10 = vpack.c.bf16 %v1034_v4, %v1034_v4  ;;  %v1419_v12 = vld [vmem:[#allocation2 + $0x50] sm:$0xff]  ;;  %1737 = vst [vmem:[#allocation3 + $0x78] sm:$0xf] %v17316_v0  ;;  %586 = vst [vmem:[#allocation3 + $0x90] sm:$0xf] %v17315_v63  ;;  %v17254_v13 = vpack.c.bf16 %v1035_v9, %v1035_v9  ;;  %v1420_v23 = vld [vmem:[#allocation2 + $0x60] sm:$0xff] }
  0x48   :  { %587 = vst [vmem:[#allocation3 + $0xb4] sm:$0xf] %v17316_v0  ;;  %v17318_v15 = vpack.c.bf16 %v1419_v12, %v1419_v12  ;;  %v652_v16 = vld [vmem:[#allocation2 + $0x49] sm:$0xff]  ;;  %v653_v17 = vld [vmem:[#allocation2 + $0x51] sm:$0xff]  ;;  %970 = vst [vmem:[#allocation3 + $0x94] sm:$0xf] %v17189_v7  ;;  %v17319_v27 = vpack.c.bf16 %v1420_v23, %v1420_v23 }
  0x49   :  { %v1036_v18 = vld [vmem:[#allocation2 + $0x4a] sm:$0xff]  ;;  %971 = vst [vmem:[#allocation3 + $0xb8] sm:$0xf] %v17190_v8  ;;  %1354 = vst [vmem:[#allocation3 + $0x98] sm:$0xf] %v17253_v10  ;;  %v17191_v19 = vpack.c.bf16 %v652_v16, %v652_v16  ;;  %v17192_v20 = vpack.c.bf16 %v653_v17, %v653_v17  ;;  %v1037_v21 = vld [vmem:[#allocation2 + $0x52] sm:$0xff] }
  0x4a   :  { %v17255_v22 = vpack.c.bf16 %v1036_v18, %v1036_v18  ;;  %v1421_v24 = vld [vmem:[#allocation2 + $0x68] sm:$0xff]  ;;  %v18544_v25 = vld [vmem:[%s21677_s1 + $0x50] sm:$0xff]   ;;  %1355 = vst [vmem:[#allocation3 + $0xbc] sm:$0xf] %v17254_v13  ;;  %1738 = vst [vmem:[#allocation3 + $0x9c] sm:$0xf] %v17317_v14  ;;  %v17256_v26 = vpack.c.bf16 %v1037_v21, %v1037_v21 }
  0x4b   :  { %1739 = vst [vmem:[#allocation3 + $0xc0] sm:$0xf] %v17318_v15  ;;  %588 = vst [vmem:[#allocation3 + $0xd8] sm:$0xf] %v17317_v14  ;;  %v17320_v28 = vpack.c.bf16 %v1421_v24, %v1421_v24  ;;  %v654_v29 = vld [vmem:[#allocation2 + $0x61] sm:$0xff]  ;;  %v655_v30 = vld [vmem:[#allocation2 + $0x69] sm:$0xff]  ;;  %6121 = vmatpush2.bf16.msra.mxu0 %v18544_v25 }
  0x4c   :  { %589 = vst [vmem:[#allocation3 + $0xfc] sm:$0xf] %v17318_v15  ;;  %v1038_v33 = vld [vmem:[#allocation2 + $0x62] sm:$0xff]  ;;  %972 = vst [vmem:[#allocation3 + $0xdc] sm:$0xf] %v17191_v19  ;;  %v17193_v34 = vpack.c.bf16 %v654_v29, %v654_v29  ;;  %v17194_v35 = vpack.c.bf16 %v655_v30, %v655_v30  ;;  %v1039_v36 = vld [vmem:[#allocation2 + $0x6a] sm:$0xff]  ;;  %6122 = vmatprep.subr.bf16.mxu0 %v21683_v1 }
  0x4d   :  { %973 = vst [vmem:[#allocation3 + $0x100] sm:$0xf] %v17192_v20  ;;  %1356 = vst [vmem:[#allocation3 + $0xe0] sm:$0xf] %v17255_v22  ;;  %v17257_v37 = vpack.c.bf16 %v1038_v33, %v1038_v33  ;;  %v1422_v38 = vld [vmem:[#allocation2 + $0x78] sm:$0xff]  ;;  %v1423_v39 = vld [vmem:[#allocation2 + $0x80] sm:$0xff]  ;;  %v17258_v41 = vpack.c.bf16 %v1039_v36, %v1039_v36 }
  0x4e   :  { %1357 = vst [vmem:[#allocation3 + $0x104] sm:$0xf] %v17256_v26  ;;  %1740 = vst [vmem:[#allocation3 + $0xe4] sm:$0xf] %v17319_v27  ;;  %v17321_v42 = vpack.c.bf16 %v1422_v38, %v1422_v38  ;;  %v17322_v43 = vpack.c.bf16 %v1423_v39, %v1423_v39  ;;  %v656_v44 = vld [vmem:[#allocation2 + $0x79] sm:$0xff]  ;;  %v657_v45 = vld [vmem:[#allocation2 + $0x81] sm:$0xff] }
  0x4f   :  { %1741 = vst [vmem:[#allocation3 + $0x108] sm:$0xf] %v17320_v28  ;;  %590 = vst [vmem:[#allocation3 + $0x120] sm:$0xf] %v17319_v27  ;;  %v17195_v46 = vpack.c.bf16 %v656_v44, %v656_v44  ;;  %v1040_v47 = vld [vmem:[#allocation2 + $0x7a] sm:$0xff]  ;;  %v1041_v48 = vld [vmem:[#allocation2 + $0x82] sm:$0xff]  ;;  %v17196_v50 = vpack.c.bf16 %v657_v45, %v657_v45 }
  0x50   :  { %591 = vst [vmem:[#allocation3 + $0x144] sm:$0xf] %v17320_v28  ;;  %974 = vst [vmem:[#allocation3 + $0x124] sm:$0xf] %v17193_v34  ;;  %v18552_v49 = vld [vmem:[#allocation3 + $0xc] ss:$36 sps:$4 sm:$0xff]   ;;  %v17259_v51 = vpack.c.bf16 %v1040_v47, %v1040_v47  ;;  %v17260_v52 = vpack.c.bf16 %v1041_v48, %v1041_v48 }
  0x51   :  { %975 = vst [vmem:[#allocation3 + $0x148] sm:$0xf] %v17194_v35  ;;  %1358 = vst [vmem:[#allocation3 + $0x128] sm:$0xf] %v17257_v37  ;;  %v18546_v53 = vld [vmem:[%s21677_s1 + $0x48] sm:$0xff]   ;;  %6415 = vmatprep.mubr.bf16.mxu1 %v18552_v49  ;;  %v18551_v55 = vld [vmem:[%s21677_s1 + $0xc0] sm:$0xff]  }
  0x52   :  { %1359 = vst [vmem:[#allocation3 + $0x14c] sm:$0xf] %v17258_v41  ;;  %1742 = vst [vmem:[#allocation3 + $0x12c] sm:$0xf] %v17321_v42  ;;  %v18547_v54 = vld [vmem:[%s21677_s1 + $0xc8] sm:$0xff]   ;;  %6123 = vmatpush2.bf16.msra.mxu0 %v18546_v53  ;;  %v18554_v60 = vld [vmem:[%s21677_s1 + $0x138] sm:$0xff]  }
  0x53   :  { %1743 = vst [vmem:[#allocation3 + $0x150] sm:$0xf] %v17322_v43  ;;  %592 = vst [vmem:[#allocation3 + $0x168] sm:$0xf] %v17321_v42  ;;  %v3724_v56 = vld [vmem:[#allocation3 + $0x24] sm:$0xff]  ;;  %6412 = vmatpush2.bf16.msra.mxu1 %v18547_v54  ;;  %6124 = vmatprep.subr.bf16.mxu0 %v21683_v1  ;;  %v18566_v0 = vld [vmem:[%s21677_s1 + $0x130] sm:$0xff]  }
  0x54   :  { %593 = vst [vmem:[#allocation3 + $0x18c] sm:$0xf] %v17322_v43  ;;  %8755 = vst [vmem:[#allocation3 + $0x8] sm:$0xf] %v19762_v31  ;;  %v18548_v31 = vld [vmem:[%s21677_s1 + $0x40] sm:$0xff]   ;;  %6413 = vmatprep.subr.bf16.mxu1 %v21683_v1  ;;  %v1424_v2 = vld [vmem:[#allocation2 + $0x90] sm:$0xff] }
  0x55   :  { %8756 = vst [vmem:[#allocation3 + $0x2c] sm:$0xf] %v19764_v32  ;;  %976 = vst [vmem:[#allocation3 + $0x16c] sm:$0xf] %v17195_v46  ;;  %v3719_v32 = vld [vmem:[#allocation3] sm:$0xff]  ;;  %v1425_v3 = vld [vmem:[#allocation2 + $0x98] sm:$0xff]  ;;  %v17323_v4 = vpack.c.bf16 %v1424_v2, %v1424_v2 }
  0x56   :  { %977 = vst [vmem:[#allocation3 + $0x190] sm:$0xf] %v17196_v50  ;;  %1360 = vst [vmem:[#allocation3 + $0x170] sm:$0xf] %v17259_v51  ;;  %v15820_v59 = vcombine.low %v3719_v32, %v3724_v56  ;;  %6125 = vmatpush2.bf16.msra.mxu0 %v18548_v31  ;;  %v18555_v62 = vld [vmem:[#allocation3 + $0x4c] ss:$36 sps:$4 sm:$0xff]   ;;  %v17324_v5 = vpack.c.bf16 %v1425_v3, %v1425_v3 }
  0x57   :  { %1361 = vst [vmem:[#allocation3 + $0x194] sm:$0xf] %v17260_v52  ;;  %614 = vst [vmem:[#allocation3 + $0x480] sm:$0xf] %v19521_v6  ;;  %6414 = vmatpush2.bf16.msra.mxu1 %v18551_v55  ;;  %6672 = vmatprep.subr.bf16.mxu0 %v21683_v1  ;;  %v18558_v63 = vld [vmem:[#allocation3 + $0x54] ss:$36 sps:$4 sm:$0xff]  }
  0x58   :  { %615 = vst [vmem:[#allocation3 + $0x4a4] sm:$0xf] %v19521_v6  ;;  %6961 = vmatprep.subr.bf16.mxu1 %v21683_v1  ;;  %v658_v7 = vld [vmem:[#allocation2 + $0x91] sm:$0xff]  ;;  %v659_v8 = vld [vmem:[#allocation2 + $0x99] sm:$0xff]  ;;  %v145_v12 = vld [vmem:[%s21676_s0 + $0x68] sm:$0xff] }
  0x59   :  { %6127 = vmatmul.mubr.bf16.vlgmr.msra.gmra.mxu0 %v15820_v59  ;;  %v144_v9 = vld [vmem:[%s21676_s0 + $0x60] sm:$0xff]  ;;  %v17197_v10 = vpack.c.bf16 %v658_v7, %v658_v7  ;;  %v17198_v11 = vpack.c.bf16 %v659_v8, %v659_v8  ;;  %v1042_v13 = vld [vmem:[#allocation2 + $0x92] sm:$0xff]  ;;  %v18557_v15 = vld [vmem:[#allocation3 + $0x48] ss:$36 sps:$4 sm:$0xff]   ;;  %1744 = vst [vmem:[#allocation3 + $0x174] sm:$0xf] %v17323_v4 }
  0x5a   :  { %6673 = vmatpush1.bf16.msra.mxu0 %v18554_v60  ;;  %210 = vst.msk [vmem:[#allocation2 + $0xa9] sm:$0xff] %vm197_vm0, %v144_v9  ;;  %v1043_v14 = vld [vmem:[#allocation2 + $0x9a] sm:$0xff]  ;;  %6134 = vmatprep.mubr.bf16.mxu0 %v18555_v62  ;;  %1745 = vst [vmem:[#allocation3 + $0x198] sm:$0xf] %v17324_v5  ;;  %v17261_v16 = vpack.c.bf16 %v1042_v13, %v1042_v13  ;;  %v18560_v18 = vld [vmem:[#allocation3 + $0x50] ss:$36 sps:$4 sm:$0xff]  }
  0x5b   :  { %v3720_v57 = vld [vmem:[#allocation3 + $0x8] sm:$0xff]  ;;  %594 = vst [vmem:[#allocation3 + $0x1b0] sm:$0xf] %v17323_v4  ;;  %595 = vst [vmem:[#allocation3 + $0x1d4] sm:$0xf] %v17324_v5  ;;  %v17262_v17 = vpack.c.bf16 %v1043_v14, %v1043_v14  ;;  %6674 = vmatprep.subr.bf16.mxu0 %v21683_v1  ;;  %v146_v20 = vld [vmem:[%s21676_s0 + $0x70] sm:$0xff] }
  0x5c   :  { %v3725_v58 = vld [vmem:[#allocation3 + $0x2c] sm:$0xff]  ;;  %211 = vst.msk [vmem:[#allocation2 + $0xb1] sm:$0xff] %vm197_vm0, %v145_v12  ;;  %v18561_v19 = vld [vmem:[#allocation3 + $0x94] ss:$36 sps:$4 sm:$0xff]   ;;  %978 = vst [vmem:[#allocation3 + $0x1b4] sm:$0xf] %v17197_v10 }
  0x5d   :  { %v15822_v61 = vcombine.low %v3720_v57, %v3725_v58  ;;  %979 = vst [vmem:[#allocation3 + $0x1d8] sm:$0xf] %v17198_v11  ;;  %v147_v21 = vld [vmem:[%s21676_s0 + $0x78] sm:$0xff]  ;;  %v148_v22 = vld [vmem:[%s21676_s0 + $0x80] sm:$0xff]  ;;  %v18579_v23 = vld [vmem:[%s21677_s1 + $0x128] sm:$0xff]  }
  0x5e   :  { %1362 = vst [vmem:[#allocation3 + $0x1b8] sm:$0xf] %v17261_v16  ;;  %1363 = vst [vmem:[#allocation3 + $0x1dc] sm:$0xf] %v17262_v17  ;;  %v149_v24 = vld [vmem:[%s21676_s0 + $0x88] sm:$0xff]  ;;  %6675 = vmatpush1.bf16.msra.mxu0 %v18566_v0  ;;  %v150_v26 = vld [vmem:[%s21676_s0 + $0x90] sm:$0xff] }
  0x5f   :  { %6416 = vmatmul.mubr.bf16.vlgmr.msra.gmra.mxu1 %v15822_v61  ;;  %212 = vst.msk [vmem:[#allocation2 + $0xc1] sm:$0xff] %vm197_vm0, %v146_v20  ;;  %213 = vst.msk [vmem:[#allocation2 + $0xc9] sm:$0xff] %vm197_vm0, %v147_v21  ;;  %v18564_v25 = vld [vmem:[#allocation3 + $0x9c] ss:$36 sps:$4 sm:$0xff]   ;;  %6676 = vmatprep.subr.bf16.mxu0 %v21683_v1  ;;  %v153_v29 = vld [vmem:[%s21676_s0 + $0xa8] sm:$0xff] }
  0x60   :  { %6423 = vmatprep.mubr.bf16.mxu1 %v18558_v63  ;;  %214 = vst.msk [vmem:[#allocation2 + $0xd9] sm:$0xff] %vm197_vm0, %v148_v22  ;;  %215 = vst.msk [vmem:[#allocation2 + $0xe1] sm:$0xff] %vm197_vm0, %v149_v24  ;;  %v151_v27 = vld [vmem:[%s21676_s0 + $0x98] sm:$0xff]  ;;  %v152_v28 = vld [vmem:[%s21676_s0 + $0xa0] sm:$0xff] }
  0x61   :  { %216 = vst.msk [vmem:[#allocation2 + $0xf1] sm:$0xff] %vm197_vm0, %v150_v26  ;;  %217 = vst.msk [vmem:[#allocation2 + $0xf9] sm:$0xff] %vm197_vm0, %v151_v27  ;;  %v154_v30 = vld [vmem:[%s21676_s0 + $0xb0] sm:$0xff]  ;;  %6135 = vmatmul.mubr.bf16.gmra.mxu0 %v18557_v15  ;;  %v1426_v33 = vld [vmem:[#allocation2 + $0xa8] sm:$0xff] }
  0x62   :  { %218 = vst.msk [vmem:[#allocation2 + $0x109] sm:$0xff] %vm197_vm0, %v152_v28  ;;  %219 = vst.msk [vmem:[#allocation2 + $0x111] sm:$0xff] %vm197_vm0, %v153_v29  ;;  %v660_v34 = vld [vmem:[#allocation2 + $0xa9] sm:$0xff]  ;;  %v155_v35 = vld [vmem:[%s21676_s0 + $0xb8] sm:$0xff]  ;;  %6142 = vmatprep.mubr.bf16.mxu0 %v18561_v19  ;;  %v17325_v36 = vpack.c.bf16 %v1426_v33, %v1426_v33  ;;  %6677 = vmatpush1.bf16.msra.mxu0 %v18579_v23 }
  0x63   :  { %220 = vst.msk [vmem:[#allocation2 + $0x121] sm:$0xff] %vm197_vm0, %v154_v30  ;;  %v17199_v37 = vpack.c.bf16 %v660_v34, %v660_v34  ;;  %221 = vst.msk [vmem:[#allocation2 + $0x129] sm:$0xff] %vm197_vm0, %v155_v35  ;;  %v18563_v38 = vld [vmem:[#allocation3 + $0x90] ss:$36 sps:$4 sm:$0xff]   ;;  %v18592_v39 = vld [vmem:[%s21677_s1 + $0x120] sm:$0xff]   ;;  %6678 = vmatprep.subr.bf16.mxu0 %v21683_v1 }
  0x64   :  { %v18567_v40 = vld [vmem:[#allocation3 + $0x98] ss:$36 sps:$4 sm:$0xff]   ;;  %v1427_v42 = vld [vmem:[#allocation2 + $0xb0] sm:$0xff]  ;;  %1746 = vst [vmem:[#allocation3 + $0x1bc] sm:$0xf] %v17325_v36 }
  0x65   :  { %v18568_v41 = vld [vmem:[#allocation3 + $0xdc] ss:$36 sps:$4 sm:$0xff]   ;;  %596 = vst [vmem:[#allocation3 + $0x1f8] sm:$0xf] %v17325_v36  ;;  %980 = vst [vmem:[#allocation3 + $0x1fc] sm:$0xf] %v17199_v37  ;;  %v17326_v44 = vpack.c.bf16 %v1427_v42, %v1427_v42 }
  0x66   :  { %v18571_v43 = vld [vmem:[#allocation3 + $0xe4] ss:$36 sps:$4 sm:$0xff]   ;;  %v661_v45 = vld [vmem:[#allocation2 + $0xb1] sm:$0xff]  ;;  %6679 = vmatpush1.bf16.msra.mxu0 %v18592_v39  ;;  %8019 = vst [vmem:[#allocation3 + $0x480] sm:$0xf] %v19521_v6 }
  0x67   :  { %6424 = vmatmul.mubr.bf16.gmra.mxu1 %v18560_v18  ;;  %v1044_v46 = vld [vmem:[#allocation2 + $0xaa] sm:$0xff]  ;;  %v1045_v47 = vld [vmem:[#allocation2 + $0xb2] sm:$0xff]  ;;  %v17200_v49 = vpack.c.bf16 %v661_v45, %v661_v45  ;;  %v1428_v52 = vld [vmem:[#allocation2 + $0xc0] sm:$0xff]  ;;  %1747 = vst [vmem:[#allocation3 + $0x1e0] sm:$0xf] %v17326_v44  ;;  %6680 = vmatprep.subr.bf16.mxu0 %v21683_v1 }
  0x68   :  { %6431 = vmatprep.mubr.bf16.mxu1 %v18564_v25  ;;  %v18605_v48 = vld [vmem:[%s21677_s1 + $0x118] sm:$0xff]   ;;  %v17263_v50 = vpack.c.bf16 %v1044_v46, %v1044_v46  ;;  %v17264_v51 = vpack.c.bf16 %v1045_v47, %v1045_v47  ;;  %v1429_v53 = vld [vmem:[#allocation2 + $0xc8] sm:$0xff]  ;;  %597 = vst [vmem:[#allocation3 + $0x21c] sm:$0xf] %v17326_v44  ;;  %v17327_v31 = vpack.c.bf16 %v1428_v52, %v1428_v52  ;;  %v1431_v63 = vld [vmem:[#allocation2 + $0xe0] sm:$0xff] }
  0x69   :  { %v662_v54 = vld [vmem:[#allocation2 + $0xc1] sm:$0xff]  ;;  %v17328_v32 = vpack.c.bf16 %v1429_v53, %v1429_v53  ;;  %v663_v55 = vld [vmem:[#allocation2 + $0xc9] sm:$0xff]  ;;  %981 = vst [vmem:[#allocation3 + $0x220] sm:$0xf] %v17200_v49  ;;  %v1430_v62 = vld [vmem:[#allocation2 + $0xd8] sm:$0xff]  ;;  %6143 = vmatmul.mubr.bf16.gmra.mxu0 %v18563_v38  ;;  %v17330_v3 = vpack.c.bf16 %v1431_v63, %v1431_v63 }
  0x6a   :  { %v17201_v56 = vpack.c.bf16 %v662_v54, %v662_v54  ;;  %v1046_v57 = vld [vmem:[#allocation2 + $0xc2] sm:$0xff]  ;;  %v1047_v58 = vld [vmem:[#allocation2 + $0xca] sm:$0xff]  ;;  %1364 = vst [vmem:[#allocation3 + $0x200] sm:$0xf] %v17263_v50  ;;  %1365 = vst [vmem:[#allocation3 + $0x224] sm:$0xf] %v17264_v51  ;;  %v17202_v59 = vpack.c.bf16 %v663_v55, %v663_v55  ;;  %v17329_v2 = vpack.c.bf16 %v1430_v62, %v1430_v62  ;;  %6150 = vmatprep.mubr.bf16.mxu0 %v18568_v41 }
  0x6b   :  { %v17265_v60 = vpack.c.bf16 %v1046_v57, %v1046_v57  ;;  %v17266_v61 = vpack.c.bf16 %v1047_v58, %v1047_v58  ;;  %v664_v0 = vld [vmem:[#allocation2 + $0xd9] sm:$0xff]  ;;  %1748 = vst [vmem:[#allocation3 + $0x204] sm:$0xf] %v17327_v31  ;;  %1749 = vst [vmem:[#allocation3 + $0x228] sm:$0xf] %v17328_v32  ;;  %v665_v4 = vld [vmem:[#allocation2 + $0xe1] sm:$0xff]  ;;  %6681 = vmatpush1.bf16.msra.mxu0 %v18605_v48 }
  0x6c   :  { %598 = vst [vmem:[#allocation3 + $0x240] sm:$0xf] %v17327_v31  ;;  %599 = vst [vmem:[#allocation3 + $0x264] sm:$0xf] %v17328_v32  ;;  %v17203_v5 = vpack.c.bf16 %v664_v0, %v664_v0  ;;  %v1048_v7 = vld [vmem:[#allocation2 + $0xda] sm:$0xff]  ;;  %v1049_v8 = vld [vmem:[#allocation2 + $0xe2] sm:$0xff]  ;;  %v17204_v10 = vpack.c.bf16 %v665_v4, %v665_v4  ;;  %6682 = vmatprep.subr.bf16.mxu0 %v21683_v1 }
  0x6d   :  { %982 = vst [vmem:[#allocation3 + $0x244] sm:$0xf] %v17201_v56  ;;  %v18618_v9 = vld [vmem:[%s21677_s1 + $0x110] sm:$0xff]   ;;  %983 = vst [vmem:[#allocation3 + $0x268] sm:$0xf] %v17202_v59  ;;  %v17267_v11 = vpack.c.bf16 %v1048_v7, %v1048_v7  ;;  %v17268_v12 = vpack.c.bf16 %v1049_v8, %v1049_v8  ;;  %v1433_v14 = vld [vmem:[#allocation2 + $0xf8] sm:$0xff] }
  0x6e   :  { %1366 = vst [vmem:[#allocation3 + $0x248] sm:$0xf] %v17265_v60  ;;  %1367 = vst [vmem:[#allocation3 + $0x26c] sm:$0xf] %v17266_v61  ;;  %v1432_v13 = vld [vmem:[#allocation2 + $0xf0] sm:$0xff]  ;;  %v17332_v18 = vpack.c.bf16 %v1433_v14, %v1433_v14  ;;  %v667_v19 = vld [vmem:[#allocation2 + $0xf9] sm:$0xff] }
  0x6f   :  { %6432 = vmatmul.mubr.bf16.gmra.mxu1 %v18567_v40  ;;  %v666_v15 = vld [vmem:[#allocation2 + $0xf1] sm:$0xff]  ;;  %1750 = vst [vmem:[#allocation3 + $0x24c] sm:$0xf] %v17329_v2  ;;  %1751 = vst [vmem:[#allocation3 + $0x270] sm:$0xf] %v17330_v3  ;;  %v17331_v17 = vpack.c.bf16 %v1432_v13, %v1432_v13  ;;  %v17206_v21 = vpack.c.bf16 %v667_v19, %v667_v19  ;;  %v1051_v23 = vld [vmem:[#allocation2 + $0xfa] sm:$0xff]  ;;  %6683 = vmatpush1.bf16.msra.mxu0 %v18618_v9 }
  0x70   :  { %v18570_v16 = vld [vmem:[#allocation3 + $0xd8] ss:$36 sps:$4 sm:$0xff]   ;;  %6439 = vmatprep.mubr.bf16.mxu1 %v18571_v43  ;;  %600 = vst [vmem:[#allocation3 + $0x288] sm:$0xf] %v17329_v2  ;;  %601 = vst [vmem:[#allocation3 + $0x2ac] sm:$0xf] %v17330_v3  ;;  %v17205_v20 = vpack.c.bf16 %v666_v15, %v666_v15  ;;  %v17270_v26 = vpack.c.bf16 %v1051_v23, %v1051_v23  ;;  %6684 = vmatprep.subr.bf16.mxu0 %v21683_v1 }
  0x71   :  { %984 = vst [vmem:[#allocation3 + $0x28c] sm:$0xf] %v17203_v5  ;;  %985 = vst [vmem:[#allocation3 + $0x2b0] sm:$0xf] %v17204_v10  ;;  %v1050_v22 = vld [vmem:[#allocation2 + $0xf2] sm:$0xff]  ;;  %v1434_v24 = vld [vmem:[#allocation2 + $0x108] sm:$0xff]  ;;  %6151 = vmatmul.mubr.bf16.gmra.mxu0 %v18570_v16 }
  0x72   :  { %1368 = vst [vmem:[#allocation3 + $0x290] sm:$0xf] %v17267_v11  ;;  %1369 = vst [vmem:[#allocation3 + $0x2b4] sm:$0xf] %v17268_v12  ;;  %v17269_v25 = vpack.c.bf16 %v1050_v22, %v1050_v22  ;;  %v1435_v27 = vld [vmem:[#allocation2 + $0x110] sm:$0xff]  ;;  %v17333_v28 = vpack.c.bf16 %v1434_v24, %v1434_v24  ;;  %v1436_v47 = vld [vmem:[#allocation2 + $0x120] sm:$0xff] }
  0x73   :  { %1752 = vst [vmem:[#allocation3 + $0x294] sm:$0xf] %v17331_v17  ;;  %1753 = vst [vmem:[#allocation3 + $0x2b8] sm:$0xf] %v17332_v18  ;;  %v668_v29 = vld [vmem:[#allocation2 + $0x109] sm:$0xff]  ;;  %v669_v30 = vld [vmem:[#allocation2 + $0x111] sm:$0xff]  ;;  %v17334_v35 = vpack.c.bf16 %v1435_v27, %v1435_v27  ;;  %v17335_v52 = vpack.c.bf16 %v1436_v47, %v1436_v47 }
  0x74   :  { %602 = vst [vmem:[#allocation3 + $0x2d0] sm:$0xf] %v17331_v17  ;;  %603 = vst [vmem:[#allocation3 + $0x2f4] sm:$0xf] %v17332_v18  ;;  %v18573_v33 = vld [vmem:[#allocation3 + $0xe0] ss:$36 sps:$4 sm:$0xff]   ;;  %v17207_v36 = vpack.c.bf16 %v668_v29, %v668_v29  ;;  %v17208_v37 = vpack.c.bf16 %v669_v30, %v669_v30 }
  0x75   :  { %986 = vst [vmem:[#allocation3 + $0x2d4] sm:$0xf] %v17205_v20  ;;  %v18574_v34 = vld [vmem:[#allocation3 + $0x124] ss:$36 sps:$4 sm:$0xff]   ;;  %987 = vst [vmem:[#allocation3 + $0x2f8] sm:$0xf] %v17206_v21 }
  0x76   :  { %v18577_v38 = vld [vmem:[#allocation3 + $0x12c] ss:$36 sps:$4 sm:$0xff]   ;;  %1370 = vst [vmem:[#allocation3 + $0x2d8] sm:$0xf] %v17269_v25  ;;  %1371 = vst [vmem:[#allocation3 + $0x2fc] sm:$0xf] %v17270_v26  ;;  %6158 = vmatprep.mubr.bf16.mxu0 %v18574_v34 }
  0x77   :  { %1754 = vst [vmem:[#allocation3 + $0x2dc] sm:$0xf] %v17333_v28  ;;  %604 = vst [vmem:[#allocation3 + $0x318] sm:$0xf] %v17333_v28  ;;  %6440 = vmatmul.mubr.bf16.gmra.mxu1 %v18573_v33  ;;  %v18576_v39 = vld [vmem:[#allocation3 + $0x120] ss:$36 sps:$4 sm:$0xff]  }
  0x78   :  { %1755 = vst [vmem:[#allocation3 + $0x300] sm:$0xf] %v17334_v35  ;;  %605 = vst [vmem:[#allocation3 + $0x33c] sm:$0xf] %v17334_v35  ;;  %6447 = vmatprep.mubr.bf16.mxu1 %v18577_v38  ;;  %v18580_v40 = vld [vmem:[#allocation3 + $0x128] ss:$36 sps:$4 sm:$0xff]  }
  0x79   :  { %988 = vst [vmem:[#allocation3 + $0x31c] sm:$0xf] %v17207_v36  ;;  %989 = vst [vmem:[#allocation3 + $0x340] sm:$0xf] %v17208_v37  ;;  %v18581_v41 = vld [vmem:[#allocation3 + $0x16c] ss:$36 sps:$4 sm:$0xff]   ;;  %6159 = vmatmul.mubr.bf16.gmra.mxu0 %v18576_v39 }
  0x7a   :  { %v18584_v42 = vld [vmem:[#allocation3 + $0x174] ss:$36 sps:$4 sm:$0xff]   ;;  %6166 = vmatprep.mubr.bf16.mxu0 %v18581_v41  ;;  %v1052_v43 = vld [vmem:[#allocation2 + $0x10a] sm:$0xff]  ;;  %v670_v54 = vld [vmem:[#allocation2 + $0x121] sm:$0xff]  ;;  %1756 = vst [vmem:[#allocation3 + $0x324] sm:$0xf] %v17335_v52 }
  0x7b   :  { %v18583_v44 = vld [vmem:[#allocation3 + $0x168] ss:$36 sps:$4 sm:$0xff]   ;;  %v1053_v45 = vld [vmem:[#allocation2 + $0x112] sm:$0xff]  ;;  %v17271_v46 = vpack.c.bf16 %v1052_v43, %v1052_v43  ;;  %v156_v32 = vld [vmem:[%s21676_s0 + $0xc0] sm:$0xff]  ;;  %v17209_v56 = vpack.c.bf16 %v670_v54, %v670_v54  ;;  %606 = vst [vmem:[#allocation3 + $0x360] sm:$0xf] %v17335_v52 }
  0x7c   :  { %v1437_v48 = vld [vmem:[#allocation2 + $0x128] sm:$0xff]  ;;  %v18586_v49 = vld [vmem:[#allocation3 + $0x170] ss:$36 sps:$4 sm:$0xff]   ;;  %v17272_v51 = vpack.c.bf16 %v1053_v45, %v1053_v45  ;;  %v18590_v55 = vld [vmem:[#allocation3 + $0x1bc] ss:$36 sps:$4 sm:$0xff]   ;;  %222 = vst.msk [vmem:[#allocation2 + $0x139] sm:$0xff] %vm197_vm0, %v156_v32 }
  0x7d   :  { %v18587_v50 = vld [vmem:[#allocation3 + $0x1b4] ss:$36 sps:$4 sm:$0xff]   ;;  %v17336_v53 = vpack.c.bf16 %v1437_v48, %v1437_v48  ;;  %v671_v31 = vld [vmem:[#allocation2 + $0x129] sm:$0xff]  ;;  %1372 = vst [vmem:[#allocation3 + $0x320] sm:$0xf] %v17271_v46  ;;  %v160_v3 = vld [vmem:[%s21676_s0 + $0xe0] sm:$0xff] }
  0x7e   :  { %v17210_v57 = vpack.c.bf16 %v671_v31, %v671_v31  ;;  %v157_v58 = vld [vmem:[%s21676_s0 + $0xc8] sm:$0xff]  ;;  %1373 = vst [vmem:[#allocation3 + $0x344] sm:$0xf] %v17272_v51  ;;  %990 = vst [vmem:[#allocation3 + $0x364] sm:$0xf] %v17209_v56  ;;  %v158_v0 = vld [vmem:[%s21676_s0 + $0xd0] sm:$0xff] }
  0x7f   :  { %6448 = vmatmul.mubr.bf16.gmra.mxu1 %v18580_v40  ;;  %v1054_v59 = vld [vmem:[#allocation2 + $0x122] sm:$0xff]  ;;  %v1055_v60 = vld [vmem:[#allocation2 + $0x12a] sm:$0xff]  ;;  %1757 = vst [vmem:[#allocation3 + $0x348] sm:$0xf] %v17336_v53  ;;  %607 = vst [vmem:[#allocation3 + $0x384] sm:$0xf] %v17336_v53 }
  0x80   :  { %6455 = vmatprep.mubr.bf16.mxu1 %v18584_v42  ;;  %223 = vst.msk [vmem:[#allocation2 + $0x141] sm:$0xff] %vm197_vm0, %v157_v58  ;;  %v17273_v61 = vpack.c.bf16 %v1054_v59, %v1054_v59  ;;  %v17274_v62 = vpack.c.bf16 %v1055_v60, %v1055_v60  ;;  %v18631_v63 = vld [vmem:[%s21677_s1 + $0x108] sm:$0xff]   ;;  %991 = vst [vmem:[#allocation3 + $0x388] sm:$0xf] %v17210_v57  ;;  %v159_v2 = vld [vmem:[%s21676_s0 + $0xd8] sm:$0xff] }
  0x81   :  { %6685 = vmatpush1.bf16.msra.mxu0 %v18631_v63  ;;  %224 = vst.msk [vmem:[#allocation2 + $0x151] sm:$0xff] %vm197_vm0, %v158_v0  ;;  %225 = vst.msk [vmem:[#allocation2 + $0x159] sm:$0xff] %vm197_vm0, %v159_v2  ;;  %v161_v4 = vld [vmem:[%s21676_s0 + $0xe8] sm:$0xff]  ;;  %v18644_v5 = vld [vmem:[%s21677_s1 + $0x100] sm:$0xff]  }
  0x82   :  { %1374 = vst [vmem:[#allocation3 + $0x368] sm:$0xf] %v17273_v61  ;;  %1375 = vst [vmem:[#allocation3 + $0x38c] sm:$0xf] %v17274_v62  ;;  %6167 = vmatmul.mubr.bf16.gmra.mxu0 %v18583_v44  ;;  %6686 = vmatprep.subr.bf16.mxu0 %v21683_v1  ;;  %v162_v7 = vld [vmem:[%s21676_s0 + $0xf0] sm:$0xff]  ;;  %v163_v8 = vld [vmem:[%s21676_s0 + $0xf8] sm:$0xff] }
  0x83   :  { %226 = vst.msk [vmem:[#allocation2 + $0x169] sm:$0xff] %vm197_vm0, %v160_v3  ;;  %227 = vst.msk [vmem:[#allocation2 + $0x171] sm:$0xff] %vm197_vm0, %v161_v4  ;;  %6174 = vmatprep.mubr.bf16.mxu0 %v18587_v50  ;;  %v678_v9 = vld [vmem:[#allocation2 + $0x1b1] sm:$0xff]  ;;  %v679_v10 = vld [vmem:[#allocation2 + $0x1b9] sm:$0xff] }
  0x84   :  { %228 = vst.msk [vmem:[#allocation2 + $0x181] sm:$0xff] %vm197_vm0, %v162_v7  ;;  %229 = vst.msk [vmem:[#allocation2 + $0x189] sm:$0xff] %vm197_vm0, %v163_v8  ;;  %v164_v11 = vld [vmem:[%s21676_s0 + $0x100] sm:$0xff]  ;;  %v18589_v12 = vld [vmem:[#allocation3 + $0x1b0] ss:$36 sps:$4 sm:$0xff]   ;;  %v19986_v13 = vpack.c.bf16 %v678_v9, %v678_v9  ;;  %v19988_v14 = vpack.c.bf16 %v679_v10, %v679_v10 }
  0x85   :  { %v165_v15 = vld [vmem:[%s21676_s0 + $0x108] sm:$0xff]  ;;  %230 = vst.msk [vmem:[#allocation2 + $0x1c9] sm:$0xff] %vm197_vm0, %v164_v11  ;;  %v1062_v16 = vld [vmem:[#allocation2 + $0x1b2] sm:$0xff]  ;;  %v1063_v17 = vld [vmem:[#allocation2 + $0x1ba] sm:$0xff]  ;;  %6687 = vmatpush1.bf16.msra.mxu0 %v18644_v5 }
  0x86   :  { %v1438_v18 = vld [vmem:[#allocation2 + $0x138] sm:$0xff]  ;;  %231 = vst.msk [vmem:[#allocation2 + $0x1d1] sm:$0xff] %vm197_vm0, %v165_v15  ;;  %v19995_v20 = vpack.c.bf16 %v1062_v16, %v1062_v16  ;;  %v19997_v21 = vpack.c.bf16 %v1063_v17, %v1063_v17  ;;  %998 = vst [vmem:[#allocation3 + $0x484] sm:$0xf] %v19986_v13  ;;  %6688 = vmatprep.subr.bf16.mxu0 %v21683_v1  ;;  %v18597_v26 = vld [vmem:[#allocation3 + $0x204] ss:$36 sps:$4 sm:$0xff]  }
  0x87   :  { %6456 = vmatmul.mubr.bf16.gmra.mxu1 %v18586_v49  ;;  %v672_v19 = vld [vmem:[#allocation2 + $0x139] sm:$0xff]  ;;  %v17337_v23 = vpack.c.bf16 %v1438_v18, %v1438_v18  ;;  %999 = vst [vmem:[#allocation3 + $0x4a8] sm:$0xf] %v19988_v14  ;;  %v673_v29 = vld [vmem:[#allocation2 + $0x141] sm:$0xff]  ;;  %v18603_v0 = vld [vmem:[#allocation3 + $0x24c] ss:$36 sps:$4 sm:$0xff]  }
  0x88   :  { %6463 = vmatprep.mubr.bf16.mxu1 %v18590_v55  ;;  %v18593_v22 = vld [vmem:[#allocation3 + $0x1b8] ss:$36 sps:$4 sm:$0xff]   ;;  %v17211_v24 = vpack.c.bf16 %v672_v19, %v672_v19  ;;  %1382 = vst [vmem:[#allocation3 + $0x488] sm:$0xf] %v19995_v20  ;;  %1383 = vst [vmem:[#allocation3 + $0x4ac] sm:$0xf] %v19997_v21  ;;  %v17212_v34 = vpack.c.bf16 %v673_v29, %v673_v29 }
  0x89   :  { %v18594_v25 = vld [vmem:[#allocation3 + $0x1fc] ss:$36 sps:$4 sm:$0xff]   ;;  %1758 = vst [vmem:[#allocation3 + $0x36c] sm:$0xf] %v17337_v23  ;;  %608 = vst [vmem:[#allocation3 + $0x3a8] sm:$0xf] %v17337_v23 }
  0x8a   :  { %v1439_v27 = vld [vmem:[#allocation2 + $0x140] sm:$0xff]  ;;  %992 = vst [vmem:[#allocation3 + $0x3ac] sm:$0xf] %v17211_v24  ;;  %6175 = vmatmul.mubr.bf16.gmra.mxu0 %v18589_v12  ;;  %v1440_v37 = vld [vmem:[#allocation2 + $0x150] sm:$0xff]  ;;  %v1441_v38 = vld [vmem:[#allocation2 + $0x158] sm:$0xff] }
  0x8b   :  { %v17338_v28 = vpack.c.bf16 %v1439_v27, %v1439_v27  ;;  %v1056_v30 = vld [vmem:[#allocation2 + $0x13a] sm:$0xff]  ;;  %v1057_v33 = vld [vmem:[#allocation2 + $0x142] sm:$0xff]  ;;  %v674_v39 = vld [vmem:[#allocation2 + $0x151] sm:$0xff]  ;;  %6182 = vmatprep.mubr.bf16.mxu0 %v18594_v25  ;;  %v17339_v40 = vpack.c.bf16 %v1440_v37, %v1440_v37  ;;  %v17340_v41 = vpack.c.bf16 %v1441_v38, %v1441_v38  ;;  %993 = vst [vmem:[#allocation3 + $0x3d0] sm:$0xf] %v17212_v34 }
  0x8c   :  { %v17275_v35 = vpack.c.bf16 %v1056_v30, %v1056_v30  ;;  %v17276_v36 = vpack.c.bf16 %v1057_v33, %v1057_v33  ;;  %v675_v42 = vld [vmem:[#allocation2 + $0x159] sm:$0xff]  ;;  %v17213_v43 = vpack.c.bf16 %v674_v39, %v674_v39  ;;  %v1442_v50 = vld [vmem:[#allocation2 + $0x168] sm:$0xff]  ;;  %v1443_v51 = vld [vmem:[#allocation2 + $0x170] sm:$0xff]  ;;  %8020 = vst [vmem:[#allocation3 + $0x4a4] sm:$0xf] %v19521_v6 }
  0x8d   :  { %1759 = vst [vmem:[#allocation3 + $0x390] sm:$0xf] %v17338_v28  ;;  %609 = vst [vmem:[#allocation3 + $0x3cc] sm:$0xf] %v17338_v28  ;;  %v1058_v44 = vld [vmem:[#allocation2 + $0x152] sm:$0xff]  ;;  %v1059_v45 = vld [vmem:[#allocation2 + $0x15a] sm:$0xff]  ;;  %v17214_v47 = vpack.c.bf16 %v675_v42, %v675_v42  ;;  %v17341_v54 = vpack.c.bf16 %v1442_v50, %v1442_v50  ;;  %v17342_v31 = vpack.c.bf16 %v1443_v51, %v1443_v51 }
  0x8e   :  { %v18596_v46 = vld [vmem:[#allocation3 + $0x1f8] ss:$36 sps:$4 sm:$0xff]   ;;  %1376 = vst [vmem:[#allocation3 + $0x3b0] sm:$0xf] %v17275_v35  ;;  %1377 = vst [vmem:[#allocation3 + $0x3d4] sm:$0xf] %v17276_v36  ;;  %v17277_v48 = vpack.c.bf16 %v1058_v44, %v1058_v44  ;;  %v17278_v49 = vpack.c.bf16 %v1059_v45, %v1059_v45 }
  0x8f   :  { %6464 = vmatmul.mubr.bf16.gmra.mxu1 %v18593_v22  ;;  %v676_v52 = vld [vmem:[#allocation2 + $0x169] sm:$0xff]  ;;  %v18599_v53 = vld [vmem:[#allocation3 + $0x200] ss:$36 sps:$4 sm:$0xff]   ;;  %1760 = vst [vmem:[#allocation3 + $0x3b4] sm:$0xf] %v17339_v40  ;;  %v677_v32 = vld [vmem:[#allocation2 + $0x171] sm:$0xff] }
  0x90   :  { %6471 = vmatprep.mubr.bf16.mxu1 %v18597_v26  ;;  %1761 = vst [vmem:[#allocation3 + $0x3d8] sm:$0xf] %v17340_v41  ;;  %610 = vst [vmem:[#allocation3 + $0x3f0] sm:$0xf] %v17339_v40  ;;  %v17215_v55 = vpack.c.bf16 %v676_v52, %v676_v52  ;;  %v1060_v56 = vld [vmem:[#allocation2 + $0x16a] sm:$0xff]  ;;  %v1061_v57 = vld [vmem:[#allocation2 + $0x172] sm:$0xff]  ;;  %v17216_v59 = vpack.c.bf16 %v677_v32, %v677_v32 }
  0x91   :  { %611 = vst [vmem:[#allocation3 + $0x414] sm:$0xf] %v17340_v41  ;;  %994 = vst [vmem:[#allocation3 + $0x3f4] sm:$0xf] %v17213_v43  ;;  %v18600_v58 = vld [vmem:[#allocation3 + $0x244] ss:$36 sps:$4 sm:$0xff]   ;;  %v17279_v60 = vpack.c.bf16 %v1060_v56, %v1060_v56  ;;  %v17280_v61 = vpack.c.bf16 %v1061_v57, %v1061_v57 }
  0x92   :  { %995 = vst [vmem:[#allocation3 + $0x418] sm:$0xf] %v17214_v47  ;;  %1378 = vst [vmem:[#allocation3 + $0x3f8] sm:$0xf] %v17277_v48  ;;  %v1444_v62 = vld [vmem:[#allocation2 + $0x180] sm:$0xff]  ;;  %v1445_v63 = vld [vmem:[#allocation2 + $0x188] sm:$0xff]  ;;  %6183 = vmatmul.mubr.bf16.gmra.mxu0 %v18596_v46 }
  0x93   :  { %1379 = vst [vmem:[#allocation3 + $0x41c] sm:$0xf] %v17278_v49  ;;  %1762 = vst [vmem:[#allocation3 + $0x3fc] sm:$0xf] %v17341_v54  ;;  %v17343_v2 = vpack.c.bf16 %v1444_v62, %v1444_v62  ;;  %v17344_v3 = vpack.c.bf16 %v1445_v63, %v1445_v63  ;;  %v20004_v4 = vld [vmem:[#allocation3 + $0x484] ss:$36 sps:$4 sm:$0xff]   ;;  %6190 = vmatprep.mubr.bf16.mxu0 %v18600_v58 }
  0x94   :  { %1763 = vst [vmem:[#allocation3 + $0x420] sm:$0xf] %v17342_v31  ;;  %612 = vst [vmem:[#allocation3 + $0x438] sm:$0xf] %v17341_v54  ;;  %v1446_v5 = vld [vmem:[#allocation2 + $0x1c8] sm:$0xff]  ;;  %v1447_v7 = vld [vmem:[#allocation2 + $0x1d0] sm:$0xff] }
  0x95   :  { %613 = vst [vmem:[#allocation3 + $0x45c] sm:$0xf] %v17342_v31  ;;  %996 = vst [vmem:[#allocation3 + $0x43c] sm:$0xf] %v17215_v55  ;;  %v17345_v8 = vpack.c.bf16 %v1446_v5, %v1446_v5  ;;  %v17346_v9 = vpack.c.bf16 %v1447_v7, %v1447_v7  ;;  %v18656_v10 = vld [vmem:[%s21677_s1 + $0x178] sm:$0xff]   ;;  %v680_v11 = vld [vmem:[#allocation2 + $0x1c9] sm:$0xff] }
  0x96   :  { %997 = vst [vmem:[#allocation3 + $0x460] sm:$0xf] %v17216_v59  ;;  %1380 = vst [vmem:[#allocation3 + $0x440] sm:$0xf] %v17279_v60  ;;  %v17219_v12 = vpack.c.bf16 %v680_v11, %v680_v11  ;;  %6689 = vmatpush2.bf16.msra.mxu0 %v18656_v10  ;;  %v18602_v6 = vld [vmem:[#allocation3 + $0x240] ss:$36 sps:$4 sm:$0xff]  }
  0x97   :  { %1381 = vst [vmem:[#allocation3 + $0x464] sm:$0xf] %v17280_v61  ;;  %1764 = vst [vmem:[#allocation3 + $0x444] sm:$0xf] %v17343_v2  ;;  %6472 = vmatmul.mubr.bf16.gmra.mxu1 %v18599_v53  ;;  %6690 = vmatprep.subr.bf16.mxu0 %v21683_v1  ;;  %v18610_v15 = vld [vmem:[#allocation3 + $0x294] ss:$36 sps:$4 sm:$0xff]  }
  0x98   :  { %1765 = vst [vmem:[#allocation3 + $0x468] sm:$0xf] %v17344_v3  ;;  %8403 = vst [vmem:[#allocation3 + $0x484] sm:$0xf] %v19986_v13  ;;  %6479 = vmatprep.mubr.bf16.mxu1 %v18603_v0  ;;  %v18606_v13 = vld [vmem:[#allocation3 + $0x248] ss:$36 sps:$4 sm:$0xff]  }
  0x99   :  { %8404 = vst [vmem:[#allocation3 + $0x4a8] sm:$0xf] %v19988_v14  ;;  %1766 = vst [vmem:[#allocation3 + $0x48c] sm:$0xf] %v17345_v8  ;;  %v18607_v14 = vld [vmem:[#allocation3 + $0x28c] ss:$36 sps:$4 sm:$0xff]  }
  0x9a   :  { %1767 = vst [vmem:[#allocation3 + $0x4b0] sm:$0xf] %v17346_v9  ;;  %616 = vst [vmem:[#allocation3 + $0x4c8] sm:$0xf] %v17345_v8  ;;  %6191 = vmatmul.mubr.bf16.gmra.mxu0 %v18602_v6  ;;  %v681_v17 = vld [vmem:[#allocation2 + $0x1d1] sm:$0xff]  ;;  %v169_v30 = vld [vmem:[%s21676_s0 + $0x128] sm:$0xff] }
  0x9b   :  { %617 = vst [vmem:[#allocation3 + $0x4ec] sm:$0xf] %v17346_v9  ;;  %1000 = vst [vmem:[#allocation3 + $0x4cc] sm:$0xf] %v17219_v12  ;;  %6198 = vmatprep.mubr.bf16.mxu0 %v18607_v14  ;;  %v18609_v18 = vld [vmem:[#allocation3 + $0x288] ss:$36 sps:$4 sm:$0xff]   ;;  %v17220_v19 = vpack.c.bf16 %v681_v17, %v681_v17 }
  0x9c   :  { %8787 = vst [vmem:[#allocation3 + $0x488] sm:$0xf] %v19995_v20  ;;  %8788 = vst [vmem:[#allocation3 + $0x4ac] sm:$0xf] %v19997_v21  ;;  %v166_v22 = vld [vmem:[%s21676_s0 + $0x110] sm:$0xff]  ;;  %v167_v23 = vld [vmem:[%s21676_s0 + $0x118] sm:$0xff] }
  0x9d   :  { %v18612_v24 = vld [vmem:[#allocation3 + $0x290] ss:$36 sps:$4 sm:$0xff]   ;;  %232 = vst.msk [vmem:[#allocation2 + $0x1e1] sm:$0xff] %vm197_vm0, %v166_v22  ;;  %233 = vst.msk [vmem:[#allocation2 + $0x1e9] sm:$0xff] %vm197_vm0, %v167_v23  ;;  %v168_v20 = vld [vmem:[%s21676_s0 + $0x120] sm:$0xff] }
  0x9e   :  { %v18613_v25 = vld [vmem:[#allocation3 + $0x2d4] ss:$36 sps:$4 sm:$0xff]   ;;  %v1064_v26 = vld [vmem:[#allocation2 + $0x1ca] sm:$0xff]  ;;  %v18616_v21 = vld [vmem:[#allocation3 + $0x2dc] ss:$36 sps:$4 sm:$0xff]   ;;  %234 = vst.msk [vmem:[#allocation2 + $0x1f9] sm:$0xff] %vm197_vm0, %v168_v20 }
  0x9f   :  { %6480 = vmatmul.mubr.bf16.gmra.mxu1 %v18606_v13  ;;  %v1065_v27 = vld [vmem:[#allocation2 + $0x1d2] sm:$0xff]  ;;  %1001 = vst [vmem:[#allocation3 + $0x4f0] sm:$0xf] %v17220_v19  ;;  %v17283_v28 = vpack.c.bf16 %v1064_v26, %v1064_v26  ;;  %235 = vst.msk [vmem:[#allocation2 + $0x201] sm:$0xff] %vm197_vm0, %v169_v30  ;;  %v172_v36 = vld [vmem:[%s21676_s0 + $0x140] sm:$0xff] }
  0xa0   :  { %6487 = vmatprep.mubr.bf16.mxu1 %v18610_v15  ;;  %v17284_v29 = vpack.c.bf16 %v1065_v27, %v1065_v27  ;;  %v18668_v33 = vld [vmem:[%s21677_s1 + $0x170] sm:$0xff]   ;;  %v171_v35 = vld [vmem:[%s21676_s0 + $0x138] sm:$0xff]  ;;  %v173_v37 = vld [vmem:[%s21676_s0 + $0x148] sm:$0xff]  ;;  %238 = vst.msk [vmem:[#allocation2 + $0x229] sm:$0xff] %vm197_vm0, %v172_v36 }
  0xa1   :  { %v20014_v16 = vld [vmem:[#allocation3 + $0x48c] ss:$36 sps:$4 sm:$0xff]   ;;  %1384 = vst [vmem:[#allocation3 + $0x4d0] sm:$0xf] %v17283_v28  ;;  %237 = vst.msk [vmem:[#allocation2 + $0x219] sm:$0xff] %vm197_vm0, %v171_v35  ;;  %6691 = vmatpush2.bf16.msra.mxu0 %v18668_v33  ;;  %v175_v40 = vld [vmem:[%s21676_s0 + $0x158] sm:$0xff] }
  0xa2   :  { %v170_v34 = vld [vmem:[%s21676_s0 + $0x130] sm:$0xff]  ;;  %1385 = vst [vmem:[#allocation3 + $0x4f4] sm:$0xf] %v17284_v29  ;;  %239 = vst.msk [vmem:[#allocation2 + $0x231] sm:$0xff] %vm197_vm0, %v173_v37  ;;  %v18681_v38 = vld [vmem:[%s21677_s1 + $0x168] sm:$0xff]   ;;  %6199 = vmatmul.mubr.bf16.gmra.mxu0 %v18609_v18  ;;  %6692 = vmatprep.subr.bf16.mxu0 %v21683_v1 }
  0xa3   :  { %236 = vst.msk [vmem:[#allocation2 + $0x211] sm:$0xff] %vm197_vm0, %v170_v34  ;;  %v174_v39 = vld [vmem:[%s21676_s0 + $0x150] sm:$0xff]  ;;  %v176_v41 = vld [vmem:[%s21676_s0 + $0x160] sm:$0xff]  ;;  %v177_v42 = vld [vmem:[%s21676_s0 + $0x168] sm:$0xff]  ;;  %6206 = vmatprep.mubr.bf16.mxu0 %v18613_v25 }
  0xa4   :  { %240 = vst.msk [vmem:[#allocation2 + $0x241] sm:$0xff] %vm197_vm0, %v174_v39  ;;  %241 = vst.msk [vmem:[#allocation2 + $0x249] sm:$0xff] %vm197_vm0, %v175_v40  ;;  %v18615_v43 = vld [vmem:[#allocation3 + $0x2d0] ss:$36 sps:$4 sm:$0xff]   ;;  %v1448_v44 = vld [vmem:[#allocation2 + $0x1e0] sm:$0xff] }
  0xa5   :  { %242 = vst.msk [vmem:[#allocation2 + $0x259] sm:$0xff] %vm197_vm0, %v176_v41  ;;  %243 = vst.msk [vmem:[#allocation2 + $0x261] sm:$0xff] %vm197_vm0, %v177_v42  ;;  %v1449_v45 = vld [vmem:[#allocation2 + $0x1e8] sm:$0xff]  ;;  %v18619_v47 = vld [vmem:[#allocation3 + $0x2d8] ss:$36 sps:$4 sm:$0xff]   ;;  %v17347_v49 = vpack.c.bf16 %v1448_v44, %v1448_v44  ;;  %6693 = vmatpush2.bf16.msra.mxu0 %v18681_v38 }
  0xa6   :  { %v682_v46 = vld [vmem:[#allocation2 + $0x1e1] sm:$0xff]  ;;  %v17348_v50 = vpack.c.bf16 %v1449_v45, %v1449_v45  ;;  %v683_v54 = vld [vmem:[#allocation2 + $0x1e9] sm:$0xff]  ;;  %6694 = vmatprep.subr.bf16.mxu0 %v21683_v1  ;;  %v1450_v58 = vld [vmem:[#allocation2 + $0x1f8] sm:$0xff] }
  0xa7   :  { %6488 = vmatmul.mubr.bf16.gmra.mxu1 %v18612_v24  ;;  %v18620_v48 = vld [vmem:[#allocation3 + $0x31c] ss:$36 sps:$4 sm:$0xff]   ;;  %v17221_v51 = vpack.c.bf16 %v682_v46, %v682_v46  ;;  %v18623_v53 = vld [vmem:[#allocation3 + $0x324] ss:$36 sps:$4 sm:$0xff]   ;;  %1768 = vst [vmem:[#allocation3 + $0x4d4] sm:$0xf] %v17347_v49  ;;  %v17222_v55 = vpack.c.bf16 %v683_v54, %v683_v54  ;;  %v17349_v61 = vpack.c.bf16 %v1450_v58, %v1450_v58 }
  0xa8   :  { %6495 = vmatprep.mubr.bf16.mxu1 %v18616_v21  ;;  %v18694_v52 = vld [vmem:[%s21677_s1 + $0x160] sm:$0xff]   ;;  %v1067_v32 = vld [vmem:[#allocation2 + $0x1ea] sm:$0xff]  ;;  %1769 = vst [vmem:[#allocation3 + $0x4f8] sm:$0xf] %v17348_v50  ;;  %618 = vst [vmem:[#allocation3 + $0x510] sm:$0xf] %v17347_v49 }
  0xa9   :  { %v1066_v31 = vld [vmem:[#allocation2 + $0x1e2] sm:$0xff]  ;;  %619 = vst [vmem:[#allocation3 + $0x534] sm:$0xf] %v17348_v50  ;;  %1002 = vst [vmem:[#allocation3 + $0x514] sm:$0xf] %v17221_v51  ;;  %v17286_v57 = vpack.c.bf16 %v1067_v32, %v1067_v32  ;;  %v684_v60 = vld [vmem:[#allocation2 + $0x1f9] sm:$0xff]  ;;  %6695 = vmatpush2.bf16.msra.mxu0 %v18694_v52 }
  0xaa   :  { %v17285_v56 = vpack.c.bf16 %v1066_v31, %v1066_v31  ;;  %v1451_v59 = vld [vmem:[#allocation2 + $0x200] sm:$0xff]  ;;  %v17223_v0 = vpack.c.bf16 %v684_v60, %v684_v60  ;;  %1003 = vst [vmem:[#allocation3 + $0x538] sm:$0xf] %v17222_v55  ;;  %v1452_v9 = vld [vmem:[#allocation2 + $0x210] sm:$0xff]  ;;  %v1453_v10 = vld [vmem:[#allocation2 + $0x218] sm:$0xff]  ;;  %6207 = vmatmul.mubr.bf16.gmra.mxu0 %v18615_v43  ;;  %6696 = vmatprep.subr.bf16.mxu0 %v21683_v1 }
  0xab   :  { %v17350_v62 = vpack.c.bf16 %v1451_v59, %v1451_v59  ;;  %v685_v63 = vld [vmem:[#allocation2 + $0x201] sm:$0xff]  ;;  %1387 = vst [vmem:[#allocation3 + $0x53c] sm:$0xf] %v17286_v57  ;;  %v686_v11 = vld [vmem:[#allocation2 + $0x211] sm:$0xff]  ;;  %1770 = vst [vmem:[#allocation3 + $0x51c] sm:$0xf] %v17349_v61  ;;  %v17351_v12 = vpack.c.bf16 %v1452_v9, %v1452_v9  ;;  %v17352_v6 = vpack.c.bf16 %v1453_v10, %v1453_v10  ;;  %6214 = vmatprep.mubr.bf16.mxu0 %v18620_v48 }
  0xac   :  { %v1068_v2 = vld [vmem:[#allocation2 + $0x1fa] sm:$0xff]  ;;  %v1069_v3 = vld [vmem:[#allocation2 + $0x202] sm:$0xff]  ;;  %1386 = vst [vmem:[#allocation3 + $0x518] sm:$0xf] %v17285_v56  ;;  %v17224_v5 = vpack.c.bf16 %v685_v63, %v685_v63  ;;  %620 = vst [vmem:[#allocation3 + $0x558] sm:$0xf] %v17349_v61  ;;  %v17225_v14 = vpack.c.bf16 %v686_v11, %v686_v11 }
  0xad   :  { %v17287_v7 = vpack.c.bf16 %v1068_v2, %v1068_v2  ;;  %v17288_v8 = vpack.c.bf16 %v1069_v3, %v1069_v3  ;;  %1771 = vst [vmem:[#allocation3 + $0x540] sm:$0xf] %v17350_v62  ;;  %621 = vst [vmem:[#allocation3 + $0x57c] sm:$0xf] %v17350_v62  ;;  %v687_v13 = vld [vmem:[#allocation2 + $0x219] sm:$0xff]  ;;  %v1454_v23 = vld [vmem:[#allocation2 + $0x228] sm:$0xff] }
  0xae   :  { %1004 = vst [vmem:[#allocation3 + $0x55c] sm:$0xf] %v17223_v0  ;;  %v1070_v15 = vld [vmem:[#allocation2 + $0x212] sm:$0xff]  ;;  %v1071_v17 = vld [vmem:[#allocation2 + $0x21a] sm:$0xff]  ;;  %1005 = vst [vmem:[#allocation3 + $0x580] sm:$0xf] %v17224_v5  ;;  %v17226_v18 = vpack.c.bf16 %v687_v13, %v687_v13  ;;  %v17353_v27 = vpack.c.bf16 %v1454_v23, %v1454_v23 }
  0xaf   :  { %6496 = vmatmul.mubr.bf16.gmra.mxu1 %v18619_v47  ;;  %1388 = vst [vmem:[#allocation3 + $0x560] sm:$0xf] %v17287_v7  ;;  %1389 = vst [vmem:[#allocation3 + $0x584] sm:$0xf] %v17288_v8  ;;  %v17289_v19 = vpack.c.bf16 %v1070_v15, %v1070_v15  ;;  %v17290_v22 = vpack.c.bf16 %v1071_v17, %v1071_v17  ;;  %v1455_v24 = vld [vmem:[#allocation2 + $0x230] sm:$0xff]  ;;  %v1456_v36 = vld [vmem:[#allocation2 + $0x240] sm:$0xff] }
  0xb0   :  { %v688_v25 = vld [vmem:[#allocation2 + $0x229] sm:$0xff]  ;;  %v18622_v26 = vld [vmem:[#allocation3 + $0x318] ss:$36 sps:$4 sm:$0xff]   ;;  %6503 = vmatprep.mubr.bf16.mxu1 %v18623_v53  ;;  %1772 = vst [vmem:[#allocation3 + $0x564] sm:$0xf] %v17351_v12  ;;  %v17354_v20 = vpack.c.bf16 %v1455_v24, %v1455_v24  ;;  %v690_v38 = vld [vmem:[#allocation2 + $0x241] sm:$0xff]  ;;  %v17355_v40 = vpack.c.bf16 %v1456_v36, %v1456_v36 }
  0xb1   :  { %1773 = vst [vmem:[#allocation3 + $0x588] sm:$0xf] %v17352_v6  ;;  %622 = vst [vmem:[#allocation3 + $0x5a0] sm:$0xf] %v17351_v12  ;;  %v689_v21 = vld [vmem:[#allocation2 + $0x231] sm:$0xff]  ;;  %v17227_v28 = vpack.c.bf16 %v688_v25, %v688_v25  ;;  %v1457_v37 = vld [vmem:[#allocation2 + $0x248] sm:$0xff]  ;;  %v17229_v42 = vpack.c.bf16 %v690_v38, %v690_v38 }
  0xb2   :  { %623 = vst [vmem:[#allocation3 + $0x5c4] sm:$0xf] %v17352_v6  ;;  %1006 = vst [vmem:[#allocation3 + $0x5a4] sm:$0xf] %v17225_v14  ;;  %v1072_v29 = vld [vmem:[#allocation2 + $0x22a] sm:$0xff]  ;;  %v1073_v30 = vld [vmem:[#allocation2 + $0x232] sm:$0xff]  ;;  %v17228_v33 = vpack.c.bf16 %v689_v21, %v689_v21  ;;  %v17356_v41 = vpack.c.bf16 %v1457_v37, %v1457_v37  ;;  %6215 = vmatmul.mubr.bf16.gmra.mxu0 %v18622_v26 }
  0xb3   :  { %1007 = vst [vmem:[#allocation3 + $0x5c8] sm:$0xf] %v17226_v18  ;;  %1390 = vst [vmem:[#allocation3 + $0x5a8] sm:$0xf] %v17289_v19  ;;  %v17291_v34 = vpack.c.bf16 %v1072_v29, %v1072_v29  ;;  %v17292_v35 = vpack.c.bf16 %v1073_v30, %v1073_v30  ;;  %v18625_v39 = vld [vmem:[#allocation3 + $0x320] ss:$36 sps:$4 sm:$0xff]  }
  0xb4   :  { %1391 = vst [vmem:[#allocation3 + $0x5cc] sm:$0xf] %v17290_v22  ;;  %1774 = vst [vmem:[#allocation3 + $0x5ac] sm:$0xf] %v17353_v27  ;;  %v18626_v43 = vld [vmem:[#allocation3 + $0x364] ss:$36 sps:$4 sm:$0xff]  }
  0xb5   :  { %1775 = vst [vmem:[#allocation3 + $0x5d0] sm:$0xf] %v17354_v20  ;;  %624 = vst [vmem:[#allocation3 + $0x5e8] sm:$0xf] %v17353_v27  ;;  %v691_v44 = vld [vmem:[#allocation2 + $0x249] sm:$0xff]  ;;  %6222 = vmatprep.mubr.bf16.mxu0 %v18626_v43  ;;  %v1458_v31 = vld [vmem:[#allocation2 + $0x258] sm:$0xff] }
  0xb6   :  { %625 = vst [vmem:[#allocation3 + $0x60c] sm:$0xf] %v17354_v20  ;;  %1008 = vst [vmem:[#allocation3 + $0x5ec] sm:$0xf] %v17227_v28  ;;  %v18629_v45 = vld [vmem:[#allocation3 + $0x36c] ss:$36 sps:$4 sm:$0xff]   ;;  %v17230_v46 = vpack.c.bf16 %v691_v44, %v691_v44  ;;  %v17357_v58 = vpack.c.bf16 %v1458_v31, %v1458_v31 }
  0xb7   :  { %1009 = vst [vmem:[#allocation3 + $0x610] sm:$0xf] %v17228_v33  ;;  %1392 = vst [vmem:[#allocation3 + $0x5f0] sm:$0xf] %v17291_v34  ;;  %6504 = vmatmul.mubr.bf16.gmra.mxu1 %v18625_v39  ;;  %v18628_v47 = vld [vmem:[#allocation3 + $0x360] ss:$36 sps:$4 sm:$0xff]  }
  0xb8   :  { %1393 = vst [vmem:[#allocation3 + $0x614] sm:$0xf] %v17292_v35  ;;  %1776 = vst [vmem:[#allocation3 + $0x5f4] sm:$0xf] %v17355_v40  ;;  %6511 = vmatprep.mubr.bf16.mxu1 %v18629_v45  ;;  %v18632_v48 = vld [vmem:[#allocation3 + $0x368] ss:$36 sps:$4 sm:$0xff]  }
  0xb9   :  { %1777 = vst [vmem:[#allocation3 + $0x618] sm:$0xf] %v17356_v41  ;;  %626 = vst [vmem:[#allocation3 + $0x630] sm:$0xf] %v17355_v40  ;;  %v18633_v49 = vld [vmem:[#allocation3 + $0x3ac] ss:$36 sps:$4 sm:$0xff]  }
  0xba   :  { %627 = vst [vmem:[#allocation3 + $0x654] sm:$0xf] %v17356_v41  ;;  %1010 = vst [vmem:[#allocation3 + $0x634] sm:$0xf] %v17229_v42  ;;  %v18636_v50 = vld [vmem:[#allocation3 + $0x3b4] ss:$36 sps:$4 sm:$0xff]   ;;  %6223 = vmatmul.mubr.bf16.gmra.mxu0 %v18628_v47 }
  0xbb   :  { %1011 = vst [vmem:[#allocation3 + $0x658] sm:$0xf] %v17230_v46  ;;  %6230 = vmatprep.mubr.bf16.mxu0 %v18633_v49  ;;  %v1074_v51 = vld [vmem:[#allocation2 + $0x242] sm:$0xff]  ;;  %v1075_v53 = vld [vmem:[#allocation2 + $0x24a] sm:$0xff]  ;;  %v18639_v56 = vld [vmem:[#allocation3 + $0x3f4] ss:$36 sps:$4 sm:$0xff]  }
  0xbc   :  { %v18635_v52 = vld [vmem:[#allocation3 + $0x3a8] ss:$36 sps:$4 sm:$0xff]   ;;  %v17293_v54 = vpack.c.bf16 %v1074_v51, %v1074_v51  ;;  %v1459_v32 = vld [vmem:[#allocation2 + $0x260] sm:$0xff]  ;;  %v18638_v55 = vld [vmem:[#allocation3 + $0x3b0] ss:$36 sps:$4 sm:$0xff]   ;;  %v17294_v57 = vpack.c.bf16 %v1075_v53, %v1075_v53 }
  0xbd   :  { %v17358_v59 = vpack.c.bf16 %v1459_v32, %v1459_v32  ;;  %v692_v60 = vld [vmem:[#allocation2 + $0x259] sm:$0xff]  ;;  %v693_v61 = vld [vmem:[#allocation2 + $0x261] sm:$0xff]  ;;  %v178_v62 = vld [vmem:[%s21676_s0 + $0x170] sm:$0xff]  ;;  %1778 = vst [vmem:[#allocation3 + $0x63c] sm:$0xf] %v17357_v58 }
  0xbe   :  { %1394 = vst [vmem:[#allocation3 + $0x638] sm:$0xf] %v17293_v54  ;;  %v17231_v63 = vpack.c.bf16 %v692_v60, %v692_v60  ;;  %v17232_v0 = vpack.c.bf16 %v693_v61, %v693_v61  ;;  %v179_v2 = vld [vmem:[%s21676_s0 + $0x178] sm:$0xff]  ;;  %244 = vst.msk [vmem:[#allocation2 + $0x271] sm:$0xff] %vm197_vm0, %v178_v62  ;;  %v1077_v5 = vld [vmem:[#allocation2 + $0x262] sm:$0xff] }
  0xbf   :  { %6512 = vmatmul.mubr.bf16.gmra.mxu1 %v18632_v48  ;;  %v1076_v3 = vld [vmem:[#allocation2 + $0x25a] sm:$0xff]  ;;  %1395 = vst [vmem:[#allocation3 + $0x65c] sm:$0xf] %v17294_v57  ;;  %1779 = vst [vmem:[#allocation3 + $0x660] sm:$0xf] %v17358_v59  ;;  %v17296_v9 = vpack.c.bf16 %v1077_v5, %v1077_v5  ;;  %v181_v11 = vld [vmem:[%s21676_s0 + $0x188] sm:$0xff] }
  0xc0   :  { %6519 = vmatprep.mubr.bf16.mxu1 %v18636_v50  ;;  %v18642_v7 = vld [vmem:[#allocation3 + $0x3fc] ss:$36 sps:$4 sm:$0xff]   ;;  %628 = vst [vmem:[#allocation3 + $0x678] sm:$0xf] %v17357_v58  ;;  %629 = vst [vmem:[#allocation3 + $0x69c] sm:$0xf] %v17358_v59  ;;  %v17295_v8 = vpack.c.bf16 %v1076_v3, %v1076_v3 }
  0xc1   :  { %245 = vst.msk [vmem:[#allocation2 + $0x279] sm:$0xff] %vm197_vm0, %v179_v2  ;;  %v180_v10 = vld [vmem:[%s21676_s0 + $0x180] sm:$0xff]  ;;  %1012 = vst [vmem:[#allocation3 + $0x67c] sm:$0xf] %v17231_v63  ;;  %v18707_v12 = vld [vmem:[%s21677_s1 + $0x158] sm:$0xff]  }
  0xc2   :  { %1013 = vst [vmem:[#allocation3 + $0x6a0] sm:$0xf] %v17232_v0  ;;  %246 = vst.msk [vmem:[#allocation2 + $0x289] sm:$0xff] %vm197_vm0, %v180_v10  ;;  %v18709_v6 = vld [vmem:[%s21677_s1 + $0x1b8] sm:$0xff]   ;;  %6231 = vmatmul.mubr.bf16.gmra.mxu0 %v18635_v52  ;;  %v182_v13 = vld [vmem:[%s21676_s0 + $0x190] sm:$0xff] }
  0xc3   :  { %247 = vst.msk [vmem:[#allocation2 + $0x291] sm:$0xff] %vm197_vm0, %v181_v11  ;;  %1396 = vst [vmem:[#allocation3 + $0x680] sm:$0xf] %v17295_v8  ;;  %6238 = vmatprep.mubr.bf16.mxu0 %v18639_v56  ;;  %v183_v14 = vld [vmem:[%s21676_s0 + $0x198] sm:$0xff]  ;;  %v18641_v15 = vld [vmem:[#allocation3 + $0x3f0] ss:$36 sps:$4 sm:$0xff]   ;;  %6697 = vmatpush2.bf16.msra.mxu0 %v18707_v12 }
  0xc4   :  { %1397 = vst [vmem:[#allocation3 + $0x6a4] sm:$0xf] %v17296_v9  ;;  %v18712_v17 = vld [vmem:[%s21677_s1 + $0x1b0] sm:$0xff]   ;;  %248 = vst.msk [vmem:[#allocation2 + $0x2a1] sm:$0xff] %vm197_vm0, %v182_v13  ;;  %6962 = vmatpush1.bf16.msra.mxu1 %v18709_v6  ;;  %6698 = vmatprep.subr.bf16.mxu0 %v21683_v1  ;;  %v18645_v22 = vld [vmem:[#allocation3 + $0x3f8] ss:$36 sps:$4 sm:$0xff]  }
  0xc5   :  { %249 = vst.msk [vmem:[#allocation2 + $0x2a9] sm:$0xff] %vm197_vm0, %v183_v14  ;;  %v1460_v18 = vld [vmem:[#allocation2 + $0x270] sm:$0xff]  ;;  %6963 = vmatprep.subr.bf16.mxu1 %v21683_v1  ;;  %v18646_v25 = vld [vmem:[#allocation3 + $0x43c] ss:$36 sps:$4 sm:$0xff]   ;;  %v18649_v26 = vld [vmem:[#allocation3 + $0x444] ss:$36 sps:$4 sm:$0xff]  }
  0xc6   :  { %v694_v19 = vld [vmem:[#allocation2 + $0x271] sm:$0xff]  ;;  %v17359_v23 = vpack.c.bf16 %v1460_v18, %v1460_v18  ;;  %v18717_v20 = vld [vmem:[%s21677_s1 + $0x1a8] sm:$0xff]   ;;  %v18651_v52 = vld [vmem:[#allocation3 + $0x440] ss:$36 sps:$4 sm:$0xff]  }
  0xc7   :  { %6520 = vmatmul.mubr.bf16.gmra.mxu1 %v18638_v55  ;;  %v17233_v24 = vpack.c.bf16 %v694_v19, %v694_v19  ;;  %v18648_v45 = vld [vmem:[#allocation3 + $0x438] ss:$36 sps:$4 sm:$0xff]   ;;  %v18720_v55 = vld [vmem:[%s21677_s1 + $0x1a0] sm:$0xff]   ;;  %v185_v58 = vld [vmem:[%s21676_s0 + $0x1a8] sm:$0xff] }
  0xc8   :  { %6527 = vmatprep.mubr.bf16.mxu1 %v18642_v7  ;;  %v1461_v27 = vld [vmem:[#allocation2 + $0x278] sm:$0xff]  ;;  %1780 = vst [vmem:[#allocation3 + $0x684] sm:$0xf] %v17359_v23  ;;  %630 = vst [vmem:[#allocation3 + $0x6c0] sm:$0xf] %v17359_v23  ;;  %6964 = vmatpush1.bf16.msra.mxu1 %v18712_v17  ;;  %v184_v56 = vld [vmem:[%s21676_s0 + $0x1a0] sm:$0xff] }
  0xc9   :  { %1014 = vst [vmem:[#allocation3 + $0x6c4] sm:$0xf] %v17233_v24  ;;  %v17360_v21 = vpack.c.bf16 %v1461_v27, %v1461_v27  ;;  %v695_v28 = vld [vmem:[#allocation2 + $0x279] sm:$0xff]  ;;  %v1462_v36 = vld [vmem:[#allocation2 + $0x288] sm:$0xff]  ;;  %6965 = vmatprep.subr.bf16.mxu1 %v21683_v1  ;;  %250 = vst.msk [vmem:[#allocation2 + $0x2b9] sm:$0xff] %vm197_vm0, %v184_v56 }
  0xca   :  { %v1078_v29 = vld [vmem:[#allocation2 + $0x272] sm:$0xff]  ;;  %v1079_v30 = vld [vmem:[#allocation2 + $0x27a] sm:$0xff]  ;;  %6239 = vmatmul.mubr.bf16.gmra.mxu0 %v18641_v15  ;;  %v17234_v33 = vpack.c.bf16 %v695_v28, %v695_v28  ;;  %v696_v38 = vld [vmem:[#allocation2 + $0x289] sm:$0xff]  ;;  %v17361_v39 = vpack.c.bf16 %v1462_v36, %v1462_v36  ;;  %251 = vst.msk [vmem:[#allocation2 + $0x2c1] sm:$0xff] %vm197_vm0, %v185_v58 }
  0xcb   :  { %v17297_v34 = vpack.c.bf16 %v1078_v29, %v1078_v29  ;;  %v17298_v35 = vpack.c.bf16 %v1079_v30, %v1079_v30  ;;  %v1463_v37 = vld [vmem:[#allocation2 + $0x290] sm:$0xff]  ;;  %6246 = vmatprep.mubr.bf16.mxu0 %v18646_v25  ;;  %1781 = vst [vmem:[#allocation3 + $0x6a8] sm:$0xf] %v17360_v21  ;;  %631 = vst [vmem:[#allocation3 + $0x6e4] sm:$0xf] %v17360_v21  ;;  %v17235_v42 = vpack.c.bf16 %v696_v38, %v696_v38  ;;  %v1464_v49 = vld [vmem:[#allocation2 + $0x2a0] sm:$0xff] }
  0xcc   :  { %v17362_v40 = vpack.c.bf16 %v1463_v37, %v1463_v37  ;;  %v697_v41 = vld [vmem:[#allocation2 + $0x291] sm:$0xff]  ;;  %1015 = vst [vmem:[#allocation3 + $0x6e8] sm:$0xf] %v17234_v33  ;;  %v1465_v50 = vld [vmem:[#allocation2 + $0x2a8] sm:$0xff]  ;;  %1782 = vst [vmem:[#allocation3 + $0x6cc] sm:$0xf] %v17361_v39  ;;  %v17363_v53 = vpack.c.bf16 %v1464_v49, %v1464_v49  ;;  %6966 = vmatpush1.bf16.msra.mxu1 %v18717_v20 }
  0xcd   :  { %v1080_v43 = vld [vmem:[#allocation2 + $0x28a] sm:$0xff]  ;;  %v1081_v44 = vld [vmem:[#allocation2 + $0x292] sm:$0xff]  ;;  %1398 = vst [vmem:[#allocation3 + $0x6c8] sm:$0xf] %v17297_v34  ;;  %1399 = vst [vmem:[#allocation3 + $0x6ec] sm:$0xf] %v17298_v35  ;;  %v17236_v46 = vpack.c.bf16 %v697_v41, %v697_v41  ;;  %v17364_v54 = vpack.c.bf16 %v1465_v50, %v1465_v50  ;;  %6967 = vmatprep.subr.bf16.mxu1 %v21683_v1 }
  0xce   :  { %v17299_v47 = vpack.c.bf16 %v1080_v43, %v1080_v43  ;;  %v17300_v48 = vpack.c.bf16 %v1081_v44, %v1081_v44  ;;  %v698_v51 = vld [vmem:[#allocation2 + $0x2a1] sm:$0xff]  ;;  %1783 = vst [vmem:[#allocation3 + $0x6f0] sm:$0xf] %v17362_v40  ;;  %632 = vst [vmem:[#allocation3 + $0x708] sm:$0xf] %v17361_v39  ;;  %v699_v31 = vld [vmem:[#allocation2 + $0x2a9] sm:$0xff] }
  0xcf   :  { %6528 = vmatmul.mubr.bf16.gmra.mxu1 %v18645_v22  ;;  %633 = vst [vmem:[#allocation3 + $0x72c] sm:$0xf] %v17362_v40  ;;  %1016 = vst [vmem:[#allocation3 + $0x70c] sm:$0xf] %v17235_v42  ;;  %v17237_v32 = vpack.c.bf16 %v698_v51, %v698_v51  ;;  %v17238_v57 = vpack.c.bf16 %v699_v31, %v699_v31  ;;  %v1082_v59 = vld [vmem:[#allocation2 + $0x2a2] sm:$0xff]  ;;  %v1083_v60 = vld [vmem:[#allocation2 + $0x2aa] sm:$0xff] }
  0xd0   :  { %6535 = vmatprep.mubr.bf16.mxu1 %v18649_v26  ;;  %1017 = vst [vmem:[#allocation3 + $0x730] sm:$0xf] %v17236_v46  ;;  %1400 = vst [vmem:[#allocation3 + $0x710] sm:$0xf] %v17299_v47  ;;  %v17301_v61 = vpack.c.bf16 %v1082_v59, %v1082_v59  ;;  %v17302_v62 = vpack.c.bf16 %v1083_v60, %v1083_v60  ;;  %v18724_v63 = vld [vmem:[%s21677_s1 + $0x150] sm:$0xff]   ;;  %6968 = vmatpush1.bf16.msra.mxu1 %v18720_v55  ;;  %v18726_v0 = vld [vmem:[%s21677_s1 + $0x198] sm:$0xff]  }
  0xd1   :  { %1401 = vst [vmem:[#allocation3 + $0x734] sm:$0xf] %v17300_v48  ;;  %1784 = vst [vmem:[#allocation3 + $0x714] sm:$0xf] %v17363_v53  ;;  %v3879_v2 = vld [vmem:[#allocation3 + $0x480] sm:$0xff]  ;;  %6969 = vmatprep.subr.bf16.mxu1 %v21683_v1  ;;  %v3880_v5 = vld [vmem:[#allocation3 + $0x488] sm:$0xff]  ;;  %6699 = vmatpush2.bf16.msra.mxu0 %v18724_v63 }
  0xd2   :  { %1785 = vst [vmem:[#allocation3 + $0x738] sm:$0xf] %v17364_v54  ;;  %634 = vst [vmem:[#allocation3 + $0x750] sm:$0xf] %v17363_v53  ;;  %6247 = vmatmul.mubr.bf16.gmra.mxu0 %v18648_v45  ;;  %v3884_v3 = vld [vmem:[#allocation3 + $0x4a4] sm:$0xff]  ;;  %v3885_v7 = vld [vmem:[#allocation3 + $0x4ac] sm:$0xff]  ;;  %6700 = vmatprep.subr.bf16.mxu0 %v21683_v1 }
  0xd3   :  { %635 = vst [vmem:[#allocation3 + $0x774] sm:$0xf] %v17364_v54  ;;  %1018 = vst [vmem:[#allocation3 + $0x754] sm:$0xf] %v17237_v32  ;;  %6254 = vmatprep.mubr.bf16.mxu0 %v20004_v4  ;;  %v15964_v8 = vcombine.low %v3879_v2, %v3884_v3  ;;  %v15966_v9 = vcombine.low %v3880_v5, %v3885_v7  ;;  %v18657_v10 = vld [vmem:[#allocation3 + $0x4cc] ss:$36 sps:$4 sm:$0xff]  }
  0xd4   :  { %1019 = vst [vmem:[#allocation3 + $0x778] sm:$0xf] %v17238_v57  ;;  %1402 = vst [vmem:[#allocation3 + $0x758] sm:$0xf] %v17301_v61  ;;  %6970 = vmatpush1.bf16.msra.mxu1 %v18726_v0  ;;  %v18660_v11 = vld [vmem:[#allocation3 + $0x4d4] ss:$36 sps:$4 sm:$0xff]  }
  0xd5   :  { %1403 = vst [vmem:[#allocation3 + $0x77c] sm:$0xf] %v17302_v62  ;;  %6971 = vmatprep.subr.bf16.mxu1 %v21683_v1  ;;  %v1466_v12 = vld [vmem:[#allocation2 + $0x2b8] sm:$0xff]  ;;  %v1467_v6 = vld [vmem:[#allocation2 + $0x2c0] sm:$0xff]  ;;  %v18729_v18 = vld [vmem:[%s21677_s1 + $0x190] sm:$0xff]  }
  0xd6   :  { %v17365_v13 = vpack.c.bf16 %v1466_v12, %v1466_v12  ;;  %v17366_v14 = vpack.c.bf16 %v1467_v6, %v1467_v6  ;;  %v700_v4 = vld [vmem:[#allocation2 + $0x2b9] sm:$0xff]  ;;  %v701_v15 = vld [vmem:[#allocation2 + $0x2c1] sm:$0xff]  ;;  %v186_v19 = vld [vmem:[%s21676_s0 + $0x1b0] sm:$0xff] }
  0xd7   :  { %6536 = vmatmul.mubr.bf16.gmra.mxu1 %v18651_v52  ;;  %v17240_v17 = vpack.c.bf16 %v701_v15, %v701_v15  ;;  %v187_v22 = vld [vmem:[%s21676_s0 + $0x1b8] sm:$0xff]  ;;  %v18659_v23 = vld [vmem:[#allocation3 + $0x4c8] ss:$36 sps:$4 sm:$0xff]   ;;  %252 = vst.msk [vmem:[#allocation2 + $0x2d1] sm:$0xff] %vm197_vm0, %v186_v19  ;;  %v18662_v26 = vld [vmem:[#allocation3 + $0x4d0] ss:$36 sps:$4 sm:$0xff]  }
  0xd8   :  { %6543 = vmatprep.mubr.bf16.mxu1 %v20014_v16  ;;  %v17239_v16 = vpack.c.bf16 %v700_v4, %v700_v4  ;;  %1786 = vst [vmem:[#allocation3 + $0x75c] sm:$0xf] %v17365_v13  ;;  %1787 = vst [vmem:[#allocation3 + $0x780] sm:$0xf] %v17366_v14  ;;  %v1084_v24 = vld [vmem:[#allocation2 + $0x2ba] sm:$0xff]  ;;  %v1085_v25 = vld [vmem:[#allocation2 + $0x2c2] sm:$0xff]  ;;  %6972 = vmatpush1.bf16.msra.mxu1 %v18729_v18 }
  0xd9   :  { %636 = vst [vmem:[#allocation3 + $0x798] sm:$0xf] %v17365_v13  ;;  %637 = vst [vmem:[#allocation3 + $0x7bc] sm:$0xf] %v17366_v14  ;;  %v18663_v27 = vld [vmem:[#allocation3 + $0x514] ss:$36 sps:$4 sm:$0xff]   ;;  %v17303_v20 = vpack.c.bf16 %v1084_v24, %v1084_v24  ;;  %v17304_v21 = vpack.c.bf16 %v1085_v25, %v1085_v25  ;;  %6973 = vmatprep.subr.bf16.mxu1 %v21683_v1 }
  0xda   :  { %6255 = vmatmul.mubr.bf16.gmra.mxu0 %v15964_v8  ;;  %253 = vst.msk [vmem:[#allocation2 + $0x2d9] sm:$0xff] %vm197_vm0, %v187_v22  ;;  %1020 = vst [vmem:[#allocation3 + $0x79c] sm:$0xf] %v17239_v16  ;;  %v18734_v28 = vld [vmem:[%s21677_s1 + $0x188] sm:$0xff]   ;;  %v18666_v29 = vld [vmem:[#allocation3 + $0x51c] ss:$36 sps:$4 sm:$0xff]  }
  0xdb   :  { %6262 = vmatprep.mubr.bf16.mxu0 %v18657_v10  ;;  %1021 = vst [vmem:[#allocation3 + $0x7c0] sm:$0xf] %v17240_v17  ;;  %v188_v30 = vld [vmem:[%s21676_s0 + $0x1c0] sm:$0xff]  ;;  %1404 = vst [vmem:[#allocation3 + $0x7a0] sm:$0xf] %v17303_v20  ;;  %v189_v33 = vld [vmem:[%s21676_s0 + $0x1c8] sm:$0xff] }
  0xdc   :  { %1405 = vst [vmem:[#allocation3 + $0x7c4] sm:$0xf] %v17304_v21  ;;  %254 = vst.msk [vmem:[#allocation2 + $0x2e9] sm:$0xff] %vm197_vm0, %v188_v30  ;;  %v18741_v34 = vld [vmem:[%s21677_s1 + $0x148] sm:$0xff]   ;;  %6974 = vmatpush1.bf16.msra.mxu1 %v18734_v28  ;;  %v18737_v35 = vld [vmem:[%s21677_s1 + $0x180] sm:$0xff]  }
  0xdd   :  { %255 = vst.msk [vmem:[#allocation2 + $0x2f1] sm:$0xff] %vm197_vm0, %v189_v33  ;;  %6975 = vmatprep.subr.bf16.mxu1 %v21683_v1  ;;  %v190_v36 = vld [vmem:[%s21676_s0 + $0x1d0] sm:$0xff]  ;;  %v191_v37 = vld [vmem:[%s21676_s0 + $0x1d8] sm:$0xff]  ;;  %6701 = vmatpush2.bf16.msra.mxu0 %v18741_v34  ;;  %v18673_v43 = vld [vmem:[#allocation3 + $0x564] ss:$36 sps:$4 sm:$0xff]  }
  0xde   :  { %256 = vst.msk [vmem:[#allocation2 + $0x301] sm:$0xff] %vm197_vm0, %v190_v36  ;;  %257 = vst.msk [vmem:[#allocation2 + $0x309] sm:$0xff] %vm197_vm0, %v191_v37  ;;  %v18665_v38 = vld [vmem:[#allocation3 + $0x510] ss:$36 sps:$4 sm:$0xff]   ;;  %v18669_v39 = vld [vmem:[#allocation3 + $0x518] ss:$36 sps:$4 sm:$0xff]   ;;  %6702 = vmatprep.subr.bf16.mxu0 %v21683_v1 }
  0xdf   :  { %6544 = vmatmul.mubr.bf16.gmra.mxu1 %v15966_v9  ;;  %v18670_v40 = vld [vmem:[#allocation3 + $0x55c] ss:$36 sps:$4 sm:$0xff]   ;;  %v1468_v41 = vld [vmem:[#allocation2 + $0x2d0] sm:$0xff]  ;;  %v18751_v12 = vld [vmem:[%s21677_s1 + $0x1e8] sm:$0xff]  }
  0xe0   :  { %6551 = vmatprep.mubr.bf16.mxu1 %v18660_v11  ;;  %6976 = vmatpush1.bf16.msra.mxu1 %v18737_v35  ;;  %v18743_v42 = vld [vmem:[%s21677_s1 + $0x1f8] sm:$0xff]   ;;  %v17367_v45 = vpack.c.bf16 %v1468_v41, %v1468_v41  ;;  %v18746_v54 = vld [vmem:[%s21677_s1 + $0x1f0] sm:$0xff]   ;;  %v18675_v14 = vld [vmem:[#allocation3 + $0x560] ss:$36 sps:$4 sm:$0xff]  }
  0xe1   :  { %v1469_v44 = vld [vmem:[#allocation2 + $0x2d8] sm:$0xff]  ;;  %6977 = vmatprep.subr.bf16.mxu1 %v21683_v1  ;;  %v18676_v4 = vld [vmem:[#allocation3 + $0x5a4] ss:$36 sps:$4 sm:$0xff]   ;;  %v18679_v24 = vld [vmem:[#allocation3 + $0x5ac] ss:$36 sps:$4 sm:$0xff]  }
  0xe2   :  { %6263 = vmatmul.mubr.bf16.gmra.mxu0 %v18659_v23  ;;  %v702_v46 = vld [vmem:[#allocation2 + $0x2d1] sm:$0xff]  ;;  %v703_v47 = vld [vmem:[#allocation2 + $0x2d9] sm:$0xff]  ;;  %v17368_v48 = vpack.c.bf16 %v1469_v44, %v1469_v44  ;;  %1788 = vst [vmem:[#allocation3 + $0x7a4] sm:$0xf] %v17367_v45  ;;  %638 = vst [vmem:[#allocation3 + $0x7e0] sm:$0xf] %v17367_v45 }
  0xe3   :  { %6270 = vmatprep.mubr.bf16.mxu0 %v18663_v27  ;;  %v17241_v49 = vpack.c.bf16 %v702_v46, %v702_v46  ;;  %v17242_v50 = vpack.c.bf16 %v703_v47, %v703_v47  ;;  %v1086_v51 = vld [vmem:[#allocation2 + $0x2d2] sm:$0xff]  ;;  %v1087_v52 = vld [vmem:[#allocation2 + $0x2da] sm:$0xff]  ;;  %v1470_v53 = vld [vmem:[#allocation2 + $0x2e8] sm:$0xff] }
  0xe4   :  { %v17305_v31 = vpack.c.bf16 %v1086_v51, %v1086_v51  ;;  %v17306_v32 = vpack.c.bf16 %v1087_v52, %v1087_v52  ;;  %v1471_v55 = vld [vmem:[#allocation2 + $0x2f0] sm:$0xff]  ;;  %v17369_v56 = vpack.c.bf16 %v1470_v53, %v1470_v53  ;;  %1789 = vst [vmem:[#allocation3 + $0x7c8] sm:$0xf] %v17368_v48  ;;  %639 = vst [vmem:[#allocation3 + $0x804] sm:$0xf] %v17368_v48  ;;  %6978 = vmatpush2.bf16.msra.mxu1 %v18743_v42  ;;  %v192_v15 = vld [vmem:[%s21676_s0 + $0x1e0] sm:$0xff] }
  0xe5   :  { %v704_v57 = vld [vmem:[#allocation2 + $0x2e9] sm:$0xff]  ;;  %v705_v58 = vld [vmem:[#allocation2 + $0x2f1] sm:$0xff]  ;;  %1022 = vst [vmem:[#allocation3 + $0x7e4] sm:$0xf] %v17241_v49  ;;  %1023 = vst [vmem:[#allocation3 + $0x808] sm:$0xf] %v17242_v50  ;;  %v17370_v59 = vpack.c.bf16 %v1471_v55, %v1471_v55  ;;  %6979 = vmatprep.subr.bf16.mxu1 %v21683_v1 }
  0xe6   :  { %v17243_v60 = vpack.c.bf16 %v704_v57, %v704_v57  ;;  %v17244_v61 = vpack.c.bf16 %v705_v58, %v705_v58  ;;  %v1088_v62 = vld [vmem:[#allocation2 + $0x2ea] sm:$0xff]  ;;  %v1089_v63 = vld [vmem:[#allocation2 + $0x2f2] sm:$0xff]  ;;  %1406 = vst [vmem:[#allocation3 + $0x7e8] sm:$0xf] %v17305_v31  ;;  %1407 = vst [vmem:[#allocation3 + $0x80c] sm:$0xf] %v17306_v32 }
  0xe7   :  { %6552 = vmatmul.mubr.bf16.gmra.mxu1 %v18662_v26  ;;  %1790 = vst [vmem:[#allocation3 + $0x7ec] sm:$0xf] %v17369_v56  ;;  %640 = vst [vmem:[#allocation3 + $0x828] sm:$0xf] %v17369_v56  ;;  %v17307_v0 = vpack.c.bf16 %v1088_v62, %v1088_v62  ;;  %v17308_v2 = vpack.c.bf16 %v1089_v63, %v1089_v63  ;;  %v1472_v3 = vld [vmem:[#allocation2 + $0x300] sm:$0xff]  ;;  %v1473_v5 = vld [vmem:[#allocation2 + $0x308] sm:$0xff] }
  0xe8   :  { %6559 = vmatprep.mubr.bf16.mxu1 %v18666_v29  ;;  %1791 = vst [vmem:[#allocation3 + $0x810] sm:$0xf] %v17370_v59  ;;  %641 = vst [vmem:[#allocation3 + $0x84c] sm:$0xf] %v17370_v59  ;;  %v17371_v7 = vpack.c.bf16 %v1472_v3, %v1472_v3  ;;  %v17372_v8 = vpack.c.bf16 %v1473_v5, %v1473_v5  ;;  %v706_v9 = vld [vmem:[#allocation2 + $0x301] sm:$0xff]  ;;  %v707_v10 = vld [vmem:[#allocation2 + $0x309] sm:$0xff]  ;;  %6980 = vmatpush2.bf16.msra.mxu1 %v18746_v54 }
  0xe9   :  { %1024 = vst [vmem:[#allocation3 + $0x82c] sm:$0xf] %v17243_v60  ;;  %1025 = vst [vmem:[#allocation3 + $0x850] sm:$0xf] %v17244_v61  ;;  %v18672_v11 = vld [vmem:[#allocation3 + $0x558] ss:$36 sps:$4 sm:$0xff]   ;;  %v17245_v6 = vpack.c.bf16 %v706_v9, %v706_v9  ;;  %v17246_v13 = vpack.c.bf16 %v707_v10, %v707_v10  ;;  %6981 = vmatprep.subr.bf16.mxu1 %v21683_v1 }
  0xea   :  { %6271 = vmatmul.mubr.bf16.gmra.mxu0 %v18665_v38  ;;  %1408 = vst [vmem:[#allocation3 + $0x830] sm:$0xf] %v17307_v0  ;;  %1409 = vst [vmem:[#allocation3 + $0x854] sm:$0xf] %v17308_v2  ;;  %v193_v16 = vld [vmem:[%s21676_s0 + $0x1e8] sm:$0xff]  ;;  %v18758_v23 = vld [vmem:[%s21677_s1 + $0x140] sm:$0xff]  }
  0xeb   :  { %6278 = vmatprep.mubr.bf16.mxu0 %v18670_v40  ;;  %1792 = vst [vmem:[#allocation3 + $0x834] sm:$0xf] %v17371_v7  ;;  %1793 = vst [vmem:[#allocation3 + $0x858] sm:$0xf] %v17372_v8  ;;  %v1090_v17 = vld [vmem:[#allocation2 + $0x302] sm:$0xff]  ;;  %v1091_v18 = vld [vmem:[#allocation2 + $0x30a] sm:$0xff]  ;;  %6703 = vmatpush2.bf16.msra.mxu0 %v18758_v23 }
  0xec   :  { %642 = vst [vmem:[#allocation3 + $0x870] sm:$0xf] %v17371_v7  ;;  %643 = vst [vmem:[#allocation3 + $0x894] sm:$0xf] %v17372_v8  ;;  %v17309_v19 = vpack.c.bf16 %v1090_v17, %v1090_v17  ;;  %v17310_v22 = vpack.c.bf16 %v1091_v18, %v1091_v18  ;;  %6982 = vmatpush2.bf16.msra.mxu1 %v18751_v12  ;;  %v18754_v25 = vld [vmem:[%s21677_s1 + $0x1e0] sm:$0xff]   ;;  %v18760_v33 = vld [vmem:[%s21677_s1 + $0x1d8] sm:$0xff]  }
  0xed   :  { %1026 = vst [vmem:[#allocation3 + $0x874] sm:$0xf] %v17245_v6  ;;  %1027 = vst [vmem:[#allocation3 + $0x898] sm:$0xf] %v17246_v13  ;;  %6983 = vmatprep.subr.bf16.mxu1 %v21683_v1  ;;  %v18678_v26 = vld [vmem:[#allocation3 + $0x5a0] ss:$36 sps:$4 sm:$0xff]  }
  0xee   :  { %258 = vst.msk [vmem:[#allocation2 + $0x319] sm:$0xff] %vm197_vm0, %v192_v15  ;;  %259 = vst.msk [vmem:[#allocation2 + $0x321] sm:$0xff] %vm197_vm0, %v193_v16  ;;  %v18682_v27 = vld [vmem:[#allocation3 + $0x5a8] ss:$36 sps:$4 sm:$0xff]   ;;  %v18686_v21 = vld [vmem:[#allocation3 + $0x5f4] ss:$36 sps:$4 sm:$0xff]  }
  0xef   :  { %6560 = vmatmul.mubr.bf16.gmra.mxu1 %v18669_v39  ;;  %1410 = vst [vmem:[#allocation3 + $0x878] sm:$0xf] %v17309_v19  ;;  %1411 = vst [vmem:[#allocation3 + $0x89c] sm:$0xf] %v17310_v22  ;;  %v18683_v20 = vld [vmem:[#allocation3 + $0x5ec] ss:$36 sps:$4 sm:$0xff]  }
  0xf0   :  { %6567 = vmatprep.mubr.bf16.mxu1 %v18673_v43  ;;  %6984 = vmatpush2.bf16.msra.mxu1 %v18754_v25  ;;  %v18763_v39 = vld [vmem:[%s21677_s1 + $0x1d0] sm:$0xff]   ;;  %v195_v41 = vld [vmem:[%s21676_s0 + $0x1f8] sm:$0xff]  ;;  %v18685_v44 = vld [vmem:[#allocation3 + $0x5e8] ss:$36 sps:$4 sm:$0xff]  }
  0xf1   :  { %6985 = vmatprep.subr.bf16.mxu1 %v21683_v1  ;;  %v194_v40 = vld [vmem:[%s21676_s0 + $0x1f0] sm:$0xff]  ;;  %261 = vst.msk [vmem:[#allocation2 + $0x339] sm:$0xff] %vm197_vm0, %v195_v41  ;;  %v18768_v47 = vld [vmem:[%s21677_s1 + $0x1c8] sm:$0xff]   ;;  %v1798_v50 = vld [vmem:[#allocation2 + $0x19] sm:$0xff] }
  0xf2   :  { %6279 = vmatmul.mubr.bf16.gmra.mxu0 %v18672_v11  ;;  %260 = vst.msk [vmem:[#allocation2 + $0x331] sm:$0xff] %vm197_vm0, %v194_v40  ;;  %v18688_v48 = vld [vmem:[#allocation3 + $0x5f0] ss:$36 sps:$4 sm:$0xff]   ;;  %v1799_v51 = vld [vmem:[#allocation2 + $0x21] sm:$0xff]  ;;  %v17377_v53 = vpack.c.bf16 %v1798_v50, %v1798_v50  ;;  %v18773_v57 = vld [vmem:[%s21677_s1 + $0x238] sm:$0xff]  }
  0xf3   :  { %6286 = vmatprep.mubr.bf16.mxu0 %v18676_v4  ;;  %v18689_v49 = vld [vmem:[#allocation3 + $0x634] ss:$36 sps:$4 sm:$0xff]   ;;  %v17378_v54 = vpack.c.bf16 %v1799_v51, %v1799_v51  ;;  %v2183_v31 = vld [vmem:[#allocation2 + $0x22] sm:$0xff]  ;;  %18353 = vmatprep.subr.bf16.mxu0 %v18773_v57  ;;  %v2186_v25 = vld [vmem:[#allocation2 + $0x4a] sm:$0xff] }
  0xf4   :  { %6986 = vmatpush2.bf16.msra.mxu1 %v18760_v33  ;;  %v2182_v52 = vld [vmem:[#allocation2 + $0x1a] sm:$0xff]  ;;  %v17442_v56 = vpack.c.bf16 %v2183_v31, %v2183_v31  ;;  %2118 = vst [vmem:[#allocation3 + $0x10] sm:$0xf] %v17377_v53  ;;  %v2567_v58 = vld [vmem:[#allocation2 + $0x30] sm:$0xff]  ;;  %v18708_v57 = vld [vmem:[#allocation3 + $0x6c8] ss:$36 sps:$4 sm:$0xff]  }
  0xf5   :  { %v1474_v28 = vld [vmem:[#allocation2 + $0x318] sm:$0xff]  ;;  %v1475_v29 = vld [vmem:[#allocation2 + $0x320] sm:$0xff]  ;;  %6987 = vmatprep.subr.bf16.mxu1 %v21683_v1  ;;  %v17441_v32 = vpack.c.bf16 %v2182_v52, %v2182_v52  ;;  %2119 = vst [vmem:[#allocation3 + $0x34] sm:$0xf] %v17378_v54  ;;  %v17505_v60 = vpack.c.bf16 %v2567_v58, %v2567_v58  ;;  %v18691_v5 = vld [vmem:[#allocation3 + $0x630] ss:$36 sps:$4 sm:$0xff]  }
  0xf6   :  { %v17373_v30 = vpack.c.bf16 %v1474_v28, %v1474_v28  ;;  %v17374_v34 = vpack.c.bf16 %v1475_v29, %v1475_v29  ;;  %v708_v35 = vld [vmem:[#allocation2 + $0x319] sm:$0xff]  ;;  %v709_v36 = vld [vmem:[#allocation2 + $0x321] sm:$0xff]  ;;  %2503 = vst [vmem:[#allocation3 + $0x38] sm:$0xf] %v17442_v56  ;;  %v2951_v62 = vld [vmem:[#allocation2 + $0x31] sm:$0xff] }
  0xf7   :  { %6568 = vmatmul.mubr.bf16.gmra.mxu1 %v18675_v14  ;;  %v17247_v37 = vpack.c.bf16 %v708_v35, %v708_v35  ;;  %v17248_v38 = vpack.c.bf16 %v709_v36, %v709_v36  ;;  %v1092_v42 = vld [vmem:[#allocation2 + $0x31a] sm:$0xff]  ;;  %v1093_v43 = vld [vmem:[#allocation2 + $0x322] sm:$0xff]  ;;  %2502 = vst [vmem:[#allocation3 + $0x14] sm:$0xf] %v17441_v32  ;;  %v17569_v2 = vpack.c.bf16 %v2951_v62, %v2951_v62  ;;  %2887 = vst [vmem:[#allocation3 + $0x18] sm:$0xf] %v17505_v60 }
  0xf8   :  { %6575 = vmatprep.mubr.bf16.mxu1 %v18679_v24  ;;  %1794 = vst [vmem:[#allocation3 + $0x87c] sm:$0xf] %v17373_v30  ;;  %644 = vst [vmem:[#allocation3 + $0x8b8] sm:$0xf] %v17373_v30  ;;  %v17311_v45 = vpack.c.bf16 %v1092_v42, %v1092_v42  ;;  %v17312_v46 = vpack.c.bf16 %v1093_v43, %v1093_v43  ;;  %6988 = vmatpush2.bf16.msra.mxu1 %v18763_v39  ;;  %v18692_v55 = vld [vmem:[#allocation3 + $0x63c] ss:$36 sps:$4 sm:$0xff]  }
  0xf9   :  { %1795 = vst [vmem:[#allocation3 + $0x8a0] sm:$0xf] %v17374_v34  ;;  %645 = vst [vmem:[#allocation3 + $0x8dc] sm:$0xf] %v17374_v34  ;;  %6989 = vmatprep.subr.bf16.mxu1 %v21683_v1  ;;  %v2568_v59 = vld [vmem:[#allocation2 + $0x38] sm:$0xff]  ;;  %v18772_v0 = vld [vmem:[%s21677_s1 + $0x1c0] sm:$0xff]  }
  0xfa   :  { %6287 = vmatmul.mubr.bf16.gmra.mxu0 %v18678_v26  ;;  %1028 = vst [vmem:[#allocation3 + $0x8bc] sm:$0xf] %v17247_v37  ;;  %1029 = vst [vmem:[#allocation3 + $0x8e0] sm:$0xf] %v17248_v38  ;;  %v17506_v61 = vpack.c.bf16 %v2568_v59, %v2568_v59  ;;  %v2952_v63 = vld [vmem:[#allocation2 + $0x39] sm:$0xff]  ;;  %v1476_v7 = vld [vmem:[#allocation2 + $0x330] sm:$0xff] }
  0xfb   :  { %6294 = vmatprep.mubr.bf16.mxu0 %v18683_v20  ;;  %1412 = vst [vmem:[#allocation3 + $0x8c0] sm:$0xf] %v17311_v45  ;;  %1413 = vst [vmem:[#allocation3 + $0x8e4] sm:$0xf] %v17312_v46  ;;  %v17570_v3 = vpack.c.bf16 %v2952_v63, %v2952_v63  ;;  %v1477_v8 = vld [vmem:[#allocation2 + $0x338] sm:$0xff]  ;;  %v17375_v11 = vpack.c.bf16 %v1476_v7, %v1476_v7  ;;  %v2569_v14 = vld [vmem:[#allocation2 + $0x48] sm:$0xff]  ;;  %v17445_v20 = vpack.c.bf16 %v2186_v25, %v2186_v25 }
  0xfc   :  { %6990 = vmatpush2.bf16.msra.mxu1 %v18768_v47  ;;  %2888 = vst [vmem:[#allocation3 + $0x3c] sm:$0xf] %v17506_v61  ;;  %3271 = vst [vmem:[#allocation3 + $0x1c] sm:$0xf] %v17569_v2  ;;  %v18695_v9 = vld [vmem:[#allocation3 + $0x638] ss:$36 sps:$4 sm:$0xff]   ;;  %v17376_v12 = vpack.c.bf16 %v1477_v8, %v1477_v8  ;;  %v17507_v17 = vpack.c.bf16 %v2569_v14, %v2569_v14 }
  0xfd   :  { %6991 = vmatprep.subr.bf16.mxu1 %v21683_v1  ;;  %3272 = vst [vmem:[#allocation3 + $0x40] sm:$0xf] %v17570_v3  ;;  %2120 = vst [vmem:[#allocation3 + $0x58] sm:$0xf] %v17569_v2  ;;  %v18696_v10 = vld [vmem:[#allocation3 + $0x67c] ss:$36 sps:$4 sm:$0xff]  }
  0xfe   :  { %2121 = vst [vmem:[#allocation3 + $0x7c] sm:$0xf] %v17570_v3  ;;  %v2184_v6 = vld [vmem:[#allocation2 + $0x32] sm:$0xff]  ;;  %v2185_v13 = vld [vmem:[#allocation2 + $0x3a] sm:$0xff]  ;;  %v2953_v18 = vld [vmem:[#allocation2 + $0x49] sm:$0xff] }
  0xff   :  { %6576 = vmatmul.mubr.bf16.gmra.mxu1 %v18682_v27  ;;  %v17443_v4 = vpack.c.bf16 %v2184_v6, %v2184_v6  ;;  %v17444_v15 = vpack.c.bf16 %v2185_v13, %v2185_v13  ;;  %v2570_v16 = vld [vmem:[#allocation2 + $0x50] sm:$0xff]  ;;  %1796 = vst [vmem:[#allocation3 + $0x8c4] sm:$0xf] %v17375_v11  ;;  %1797 = vst [vmem:[#allocation3 + $0x8e8] sm:$0xf] %v17376_v12  ;;  %v17571_v23 = vpack.c.bf16 %v2953_v18, %v2953_v18  ;;  %v2571_v28 = vld [vmem:[#allocation2 + $0x60] sm:$0xff] }
 0x100   :  { %6583 = vmatprep.mubr.bf16.mxu1 %v18686_v21  ;;  %6992 = vmatpush2.bf16.msra.mxu1 %v18772_v0  ;;  %v2954_v19 = vld [vmem:[#allocation2 + $0x51] sm:$0xff]  ;;  %v17508_v22 = vpack.c.bf16 %v2570_v16, %v2570_v16  ;;  %v18699_v27 = vld [vmem:[#allocation3 + $0x684] ss:$36 sps:$4 sm:$0xff]   ;;  %2889 = vst [vmem:[#allocation3 + $0x60] sm:$0xf] %v17507_v17  ;;  %v17509_v33 = vpack.c.bf16 %v2571_v28, %v2571_v28  ;;  %v2957_v47 = vld [vmem:[#allocation2 + $0x79] sm:$0xff] }
 0x101   :  { %v17572_v24 = vpack.c.bf16 %v2954_v19, %v2954_v19  ;;  %v2187_v26 = vld [vmem:[#allocation2 + $0x52] sm:$0xff]  ;;  %13498 = vmatprep.subr.bf16.mxu1 %v21683_v1  ;;  %2504 = vst [vmem:[#allocation3 + $0x5c] sm:$0xf] %v17443_v4  ;;  %2505 = vst [vmem:[#allocation3 + $0x80] sm:$0xf] %v17444_v15  ;;  %v2572_v29 = vld [vmem:[#allocation2 + $0x68] sm:$0xff]  ;;  %v17575_v51 = vpack.c.bf16 %v2957_v47, %v2957_v47 }
 0x102   :  { %6295 = vmatmul.mubr.bf16.gmra.mxu0 %v18685_v44  ;;  %v17446_v21 = vpack.c.bf16 %v2187_v26, %v2187_v26  ;;  %2890 = vst [vmem:[#allocation3 + $0x84] sm:$0xf] %v17508_v22  ;;  %3273 = vst [vmem:[#allocation3 + $0x64] sm:$0xf] %v17571_v23  ;;  %v2955_v30 = vld [vmem:[#allocation2 + $0x61] sm:$0xff]  ;;  %v17510_v34 = vpack.c.bf16 %v2572_v29, %v2572_v29  ;;  %v2956_v35 = vld [vmem:[#allocation2 + $0x69] sm:$0xff] }
 0x103   :  { %6302 = vmatprep.mubr.bf16.mxu0 %v18689_v49  ;;  %3274 = vst [vmem:[#allocation3 + $0x88] sm:$0xf] %v17572_v24  ;;  %2122 = vst [vmem:[#allocation3 + $0xa0] sm:$0xf] %v17571_v23  ;;  %v17573_v36 = vpack.c.bf16 %v2955_v30, %v2955_v30  ;;  %v2188_v37 = vld [vmem:[#allocation2 + $0x62] sm:$0xff]  ;;  %v2189_v38 = vld [vmem:[#allocation2 + $0x6a] sm:$0xff]  ;;  %v17574_v39 = vpack.c.bf16 %v2956_v35, %v2956_v35 }
 0x104   :  { %2123 = vst [vmem:[#allocation3 + $0xc4] sm:$0xf] %v17572_v24  ;;  %2506 = vst [vmem:[#allocation3 + $0xa4] sm:$0xf] %v17445_v20  ;;  %v17447_v40 = vpack.c.bf16 %v2188_v37, %v2188_v37  ;;  %v17448_v41 = vpack.c.bf16 %v2189_v38, %v2189_v38  ;;  %v18698_v42 = vld [vmem:[#allocation3 + $0x678] ss:$36 sps:$4 sm:$0xff]  }
 0x105   :  { %2507 = vst [vmem:[#allocation3 + $0xc8] sm:$0xf] %v17446_v21  ;;  %2891 = vst [vmem:[#allocation3 + $0xa8] sm:$0xf] %v17509_v33  ;;  %v2573_v43 = vld [vmem:[#allocation2 + $0x78] sm:$0xff]  ;;  %v2574_v44 = vld [vmem:[#allocation2 + $0x80] sm:$0xff] }
 0x106   :  { %2892 = vst [vmem:[#allocation3 + $0xcc] sm:$0xf] %v17510_v34  ;;  %3275 = vst [vmem:[#allocation3 + $0xac] sm:$0xf] %v17573_v36  ;;  %v17511_v45 = vpack.c.bf16 %v2573_v43, %v2573_v43  ;;  %v17512_v46 = vpack.c.bf16 %v2574_v44, %v2574_v44  ;;  %v2190_v49 = vld [vmem:[#allocation2 + $0x7a] sm:$0xff]  ;;  %v2191_v32 = vld [vmem:[#allocation2 + $0x82] sm:$0xff] }
 0x107   :  { %6584 = vmatmul.mubr.bf16.gmra.mxu1 %v18688_v48  ;;  %2124 = vst [vmem:[#allocation3 + $0xe8] sm:$0xf] %v17573_v36  ;;  %3276 = vst [vmem:[#allocation3 + $0xd0] sm:$0xf] %v17574_v39  ;;  %v2958_v48 = vld [vmem:[#allocation2 + $0x81] sm:$0xff]  ;;  %v17449_v53 = vpack.c.bf16 %v2190_v49, %v2190_v49  ;;  %v2575_v61 = vld [vmem:[#allocation2 + $0x90] sm:$0xff] }
 0x108   :  { %6591 = vmatprep.mubr.bf16.mxu1 %v18692_v55  ;;  %2125 = vst [vmem:[#allocation3 + $0x10c] sm:$0xf] %v17574_v39  ;;  %2508 = vst [vmem:[#allocation3 + $0xec] sm:$0xf] %v17447_v40  ;;  %v18701_v50 = vld [vmem:[#allocation3 + $0x680] ss:$36 sps:$4 sm:$0xff]   ;;  %v17576_v52 = vpack.c.bf16 %v2958_v48, %v2958_v48  ;;  %v17450_v55 = vpack.c.bf16 %v2191_v32, %v2191_v32  ;;  %v17513_v2 = vpack.c.bf16 %v2575_v61, %v2575_v61 }
 0x109   :  { %2509 = vst [vmem:[#allocation3 + $0x110] sm:$0xf] %v17448_v41  ;;  %v18702_v54 = vld [vmem:[#allocation3 + $0x6c4] ss:$36 sps:$4 sm:$0xff]   ;;  %2893 = vst [vmem:[#allocation3 + $0xf0] sm:$0xf] %v17511_v45 }
 0x10a   :  { %6303 = vmatmul.mubr.bf16.gmra.mxu0 %v18691_v5  ;;  %2894 = vst [vmem:[#allocation3 + $0x114] sm:$0xf] %v17512_v46  ;;  %v18705_v31 = vld [vmem:[#allocation3 + $0x6cc] ss:$36 sps:$4 sm:$0xff]   ;;  %3277 = vst [vmem:[#allocation3 + $0xf4] sm:$0xf] %v17575_v51 }
 0x10b   :  { %6310 = vmatprep.mubr.bf16.mxu0 %v18696_v10  ;;  %3278 = vst [vmem:[#allocation3 + $0x118] sm:$0xf] %v17576_v52  ;;  %2126 = vst [vmem:[#allocation3 + $0x130] sm:$0xf] %v17575_v51  ;;  %v18704_v56 = vld [vmem:[#allocation3 + $0x6c0] ss:$36 sps:$4 sm:$0xff]  }
 0x10c   :  { %2127 = vst [vmem:[#allocation3 + $0x154] sm:$0xf] %v17576_v52  ;;  %2510 = vst [vmem:[#allocation3 + $0x134] sm:$0xf] %v17449_v53  ;;  %v18710_v58 = vld [vmem:[#allocation3 + $0x70c] ss:$36 sps:$4 sm:$0xff]  }
 0x10d   :  { %2511 = vst [vmem:[#allocation3 + $0x158] sm:$0xf] %v17450_v55  ;;  %v20237_v59 = vld [vmem:[%s21678_s2] ss:$0 sm:$0xff]  ;;  %v18714_v60 = vld [vmem:[#allocation3 + $0x714] ss:$36 sps:$4 sm:$0xff]  }
 0x10e   :  { %v2576_v62 = vld [vmem:[#allocation2 + $0x98] sm:$0xff]  ;;  %v2577_v13 = vld [vmem:[#allocation2 + $0xa8] sm:$0xff]  ;;  %v2578_v14 = vld [vmem:[#allocation2 + $0xb0] sm:$0xff]  ;;  %2895 = vst [vmem:[#allocation3 + $0x138] sm:$0xf] %v17513_v2 }
 0x10f   :  { %6592 = vmatmul.mubr.bf16.gmra.mxu1 %v18695_v9  ;;  %v2959_v63 = vld [vmem:[#allocation2 + $0x91] sm:$0xff]  ;;  %v17514_v3 = vpack.c.bf16 %v2576_v62, %v2576_v62  ;;  %v2960_v5 = vld [vmem:[#allocation2 + $0x99] sm:$0xff]  ;;  %v2961_v4 = vld [vmem:[#allocation2 + $0xa9] sm:$0xff]  ;;  %v17515_v18 = vpack.c.bf16 %v2577_v13, %v2577_v13  ;;  %v17516_v19 = vpack.c.bf16 %v2578_v14, %v2578_v14 }
 0x110   :  { %6599 = vmatprep.mubr.bf16.mxu1 %v18699_v27  ;;  %v17577_v7 = vpack.c.bf16 %v2959_v63, %v2959_v63  ;;  %v2192_v8 = vld [vmem:[#allocation2 + $0x92] sm:$0xff]  ;;  %v2193_v9 = vld [vmem:[#allocation2 + $0x9a] sm:$0xff]  ;;  %v17578_v12 = vpack.c.bf16 %v2960_v5, %v2960_v5  ;;  %v20240_v16 = vld [vmem:[#allocation3 + $0x708] ss:$36 sps:$4 sm:$0xff]   ;;  %v17579_v23 = vpack.c.bf16 %v2961_v4, %v2961_v4 }
 0x111   :  { %v17451_v6 = vpack.c.bf16 %v2192_v8, %v2192_v8  ;;  %2896 = vst [vmem:[#allocation3 + $0x15c] sm:$0xf] %v17514_v3  ;;  %v17452_v17 = vpack.c.bf16 %v2193_v9, %v2193_v9  ;;  %v2962_v22 = vld [vmem:[#allocation2 + $0xb1] sm:$0xff]  ;;  %v18722_v34 = vld [vmem:[#allocation3 + $0x75c] ss:$36 sps:$4 sm:$0xff]   ;;  %v2580_v36 = vld [vmem:[#allocation2 + $0xc8] sm:$0xff] }
 0x112   :  { %6311 = vmatmul.mubr.bf16.gmra.mxu0 %v18698_v42  ;;  %3279 = vst [vmem:[#allocation3 + $0x13c] sm:$0xf] %v17577_v7  ;;  %2128 = vst [vmem:[#allocation3 + $0x178] sm:$0xf] %v17577_v7  ;;  %v2194_v24 = vld [vmem:[#allocation2 + $0xaa] sm:$0xff]  ;;  %v2195_v25 = vld [vmem:[#allocation2 + $0xb2] sm:$0xff]  ;;  %v17580_v28 = vpack.c.bf16 %v2962_v22, %v2962_v22  ;;  %v17518_v41 = vpack.c.bf16 %v2580_v36, %v2580_v36 }
 0x113   :  { %6318 = vmatprep.mubr.bf16.mxu0 %v18702_v54  ;;  %v18716_v20 = vld [vmem:[#allocation3 + $0x710] ss:$36 sps:$4 sm:$0xff]   ;;  %3280 = vst [vmem:[#allocation3 + $0x160] sm:$0xf] %v17578_v12  ;;  %2129 = vst [vmem:[#allocation3 + $0x19c] sm:$0xf] %v17578_v12  ;;  %v17453_v29 = vpack.c.bf16 %v2194_v24, %v2194_v24  ;;  %v17454_v30 = vpack.c.bf16 %v2195_v25, %v2195_v25 }
 0x114   :  { %v18718_v21 = vld [vmem:[#allocation3 + $0x754] ss:$36 sps:$4 sm:$0xff]   ;;  %2512 = vst [vmem:[#allocation3 + $0x17c] sm:$0xf] %v17451_v6  ;;  %2513 = vst [vmem:[#allocation3 + $0x1a0] sm:$0xf] %v17452_v17 }
 0x115   :  { %2897 = vst [vmem:[#allocation3 + $0x180] sm:$0xf] %v17515_v18  ;;  %2898 = vst [vmem:[#allocation3 + $0x1a4] sm:$0xf] %v17516_v19  ;;  %v2579_v35 = vld [vmem:[#allocation2 + $0xc0] sm:$0xff]  ;;  %v2964_v42 = vld [vmem:[#allocation2 + $0xc9] sm:$0xff] }
 0x116   :  { %3281 = vst [vmem:[#allocation3 + $0x184] sm:$0xf] %v17579_v23  ;;  %2130 = vst [vmem:[#allocation3 + $0x1c0] sm:$0xf] %v17579_v23  ;;  %v2963_v37 = vld [vmem:[#allocation2 + $0xc1] sm:$0xff]  ;;  %v17517_v40 = vpack.c.bf16 %v2579_v35, %v2579_v35  ;;  %v2197_v45 = vld [vmem:[#allocation2 + $0xca] sm:$0xff]  ;;  %v17582_v47 = vpack.c.bf16 %v2964_v42, %v2964_v42 }
 0x117   :  { %6600 = vmatmul.mubr.bf16.gmra.mxu1 %v18701_v50  ;;  %3282 = vst [vmem:[#allocation3 + $0x1a8] sm:$0xf] %v17580_v28  ;;  %2131 = vst [vmem:[#allocation3 + $0x1e4] sm:$0xf] %v17580_v28  ;;  %v17581_v43 = vpack.c.bf16 %v2963_v37, %v2963_v37  ;;  %v2196_v44 = vld [vmem:[#allocation2 + $0xc2] sm:$0xff]  ;;  %v17456_v49 = vpack.c.bf16 %v2197_v45, %v2197_v45  ;;  %v2581_v50 = vld [vmem:[#allocation2 + $0xd8] sm:$0xff] }
 0x118   :  { %6607 = vmatprep.mubr.bf16.mxu1 %v18705_v31  ;;  %2514 = vst [vmem:[#allocation3 + $0x1c4] sm:$0xf] %v17453_v29  ;;  %2515 = vst [vmem:[#allocation3 + $0x1e8] sm:$0xf] %v17454_v30  ;;  %v17455_v48 = vpack.c.bf16 %v2196_v44, %v2196_v44  ;;  %v2582_v51 = vld [vmem:[#allocation2 + $0xe0] sm:$0xff]  ;;  %v17519_v31 = vpack.c.bf16 %v2581_v50, %v2581_v50  ;;  %v2583_v3 = vld [vmem:[#allocation2 + $0xf0] sm:$0xff] }
 0x119   :  { %v6128_v0 = vpop.f32.mrf.mxu0  ;;  %v2965_v52 = vld [vmem:[#allocation2 + $0xd9] sm:$0xff]  ;;  %2899 = vst [vmem:[#allocation3 + $0x1c8] sm:$0xf] %v17517_v40  ;;  %2900 = vst [vmem:[#allocation3 + $0x1ec] sm:$0xf] %v17518_v41  ;;  %v17520_v32 = vpack.c.bf16 %v2582_v51, %v2582_v51  ;;  %v2966_v55 = vld [vmem:[#allocation2 + $0xe1] sm:$0xff]  ;;  %v17521_v8 = vpack.c.bf16 %v2583_v3, %v2583_v3 }
 0x11a   :  { %6319 = vmatmul.mubr.bf16.gmra.mxu0 %v18704_v56  ;;  %v6129_v10 = vadd.f32 %v20237_v59, %v6128_v0  ;;  %3283 = vst [vmem:[#allocation3 + $0x1cc] sm:$0xf] %v17581_v43  ;;  %2132 = vst [vmem:[#allocation3 + $0x208] sm:$0xf] %v17581_v43  ;;  %v17583_v56 = vpack.c.bf16 %v2965_v52, %v2965_v52  ;;  %v17584_v61 = vpack.c.bf16 %v2966_v55, %v2966_v55  ;;  %v2584_v5 = vld [vmem:[#allocation2 + $0xf8] sm:$0xff]  ;;  %v2585_v42 = vld [vmem:[#allocation2 + $0x108] sm:$0xff] }
 0x11b   :  { %6326 = vmatprep.mubr.bf16.mxu0 %v18710_v58  ;;  %v6130_v15 = vpop.f32.mrf.mxu0  ;;  %v2199_v58 = vld [vmem:[#allocation2 + $0xe2] sm:$0xff]  ;;  %3284 = vst [vmem:[#allocation3 + $0x1f0] sm:$0xf] %v17582_v47  ;;  %2133 = vst [vmem:[#allocation3 + $0x22c] sm:$0xf] %v17582_v47  ;;  %v17522_v9 = vpack.c.bf16 %v2584_v5, %v2584_v5  ;;  %v2968_v35 = vld [vmem:[#allocation2 + $0xf9] sm:$0xff]  ;;  %v17523_v47 = vpack.c.bf16 %v2585_v42, %v2585_v42 }
 0x11c   :  { %2516 = vst [vmem:[#allocation3 + $0x20c] sm:$0xf] %v17455_v48  ;;  %2517 = vst [vmem:[#allocation3 + $0x230] sm:$0xf] %v17456_v49  ;;  %v17458_v63 = vpack.c.bf16 %v2199_v58, %v2199_v58  ;;  %v18721_v6 = vld [vmem:[#allocation3 + $0x750] ss:$36 sps:$4 sm:$0xff]  }
 0x11d   :  { %v6131_v33 = vpop.f32.mrf.mxu0  ;;  %2901 = vst [vmem:[#allocation3 + $0x210] sm:$0xf] %v17519_v31  ;;  %2902 = vst [vmem:[#allocation3 + $0x234] sm:$0xf] %v17520_v32  ;;  %v18725_v4 = vld [vmem:[#allocation3 + $0x758] ss:$36 sps:$4 sm:$0xff]  }
 0x11e   :  { %v6132_v38 = vadd.f32 %v20237_v59, %v6131_v33  ;;  %3285 = vst [vmem:[#allocation3 + $0x214] sm:$0xf] %v17583_v56  ;;  %2134 = vst [vmem:[#allocation3 + $0x250] sm:$0xf] %v17583_v56  ;;  %v18727_v15 = vld [vmem:[#allocation3 + $0x79c] ss:$36 sps:$4 sm:$0xff]  }
 0x11f   :  { %v6417_v11 = vpop.f32.mrf.mxu1  ;;  %6608 = vmatmul.mubr.bf16.gmra.mxu1 %v18708_v57  ;;  %v6133_v46 = vpop.f32.mrf.mxu0  ;;  %v2198_v57 = vld [vmem:[#allocation2 + $0xda] sm:$0xff]  ;;  %3286 = vst [vmem:[#allocation3 + $0x238] sm:$0xf] %v17584_v61  ;;  %2135 = vst [vmem:[#allocation3 + $0x274] sm:$0xf] %v17584_v61  ;;  %v2200_v40 = vld [vmem:[#allocation2 + $0xf2] sm:$0xff] }
 0x120   :  { %6615 = vmatprep.mubr.bf16.mxu1 %v18714_v60  ;;  %v20242_v26 = vadd.f32 %v6417_v11, %v6129_v10  ;;  %v17457_v62 = vpack.c.bf16 %v2198_v57, %v2198_v57  ;;  %2519 = vst [vmem:[#allocation3 + $0x278] sm:$0xf] %v17458_v63  ;;  %2903 = vst [vmem:[#allocation3 + $0x258] sm:$0xf] %v17521_v8  ;;  %v18731_v17 = vld [vmem:[#allocation3 + $0x7a4] ss:$36 sps:$4 sm:$0xff]   ;;  %v17459_v44 = vpack.c.bf16 %v2200_v40, %v2200_v40 }
 0x121   :  { %v6419_v27 = vpop.f32.mrf.mxu1  ;;  %v6136_v60 = vpop.f32.mrf.mxu0  ;;  %2904 = vst [vmem:[#allocation3 + $0x27c] sm:$0xf] %v17522_v9  ;;  %v18733_v28 = vld [vmem:[#allocation3 + $0x7a0] ss:$36 sps:$4 sm:$0xff]   ;;  %v18739_v33 = vld [vmem:[#allocation3 + $0x7ec] ss:$36 sps:$4 sm:$0xff]  }
 0x122   :  { %6327 = vmatmul.mubr.bf16.gmra.mxu0 %v20240_v16  ;;  %v6137_v0 = vadd.f32 %v20237_v59, %v6136_v60  ;;  %2518 = vst [vmem:[#allocation3 + $0x254] sm:$0xf] %v17457_v62  ;;  %v18730_v27 = vld [vmem:[#allocation3 + $0x798] ss:$36 sps:$4 sm:$0xff]   ;;  %v18735_v29 = vld [vmem:[#allocation3 + $0x7e4] ss:$36 sps:$4 sm:$0xff]  }
 0x123   :  { %v6420_v39 = vpop.f32.mrf.mxu1  ;;  %6334 = vmatprep.mubr.bf16.mxu0 %v18718_v21  ;;  %v6138_v7 = vpop.f32.mrf.mxu0  ;;  %v2201_v41 = vld [vmem:[#allocation2 + $0xfa] sm:$0xff]  ;;  %v2586_v46 = vld [vmem:[#allocation2 + $0x110] sm:$0xff]  ;;  %2520 = vst [vmem:[#allocation3 + $0x29c] sm:$0xf] %v17459_v44  ;;  %2905 = vst [vmem:[#allocation3 + $0x2a0] sm:$0xf] %v17523_v47 }
 0x124   :  { %v20245_v53 = vadd.f32 %v6420_v39, %v6132_v38  ;;  %v17586_v39 = vpack.c.bf16 %v2968_v35, %v2968_v35  ;;  %v17460_v45 = vpack.c.bf16 %v2201_v41, %v2201_v41  ;;  %v2969_v48 = vld [vmem:[#allocation2 + $0x109] sm:$0xff]  ;;  %v2970_v49 = vld [vmem:[#allocation2 + $0x111] sm:$0xff]  ;;  %v17524_v52 = vpack.c.bf16 %v2586_v46, %v2586_v46  ;;  %v2587_v56 = vld [vmem:[#allocation2 + $0x120] sm:$0xff] }
 0x125   :  { %v6422_v54 = vpop.f32.mrf.mxu1  ;;  %v6139_v12 = vpop.f32.mrf.mxu0  ;;  %v17588_v31 = vpack.c.bf16 %v2970_v49, %v2970_v49  ;;  %v2202_v32 = vld [vmem:[#allocation2 + $0x10a] sm:$0xff]  ;;  %v2203_v55 = vld [vmem:[#allocation2 + $0x112] sm:$0xff]  ;;  %v17525_v62 = vpack.c.bf16 %v2587_v56, %v2587_v56  ;;  %v2971_v63 = vld [vmem:[#allocation2 + $0x121] sm:$0xff] }
 0x126   :  { %v6140_v13 = vadd.f32 %v20237_v59, %v6139_v12  ;;  %3288 = vst [vmem:[#allocation3 + $0x280] sm:$0xf] %v17586_v39  ;;  %2137 = vst [vmem:[#allocation3 + $0x2bc] sm:$0xf] %v17586_v39  ;;  %v17587_v54 = vpack.c.bf16 %v2969_v48, %v2969_v48  ;;  %v17461_v58 = vpack.c.bf16 %v2202_v32, %v2202_v32  ;;  %v2588_v61 = vld [vmem:[#allocation2 + $0x128] sm:$0xff]  ;;  %v2975_v42 = vld [vmem:[#allocation2 + $0x151] sm:$0xff] }
 0x127   :  { %v6425_v2 = vpop.f32.mrf.mxu1  ;;  %6616 = vmatmul.mubr.bf16.gmra.mxu1 %v18716_v20  ;;  %v6141_v16 = vpop.f32.mrf.mxu0  ;;  %2521 = vst [vmem:[#allocation3 + $0x2c0] sm:$0xf] %v17460_v45  ;;  %v17462_v60 = vpack.c.bf16 %v2203_v55, %v2203_v55  ;;  %2906 = vst [vmem:[#allocation3 + $0x2c4] sm:$0xf] %v17524_v52  ;;  %v17526_v5 = vpack.c.bf16 %v2588_v61, %v2588_v61  ;;  %v17589_v7 = vpack.c.bf16 %v2971_v63, %v2971_v63  ;;  %v2204_v8 = vld [vmem:[#allocation2 + $0x122] sm:$0xff]  ;;  %v2205_v9 = vld [vmem:[#allocation2 + $0x12a] sm:$0xff] }
 0x128   :  { %6623 = vmatprep.mubr.bf16.mxu1 %v18722_v34  ;;  %v20249_v10 = vadd.f32 %v6425_v2, %v6137_v0  ;;  %v2967_v34 = vld [vmem:[#allocation2 + $0xf1] sm:$0xff]  ;;  %v2972_v0 = vld [vmem:[#allocation2 + $0x129] sm:$0xff]  ;;  %3289 = vst [vmem:[#allocation3 + $0x2a4] sm:$0xf] %v17587_v54  ;;  %3290 = vst [vmem:[#allocation3 + $0x2c8] sm:$0xf] %v17588_v31  ;;  %v17593_v47 = vpack.c.bf16 %v2975_v42, %v2975_v42 }
 0x129   :  { %v6427_v11 = vpop.f32.mrf.mxu1  ;;  %v6144_v22 = vpop.f32.mrf.mxu0  ;;  %v17585_v38 = vpack.c.bf16 %v2967_v34, %v2967_v34  ;;  %2138 = vst [vmem:[#allocation3 + $0x2e0] sm:$0xf] %v17587_v54  ;;  %2139 = vst [vmem:[#allocation3 + $0x304] sm:$0xf] %v17588_v31  ;;  %v2208_v44 = vld [vmem:[#allocation2 + $0x152] sm:$0xff]  ;;  %v2979_v42 = vld [vmem:[#allocation2 + $0x181] sm:$0xff] }
 0x12a   :  { %6335 = vmatmul.mubr.bf16.gmra.mxu0 %v18721_v6  ;;  %v6145_v23 = vadd.f32 %v20237_v59, %v6144_v22  ;;  %v2589_v11 = vld [vmem:[#allocation2 + $0x138] sm:$0xff]  ;;  %v18738_v6 = vld [vmem:[#allocation3 + $0x7e0] ss:$36 sps:$4 sm:$0xff]   ;;  %2522 = vst [vmem:[#allocation3 + $0x2e4] sm:$0xf] %v17461_v58  ;;  %v17467_v49 = vpack.c.bf16 %v2208_v44, %v2208_v44 }
 0x12b   :  { %v6428_v14 = vpop.f32.mrf.mxu1  ;;  %6342 = vmatprep.mubr.bf16.mxu0 %v18727_v15  ;;  %v6146_v25 = vpop.f32.mrf.mxu0  ;;  %3287 = vst [vmem:[#allocation3 + $0x25c] sm:$0xf] %v17585_v38  ;;  %2136 = vst [vmem:[#allocation3 + $0x298] sm:$0xf] %v17585_v38  ;;  %v2590_v15 = vld [vmem:[#allocation2 + $0x140] sm:$0xff]  ;;  %v17527_v16 = vpack.c.bf16 %v2589_v11, %v2589_v11 }
 0x12c   :  { %v20252_v18 = vadd.f32 %v6428_v14, %v6140_v13  ;;  %2523 = vst [vmem:[#allocation3 + $0x308] sm:$0xf] %v17462_v60  ;;  %2907 = vst [vmem:[#allocation3 + $0x2e8] sm:$0xf] %v17525_v62  ;;  %v17590_v13 = vpack.c.bf16 %v2972_v0, %v2972_v0  ;;  %v17463_v14 = vpack.c.bf16 %v2204_v8, %v2204_v8  ;;  %v18744_v25 = vld [vmem:[#allocation3 + $0x82c] ss:$36 sps:$4 sm:$0xff]  }
 0x12d   :  { %v6430_v19 = vpop.f32.mrf.mxu1  ;;  %v6147_v30 = vpop.f32.mrf.mxu0  ;;  %2908 = vst [vmem:[#allocation3 + $0x30c] sm:$0xf] %v17526_v5  ;;  %3291 = vst [vmem:[#allocation3 + $0x2ec] sm:$0xf] %v17589_v7  ;;  %v18748_v46 = vld [vmem:[#allocation3 + $0x834] ss:$36 sps:$4 sm:$0xff]  }
 0x12e   :  { %v6148_v36 = vadd.f32 %v20237_v59, %v6147_v30  ;;  %v2974_v19 = vld [vmem:[#allocation2 + $0x141] sm:$0xff]  ;;  %2140 = vst [vmem:[#allocation3 + $0x328] sm:$0xf] %v17589_v7  ;;  %3292 = vst [vmem:[#allocation3 + $0x310] sm:$0xf] %v17590_v13 }
 0x12f   :  { %v6433_v24 = vpop.f32.mrf.mxu1  ;;  %6624 = vmatmul.mubr.bf16.gmra.mxu1 %v18725_v4  ;;  %v6149_v43 = vpop.f32.mrf.mxu0  ;;  %v17464_v4 = vpack.c.bf16 %v2205_v9, %v2205_v9  ;;  %v2207_v30 = vld [vmem:[#allocation2 + $0x142] sm:$0xff]  ;;  %2141 = vst [vmem:[#allocation3 + $0x34c] sm:$0xf] %v17590_v13  ;;  %2524 = vst [vmem:[#allocation3 + $0x32c] sm:$0xf] %v17463_v14  ;;  %v2209_v13 = vld [vmem:[#allocation2 + $0x15a] sm:$0xff] }
 0x130   :  { %6631 = vmatprep.mubr.bf16.mxu1 %v18731_v17  ;;  %v20255_v20 = vadd.f32 %v6433_v24, %v6145_v23  ;;  %v2973_v17 = vld [vmem:[#allocation2 + $0x139] sm:$0xff]  ;;  %v18742_v24 = vld [vmem:[#allocation3 + $0x7e8] ss:$36 sps:$4 sm:$0xff]   ;;  %2909 = vst [vmem:[#allocation3 + $0x330] sm:$0xf] %v17527_v16  ;;  %v17466_v35 = vpack.c.bf16 %v2207_v30, %v2207_v30 }
 0x131   :  { %v6435_v21 = vpop.f32.mrf.mxu1  ;;  %v6152_v57 = vpop.f32.mrf.mxu0  ;;  %2525 = vst [vmem:[#allocation3 + $0x350] sm:$0xf] %v17464_v4  ;;  %v2976_v43 = vld [vmem:[#allocation2 + $0x159] sm:$0xff]  ;;  %3295 = vst [vmem:[#allocation3 + $0x37c] sm:$0xf] %v17593_v47 }
 0x132   :  { %6343 = vmatmul.mubr.bf16.gmra.mxu0 %v18730_v27  ;;  %v6153_v2 = vadd.f32 %v20237_v59, %v6152_v57  ;;  %v17528_v27 = vpack.c.bf16 %v2590_v15, %v2590_v15  ;;  %v17591_v21 = vpack.c.bf16 %v2973_v17, %v2973_v17  ;;  %2527 = vst [vmem:[#allocation3 + $0x398] sm:$0xf] %v17466_v35  ;;  %2144 = vst [vmem:[#allocation3 + $0x3b8] sm:$0xf] %v17593_v47  ;;  %v18747_v60 = vld [vmem:[#allocation3 + $0x828] ss:$36 sps:$4 sm:$0xff]  }
 0x133   :  { %v6436_v37 = vpop.f32.mrf.mxu1  ;;  %6350 = vmatprep.mubr.bf16.mxu0 %v18735_v29  ;;  %v6154_v12 = vpop.f32.mrf.mxu0  ;;  %v2206_v29 = vld [vmem:[#allocation2 + $0x13a] sm:$0xff]  ;;  %v17594_v48 = vpack.c.bf16 %v2976_v43, %v2976_v43  ;;  %2528 = vst [vmem:[#allocation3 + $0x3bc] sm:$0xf] %v17467_v49  ;;  %v18750_v63 = vld [vmem:[#allocation3 + $0x830] ss:$36 sps:$4 sm:$0xff]   ;;  %v17468_v17 = vpack.c.bf16 %v2209_v13, %v2209_v13  ;;  %v17597_v47 = vpack.c.bf16 %v2979_v42, %v2979_v42 }
 0x134   :  { %v20258_v50 = vadd.f32 %v6436_v37, %v6148_v36  ;;  %v17465_v34 = vpack.c.bf16 %v2206_v29, %v2206_v29  ;;  %v2591_v36 = vld [vmem:[#allocation2 + $0x150] sm:$0xff]  ;;  %v2592_v37 = vld [vmem:[#allocation2 + $0x158] sm:$0xff]  ;;  %2910 = vst [vmem:[#allocation3 + $0x354] sm:$0xf] %v17528_v27  ;;  %3293 = vst [vmem:[#allocation3 + $0x334] sm:$0xf] %v17591_v21 }
 0x135   :  { %v6438_v51 = vpop.f32.mrf.mxu1  ;;  %2142 = vst [vmem:[#allocation3 + $0x370] sm:$0xf] %v17591_v21  ;;  %v17529_v40 = vpack.c.bf16 %v2591_v36, %v2591_v36  ;;  %v17530_v41 = vpack.c.bf16 %v2592_v37, %v2592_v37  ;;  %3296 = vst [vmem:[#allocation3 + $0x3a0] sm:$0xf] %v17594_v48  ;;  %v18752_v0 = vld [vmem:[#allocation3 + $0x874] ss:$36 sps:$4 sm:$0xff]  }
 0x136   :  { %2526 = vst [vmem:[#allocation3 + $0x374] sm:$0xf] %v17465_v34  ;;  %2145 = vst [vmem:[#allocation3 + $0x3dc] sm:$0xf] %v17594_v48  ;;  %v18759_v15 = vld [vmem:[#allocation3 + $0x878] ss:$36 sps:$4 sm:$0xff]  }
 0x137   :  { %v6441_v3 = vpop.f32.mrf.mxu1  ;;  %6632 = vmatmul.mubr.bf16.gmra.mxu1 %v18733_v28  ;;  %v17592_v28 = vpack.c.bf16 %v2974_v19, %v2974_v19  ;;  %2911 = vst [vmem:[#allocation3 + $0x378] sm:$0xf] %v17529_v40  ;;  %2912 = vst [vmem:[#allocation3 + $0x39c] sm:$0xf] %v17530_v41  ;;  %v18761_v16 = vld [vmem:[#allocation3 + $0x8bc] ss:$36 sps:$4 sm:$0xff]  }
 0x138   :  { %6639 = vmatprep.mubr.bf16.mxu1 %v18739_v33  ;;  %v20261_v22 = vadd.f32 %v6441_v3, %v6153_v2  ;;  %v6155_v33 = vpop.f32.mrf.mxu0  ;;  %v18756_v3 = vld [vmem:[#allocation3 + $0x87c] ss:$36 sps:$4 sm:$0xff]   ;;  %v2593_v19 = vld [vmem:[#allocation2 + $0x168] sm:$0xff]  ;;  %v2978_v29 = vld [vmem:[#allocation2 + $0x171] sm:$0xff]  ;;  %2529 = vst [vmem:[#allocation3 + $0x3e0] sm:$0xf] %v17468_v17 }
 0x139   :  { %v6443_v23 = vpop.f32.mrf.mxu1  ;;  %v6156_v38 = vadd.f32 %v20237_v59, %v6155_v33  ;;  %3294 = vst [vmem:[#allocation3 + $0x358] sm:$0xf] %v17592_v28  ;;  %2143 = vst [vmem:[#allocation3 + $0x394] sm:$0xf] %v17592_v28  ;;  %v18765_v27 = vld [vmem:[#allocation3 + $0x8c4] ss:$36 sps:$4 sm:$0xff]   ;;  %v17531_v21 = vpack.c.bf16 %v2593_v19, %v2593_v19  ;;  %v17596_v37 = vpack.c.bf16 %v2978_v29, %v2978_v29 }
 0x13a   :  { %v6157_v45 = vpop.f32.mrf.mxu0  ;;  %6351 = vmatmul.mubr.bf16.gmra.mxu0 %v18738_v6  ;;  %v18755_v6 = vld [vmem:[#allocation3 + $0x870] ss:$36 sps:$4 sm:$0xff]   ;;  %v2595_v40 = vld [vmem:[#allocation2 + $0x180] sm:$0xff]  ;;  %v2596_v41 = vld [vmem:[#allocation2 + $0x188] sm:$0xff]  ;;  %3299 = vst [vmem:[#allocation3 + $0x40c] sm:$0xf] %v17597_v47 }
 0x13b   :  { %v6444_v39 = vpop.f32.mrf.mxu1  ;;  %6358 = vmatprep.mubr.bf16.mxu0 %v18744_v25  ;;  %v2594_v23 = vld [vmem:[#allocation2 + $0x170] sm:$0xff]  ;;  %2913 = vst [vmem:[#allocation3 + $0x3c0] sm:$0xf] %v17531_v21  ;;  %v17533_v44 = vpack.c.bf16 %v2595_v40, %v2595_v40  ;;  %v17534_v45 = vpack.c.bf16 %v2596_v41, %v2596_v41  ;;  %v2212_v48 = vld [vmem:[#allocation2 + $0x182] sm:$0xff]  ;;  %3298 = vst [vmem:[#allocation3 + $0x3e8] sm:$0xf] %v17596_v37 }
 0x13c   :  { %v20264_v51 = vadd.f32 %v6444_v39, %v6156_v38  ;;  %v6160_v54 = vpop.f32.mrf.mxu0  ;;  %v17532_v28 = vpack.c.bf16 %v2594_v23, %v2594_v23  ;;  %v2210_v33 = vld [vmem:[#allocation2 + $0x16a] sm:$0xff]  ;;  %v2211_v34 = vld [vmem:[#allocation2 + $0x172] sm:$0xff]  ;;  %2147 = vst [vmem:[#allocation3 + $0x424] sm:$0xf] %v17596_v37  ;;  %2148 = vst [vmem:[#allocation3 + $0x448] sm:$0xf] %v17597_v47 }
 0x13d   :  { %v6446_v52 = vpop.f32.mrf.mxu1  ;;  %v6161_v31 = vadd.f32 %v20237_v59, %v6160_v54  ;;  %v17469_v38 = vpack.c.bf16 %v2210_v33, %v2210_v33  ;;  %v17470_v39 = vpack.c.bf16 %v2211_v34, %v2211_v34  ;;  %v2213_v49 = vld [vmem:[#allocation2 + $0x18a] sm:$0xff]  ;;  %2915 = vst [vmem:[#allocation3 + $0x408] sm:$0xf] %v17533_v44  ;;  %2916 = vst [vmem:[#allocation3 + $0x42c] sm:$0xf] %v17534_v45  ;;  %v2215_v21 = vld [vmem:[#allocation2 + $0x1d2] sm:$0xff] }
 0x13e   :  { %v6162_v55 = vpop.f32.mrf.mxu0  ;;  %2914 = vst [vmem:[#allocation3 + $0x3e4] sm:$0xf] %v17532_v28  ;;  %v19488_v52 = vld [vmem:[#allocation2] sm:$0xff]  ;;  %v2214_v13 = vld [vmem:[#allocation2 + $0x1ca] sm:$0xff]  ;;  %v18771_v19 = vld [vmem:[#allocation3 + $0x14] ss:$36 sps:$4 sm:$0xff]  }
 0x13f   :  { %v6449_v32 = vpop.f32.mrf.mxu1  ;;  %6640 = vmatmul.mubr.bf16.gmra.mxu1 %v18742_v24  ;;  %v2977_v24 = vld [vmem:[#allocation2 + $0x169] sm:$0xff]  ;;  %v20276_v54 = vpack.c.bf16 %v19488_v52, %v19488_v52  ;;  %2530 = vst [vmem:[#allocation3 + $0x404] sm:$0xf] %v17469_v38  ;;  %2531 = vst [vmem:[#allocation3 + $0x428] sm:$0xf] %v17470_v39  ;;  %v17473_v23 = vpack.c.bf16 %v2214_v13, %v2214_v13  ;;  %v2599_v28 = vld [vmem:[#allocation2 + $0x1e0] sm:$0xff] }
 0x140   :  { %6647 = vmatprep.mubr.bf16.mxu1 %v18748_v46  ;;  %v20267_v56 = vadd.f32 %v6449_v32, %v6161_v31  ;;  %v6163_v58 = vpop.f32.mrf.mxu0  ;;  %v17595_v30 = vpack.c.bf16 %v2977_v24, %v2977_v24  ;;  %v2980_v46 = vld [vmem:[#allocation2 + $0x189] sm:$0xff]  ;;  %v18767_v17 = vld [vmem:[#allocation3 + $0x8c0] ss:$36 sps:$4 sm:$0xff]   ;;  %v17537_v33 = vpack.c.bf16 %v2599_v28, %v2599_v28  ;;  %v18779_v28 = vld [vmem:[#allocation3 + $0x58] ss:$36 sps:$4 sm:$0xff]  }
 0x141   :  { %v6451_v57 = vpop.f32.mrf.mxu1  ;;  %v6164_v61 = vadd.f32 %v20237_v59, %v6163_v58  ;;  %v17598_v55 = vpack.c.bf16 %v2980_v46, %v2980_v46  ;;  %v17472_v58 = vpack.c.bf16 %v2213_v49, %v2213_v49  ;;  %2917 = vst [vmem:[#allocation3 + $0x450] sm:$0xf] %v20276_v54  ;;  %2918 = vst [vmem:[#allocation3 + $0x474] sm:$0xf] %v20276_v54  ;;  %v18776_v29 = vld [vmem:[#allocation3 + $0x1c] ss:$36 sps:$4 sm:$0xff]  }
 0x142   :  { %v6165_v2 = vpop.f32.mrf.mxu0  ;;  %6359 = vmatmul.mubr.bf16.gmra.mxu0 %v18747_v60  ;;  %3297 = vst [vmem:[#allocation3 + $0x3c4] sm:$0xf] %v17595_v30  ;;  %2146 = vst [vmem:[#allocation3 + $0x400] sm:$0xf] %v17595_v30  ;;  %v17471_v57 = vpack.c.bf16 %v2212_v48, %v2212_v48  ;;  %v2981_v60 = vld [vmem:[#allocation2 + $0x199] sm:$0xff]  ;;  %v17474_v30 = vpack.c.bf16 %v2215_v21, %v2215_v21  ;;  %v2600_v48 = vld [vmem:[#allocation2 + $0x1e8] sm:$0xff] }
 0x143   :  { %v6452_v62 = vpop.f32.mrf.mxu1  ;;  %6366 = vmatprep.mubr.bf16.mxu0 %v18752_v0  ;;  %3300 = vst [vmem:[#allocation3 + $0x430] sm:$0xf] %v17598_v55  ;;  %2149 = vst [vmem:[#allocation3 + $0x46c] sm:$0xf] %v17598_v55  ;;  %v18769_v42 = vld [vmem:[#allocation3 + $0x10] ss:$36 sps:$4 sm:$0xff]  }
 0x144   :  { %v20270_v5 = vadd.f32 %v6452_v62, %v6164_v61  ;;  %v6168_v8 = vpop.f32.mrf.mxu0  ;;  %v2982_v61 = vld [vmem:[#allocation2 + $0x1a1] sm:$0xff]  ;;  %2532 = vst [vmem:[#allocation3 + $0x44c] sm:$0xf] %v17471_v57  ;;  %2533 = vst [vmem:[#allocation3 + $0x470] sm:$0xf] %v17472_v58  ;;  %v2984_v52 = vld [vmem:[#allocation2 + $0x1e9] sm:$0xff]  ;;  %v17538_v57 = vpack.c.bf16 %v2600_v48, %v2600_v48 }
 0x145   :  { %v6454_v7 = vpop.f32.mrf.mxu1  ;;  %v6169_v9 = vadd.f32 %v20237_v59, %v6168_v8  ;;  %v17600_v0 = vpack.c.bf16 %v2982_v61, %v2982_v61  ;;  %v18764_v8 = vld [vmem:[#allocation3 + $0x8b8] ss:$36 sps:$4 sm:$0xff]   ;;  %2534 = vst [vmem:[#allocation3 + $0x494] sm:$0xf] %v17473_v23  ;;  %2535 = vst [vmem:[#allocation3 + $0x4b8] sm:$0xf] %v17474_v30 }
 0x146   :  { %v6170_v12 = vpop.f32.mrf.mxu0  ;;  %2919 = vst [vmem:[#allocation3 + $0x498] sm:$0xf] %v17537_v33  ;;  %v18777_v46 = vld [vmem:[#allocation3 + $0x5c] ss:$36 sps:$4 sm:$0xff]   ;;  %v18780_v47 = vld [vmem:[#allocation3 + $0x64] ss:$36 sps:$4 sm:$0xff]  }
 0x147   :  { %v6457_v11 = vpop.f32.mrf.mxu1  ;;  %6648 = vmatmul.mubr.bf16.gmra.mxu1 %v18750_v63  ;;  %v17599_v63 = vpack.c.bf16 %v2981_v60, %v2981_v60  ;;  %3302 = vst [vmem:[#allocation3 + $0x478] sm:$0xf] %v17600_v0  ;;  %v1830_v12 = vld [vmem:[#allocation2 + $0x1c9] sm:$0xff]  ;;  %10321 = vst [vmem:[#allocation3 + $0x450] sm:$0xf] %v20276_v54  ;;  %v2983_v49 = vld [vmem:[#allocation2 + $0x1e1] sm:$0xff]  ;;  %v17602_v60 = vpack.c.bf16 %v2984_v52, %v2984_v52 }
 0x148   :  { %6655 = vmatprep.mubr.bf16.mxu1 %v18756_v3  ;;  %v20273_v14 = vadd.f32 %v6457_v11, %v6169_v9  ;;  %v6171_v25 = vpop.f32.mrf.mxu0  ;;  %10322 = vst [vmem:[#allocation3 + $0x474] sm:$0xf] %v20276_v54  ;;  %v17601_v58 = vpack.c.bf16 %v2983_v49, %v2983_v49  ;;  %v2216_v61 = vld [vmem:[#allocation2 + $0x1e2] sm:$0xff]  ;;  %2920 = vst [vmem:[#allocation3 + $0x4bc] sm:$0xf] %v17538_v57  ;;  %v2218_v33 = vld [vmem:[#allocation2 + $0x1fa] sm:$0xff] }
 0x149   :  { %v6459_v4 = vpop.f32.mrf.mxu1  ;;  %v6172_v35 = vadd.f32 %v20237_v59, %v6171_v25  ;;  %3301 = vst [vmem:[#allocation3 + $0x454] sm:$0xf] %v17599_v63  ;;  %3304 = vst [vmem:[#allocation3 + $0x4c0] sm:$0xf] %v17602_v60  ;;  %v18783_v30 = vld [vmem:[#allocation3 + $0xa4] ss:$36 sps:$4 sm:$0xff]  }
 0x14a   :  { %v6173_v43 = vpop.f32.mrf.mxu0  ;;  %6367 = vmatmul.mubr.bf16.gmra.mxu0 %v18755_v6  ;;  %v1831_v6 = vld [vmem:[#allocation2 + $0x1d1] sm:$0xff]  ;;  %3303 = vst [vmem:[#allocation3 + $0x49c] sm:$0xf] %v17601_v58  ;;  %2152 = vst [vmem:[#allocation3 + $0x4d8] sm:$0xf] %v17601_v58  ;;  %v18848_v58 = vld [vmem:[%s21677_s1 + $0x220] sm:$0xff]  }
 0x14b   :  { %v6460_v36 = vpop.f32.mrf.mxu1  ;;  %6374 = vmatprep.mubr.bf16.mxu0 %v18761_v16  ;;  %v17410_v16 = vpack.c.bf16 %v1831_v6, %v1831_v6  ;;  %v18774_v43 = vld [vmem:[#allocation3 + $0x18] ss:$36 sps:$4 sm:$0xff]   ;;  %2153 = vst [vmem:[#allocation3 + $0x4fc] sm:$0xf] %v17602_v60  ;;  %v18786_v48 = vld [vmem:[#allocation3 + $0xac] ss:$36 sps:$4 sm:$0xff]  }
 0x14c   :  { %v20278_v31 = vadd.f32 %v6460_v36, %v6172_v35  ;;  %v6176_v62 = vpop.f32.mrf.mxu0 }
 0x14d   :  { %v6462_v32 = vpop.f32.mrf.mxu1  ;;  %v6177_v2 = vadd.f32 %v20237_v59, %v6176_v62  ;;  %2151 = vst [vmem:[#allocation3 + $0x4b4] sm:$0xf] %v17410_v16  ;;  %v2217_v62 = vld [vmem:[#allocation2 + $0x1ea] sm:$0xff]  ;;  %v19489_v16 = vld [vmem:[%s21677_s1 + $0x238] sm:$0xff]  }
 0x14e   :  { %v6178_v7 = vpop.f32.mrf.mxu0 }
 0x14f   :  { %v6465_v3 = vpop.f32.mrf.mxu1  ;;  %6656 = vmatmul.mubr.bf16.gmra.mxu1 %v18759_v15  ;;  %v17409_v15 = vpack.c.bf16 %v1830_v12, %v1830_v12  ;;  %v17476_v7 = vpack.c.bf16 %v2217_v62, %v2217_v62  ;;  %v2985_v12 = vld [vmem:[#allocation2 + $0x1f9] sm:$0xff] }
 0x150   :  { %6663 = vmatprep.mubr.bf16.mxu1 %v18765_v27  ;;  %v20283_v9 = vadd.f32 %v6465_v3, %v6177_v2  ;;  %v6179_v4 = vpop.f32.mrf.mxu0  ;;  %v20291_v44 = vld [vmem:[#allocation3 + $0x454] ss:$36 sps:$4 sm:$0xff]   ;;  %v17475_v3 = vpack.c.bf16 %v2216_v61, %v2216_v61 }
 0x151   :  { %v6467_v11 = vpop.f32.mrf.mxu1  ;;  %v6180_v24 = vadd.f32 %v20237_v59, %v6179_v4  ;;  %2150 = vst [vmem:[#allocation3 + $0x490] sm:$0xf] %v17409_v15  ;;  %10705 = vst [vmem:[#allocation3 + $0x454] sm:$0xf] %v17599_v63  ;;  %v17603_v4 = vpack.c.bf16 %v2985_v12, %v2985_v12 }
 0x152   :  { %v6181_v27 = vpop.f32.mrf.mxu0  ;;  %6375 = vmatmul.mubr.bf16.gmra.mxu0 %v18764_v8  ;;  %10706 = vst [vmem:[#allocation3 + $0x478] sm:$0xf] %v17600_v0  ;;  %v2601_v8 = vld [vmem:[#allocation2 + $0x1f8] sm:$0xff]  ;;  %v2602_v11 = vld [vmem:[#allocation2 + $0x200] sm:$0xff]  ;;  %v18798_v0 = vld [vmem:[%s21677_s1 + $0x230] sm:$0xff]  }
 0x153   :  { %v6468_v25 = vpop.f32.mrf.mxu1  ;;  %6704 = vmatprep.mubr.bf16.mxu0 %v18771_v19  ;;  %v17539_v6 = vpack.c.bf16 %v2601_v8, %v2601_v8  ;;  %v17540_v13 = vpack.c.bf16 %v2602_v11, %v2602_v11  ;;  %2536 = vst [vmem:[#allocation3 + $0x4dc] sm:$0xf] %v17475_v3  ;;  %2537 = vst [vmem:[#allocation3 + $0x500] sm:$0xf] %v17476_v7  ;;  %v2986_v19 = vld [vmem:[#allocation2 + $0x201] sm:$0xff]  ;;  %v18872_v8 = vld [vmem:[%s21677_s1 + $0x218] sm:$0xff]  }
 0x154   :  { %v20286_v34 = vadd.f32 %v6468_v25, %v6180_v24  ;;  %v6184_v36 = vpop.f32.mrf.mxu0  ;;  %v18823_v24 = vld [vmem:[%s21677_s1 + $0x228] sm:$0xff]   ;;  %v17604_v25 = vpack.c.bf16 %v2986_v19, %v2986_v19  ;;  %3305 = vst [vmem:[#allocation3 + $0x4e4] sm:$0xf] %v17603_v4  ;;  %2154 = vst [vmem:[#allocation3 + $0x520] sm:$0xf] %v17603_v4 }
 0x155   :  { %v6470_v35 = vpop.f32.mrf.mxu1  ;;  %v6185_v37 = vadd.f32 %v20237_v59, %v6184_v36  ;;  %2921 = vst [vmem:[#allocation3 + $0x4e0] sm:$0xf] %v17539_v6  ;;  %2922 = vst [vmem:[#allocation3 + $0x504] sm:$0xf] %v17540_v13  ;;  %v18785_v7 = vld [vmem:[#allocation3 + $0xa0] ss:$36 sps:$4 sm:$0xff]  }
 0x156   :  { %v6186_v39 = vpop.f32.mrf.mxu0  ;;  %3306 = vst [vmem:[#allocation3 + $0x508] sm:$0xf] %v17604_v25  ;;  %2155 = vst [vmem:[#allocation3 + $0x544] sm:$0xf] %v17604_v25  ;;  %v2219_v35 = vld [vmem:[#allocation2 + $0x202] sm:$0xff]  ;;  %v2220_v6 = vld [vmem:[#allocation2 + $0x212] sm:$0xff] }
 0x157   :  { %v6473_v38 = vpop.f32.mrf.mxu1  ;;  %6664 = vmatmul.mubr.bf16.gmra.mxu1 %v18767_v17  ;;  %v20313_v39 = vld [vmem:[%s21678_s2] ss:$0 sm:$0xff]  ;;  %v18792_v25 = vld [vmem:[#allocation3 + $0xf4] ss:$36 sps:$4 sm:$0xff]  }
 0x158   :  { %6993 = vmatprep.mubr.bf16.mxu1 %v18776_v29  ;;  %v20289_v40 = vadd.f32 %v6473_v38, %v6185_v37  ;;  %v6187_v45 = vpop.f32.mrf.mxu0  ;;  %v18782_v29 = vld [vmem:[#allocation3 + $0x60] ss:$36 sps:$4 sm:$0xff]   ;;  %v17477_v37 = vpack.c.bf16 %v2218_v33, %v2218_v33  ;;  %v17478_v38 = vpack.c.bf16 %v2219_v35, %v2219_v35  ;;  %v2989_v35 = vld [vmem:[#allocation2 + $0x229] sm:$0xff] }
 0x159   :  { %v6475_v41 = vpop.f32.mrf.mxu1  ;;  %v6188_v32 = vadd.f32 %v20237_v59, %v6187_v45  ;;  %v2604_v45 = vld [vmem:[#allocation2 + $0x218] sm:$0xff] }
 0x15a   :  { %v6189_v2 = vpop.f32.mrf.mxu0  ;;  %6705 = vmatmul.mubr.bf16.vlgmr.msra.gmra.mxu0 %v18769_v42  ;;  %2538 = vst [vmem:[#allocation3 + $0x524] sm:$0xf] %v17477_v37  ;;  %2539 = vst [vmem:[#allocation3 + $0x548] sm:$0xf] %v17478_v38  ;;  %v17542_v52 = vpack.c.bf16 %v2604_v45, %v2604_v45  ;;  %v2221_v13 = vld [vmem:[#allocation2 + $0x21a] sm:$0xff]  ;;  %v17607_v38 = vpack.c.bf16 %v2989_v35, %v2989_v35  ;;  %v2224_v35 = vld [vmem:[#allocation2 + $0x242] sm:$0xff] }
 0x15b   :  { %v6476_v55 = vpop.f32.mrf.mxu1  ;;  %18354 = vmatpush3.bf16.msra.mxu0 %v19489_v16  ;;  %6712 = vmatprep.mubr.bf16.mxu0 %v18777_v46  ;;  %v2987_v46 = vld [vmem:[#allocation2 + $0x211] sm:$0xff]  ;;  %v2988_v2 = vld [vmem:[#allocation2 + $0x219] sm:$0xff]  ;;  %v17480_v19 = vpack.c.bf16 %v2221_v13, %v2221_v13 }
 0x15c   :  { %v20296_v54 = vadd.f32 %v6476_v55, %v6188_v32  ;;  %v6192_v17 = vpop.f32.mrf.mxu0  ;;  %18355 = vmatprep.subr.bf16.mxu0 %v18798_v0  ;;  %v17605_v32 = vpack.c.bf16 %v2987_v46, %v2987_v46  ;;  %2924 = vst [vmem:[#allocation3 + $0x54c] sm:$0xf] %v17542_v52  ;;  %v17606_v11 = vpack.c.bf16 %v2988_v2, %v2988_v2  ;;  %3309 = vst [vmem:[#allocation3 + $0x574] sm:$0xf] %v17607_v38 }
 0x15d   :  { %v6478_v63 = vpop.f32.mrf.mxu1  ;;  %v6193_v15 = vadd.f32 %v20237_v59, %v6192_v17  ;;  %v17479_v17 = vpack.c.bf16 %v2220_v6, %v2220_v6  ;;  %2541 = vst [vmem:[#allocation3 + $0x590] sm:$0xf] %v17480_v19  ;;  %2158 = vst [vmem:[#allocation3 + $0x5b0] sm:$0xf] %v17607_v38  ;;  %v17483_v38 = vpack.c.bf16 %v2224_v35, %v2224_v35  ;;  %v2611_v35 = vld [vmem:[#allocation2 + $0x270] sm:$0xff] }
 0x15e   :  { %v6194_v21 = vpop.f32.mrf.mxu0  ;;  %3307 = vst [vmem:[#allocation3 + $0x52c] sm:$0xf] %v17605_v32  ;;  %2156 = vst [vmem:[#allocation3 + $0x568] sm:$0xf] %v17605_v32  ;;  %v2222_v32 = vld [vmem:[#allocation2 + $0x22a] sm:$0xff] }
 0x15f   :  { %v6481_v23 = vpop.f32.mrf.mxu1  ;;  %6994 = vmatmul.mubr.bf16.vlgmr.msra.gmra.mxu1 %v18774_v43  ;;  %18356 = vmatpush3.bf16.msra.mxu0 %v18798_v0  ;;  %v2603_v43 = vld [vmem:[#allocation2 + $0x210] sm:$0xff]  ;;  %v18788_v0 = vld [vmem:[#allocation3 + $0xa8] ss:$36 sps:$4 sm:$0xff]   ;;  %3308 = vst [vmem:[#allocation3 + $0x550] sm:$0xf] %v17606_v11 }
 0x160   :  { %7001 = vmatprep.mubr.bf16.mxu1 %v18780_v47  ;;  %v20308_v59 = vadd.f32 %v6481_v23, %v6193_v15  ;;  %v6195_v36 = vpop.f32.mrf.mxu0  ;;  %18357 = vmatprep.subr.bf16.mxu0 %v18823_v24  ;;  %v17541_v49 = vpack.c.bf16 %v2603_v43, %v2603_v43  ;;  %2157 = vst [vmem:[#allocation3 + $0x58c] sm:$0xf] %v17606_v11  ;;  %v18789_v23 = vld [vmem:[#allocation3 + $0xec] ss:$36 sps:$4 sm:$0xff]   ;;  %2540 = vst [vmem:[#allocation3 + $0x56c] sm:$0xf] %v17479_v17 }
 0x161   :  { %v6483_v27 = vpop.f32.mrf.mxu1  ;;  %v6196_v41 = vadd.f32 %v20313_v39, %v6195_v36  ;;  %v2605_v21 = vld [vmem:[#allocation2 + $0x228] sm:$0xff]  ;;  %v2990_v36 = vld [vmem:[#allocation2 + $0x231] sm:$0xff]  ;;  %2544 = vst [vmem:[#allocation3 + $0x5fc] sm:$0xf] %v17483_v38 }
 0x162   :  { %v6197_v47 = vpop.f32.mrf.mxu0  ;;  %6713 = vmatmul.mubr.bf16.gmra.mxu0 %v18779_v28  ;;  %2923 = vst [vmem:[#allocation3 + $0x528] sm:$0xf] %v17541_v49  ;;  %v2606_v28 = vld [vmem:[#allocation2 + $0x230] sm:$0xff]  ;;  %v2608_v11 = vld [vmem:[#allocation2 + $0x248] sm:$0xff] }
 0x163   :  { %v6484_v42 = vpop.f32.mrf.mxu1  ;;  %6720 = vmatprep.mubr.bf16.mxu0 %v18783_v30  ;;  %18358 = vmatpush3.bf16.msra.mxu0 %v18823_v24  ;;  %v17543_v30 = vpack.c.bf16 %v2605_v21, %v2605_v21  ;;  %v17544_v33 = vpack.c.bf16 %v2606_v28, %v2606_v28  ;;  %v18794_v49 = vld [vmem:[#allocation3 + $0xf0] ss:$36 sps:$4 sm:$0xff]   ;;  %v17546_v13 = vpack.c.bf16 %v2608_v11, %v2608_v11 }
 0x164   :  { %v20316_v55 = vadd.f32 %v6484_v42, %v6196_v41  ;;  %v6200_v60 = vpop.f32.mrf.mxu0  ;;  %18359 = vmatprep.subr.bf16.mxu0 %v18848_v58  ;;  %v17608_v41 = vpack.c.bf16 %v2990_v36, %v2990_v36  ;;  %v2992_v17 = vld [vmem:[#allocation2 + $0x249] sm:$0xff] }
 0x165   :  { %v6486_v57 = vpop.f32.mrf.mxu1  ;;  %v6201_v61 = vadd.f32 %v20313_v39, %v6200_v60  ;;  %2925 = vst [vmem:[#allocation3 + $0x570] sm:$0xf] %v17543_v30  ;;  %2926 = vst [vmem:[#allocation3 + $0x594] sm:$0xf] %v17544_v33  ;;  %v18797_v21 = vld [vmem:[#allocation3 + $0x130] ss:$36 sps:$4 sm:$0xff]  }
 0x166   :  { %v6202_v3 = vpop.f32.mrf.mxu0  ;;  %3310 = vst [vmem:[#allocation3 + $0x598] sm:$0xf] %v17608_v41  ;;  %2159 = vst [vmem:[#allocation3 + $0x5d4] sm:$0xf] %v17608_v41  ;;  %v2223_v57 = vld [vmem:[#allocation2 + $0x232] sm:$0xff]  ;;  %v2225_v36 = vld [vmem:[#allocation2 + $0x24a] sm:$0xff] }
 0x167   :  { %v6489_v62 = vpop.f32.mrf.mxu1  ;;  %7002 = vmatmul.mubr.bf16.gmra.mxu1 %v18782_v29  ;;  %18360 = vmatpush3.bf16.msra.mxu0 %v18848_v58  ;;  %v17482_v2 = vpack.c.bf16 %v2223_v57, %v2223_v57  ;;  %2928 = vst [vmem:[#allocation3 + $0x5dc] sm:$0xf] %v17546_v13  ;;  %v18801_v30 = vld [vmem:[#allocation3 + $0x138] ss:$36 sps:$4 sm:$0xff]   ;;  %v17484_v41 = vpack.c.bf16 %v2225_v36, %v2225_v36  ;;  %v18897_v11 = vld [vmem:[%s21677_s1 + $0x210] sm:$0xff]  }
 0x168   :  { %7009 = vmatprep.mubr.bf16.mxu1 %v18786_v48  ;;  %v20325_v12 = vadd.f32 %v6489_v62, %v6201_v61  ;;  %v6203_v4 = vpop.f32.mrf.mxu0  ;;  %18361 = vmatprep.subr.bf16.mxu0 %v18872_v8  ;;  %v18791_v48 = vld [vmem:[#allocation3 + $0xe8] ss:$36 sps:$4 sm:$0xff]   ;;  %v18795_v61 = vld [vmem:[#allocation3 + $0x134] ss:$36 sps:$4 sm:$0xff]   ;;  %v17481_v62 = vpack.c.bf16 %v2222_v32, %v2222_v32  ;;  %v18802_v33 = vld [vmem:[#allocation3 + $0x17c] ss:$36 sps:$4 sm:$0xff]  }
 0x169   :  { %v6491_v63 = vpop.f32.mrf.mxu1  ;;  %v6204_v15 = vadd.f32 %v20313_v39, %v6203_v4  ;;  %2543 = vst [vmem:[#allocation3 + $0x5d8] sm:$0xf] %v17482_v2  ;;  %v2991_v4 = vld [vmem:[#allocation2 + $0x241] sm:$0xff]  ;;  %2545 = vst [vmem:[#allocation3 + $0x620] sm:$0xf] %v17484_v41  ;;  %v2612_v36 = vld [vmem:[#allocation2 + $0x278] sm:$0xff]  ;;  %v17549_v41 = vpack.c.bf16 %v2611_v35, %v2611_v35 }
 0x16a   :  { %v6205_v24 = vpop.f32.mrf.mxu0  ;;  %6721 = vmatmul.mubr.bf16.gmra.mxu0 %v18785_v7  ;;  %v18799_v7 = vld [vmem:[#allocation3 + $0x13c] ss:$36 sps:$4 sm:$0xff]   ;;  %2542 = vst [vmem:[#allocation3 + $0x5b4] sm:$0xf] %v17481_v62 }
 0x16b   :  { %v6492_v16 = vpop.f32.mrf.mxu1  ;;  %6728 = vmatprep.mubr.bf16.mxu0 %v18789_v23  ;;  %18362 = vmatpush3.bf16.msra.mxu0 %v18872_v8  ;;  %v2607_v8 = vld [vmem:[#allocation2 + $0x240] sm:$0xff]  ;;  %2931 = vst [vmem:[#allocation3 + $0x648] sm:$0xf] %v17549_v41 }
 0x16c   :  { %v20328_v27 = vadd.f32 %v6492_v16, %v6204_v15  ;;  %v6208_v37 = vpop.f32.mrf.mxu0  ;;  %v17545_v6 = vpack.c.bf16 %v2607_v8, %v2607_v8  ;;  %v17609_v15 = vpack.c.bf16 %v2991_v4, %v2991_v4  ;;  %v17610_v16 = vpack.c.bf16 %v2992_v17, %v2992_v17  ;;  %v2994_v62 = vld [vmem:[#allocation2 + $0x261] sm:$0xff]  ;;  %18363 = vmatprep.subr.bf16.mxu0 %v18897_v11 }
 0x16d   :  { %v6494_v29 = vpop.f32.mrf.mxu1  ;;  %v6209_v42 = vadd.f32 %v20313_v39, %v6208_v37  ;;  %v18807_v17 = vld [vmem:[#allocation3 + $0x180] ss:$36 sps:$4 sm:$0xff]  }
 0x16e   :  { %v6210_v45 = vpop.f32.mrf.mxu0  ;;  %2927 = vst [vmem:[#allocation3 + $0x5b8] sm:$0xf] %v17545_v6  ;;  %3311 = vst [vmem:[#allocation3 + $0x5bc] sm:$0xf] %v17609_v15  ;;  %v18804_v6 = vld [vmem:[#allocation3 + $0x178] ss:$36 sps:$4 sm:$0xff]  }
 0x16f   :  { %v6497_v43 = vpop.f32.mrf.mxu1  ;;  %7010 = vmatmul.mubr.bf16.gmra.mxu1 %v18788_v0  ;;  %3312 = vst [vmem:[#allocation3 + $0x5e0] sm:$0xf] %v17610_v16  ;;  %2160 = vst [vmem:[#allocation3 + $0x5f8] sm:$0xf] %v17609_v15  ;;  %v2609_v45 = vld [vmem:[#allocation2 + $0x258] sm:$0xff]  ;;  %v2227_v15 = vld [vmem:[#allocation2 + $0x262] sm:$0xff]  ;;  %18364 = vmatpush3.bf16.msra.mxu0 %v18897_v11 }
 0x170   :  { %7017 = vmatprep.mubr.bf16.mxu1 %v18792_v25  ;;  %v20331_v46 = vadd.f32 %v6497_v43, %v6209_v42  ;;  %v6211_v52 = vpop.f32.mrf.mxu0  ;;  %2161 = vst [vmem:[#allocation3 + $0x61c] sm:$0xf] %v17610_v16  ;;  %v17547_v32 = vpack.c.bf16 %v2609_v45, %v2609_v45  ;;  %v2996_v45 = vld [vmem:[#allocation2 + $0x279] sm:$0xff] }
 0x171   :  { %v6499_v47 = vpop.f32.mrf.mxu1  ;;  %v6212_v58 = vadd.f32 %v20313_v39, %v6211_v52  ;;  %v18805_v52 = vld [vmem:[#allocation3 + $0x184] ss:$36 sps:$4 sm:$0xff]  }
 0x172   :  { %v6213_v3 = vpop.f32.mrf.mxu0  ;;  %6729 = vmatmul.mubr.bf16.gmra.mxu0 %v18791_v48  ;;  %v2610_v47 = vld [vmem:[#allocation2 + $0x260] sm:$0xff]  ;;  %2929 = vst [vmem:[#allocation3 + $0x600] sm:$0xf] %v17547_v32 }
 0x173   :  { %v6500_v60 = vpop.f32.mrf.mxu1  ;;  %6736 = vmatprep.mubr.bf16.mxu0 %v18795_v61  ;;  %v2993_v48 = vld [vmem:[#allocation2 + $0x259] sm:$0xff]  ;;  %v17548_v57 = vpack.c.bf16 %v2610_v47, %v2610_v47  ;;  %v17612_v3 = vpack.c.bf16 %v2994_v62, %v2994_v62 }
 0x174   :  { %v20334_v63 = vadd.f32 %v6500_v60, %v6212_v58  ;;  %v6216_v19 = vpop.f32.mrf.mxu0  ;;  %v17611_v58 = vpack.c.bf16 %v2993_v48, %v2993_v48 }
 0x175   :  { %v6502_v0 = vpop.f32.mrf.mxu1  ;;  %v6217_v23 = vadd.f32 %v20313_v39, %v6216_v19  ;;  %2930 = vst [vmem:[#allocation3 + $0x624] sm:$0xf] %v17548_v57  ;;  %3314 = vst [vmem:[#allocation3 + $0x628] sm:$0xf] %v17612_v3  ;;  %v2226_v19 = vld [vmem:[#allocation2 + $0x25a] sm:$0xff] }
 0x176   :  { %v6218_v25 = vpop.f32.mrf.mxu0  ;;  %3313 = vst [vmem:[#allocation3 + $0x604] sm:$0xf] %v17611_v58  ;;  %2162 = vst [vmem:[#allocation3 + $0x640] sm:$0xf] %v17611_v58  ;;  %v18810_v58 = vld [vmem:[#allocation3 + $0x1c0] ss:$36 sps:$4 sm:$0xff]  }
 0x177   :  { %v6505_v24 = vpop.f32.mrf.mxu1  ;;  %7018 = vmatmul.mubr.bf16.gmra.mxu1 %v18794_v49  ;;  %2163 = vst [vmem:[#allocation3 + $0x664] sm:$0xf] %v17612_v3  ;;  %v2228_v3 = vld [vmem:[#allocation2 + $0x272] sm:$0xff] }
 0x178   :  { %7025 = vmatprep.mubr.bf16.mxu1 %v18799_v7  ;;  %v20337_v28 = vadd.f32 %v6505_v24, %v6217_v23  ;;  %v6219_v37 = vpop.f32.mrf.mxu0  ;;  %v17485_v23 = vpack.c.bf16 %v2226_v19, %v2226_v19  ;;  %v17486_v24 = vpack.c.bf16 %v2227_v15, %v2227_v15  ;;  %v17487_v11 = vpack.c.bf16 %v2228_v3, %v2228_v3  ;;  %v18817_v15 = vld [vmem:[#allocation3 + $0x214] ss:$36 sps:$4 sm:$0xff]  }
 0x179   :  { %v6507_v29 = vpop.f32.mrf.mxu1  ;;  %v6220_v42 = vadd.f32 %v20313_v39, %v6219_v37 }
 0x17a   :  { %v6221_v49 = vpop.f32.mrf.mxu0  ;;  %6737 = vmatmul.mubr.bf16.gmra.mxu0 %v18797_v21  ;;  %v18808_v29 = vld [vmem:[#allocation3 + $0x1c4] ss:$36 sps:$4 sm:$0xff]   ;;  %2546 = vst [vmem:[#allocation3 + $0x644] sm:$0xf] %v17485_v23  ;;  %2547 = vst [vmem:[#allocation3 + $0x668] sm:$0xf] %v17486_v24 }
 0x17b   :  { %v6508_v43 = vpop.f32.mrf.mxu1  ;;  %6744 = vmatprep.mubr.bf16.mxu0 %v18802_v33  ;;  %v18811_v33 = vld [vmem:[#allocation3 + $0x1cc] ss:$36 sps:$4 sm:$0xff]   ;;  %v17614_v49 = vpack.c.bf16 %v2996_v45, %v2996_v45  ;;  %2548 = vst [vmem:[#allocation3 + $0x68c] sm:$0xf] %v17487_v11  ;;  %v18824_v11 = vld [vmem:[#allocation3 + $0x25c] ss:$36 sps:$4 sm:$0xff]  }
 0x17c   :  { %v20340_v60 = vadd.f32 %v6508_v43, %v6220_v42  ;;  %v6224_v2 = vpop.f32.mrf.mxu0  ;;  %v17550_v42 = vpack.c.bf16 %v2612_v36, %v2612_v36  ;;  %v2995_v43 = vld [vmem:[#allocation2 + $0x271] sm:$0xff]  ;;  %v18816_v45 = vld [vmem:[#allocation3 + $0x208] ss:$36 sps:$4 sm:$0xff]  }
 0x17d   :  { %v6510_v61 = vpop.f32.mrf.mxu1  ;;  %v6225_v7 = vadd.f32 %v20313_v39, %v6224_v2  ;;  %v17613_v48 = vpack.c.bf16 %v2995_v43, %v2995_v43  ;;  %3316 = vst [vmem:[#allocation3 + $0x670] sm:$0xf] %v17614_v49  ;;  %2165 = vst [vmem:[#allocation3 + $0x6ac] sm:$0xf] %v17614_v49  ;;  %v18813_v2 = vld [vmem:[#allocation3 + $0x1c8] ss:$36 sps:$4 sm:$0xff]  }
 0x17e   :  { %v6226_v0 = vpop.f32.mrf.mxu0  ;;  %2932 = vst [vmem:[#allocation3 + $0x66c] sm:$0xf] %v17550_v42  ;;  %v2614_v23 = vld [vmem:[#allocation2 + $0x290] sm:$0xff] }
 0x17f   :  { %v6513_v8 = vpop.f32.mrf.mxu1  ;;  %7026 = vmatmul.mubr.bf16.gmra.mxu1 %v18801_v30  ;;  %3315 = vst [vmem:[#allocation3 + $0x64c] sm:$0xf] %v17613_v48  ;;  %2164 = vst [vmem:[#allocation3 + $0x688] sm:$0xf] %v17613_v48  ;;  %v18819_v49 = vld [vmem:[#allocation3 + $0x210] ss:$36 sps:$4 sm:$0xff]  }
 0x180   :  { %7033 = vmatprep.mubr.bf16.mxu1 %v18805_v52  ;;  %v20346_v13 = vadd.f32 %v6513_v8, %v6225_v7  ;;  %v6227_v16 = vpop.f32.mrf.mxu0  ;;  %v2229_v7 = vld [vmem:[#allocation2 + $0x27a] sm:$0xff] }
 0x181   :  { %v6515_v4 = vpop.f32.mrf.mxu1  ;;  %v6228_v25 = vadd.f32 %v20313_v39, %v6227_v16  ;;  %v17488_v0 = vpack.c.bf16 %v2229_v7, %v2229_v7  ;;  %v2613_v16 = vld [vmem:[#allocation2 + $0x288] sm:$0xff]  ;;  %v18820_v7 = vld [vmem:[#allocation3 + $0x254] ss:$36 sps:$4 sm:$0xff]  }
 0x182   :  { %v6229_v30 = vpop.f32.mrf.mxu0  ;;  %6745 = vmatmul.mubr.bf16.gmra.mxu0 %v18804_v6 }
 0x183   :  { %v6516_v21 = vpop.f32.mrf.mxu1  ;;  %6752 = vmatprep.mubr.bf16.mxu0 %v18808_v29  ;;  %2549 = vst [vmem:[#allocation3 + $0x6b0] sm:$0xf] %v17488_v0  ;;  %v17552_v29 = vpack.c.bf16 %v2614_v23, %v2614_v23  ;;  %v2997_v30 = vld [vmem:[#allocation2 + $0x289] sm:$0xff]  ;;  %v2615_v0 = vld [vmem:[#allocation2 + $0x2a0] sm:$0xff] }
 0x184   :  { %v20349_v37 = vadd.f32 %v6516_v21, %v6228_v25  ;;  %v6232_v47 = vpop.f32.mrf.mxu0  ;;  %v17551_v21 = vpack.c.bf16 %v2613_v16, %v2613_v16  ;;  %v17615_v36 = vpack.c.bf16 %v2997_v30, %v2997_v30  ;;  %v2999_v16 = vld [vmem:[#allocation2 + $0x2a1] sm:$0xff]  ;;  %v3000_v23 = vld [vmem:[#allocation2 + $0x2a9] sm:$0xff] }
 0x185   :  { %v6518_v38 = vpop.f32.mrf.mxu1  ;;  %v6233_v52 = vadd.f32 %v20313_v39, %v6232_v47  ;;  %2934 = vst [vmem:[#allocation3 + $0x6b4] sm:$0xf] %v17552_v29  ;;  %v17618_v29 = vpack.c.bf16 %v3000_v23, %v3000_v23 }
 0x186   :  { %v6234_v57 = vpop.f32.mrf.mxu0  ;;  %2933 = vst [vmem:[#allocation3 + $0x690] sm:$0xf] %v17551_v21  ;;  %3317 = vst [vmem:[#allocation3 + $0x694] sm:$0xf] %v17615_v36  ;;  %v17617_v21 = vpack.c.bf16 %v2999_v16, %v2999_v16 }
 0x187   :  { %v6521_v32 = vpop.f32.mrf.mxu1  ;;  %7034 = vmatmul.mubr.bf16.gmra.mxu1 %v18807_v17  ;;  %v18814_v17 = vld [vmem:[#allocation3 + $0x20c] ss:$36 sps:$4 sm:$0xff]   ;;  %2166 = vst [vmem:[#allocation3 + $0x6d0] sm:$0xf] %v17615_v36  ;;  %3320 = vst [vmem:[#allocation3 + $0x700] sm:$0xf] %v17618_v29 }
 0x188   :  { %7041 = vmatprep.mubr.bf16.mxu1 %v18811_v33  ;;  %v20352_v61 = vadd.f32 %v6521_v32, %v6233_v52  ;;  %v6235_v8 = vpop.f32.mrf.mxu0  ;;  %v2998_v33 = vld [vmem:[#allocation2 + $0x291] sm:$0xff]  ;;  %3319 = vst [vmem:[#allocation3 + $0x6dc] sm:$0xf] %v17617_v21  ;;  %2168 = vst [vmem:[#allocation3 + $0x718] sm:$0xf] %v17617_v21 }
 0x189   :  { %v6523_v62 = vpop.f32.mrf.mxu1  ;;  %v6236_v6 = vadd.f32 %v20313_v39, %v6235_v8  ;;  %v17616_v38 = vpack.c.bf16 %v2998_v33, %v2998_v33  ;;  %v2230_v52 = vld [vmem:[#allocation2 + $0x28a] sm:$0xff]  ;;  %v2231_v32 = vld [vmem:[#allocation2 + $0x292] sm:$0xff]  ;;  %2169 = vst [vmem:[#allocation3 + $0x73c] sm:$0xf] %v17618_v29 }
 0x18a   :  { %v6237_v19 = vpop.f32.mrf.mxu0  ;;  %6753 = vmatmul.mubr.bf16.gmra.mxu0 %v18810_v58  ;;  %v17489_v58 = vpack.c.bf16 %v2230_v52, %v2230_v52  ;;  %v17490_v62 = vpack.c.bf16 %v2231_v32, %v2231_v32  ;;  %v18822_v36 = vld [vmem:[#allocation3 + $0x250] ss:$36 sps:$4 sm:$0xff]   ;;  %v18922_v29 = vld [vmem:[%s21677_s1 + $0x208] sm:$0xff]  }
 0x18b   :  { %v6524_v4 = vpop.f32.mrf.mxu1  ;;  %6760 = vmatprep.mubr.bf16.mxu0 %v18814_v17  ;;  %3318 = vst [vmem:[#allocation3 + $0x6b8] sm:$0xf] %v17616_v38  ;;  %2167 = vst [vmem:[#allocation3 + $0x6f4] sm:$0xf] %v17616_v38  ;;  %v17553_v19 = vpack.c.bf16 %v2615_v0, %v2615_v0  ;;  %18365 = vmatprep.subr.bf16.mxu0 %v18922_v29 }
 0x18c   :  { %v20355_v24 = vadd.f32 %v6524_v4, %v6236_v6  ;;  %v6240_v35 = vpop.f32.mrf.mxu0  ;;  %2550 = vst [vmem:[#allocation3 + $0x6d4] sm:$0xf] %v17489_v58  ;;  %2551 = vst [vmem:[#allocation3 + $0x6f8] sm:$0xf] %v17490_v62  ;;  %v2616_v6 = vld [vmem:[#allocation2 + $0x2a8] sm:$0xff]  ;;  %18366 = vmatpush3.bf16.msra.mxu0 %v18922_v29 }
 0x18d   :  { %v6526_v25 = vpop.f32.mrf.mxu1  ;;  %v6241_v41 = vadd.f32 %v20313_v39, %v6240_v35  ;;  %2935 = vst [vmem:[#allocation3 + $0x6d8] sm:$0xf] %v17553_v19  ;;  %v18827_v58 = vld [vmem:[#allocation3 + $0x29c] ss:$36 sps:$4 sm:$0xff]  }
 0x18e   :  { %v6242_v43 = vpop.f32.mrf.mxu0  ;;  %v3002_v19 = vld [vmem:[#allocation2 + $0x2c1] sm:$0xff] }
 0x18f   :  { %v6529_v42 = vpop.f32.mrf.mxu1  ;;  %7042 = vmatmul.mubr.bf16.gmra.mxu1 %v18813_v2  ;;  %v2232_v43 = vld [vmem:[#allocation2 + $0x2a2] sm:$0xff]  ;;  %v17620_v23 = vpack.c.bf16 %v3002_v19, %v3002_v19  ;;  %v3004_v19 = vld [vmem:[#allocation2 + $0x2d9] sm:$0xff] }
 0x190   :  { %7049 = vmatprep.mubr.bf16.mxu1 %v18817_v15  ;;  %v20358_v47 = vadd.f32 %v6529_v42, %v6241_v41  ;;  %v6243_v57 = vpop.f32.mrf.mxu0  ;;  %v17554_v15 = vpack.c.bf16 %v2616_v6, %v2616_v6  ;;  %v18826_v42 = vld [vmem:[#allocation3 + $0x258] ss:$36 sps:$4 sm:$0xff]   ;;  %v17491_v52 = vpack.c.bf16 %v2232_v43, %v2232_v43  ;;  %v2235_v43 = vld [vmem:[#allocation2 + $0x2c2] sm:$0xff] }
 0x191   :  { %v6531_v48 = vpop.f32.mrf.mxu1  ;;  %v6244_v2 = vadd.f32 %v20313_v39, %v6243_v57  ;;  %3322 = vst [vmem:[#allocation3 + $0x748] sm:$0xf] %v17620_v23  ;;  %2171 = vst [vmem:[#allocation3 + $0x784] sm:$0xf] %v17620_v23  ;;  %v17622_v23 = vpack.c.bf16 %v3004_v19, %v3004_v19  ;;  %v3005_v19 = vld [vmem:[#allocation2 + $0x2e9] sm:$0xff] }
 0x192   :  { %v6245_v8 = vpop.f32.mrf.mxu0  ;;  %6761 = vmatmul.mubr.bf16.gmra.mxu0 %v18816_v45  ;;  %2936 = vst [vmem:[#allocation3 + $0x6fc] sm:$0xf] %v17554_v15  ;;  %v2233_v45 = vld [vmem:[#allocation2 + $0x2aa] sm:$0xff]  ;;  %2552 = vst [vmem:[#allocation3 + $0x71c] sm:$0xf] %v17491_v52  ;;  %v17494_v52 = vpack.c.bf16 %v2235_v43, %v2235_v43  ;;  %v2236_v43 = vld [vmem:[#allocation2 + $0x2d2] sm:$0xff] }
 0x193   :  { %v6532_v3 = vpop.f32.mrf.mxu1  ;;  %6768 = vmatprep.mubr.bf16.mxu0 %v18820_v7  ;;  %v17492_v32 = vpack.c.bf16 %v2233_v45, %v2233_v45  ;;  %v2618_v7 = vld [vmem:[#allocation2 + $0x2c0] sm:$0xff]  ;;  %3324 = vst [vmem:[#allocation3 + $0x790] sm:$0xf] %v17622_v23  ;;  %2173 = vst [vmem:[#allocation3 + $0x7cc] sm:$0xf] %v17622_v23  ;;  %v17623_v23 = vpack.c.bf16 %v3005_v19, %v3005_v19 }
 0x194   :  { %v20361_v4 = vadd.f32 %v6532_v3, %v6244_v2  ;;  %v6248_v25 = vpop.f32.mrf.mxu0  ;;  %v18830_v2 = vld [vmem:[#allocation3 + $0x2a4] ss:$36 sps:$4 sm:$0xff]   ;;  %v2617_v3 = vld [vmem:[#allocation2 + $0x2b8] sm:$0xff]  ;;  %v17556_v6 = vpack.c.bf16 %v2618_v7, %v2618_v7  ;;  %2555 = vst [vmem:[#allocation3 + $0x788] sm:$0xf] %v17494_v52  ;;  %v17495_v52 = vpack.c.bf16 %v2236_v43, %v2236_v43 }
 0x195   :  { %v6534_v17 = vpop.f32.mrf.mxu1  ;;  %v6249_v30 = vadd.f32 %v20313_v39, %v6248_v25  ;;  %2553 = vst [vmem:[#allocation3 + $0x740] sm:$0xf] %v17492_v32  ;;  %v17555_v0 = vpack.c.bf16 %v2617_v3, %v2617_v3  ;;  %v2620_v3 = vld [vmem:[#allocation2 + $0x2d8] sm:$0xff]  ;;  %v18841_v43 = vld [vmem:[#allocation3 + $0x328] ss:$36 sps:$4 sm:$0xff]  }
 0x196   :  { %v6250_v35 = vpop.f32.mrf.mxu0  ;;  %v3001_v17 = vld [vmem:[#allocation2 + $0x2b9] sm:$0xff]  ;;  %2938 = vst [vmem:[#allocation3 + $0x744] sm:$0xf] %v17556_v6  ;;  %v17558_v6 = vpack.c.bf16 %v2620_v3, %v2620_v3  ;;  %2556 = vst [vmem:[#allocation3 + $0x7ac] sm:$0xf] %v17495_v52  ;;  %v2622_v3 = vld [vmem:[#allocation2 + $0x2f0] sm:$0xff] }
 0x197   :  { %v6537_v33 = vpop.f32.mrf.mxu1  ;;  %7050 = vmatmul.mubr.bf16.gmra.mxu1 %v18819_v49  ;;  %v17619_v16 = vpack.c.bf16 %v3001_v17, %v3001_v17  ;;  %2937 = vst [vmem:[#allocation3 + $0x720] sm:$0xf] %v17555_v0  ;;  %v3003_v17 = vld [vmem:[#allocation2 + $0x2d1] sm:$0xff]  ;;  %3325 = vst [vmem:[#allocation3 + $0x7b4] sm:$0xf] %v17623_v23 }
 0x198   :  { %7057 = vmatprep.mubr.bf16.mxu1 %v18824_v11  ;;  %v20364_v38 = vadd.f32 %v6537_v33, %v6249_v30  ;;  %v6251_v48 = vpop.f32.mrf.mxu0  ;;  %v18829_v33 = vld [vmem:[#allocation3 + $0x298] ss:$36 sps:$4 sm:$0xff]   ;;  %2940 = vst [vmem:[#allocation3 + $0x78c] sm:$0xf] %v17558_v6  ;;  %2174 = vst [vmem:[#allocation3 + $0x7f0] sm:$0xf] %v17623_v23 }
 0x199   :  { %v6539_v41 = vpop.f32.mrf.mxu1  ;;  %v6252_v49 = vadd.f32 %v20313_v39, %v6251_v48  ;;  %3321 = vst [vmem:[#allocation3 + $0x724] sm:$0xf] %v17619_v16  ;;  %2170 = vst [vmem:[#allocation3 + $0x760] sm:$0xf] %v17619_v16  ;;  %v17621_v16 = vpack.c.bf16 %v3003_v17, %v3003_v17  ;;  %v17560_v17 = vpack.c.bf16 %v2622_v3, %v2622_v3  ;;  %v2238_v52 = vld [vmem:[#allocation2 + $0x2ea] sm:$0xff]  ;;  %v3007_v23 = vld [vmem:[#allocation2 + $0x301] sm:$0xff] }
 0x19a   :  { %v6253_v62 = vpop.f32.mrf.mxu0  ;;  %6769 = vmatmul.mubr.bf16.gmra.mxu0 %v18822_v36  ;;  %v18832_v41 = vld [vmem:[#allocation3 + $0x2a0] ss:$36 sps:$4 sm:$0xff]  }
 0x19b   :  { %v6540_v57 = vpop.f32.mrf.mxu1  ;;  %6776 = vmatprep.mubr.bf16.mxu0 %v18827_v58  ;;  %v18836_v62 = vld [vmem:[#allocation3 + $0x2ec] ss:$36 sps:$4 sm:$0xff]   ;;  %3323 = vst [vmem:[#allocation3 + $0x76c] sm:$0xf] %v17621_v16  ;;  %2172 = vst [vmem:[#allocation3 + $0x7a8] sm:$0xf] %v17621_v16 }
 0x19c   :  { %v20367_v8 = vadd.f32 %v6540_v57, %v6252_v49  ;;  %v6256_v15 = vpop.f32.mrf.mxu0  ;;  %v18833_v57 = vld [vmem:[#allocation3 + $0x2e4] ss:$36 sps:$4 sm:$0xff]   ;;  %2942 = vst [vmem:[#allocation3 + $0x7d4] sm:$0xf] %v17560_v17 }
 0x19d   :  { %v6542_v11 = vpop.f32.mrf.mxu1  ;;  %v6257_v25 = vadd.f32 %v20313_v39, %v6256_v15 }
 0x19e   :  { %v6258_v30 = vpop.f32.mrf.mxu0 }
 0x19f   :  { %v6545_v21 = vpop.f32.mrf.mxu1  ;;  %7058 = vmatmul.mubr.bf16.gmra.mxu1 %v18826_v42  ;;  %v2234_v42 = vld [vmem:[#allocation2 + $0x2ba] sm:$0xff] }
 0x1a0   :  { %7065 = vmatprep.mubr.bf16.mxu1 %v18830_v2  ;;  %v20373_v35 = vadd.f32 %v6545_v21, %v6257_v25  ;;  %v6259_v45 = vpop.f32.mrf.mxu0  ;;  %v17493_v48 = vpack.c.bf16 %v2234_v42, %v2234_v42  ;;  %v2619_v2 = vld [vmem:[#allocation2 + $0x2d0] sm:$0xff]  ;;  %v18835_v30 = vld [vmem:[#allocation3 + $0x2e0] ss:$36 sps:$4 sm:$0xff]  }
 0x1a1   :  { %v6547_v36 = vpop.f32.mrf.mxu1  ;;  %v6260_v32 = vadd.f32 %v20313_v39, %v6259_v45  ;;  %v17557_v0 = vpack.c.bf16 %v2619_v2, %v2619_v2  ;;  %v2237_v45 = vld [vmem:[#allocation2 + $0x2da] sm:$0xff] }
 0x1a2   :  { %v6261_v58 = vpop.f32.mrf.mxu0  ;;  %2554 = vst [vmem:[#allocation3 + $0x764] sm:$0xf] %v17493_v48  ;;  %6777 = vmatmul.mubr.bf16.gmra.mxu0 %v18829_v33  ;;  %v18838_v33 = vld [vmem:[#allocation3 + $0x2e8] ss:$36 sps:$4 sm:$0xff]   ;;  %v18842_v2 = vld [vmem:[#allocation3 + $0x334] ss:$36 sps:$4 sm:$0xff]  }
 0x1a3   :  { %v6548_v49 = vpop.f32.mrf.mxu1  ;;  %6784 = vmatprep.mubr.bf16.mxu0 %v18833_v57  ;;  %2939 = vst [vmem:[#allocation3 + $0x768] sm:$0xf] %v17557_v0  ;;  %v18839_v57 = vld [vmem:[#allocation3 + $0x32c] ss:$36 sps:$4 sm:$0xff]  }
 0x1a4   :  { %v20376_v7 = vadd.f32 %v6548_v49, %v6260_v32  ;;  %v6264_v15 = vpop.f32.mrf.mxu0  ;;  %v17496_v32 = vpack.c.bf16 %v2237_v45, %v2237_v45 }
 0x1a5   :  { %v6550_v11 = vpop.f32.mrf.mxu1  ;;  %v6265_v25 = vadd.f32 %v20313_v39, %v6264_v15  ;;  %v3006_v15 = vld [vmem:[#allocation2 + $0x2f1] sm:$0xff] }
 0x1a6   :  { %v6266_v29 = vpop.f32.mrf.mxu0  ;;  %2557 = vst [vmem:[#allocation3 + $0x7d0] sm:$0xf] %v17496_v32  ;;  %v2239_v32 = vld [vmem:[#allocation2 + $0x2f2] sm:$0xff] }
 0x1a7   :  { %v6553_v21 = vpop.f32.mrf.mxu1  ;;  %7066 = vmatmul.mubr.bf16.gmra.mxu1 %v18832_v41 }
 0x1a8   :  { %7073 = vmatprep.mubr.bf16.mxu1 %v18836_v62  ;;  %v20379_v36 = vadd.f32 %v6553_v21, %v6265_v25  ;;  %v6267_v48 = vpop.f32.mrf.mxu0  ;;  %v2621_v62 = vld [vmem:[#allocation2 + $0x2e8] sm:$0xff]  ;;  %v17624_v25 = vpack.c.bf16 %v3006_v15, %v3006_v15 }
 0x1a9   :  { %v6555_v42 = vpop.f32.mrf.mxu1  ;;  %v6268_v41 = vadd.f32 %v20313_v39, %v6267_v48  ;;  %v17559_v6 = vpack.c.bf16 %v2621_v62, %v2621_v62  ;;  %v20387_v39 = vld [vmem:[%s21678_s2] ss:$0 sm:$0xff]  ;;  %v18844_v48 = vld [vmem:[#allocation3 + $0x330] ss:$36 sps:$4 sm:$0xff]  }
 0x1aa   :  { %v6269_v58 = vpop.f32.mrf.mxu0  ;;  %6785 = vmatmul.mubr.bf16.gmra.mxu0 %v18835_v30  ;;  %3326 = vst [vmem:[#allocation3 + $0x7d8] sm:$0xf] %v17624_v25  ;;  %2175 = vst [vmem:[#allocation3 + $0x814] sm:$0xf] %v17624_v25  ;;  %v18845_v62 = vld [vmem:[#allocation3 + $0x374] ss:$36 sps:$4 sm:$0xff]  }
 0x1ab   :  { %v6556_v49 = vpop.f32.mrf.mxu1  ;;  %6792 = vmatprep.mubr.bf16.mxu0 %v18839_v57  ;;  %2941 = vst [vmem:[#allocation3 + $0x7b0] sm:$0xf] %v17559_v6  ;;  %v17498_v58 = vpack.c.bf16 %v2239_v32, %v2239_v32  ;;  %v2624_v6 = vld [vmem:[#allocation2 + $0x308] sm:$0xff] }
 0x1ac   :  { %v20382_v11 = vadd.f32 %v6556_v49, %v6268_v41  ;;  %v6272_v16 = vpop.f32.mrf.mxu0  ;;  %v17497_v49 = vpack.c.bf16 %v2238_v52, %v2238_v52  ;;  %v3008_v25 = vld [vmem:[#allocation2 + $0x309] sm:$0xff] }
 0x1ad   :  { %v6558_v0 = vpop.f32.mrf.mxu1  ;;  %v6273_v21 = vadd.f32 %v20387_v39, %v6272_v16  ;;  %2559 = vst [vmem:[#allocation3 + $0x818] sm:$0xf] %v17498_v58  ;;  %v17562_v16 = vpack.c.bf16 %v2624_v6, %v2624_v6 }
 0x1ae   :  { %v6274_v42 = vpop.f32.mrf.mxu0  ;;  %v18849_v0 = vld [vmem:[#allocation3 + $0x37c] ss:$36 sps:$4 sm:$0xff]   ;;  %2558 = vst [vmem:[#allocation3 + $0x7f4] sm:$0xf] %v17497_v49 }
 0x1af   :  { %v6561_v29 = vpop.f32.mrf.mxu1  ;;  %7074 = vmatmul.mubr.bf16.gmra.mxu1 %v18838_v33  ;;  %v17626_v42 = vpack.c.bf16 %v3008_v25, %v3008_v25  ;;  %2944 = vst [vmem:[#allocation3 + $0x81c] sm:$0xf] %v17562_v16  ;;  %v18943_v49 = vld [vmem:[%s21679_s3 + $0x38] sm:$0xff]   ;;  %v18855_v16 = vld [vmem:[#allocation3 + $0x3c4] ss:$36 sps:$4 sm:$0xff]  }
 0x1b0   :  { %7081 = vmatprep.mubr.bf16.mxu1 %v18842_v2  ;;  %v20390_v30 = vadd.f32 %v6561_v29, %v6273_v21  ;;  %v6275_v41 = vpop.f32.mrf.mxu0  ;;  %v2623_v2 = vld [vmem:[#allocation2 + $0x300] sm:$0xff]  ;;  %v17625_v29 = vpack.c.bf16 %v3007_v23, %v3007_v23  ;;  %13499 = vmatpush1.bf16.msra.mxu1 %v18943_v49  ;;  %v2625_v23 = vld [vmem:[#allocation2 + $0x318] sm:$0xff] }
 0x1b1   :  { %v6563_v45 = vpop.f32.mrf.mxu1  ;;  %v6276_v33 = vadd.f32 %v20387_v39, %v6275_v41  ;;  %v17561_v15 = vpack.c.bf16 %v2623_v2, %v2623_v2  ;;  %v18847_v41 = vld [vmem:[#allocation3 + $0x370] ss:$36 sps:$4 sm:$0xff]   ;;  %3328 = vst [vmem:[#allocation3 + $0x820] sm:$0xf] %v17626_v42  ;;  %2177 = vst [vmem:[#allocation3 + $0x85c] sm:$0xf] %v17626_v42  ;;  %13500 = vmatprep.subr.bf16.mxu1 %v21683_v1  ;;  %v17563_v42 = vpack.c.bf16 %v2625_v23, %v2625_v23 }
 0x1b2   :  { %21685 = vst [vmem:[#allocation7_spill] sm:$0xff] %v20390_v30  ;;  %v6277_v3 = vpop.f32.mrf.mxu0  ;;  %6793 = vmatmul.mubr.bf16.gmra.mxu0 %v18841_v43  ;;  %3327 = vst [vmem:[#allocation3 + $0x7fc] sm:$0xf] %v17625_v29  ;;  %v2626_v25 = vld [vmem:[#allocation2 + $0x320] sm:$0xff] }
 0x1b3   :  { %v6564_v57 = vpop.f32.mrf.mxu1  ;;  %6800 = vmatprep.mubr.bf16.mxu0 %v18845_v62  ;;  %2943 = vst [vmem:[#allocation3 + $0x7f8] sm:$0xf] %v17561_v15  ;;  %2176 = vst [vmem:[#allocation3 + $0x838] sm:$0xf] %v17625_v29  ;;  %v18873_v30 = vld [vmem:[#allocation3 + $0x49c] ss:$36 sps:$4 sm:$0xff]  }
 0x1b4   :  { %v20393_v17 = vadd.f32 %v6564_v57, %v6276_v33  ;;  %v6280_v21 = vpop.f32.mrf.mxu0  ;;  %v18851_v33 = vld [vmem:[#allocation3 + $0x378] ss:$36 sps:$4 sm:$0xff]   ;;  %v2240_v57 = vld [vmem:[#allocation2 + $0x302] sm:$0xff]  ;;  %2945 = vst [vmem:[#allocation3 + $0x840] sm:$0xf] %v17563_v42 }
 0x1b5   :  { %v6566_v19 = vpop.f32.mrf.mxu1  ;;  %v6281_v45 = vadd.f32 %v20387_v39, %v6280_v21  ;;  %v17499_v3 = vpack.c.bf16 %v2240_v57, %v2240_v57 }
 0x1b6   :  { %21686 = vst [vmem:[#allocation8_spill] sm:$0xff] %v20393_v17  ;;  %v6282_v32 = vpop.f32.mrf.mxu0  ;;  %v18852_v19 = vld [vmem:[#allocation3 + $0x3bc] ss:$36 sps:$4 sm:$0xff]  }
 0x1b7   :  { %v6569_v52 = vpop.f32.mrf.mxu1  ;;  %7082 = vmatmul.mubr.bf16.gmra.mxu1 %v18844_v48  ;;  %v2241_v48 = vld [vmem:[#allocation2 + $0x30a] sm:$0xff]  ;;  %2560 = vst [vmem:[#allocation3 + $0x83c] sm:$0xf] %v17499_v3  ;;  %v3010_v32 = vld [vmem:[#allocation2 + $0x321] sm:$0xff] }
 0x1b8   :  { %7089 = vmatprep.mubr.bf16.mxu1 %v18849_v0  ;;  %v20399_v43 = vadd.f32 %v6569_v52, %v6281_v45  ;;  %v6283_v62 = vpop.f32.mrf.mxu0  ;;  %v17500_v2 = vpack.c.bf16 %v2241_v48, %v2241_v48  ;;  %v17564_v45 = vpack.c.bf16 %v2626_v25, %v2626_v25  ;;  %v3009_v52 = vld [vmem:[#allocation2 + $0x319] sm:$0xff]  ;;  %v17628_v57 = vpack.c.bf16 %v3010_v32, %v3010_v32  ;;  %v18861_v32 = vld [vmem:[#allocation3 + $0x40c] ss:$36 sps:$4 sm:$0xff]  }
 0x1b9   :  { %v6571_v58 = vpop.f32.mrf.mxu1  ;;  %v6284_v0 = vadd.f32 %v20387_v39, %v6283_v62  ;;  %v18948_v3 = vld [vmem:[%s21677_s1 + $0x200] sm:$0xff]  }
 0x1ba   :  { %21687 = vst [vmem:[#allocation9_spill] sm:$0xff] %v20399_v43  ;;  %v6285_v15 = vpop.f32.mrf.mxu0  ;;  %2561 = vst [vmem:[#allocation3 + $0x860] sm:$0xf] %v17500_v2  ;;  %6801 = vmatmul.mubr.bf16.gmra.mxu0 %v18847_v41  ;;  %v17627_v58 = vpack.c.bf16 %v3009_v52, %v3009_v52  ;;  %18367 = vmatprep.subr.bf16.mxu0 %v18948_v3  ;;  %v18858_v52 = vld [vmem:[#allocation3 + $0x404] ss:$36 sps:$4 sm:$0xff]  }
 0x1bb   :  { %v6572_v6 = vpop.f32.mrf.mxu1  ;;  %6808 = vmatprep.mubr.bf16.mxu0 %v18852_v19  ;;  %2946 = vst [vmem:[#allocation3 + $0x864] sm:$0xf] %v17564_v45  ;;  %3330 = vst [vmem:[#allocation3 + $0x868] sm:$0xf] %v17628_v57  ;;  %v18857_v15 = vld [vmem:[#allocation3 + $0x3c0] ss:$36 sps:$4 sm:$0xff]   ;;  %18368 = vmatpush3.bf16.msra.mxu0 %v18948_v3 }
 0x1bc   :  { %v20403_v21 = vadd.f32 %v6572_v6, %v6284_v0  ;;  %v6288_v49 = vpop.f32.mrf.mxu0  ;;  %v18854_v0 = vld [vmem:[#allocation3 + $0x3b8] ss:$36 sps:$4 sm:$0xff]   ;;  %3329 = vst [vmem:[#allocation3 + $0x844] sm:$0xf] %v17627_v58  ;;  %2178 = vst [vmem:[#allocation3 + $0x880] sm:$0xf] %v17627_v58  ;;  %13787 = vmatprep.subr.bf16.mxu0 %v21683_v1 }
 0x1bd   :  { %v6574_v29 = vpop.f32.mrf.mxu1  ;;  %v6289_v48 = vadd.f32 %v20387_v39, %v6288_v49  ;;  %2179 = vst [vmem:[#allocation3 + $0x8a4] sm:$0xf] %v17628_v57  ;;  %v2243_v19 = vld [vmem:[#allocation2 + $0x322] sm:$0xff]  ;;  %v2627_v49 = vld [vmem:[#allocation2 + $0x330] sm:$0xff]  ;;  %v2628_v58 = vld [vmem:[#allocation2 + $0x338] sm:$0xff] }
 0x1be   :  { %21688 = vst [vmem:[#allocation10_spill] sm:$0xff] %v20403_v21  ;;  %v6290_v2 = vpop.f32.mrf.mxu0  ;;  %v17502_v29 = vpack.c.bf16 %v2243_v19, %v2243_v19  ;;  %v3011_v3 = vld [vmem:[#allocation2 + $0x331] sm:$0xff] }
 0x1bf   :  { %v6577_v62 = vpop.f32.mrf.mxu1  ;;  %7090 = vmatmul.mubr.bf16.gmra.mxu1 %v18851_v33  ;;  %v2242_v33 = vld [vmem:[#allocation2 + $0x31a] sm:$0xff]  ;;  %v17566_v2 = vpack.c.bf16 %v2628_v58, %v2628_v58  ;;  %v17629_v19 = vpack.c.bf16 %v3011_v3, %v3011_v3  ;;  %v21692_v3 = vmov 0  }
 0x1c0   :  { %7097 = vmatprep.mubr.bf16.mxu1 %v18855_v16  ;;  %v20409_v41 = vadd.f32 %v6577_v62, %v6289_v48  ;;  %v6291_v23 = vpop.f32.mrf.mxu0  ;;  %v17501_v25 = vpack.c.bf16 %v2242_v33, %v2242_v33  ;;  %2563 = vst [vmem:[#allocation3 + $0x8a8] sm:$0xf] %v17502_v29  ;;  %v17565_v62 = vpack.c.bf16 %v2627_v49, %v2627_v49  ;;  %v18860_v29 = vld [vmem:[#allocation3 + $0x400] ss:$36 sps:$4 sm:$0xff]   ;;  %v2244_v49 = vld [vmem:[#allocation2 + $0x332] sm:$0xff] }
 0x1c1   :  { %v6579_v6 = vpop.f32.mrf.mxu1  ;;  %v6292_v42 = vadd.f32 %v20387_v39, %v6291_v23  ;;  %2948 = vst [vmem:[#allocation3 + $0x8ac] sm:$0xf] %v17566_v2  ;;  %3331 = vst [vmem:[#allocation3 + $0x88c] sm:$0xf] %v17629_v19  ;;  %v17503_v58 = vpack.c.bf16 %v2244_v49, %v2244_v49  ;;  %v18864_v2 = vld [vmem:[#allocation3 + $0x44c] ss:$36 sps:$4 sm:$0xff]  }
 0x1c2   :  { %21689 = vst [vmem:[#allocation11_spill] sm:$0xff] %v20409_v41  ;;  %v6293_v16 = vpop.f32.mrf.mxu0  ;;  %2562 = vst [vmem:[#allocation3 + $0x884] sm:$0xf] %v17501_v25  ;;  %v3012_v6 = vld [vmem:[#allocation2 + $0x339] sm:$0xff]  ;;  %6809 = vmatmul.mubr.bf16.gmra.mxu0 %v18854_v0 }
 0x1c3   :  { %v6580_v45 = vpop.f32.mrf.mxu1  ;;  %v17630_v23 = vpack.c.bf16 %v3012_v6, %v3012_v6  ;;  %6816 = vmatprep.mubr.bf16.mxu0 %v18858_v52  ;;  %2947 = vst [vmem:[#allocation3 + $0x888] sm:$0xf] %v17565_v62  ;;  %2180 = vst [vmem:[#allocation3 + $0x8c8] sm:$0xf] %v17629_v19  ;;  %v18863_v16 = vld [vmem:[#allocation3 + $0x408] ss:$36 sps:$4 sm:$0xff]  }
 0x1c4   :  { %v20413_v57 = vadd.f32 %v6580_v45, %v6292_v42  ;;  %v6296_v33 = vpop.f32.mrf.mxu0  ;;  %v18957_v42 = vld [vmem:[%s21679_s3 + $0x30] sm:$0xff]   ;;  %2564 = vst [vmem:[#allocation3 + $0x8cc] sm:$0xf] %v17503_v58 }
 0x1c5   :  { %v6582_v48 = vpop.f32.mrf.mxu1  ;;  %v6297_v41 = vadd.f32 %v20387_v39, %v6296_v33  ;;  %3332 = vst [vmem:[#allocation3 + $0x8b0] sm:$0xf] %v17630_v23  ;;  %2181 = vst [vmem:[#allocation3 + $0x8ec] sm:$0xf] %v17630_v23  ;;  %13501 = vmatpush1.bf16.msra.mxu1 %v18957_v42  ;;  %v19492_v33 = vld [vmem:[#allocation2] sm:$0xff]  ;;  %v3014_v19 = vld [vmem:[#allocation2 + $0x351] sm:$0xff] }
 0x1c6   :  { %21690 = vst [vmem:[#allocation12_spill] sm:$0xff] %v20413_v57  ;;  %v6298_v25 = vpop.f32.mrf.mxu0  ;;  %13502 = vmatprep.subr.bf16.mxu1 %v21692_v3  ;;  %v17632_v42 = vpack.c.bf16 %v3014_v19, %v3014_v19  ;;  %v3872_v58 = vld [vmem:[#allocation3 + $0x450] sm:$0xff] }
 0x1c7   :  { %v6585_v1 = vpop.f32.mrf.mxu1  ;;  %7098 = vmatmul.mubr.bf16.gmra.mxu1 %v18857_v15  ;;  %v2245_v15 = vld [vmem:[#allocation2 + $0x33a] sm:$0xff] }
 0x1c8   :  { %7105 = vmatprep.mubr.bf16.mxu1 %v18861_v32  ;;  %v20419_v0 = vadd.f32 %v6585_v1, %v6297_v41  ;;  %v6299_v52 = vpop.f32.mrf.mxu0  ;;  %v17504_v48 = vpack.c.bf16 %v2245_v15, %v2245_v15  ;;  %v17567_v1 = vpack.c.bf16 %v19492_v33, %v19492_v33  ;;  %v3013_v41 = vld [vmem:[#allocation2 + $0x349] sm:$0xff]  ;;  %3334 = vst [vmem:[#allocation3 + $0x8f8] sm:$0xf] %v17632_v42  ;;  %v3877_v33 = vld [vmem:[#allocation3 + $0x474] sm:$0xff] }
 0x1c9   :  { %v6587_v45 = vpop.f32.mrf.mxu1  ;;  %v6300_v32 = vadd.f32 %v20387_v39, %v6299_v52  ;;  %v15961_v57 = vcombine.low %v3872_v58, %v3877_v33  ;;  %v18869_v21 = vld [vmem:[#allocation3 + $0x494] ss:$36 sps:$4 sm:$0xff]  }
 0x1ca   :  { %21691 = vst [vmem:[#allocation13_spill] sm:$0xff] %v20419_v0  ;;  %v6301_v6 = vpop.f32.mrf.mxu0  ;;  %2565 = vst [vmem:[#allocation3 + $0x8f0] sm:$0xf] %v17504_v48  ;;  %v17631_v45 = vpack.c.bf16 %v3013_v41, %v3013_v41  ;;  %6817 = vmatmul.mubr.bf16.gmra.mxu0 %v18860_v29  ;;  %v3335_v41 = vld [vmem:[#allocation2 + $0x32] sm:$0xff]  ;;  %v3336_v29 = vld [vmem:[#allocation2 + $0x3a] sm:$0xff] }
 0x1cb   :  { %v6588_v62 = vpop.f32.mrf.mxu1  ;;  %2949 = vst [vmem:[#allocation3 + $0x8d0] sm:$0xf] %v17567_v1  ;;  %2950 = vst [vmem:[#allocation3 + $0x8f4] sm:$0xf] %v17567_v1  ;;  %6824 = vmatprep.mubr.bf16.mxu0 %v18864_v2  ;;  %v18866_v6 = vld [vmem:[#allocation3 + $0x448] ss:$36 sps:$4 sm:$0xff]  }
 0x1cc   :  { %v20423_v23 = vadd.f32 %v6588_v62, %v6300_v32  ;;  %v6304_v49 = vpop.f32.mrf.mxu0  ;;  %3333 = vst [vmem:[#allocation3 + $0x8d4] sm:$0xf] %v17631_v45  ;;  %v3338_v0 = vld [vmem:[#allocation2 + $0x52] sm:$0xff]  ;;  %10353 = vst [vmem:[#allocation3 + $0x8d0] sm:$0xf] %v17567_v1 }
 0x1cd   :  { %v6590_v25 = vpop.f32.mrf.mxu1  ;;  %v6305_v15 = vadd.f32 %v20387_v39, %v6304_v49  ;;  %v3337_v49 = vld [vmem:[#allocation2 + $0x4a] sm:$0xff]  ;;  %v17636_v43 = vpack.c.bf16 %v3338_v0, %v3338_v0  ;;  %10354 = vst [vmem:[#allocation3 + $0x8f4] sm:$0xf] %v17567_v1 }
 0x1ce   :  { %21693 = vst [vmem:[#allocation14_spill] sm:$0xff] %v20423_v23  ;;  %v6306_v48 = vpop.f32.mrf.mxu0  ;;  %v17633_v25 = vpack.c.bf16 %v3335_v41, %v3335_v41  ;;  %v17634_v23 = vpack.c.bf16 %v3336_v29, %v3336_v29 }
 0x1cf   :  { %v6593_v52 = vpop.f32.mrf.mxu1  ;;  %7106 = vmatmul.mubr.bf16.gmra.mxu1 %v18863_v16  ;;  %v17635_v48 = vpack.c.bf16 %v3337_v49, %v3337_v49  ;;  %3658 = vst [vmem:[#allocation3 + $0x8c] sm:$0xf] %v17636_v43 }
 0x1d0   :  { %7113 = vmatprep.mubr.bf16.mxu1 %v20291_v44  ;;  %v20427_v32 = vadd.f32 %v6593_v52, %v6305_v15  ;;  %v6307_v19 = vpop.f32.mrf.mxu0  ;;  %3655 = vst [vmem:[#allocation3 + $0x20] sm:$0xf] %v17633_v25  ;;  %3656 = vst [vmem:[#allocation3 + $0x44] sm:$0xf] %v17634_v23 }
 0x1d1   :  { %v6595_v62 = vpop.f32.mrf.mxu1  ;;  %v6308_v16 = vadd.f32 %v20387_v39, %v6307_v19  ;;  %3657 = vst [vmem:[#allocation3 + $0x68] sm:$0xf] %v17635_v48 }
 0x1d2   :  { %v6309_v17 = vpop.f32.mrf.mxu0  ;;  %6825 = vmatmul.mubr.bf16.gmra.mxu0 %v18866_v6 }
 0x1d3   :  { %v6596_v2 = vpop.f32.mrf.mxu1  ;;  %v20432_v62 = vld [vmem:[#allocation3 + $0x8d4] ss:$36 sps:$4 sm:$0xff]   ;;  %6832 = vmatprep.mubr.bf16.mxu0 %v18869_v21  ;;  %v18970_v17 = vld [vmem:[%s21679_s3 + $0x28] sm:$0xff]  }
 0x1d4   :  { %v20430_v44 = vadd.f32 %v6596_v2, %v6308_v16  ;;  %v6312_v52 = vpop.f32.mrf.mxu0  ;;  %10737 = vst [vmem:[#allocation3 + $0x8d4] sm:$0xf] %v17631_v45  ;;  %10738 = vst [vmem:[#allocation3 + $0x8f8] sm:$0xf] %v17632_v42 }
 0x1d5   :  { %v6598_v15 = vpop.f32.mrf.mxu1  ;;  %v6313_v41 = vadd.f32 %v20387_v39, %v6312_v52 }
 0x1d7   :  { %v6601_v29 = vpop.f32.mrf.mxu1  ;;  %7114 = vmatmul.mubr.bf16.gmra.mxu1 %v15961_v57 }
 0x1d8   :  { %12 = vsyncpa [#allocation5], 0  ;;  %v6314_v0 = vpop.f32.mrf.mxu0  ;;  %7121 = vmatprep.mubr.bf16.mxu1 %v18873_v30  ;;  %v20438_v43 = vadd.f32 %v6601_v29, %v6313_v41  ;;  %v18871_v58 = vld [vmem:[#allocation3 + $0x490] ss:$36 sps:$4 sm:$0xff]   ;;  %13503 = vmatpush1.bf16.msra.mxu1 %v18970_v17  ;;  %v3339_v6 = vld [vmem:[#allocation2 + $0x62] sm:$0xff]  ;;  %s19522_s30 = smov [#allocation4]  }
 0x1d9   :  { %v6603_v23 = vpop.f32.mrf.mxu1  ;;  %v3340_v33 = vld [vmem:[#allocation2 + $0x6a] sm:$0xff]  ;;  %v18875_v21 = vld [vmem:[#allocation3 + $0x498] ss:$36 sps:$4 sm:$0xff]   ;;  %v17637_v19 = vpack.c.bf16 %v3339_v6, %v3339_v6  ;;  %v3342_v42 = vld [vmem:[#allocation2 + $0x82] sm:$0xff]  ;;  %13504 = vmatprep.subr.bf16.mxu1 %v21692_v3  ;;  %s15230_s7 = sshll.u32 %s19522_s30, 4  ;;  %s15231_s7 = int_to_ptr.vmem [resolvable:$true] %s15230_s7 }
 0x1da   :  { %21694 = vst [vmem:[#allocation15_spill] sm:$0xff] %v20438_v43  ;;  %v6315_v57 = vpop.f32.mrf.mxu0  ;;  %v17638_v1 = vpack.c.bf16 %v3340_v33, %v3340_v33  ;;  %v3341_v45 = vld [vmem:[#allocation2 + $0x7a] sm:$0xff]  ;;  %v17640_v2 = vpack.c.bf16 %v3342_v42, %v3342_v42  ;;  %v18879_v15 = vld [vmem:[#allocation3 + $0x4e4] ss:$36 sps:$4 sm:$0xff]   ;;  %6833 = vmatmul.mubr.bf16.gmra.mxu0 %v18871_v58  ;;  %s19497_s8 = scalar_lea.vmem %s15231_s7, 32  ;;  %p19502_p1 = scmp.lt.s32.totalorder %s15231_s7, %s15231_s7 }
 0x1db   :  { %v6316_v25 = vadd.f32 %v20387_v39, %v6315_v57  ;;  %v6604_v49 = vpop.f32.mrf.mxu1  ;;  %v18876_v16 = vld [vmem:[#allocation3 + $0x4dc] ss:$36 sps:$4 sm:$0xff]   ;;  %v17639_v30 = vpack.c.bf16 %v3341_v45, %v3341_v45  ;;  %3659 = vst [vmem:[#allocation3 + $0xb0] sm:$0xf] %v17637_v19  ;;  %v3343_v19 = vld [vmem:[#allocation2 + $0x92] sm:$0xff]  ;;  %p19498_p0 = scmp.ne.s32.totalorder %s15231_s7, %s19497_s8  ;;  %p19503_p2 = scmp.lt.s32.totalorder %s19497_s8, %s19497_s8 }
 0x1dc   :  { %v6317_v48 = vpop.f32.mrf.mxu0  ;;  %3660 = vst [vmem:[#allocation3 + $0xd4] sm:$0xf] %v17638_v1  ;;  %3662 = vst [vmem:[#allocation3 + $0x11c] sm:$0xf] %v17640_v2  ;;  %6840 = vmatprep.mubr.bf16.mxu0 %v18876_v16  ;;  %v18878_v57 = vld [vmem:[#allocation3 + $0x4d8] ss:$36 sps:$4 sm:$0xff]  }
 0x1dd   :  { %v20442_v52 = vadd.f32 %v6604_v49, %v6316_v25  ;;  %v6606_v41 = vpop.f32.mrf.mxu1  ;;  %3661 = vst [vmem:[#allocation3 + $0xf8] sm:$0xf] %v17639_v30  ;;  %v3344_v1 = vld [vmem:[#allocation2 + $0x9a] sm:$0xff]  ;;  %v17641_v25 = vpack.c.bf16 %v3343_v19, %v3343_v19  ;;  %v3345_v30 = vld [vmem:[#allocation2 + $0xaa] sm:$0xff]  ;;  %v3346_v2 = vld [vmem:[#allocation2 + $0xb2] sm:$0xff]  ;;  %p19504_p3 = por %p19503_p2, %p19502_p1 }
 0x1de   :  { %v6320_v29 = vpop.f32.mrf.mxu0  ;;  %v18881_v42 = vld [vmem:[#allocation3 + $0x4e0] ss:$36 sps:$4 sm:$0xff]   ;;  %v17642_v49 = vpack.c.bf16 %v3344_v1, %v3344_v1  ;;  %v17644_v16 = vpack.c.bf16 %v3346_v2, %v3346_v2 }
 0x1df   :  { %21695 = vst [vmem:[#allocation16_spill] sm:$0xff] %v20442_v52  ;;  %v6321_v17 = vadd.f32 %v20387_v39, %v6320_v29  ;;  %v6609_v0 = vpop.f32.mrf.mxu1  ;;  %7122 = vmatmul.mubr.bf16.gmra.mxu1 %v18875_v21  ;;  %v18882_v41 = vld [vmem:[#allocation3 + $0x524] ss:$36 sps:$4 sm:$0xff]   ;;  %v17643_v21 = vpack.c.bf16 %v3345_v30, %v3345_v30  ;;  %3663 = vst [vmem:[#allocation3 + $0x140] sm:$0xf] %v17641_v25  ;;  %p19505_p4 = pnand %p19504_p3, %p19498_p0 }
 0x1e0   :  { %v6322_v23 = vpop.f32.mrf.mxu0  ;;  %7129 = vmatprep.mubr.bf16.mxu1 %v18879_v15  ;;  %v18885_v15 = vld [vmem:[#allocation3 + $0x52c] ss:$36 sps:$4 sm:$0xff]   ;;  %3664 = vst [vmem:[#allocation3 + $0x164] sm:$0xf] %v17642_v49  ;;  %3666 = vst [vmem:[#allocation3 + $0x1ac] sm:$0xf] %v17644_v16 }
 0x1e1   :  { %v20445_v6 = vadd.f32 %v6609_v0, %v6321_v17  ;;  %v6611_v33 = vpop.f32.mrf.mxu1  ;;  %3665 = vst [vmem:[#allocation3 + $0x188] sm:$0xf] %v17643_v21  ;;  %v18975_v1 = vld [vmem:[%s21679_s3 + $0x20] sm:$0xff]  }
 0x1e2   :  { %v6323_v45 = vpop.f32.mrf.mxu0  ;;  %6841 = vmatmul.mubr.bf16.gmra.mxu0 %v18878_v57  ;;  %v18884_v30 = vld [vmem:[#allocation3 + $0x520] ss:$36 sps:$4 sm:$0xff]   ;;  %13505 = vmatpush1.bf16.msra.mxu1 %v18975_v1  ;;  %v18887_v57 = vld [vmem:[#allocation3 + $0x528] ss:$36 sps:$4 sm:$0xff]  }
 0x1e3   :  { %21696 = vst [vmem:[#allocation17_spill] sm:$0xff] %v20445_v6  ;;  %v6324_v58 = vadd.f32 %v20387_v39, %v6323_v45  ;;  %v6612_v48 = vpop.f32.mrf.mxu1  ;;  %6848 = vmatprep.mubr.bf16.mxu0 %v18882_v41  ;;  %v3347_v2 = vld [vmem:[#allocation2 + $0xc2] sm:$0xff]  ;;  %13506 = vmatprep.subr.bf16.mxu1 %v21692_v3  ;;  %v3369_v6 = vld [vmem:[#allocation2 + $0x1fa] sm:$0xff] }
 0x1e4   :  { %v6325_v29 = vpop.f32.mrf.mxu0  ;;  %v17645_v21 = vpack.c.bf16 %v3347_v2, %v3347_v2 }
 0x1e5   :  { %v20448_v17 = vadd.f32 %v6612_v48, %v6324_v58  ;;  %v6614_v0 = vpop.f32.mrf.mxu1  ;;  %v3348_v58 = vld [vmem:[#allocation2 + $0xca] sm:$0xff]  ;;  %v3349_v29 = vld [vmem:[#allocation2 + $0xda] sm:$0xff] }
 0x1e6   :  { %v6328_v23 = vpop.f32.mrf.mxu0  ;;  %v17646_v16 = vpack.c.bf16 %v3348_v58, %v3348_v58  ;;  %3667 = vst [vmem:[#allocation3 + $0x1d0] sm:$0xf] %v17645_v21  ;;  %v3351_v21 = vld [vmem:[#allocation2 + $0xf2] sm:$0xff] }
 0x1e7   :  { %21697 = vst [vmem:[#allocation18_spill] sm:$0xff] %v20448_v17  ;;  %v6329_v33 = vadd.f32 %v20387_v39, %v6328_v23  ;;  %v6617_v19 = vpop.f32.mrf.mxu1  ;;  %7130 = vmatmul.mubr.bf16.gmra.mxu1 %v18881_v42  ;;  %v3350_v42 = vld [vmem:[#allocation2 + $0xe2] sm:$0xff]  ;;  %v18888_v23 = vld [vmem:[#allocation3 + $0x56c] ss:$36 sps:$4 sm:$0xff]   ;;  %v18894_v17 = vld [vmem:[#allocation3 + $0x5b4] ss:$36 sps:$4 sm:$0xff]  }
 0x1e8   :  { %v6330_v45 = vpop.f32.mrf.mxu0  ;;  %7137 = vmatprep.mubr.bf16.mxu1 %v18885_v15  ;;  %v17647_v15 = vpack.c.bf16 %v3349_v29, %v3349_v29  ;;  %3668 = vst [vmem:[#allocation3 + $0x1f4] sm:$0xf] %v17646_v16  ;;  %v3352_v16 = vld [vmem:[#allocation2 + $0xfa] sm:$0xff] }
 0x1e9   :  { %v20454_v25 = vadd.f32 %v6617_v19, %v6329_v33  ;;  %v6619_v49 = vpop.f32.mrf.mxu1  ;;  %v17648_v33 = vpack.c.bf16 %v3350_v42, %v3350_v42  ;;  %v18891_v45 = vld [vmem:[#allocation3 + $0x574] ss:$36 sps:$4 sm:$0xff]  }
 0x1ea   :  { %v6331_v48 = vpop.f32.mrf.mxu0  ;;  %3669 = vst [vmem:[#allocation3 + $0x218] sm:$0xf] %v17647_v15  ;;  %6849 = vmatmul.mubr.bf16.gmra.mxu0 %v18884_v30  ;;  %v17650_v15 = vpack.c.bf16 %v3352_v16, %v3352_v16 }
 0x1eb   :  { %21698 = vst [vmem:[#allocation19_spill] sm:$0xff] %v20454_v25  ;;  %v6332_v41 = vadd.f32 %v20387_v39, %v6331_v48  ;;  %v6620_v0 = vpop.f32.mrf.mxu1  ;;  %3670 = vst [vmem:[#allocation3 + $0x23c] sm:$0xf] %v17648_v33  ;;  %6856 = vmatprep.mubr.bf16.mxu0 %v18888_v23  ;;  %v3353_v33 = vld [vmem:[#allocation2 + $0x10a] sm:$0xff] }
 0x1ec   :  { %v6333_v19 = vpop.f32.mrf.mxu0  ;;  %3672 = vst [vmem:[#allocation3 + $0x284] sm:$0xf] %v17650_v15 }
 0x1ed   :  { %v20458_v1 = vadd.f32 %v6620_v0, %v6332_v41  ;;  %v6622_v49 = vpop.f32.mrf.mxu1  ;;  %v18890_v19 = vld [vmem:[#allocation3 + $0x568] ss:$36 sps:$4 sm:$0xff]   ;;  %v18893_v0 = vld [vmem:[#allocation3 + $0x570] ss:$36 sps:$4 sm:$0xff]  }
 0x1ee   :  { %v6336_v2 = vpop.f32.mrf.mxu0  ;;  %v17649_v49 = vpack.c.bf16 %v3351_v21, %v3351_v21 }
 0x1ef   :  { %21699 = vst [vmem:[#allocation20_spill] sm:$0xff] %v20458_v1  ;;  %v6337_v58 = vadd.f32 %v20387_v39, %v6336_v2  ;;  %v6625_v25 = vpop.f32.mrf.mxu1  ;;  %7138 = vmatmul.mubr.bf16.gmra.mxu1 %v18887_v57  ;;  %v3354_v1 = vld [vmem:[#allocation2 + $0x112] sm:$0xff]  ;;  %v17651_v57 = vpack.c.bf16 %v3353_v33, %v3353_v33 }
 0x1f0   :  { %v6338_v48 = vpop.f32.mrf.mxu0  ;;  %7145 = vmatprep.mubr.bf16.mxu1 %v18891_v45  ;;  %v17652_v23 = vpack.c.bf16 %v3354_v1, %v3354_v1  ;;  %v18898_v45 = vld [vmem:[#allocation3 + $0x5bc] ss:$36 sps:$4 sm:$0xff]   ;;  %3671 = vst [vmem:[#allocation3 + $0x260] sm:$0xf] %v17649_v49  ;;  %v18896_v33 = vld [vmem:[#allocation3 + $0x5b0] ss:$36 sps:$4 sm:$0xff]  }
 0x1f1   :  { %v20461_v29 = vadd.f32 %v6625_v25, %v6337_v58  ;;  %v6627_v42 = vpop.f32.mrf.mxu1  ;;  %3673 = vst [vmem:[#allocation3 + $0x2a8] sm:$0xf] %v17651_v57  ;;  %v18980_v1 = vld [vmem:[%s21679_s3 + $0x18] sm:$0xff]  }
 0x1f2   :  { %v6339_v41 = vpop.f32.mrf.mxu0  ;;  %3674 = vst [vmem:[#allocation3 + $0x2cc] sm:$0xf] %v17652_v23  ;;  %6857 = vmatmul.mubr.bf16.gmra.mxu0 %v18890_v19  ;;  %13507 = vmatpush1.bf16.msra.mxu1 %v18980_v1  ;;  %v18900_v19 = vld [vmem:[#allocation3 + $0x5b8] ss:$36 sps:$4 sm:$0xff]  }
 0x1f3   :  { %21700 = vst [vmem:[#allocation21_spill] sm:$0xff] %v20461_v29  ;;  %v6340_v30 = vadd.f32 %v20387_v39, %v6339_v41  ;;  %v6628_v2 = vpop.f32.mrf.mxu1  ;;  %6864 = vmatprep.mubr.bf16.mxu0 %v18894_v17  ;;  %13508 = vmatprep.subr.bf16.mxu1 %v21692_v3  ;;  %v18907_v29 = vld [vmem:[#allocation3 + $0x644] ss:$36 sps:$4 sm:$0xff]  }
 0x1f4   :  { %v6341_v48 = vpop.f32.mrf.mxu0 }
 0x1f5   :  { %v20464_v25 = vadd.f32 %v6628_v2, %v6340_v30  ;;  %v6630_v58 = vpop.f32.mrf.mxu1  ;;  %v3355_v30 = vld [vmem:[#allocation2 + $0x122] sm:$0xff]  ;;  %v3356_v2 = vld [vmem:[#allocation2 + $0x12a] sm:$0xff] }
 0x1f6   :  { %v6344_v42 = vpop.f32.mrf.mxu0  ;;  %v17653_v23 = vpack.c.bf16 %v3355_v30, %v3355_v30  ;;  %v17654_v48 = vpack.c.bf16 %v3356_v2, %v3356_v2  ;;  %v3357_v58 = vld [vmem:[#allocation2 + $0x13a] sm:$0xff] }
 0x1f7   :  { %21701 = vst [vmem:[#allocation22_spill] sm:$0xff] %v20464_v25  ;;  %v6345_v21 = vadd.f32 %v20387_v39, %v6344_v42  ;;  %v6633_v16 = vpop.f32.mrf.mxu1  ;;  %7146 = vmatmul.mubr.bf16.gmra.mxu1 %v18893_v0  ;;  %v3358_v0 = vld [vmem:[#allocation2 + $0x142] sm:$0xff] }
 0x1f8   :  { %v6346_v41 = vpop.f32.mrf.mxu0  ;;  %7153 = vmatprep.mubr.bf16.mxu1 %v18898_v45  ;;  %v17655_v45 = vpack.c.bf16 %v3357_v58, %v3357_v58  ;;  %3675 = vst [vmem:[#allocation3 + $0x2f0] sm:$0xf] %v17653_v23  ;;  %3676 = vst [vmem:[#allocation3 + $0x314] sm:$0xf] %v17654_v48  ;;  %v3359_v23 = vld [vmem:[#allocation2 + $0x152] sm:$0xff]  ;;  %v3360_v48 = vld [vmem:[#allocation2 + $0x15a] sm:$0xff] }
 0x1f9   :  { %v20470_v49 = vadd.f32 %v6633_v16, %v6345_v21  ;;  %v6635_v15 = vpop.f32.mrf.mxu1  ;;  %v18901_v41 = vld [vmem:[#allocation3 + $0x5fc] ss:$36 sps:$4 sm:$0xff]   ;;  %v17656_v21 = vpack.c.bf16 %v3358_v0, %v3358_v0 }
 0x1fa   :  { %v6347_v57 = vpop.f32.mrf.mxu0  ;;  %v18904_v15 = vld [vmem:[#allocation3 + $0x604] ss:$36 sps:$4 sm:$0xff]   ;;  %3677 = vst [vmem:[#allocation3 + $0x338] sm:$0xf] %v17655_v45  ;;  %6865 = vmatmul.mubr.bf16.gmra.mxu0 %v18896_v33  ;;  %v17658_v45 = vpack.c.bf16 %v3360_v48, %v3360_v48 }
 0x1fb   :  { %21702 = vst [vmem:[#allocation23_spill] sm:$0xff] %v20470_v49  ;;  %v6348_v17 = vadd.f32 %v20387_v39, %v6347_v57  ;;  %v6636_v42 = vpop.f32.mrf.mxu1  ;;  %3678 = vst [vmem:[#allocation3 + $0x35c] sm:$0xf] %v17656_v21  ;;  %6872 = vmatprep.mubr.bf16.mxu0 %v18901_v41  ;;  %v3361_v21 = vld [vmem:[#allocation2 + $0x16a] sm:$0xff] }
 0x1fc   :  { %v6349_v16 = vpop.f32.mrf.mxu0  ;;  %3680 = vst [vmem:[#allocation3 + $0x3a4] sm:$0xf] %v17658_v45 }
 0x1fd   :  { %v20474_v1 = vadd.f32 %v6636_v42, %v6348_v17  ;;  %v6638_v49 = vpop.f32.mrf.mxu1  ;;  %v18903_v16 = vld [vmem:[#allocation3 + $0x5f8] ss:$36 sps:$4 sm:$0xff]   ;;  %v18906_v42 = vld [vmem:[#allocation3 + $0x600] ss:$36 sps:$4 sm:$0xff]  }
 0x1fe   :  { %v6352_v30 = vpop.f32.mrf.mxu0  ;;  %v17657_v49 = vpack.c.bf16 %v3359_v23, %v3359_v23 }
 0x1ff   :  { %21703 = vst [vmem:[#allocation24_spill] sm:$0xff] %v20474_v1  ;;  %v6353_v2 = vadd.f32 %v20387_v39, %v6352_v30  ;;  %v6641_v25 = vpop.f32.mrf.mxu1  ;;  %7154 = vmatmul.mubr.bf16.gmra.mxu1 %v18900_v19  ;;  %v3362_v1 = vld [vmem:[#allocation2 + $0x172] sm:$0xff]  ;;  %v17659_v19 = vpack.c.bf16 %v3361_v21, %v3361_v21  ;;  %v18909_v21 = vld [vmem:[#allocation3 + $0x640] ss:$36 sps:$4 sm:$0xff]  }
 0x200   :  { %v6354_v57 = vpop.f32.mrf.mxu0  ;;  %7161 = vmatprep.mubr.bf16.mxu1 %v18904_v15  ;;  %v17660_v41 = vpack.c.bf16 %v3362_v1, %v3362_v1  ;;  %v18910_v15 = vld [vmem:[#allocation3 + $0x64c] ss:$36 sps:$4 sm:$0xff]   ;;  %3679 = vst [vmem:[#allocation3 + $0x380] sm:$0xf] %v17657_v49 }
 0x201   :  { %v20477_v58 = vadd.f32 %v6641_v25, %v6353_v2  ;;  %v6643_v0 = vpop.f32.mrf.mxu1  ;;  %3681 = vst [vmem:[#allocation3 + $0x3c8] sm:$0xf] %v17659_v19  ;;  %v18985_v1 = vld [vmem:[%s21679_s3 + $0x10] sm:$0xff]  }
 0x202   :  { %v6355_v17 = vpop.f32.mrf.mxu0  ;;  %3682 = vst [vmem:[#allocation3 + $0x3ec] sm:$0xf] %v17660_v41  ;;  %6873 = vmatmul.mubr.bf16.gmra.mxu0 %v18903_v16  ;;  %13509 = vmatpush1.bf16.msra.mxu1 %v18985_v1  ;;  %v18912_v16 = vld [vmem:[#allocation3 + $0x648] ss:$36 sps:$4 sm:$0xff]  }
 0x203   :  { %21704 = vst [vmem:[#allocation25_spill] sm:$0xff] %v20477_v58  ;;  %v6356_v33 = vadd.f32 %v20387_v39, %v6355_v17  ;;  %v6644_v30 = vpop.f32.mrf.mxu1  ;;  %6880 = vmatprep.mubr.bf16.mxu0 %v18907_v29  ;;  %13510 = vmatprep.subr.bf16.mxu1 %v21692_v3  ;;  %v20492_v29 = vld [vmem:[%s21678_s2] ss:$0 sm:$0xff]  ;;  %v18915_v58 = vld [vmem:[#allocation3 + $0x688] ss:$36 sps:$4 sm:$0xff]  }
 0x204   :  { %v6357_v57 = vpop.f32.mrf.mxu0 }
 0x205   :  { %v20480_v25 = vadd.f32 %v6644_v30, %v6356_v33  ;;  %v6646_v2 = vpop.f32.mrf.mxu1  ;;  %v3363_v33 = vld [vmem:[#allocation2 + $0x182] sm:$0xff]  ;;  %v3364_v30 = vld [vmem:[#allocation2 + $0x18a] sm:$0xff]  ;;  %v3365_v57 = vld [vmem:[#allocation2 + $0x19a] sm:$0xff] }
 0x206   :  { %v6360_v0 = vpop.f32.mrf.mxu0  ;;  %v17661_v41 = vpack.c.bf16 %v3363_v33, %v3363_v33 }
 0x207   :  { %21705 = vst [vmem:[#allocation26_spill] sm:$0xff] %v20480_v25  ;;  %v6361_v23 = vadd.f32 %v20387_v39, %v6360_v0  ;;  %v6649_v48 = vpop.f32.mrf.mxu1  ;;  %7162 = vmatmul.mubr.bf16.gmra.mxu1 %v18906_v42  ;;  %v17662_v39 = vpack.c.bf16 %v3364_v30, %v3364_v30  ;;  %v3366_v42 = vld [vmem:[#allocation2 + $0x1a2] sm:$0xff]  ;;  %v18913_v0 = vld [vmem:[#allocation3 + $0x68c] ss:$36 sps:$4 sm:$0xff]  }
 0x208   :  { %v6362_v17 = vpop.f32.mrf.mxu0  ;;  %7169 = vmatprep.mubr.bf16.mxu1 %v18910_v15  ;;  %3683 = vst [vmem:[#allocation3 + $0x410] sm:$0xf] %v17661_v41  ;;  %v18918_v41 = vld [vmem:[#allocation3 + $0x690] ss:$36 sps:$4 sm:$0xff]  }
 0x209   :  { %v20486_v49 = vadd.f32 %v6649_v48, %v6361_v23  ;;  %v6651_v45 = vpop.f32.mrf.mxu1  ;;  %v17663_v23 = vpack.c.bf16 %v3365_v57, %v3365_v57  ;;  %v17664_v48 = vpack.c.bf16 %v3366_v42, %v3366_v42  ;;  %v18916_v17 = vld [vmem:[#allocation3 + $0x694] ss:$36 sps:$4 sm:$0xff]   ;;  %3684 = vst [vmem:[#allocation3 + $0x434] sm:$0xf] %v17662_v39  ;;  %v3367_v39 = vld [vmem:[#allocation2 + $0x1e2] sm:$0xff] }
 0x20a   :  { %v6363_v19 = vpop.f32.mrf.mxu0  ;;  %6881 = vmatmul.mubr.bf16.gmra.mxu0 %v18909_v21  ;;  %v3370_v21 = vld [vmem:[#allocation2 + $0x202] sm:$0xff] }
 0x20b   :  { %21706 = vst [vmem:[#allocation27_spill] sm:$0xff] %v20486_v49  ;;  %v6364_v15 = vadd.f32 %v20492_v29, %v6363_v19  ;;  %v6652_v2 = vpop.f32.mrf.mxu1  ;;  %3685 = vst [vmem:[#allocation3 + $0x458] sm:$0xf] %v17663_v23  ;;  %6888 = vmatprep.mubr.bf16.mxu0 %v18913_v0  ;;  %v17667_v0 = vpack.c.bf16 %v3369_v6, %v3369_v6 }
 0x20c   :  { %v6365_v1 = vpop.f32.mrf.mxu0  ;;  %3686 = vst [vmem:[#allocation3 + $0x47c] sm:$0xf] %v17664_v48 }
 0x20d   :  { %v20495_v45 = vadd.f32 %v6652_v2, %v6364_v15  ;;  %v6654_v33 = vpop.f32.mrf.mxu1  ;;  %v3368_v15 = vld [vmem:[#allocation2 + $0x1ea] sm:$0xff]  ;;  %v18919_v1 = vld [vmem:[#allocation3 + $0x6d4] ss:$36 sps:$4 sm:$0xff]   ;;  %3689 = vst [vmem:[#allocation3 + $0x4e8] sm:$0xf] %v17667_v0 }
 0x20e   :  { %v6368_v30 = vpop.f32.mrf.mxu0  ;;  %v17665_v33 = vpack.c.bf16 %v3367_v39, %v3367_v39  ;;  %v3373_v0 = vld [vmem:[#allocation2 + $0x22a] sm:$0xff] }
 0x20f   :  { %21707 = vst [vmem:[#allocation28_spill] sm:$0xff] %v20495_v45  ;;  %v6369_v49 = vadd.f32 %v20492_v29, %v6368_v30  ;;  %v6657_v25 = vpop.f32.mrf.mxu1  ;;  %7170 = vmatmul.mubr.bf16.gmra.mxu1 %v18912_v16  ;;  %v17666_v45 = vpack.c.bf16 %v3368_v15, %v3368_v15  ;;  %v18923_v16 = vld [vmem:[#allocation3 + $0x6dc] ss:$36 sps:$4 sm:$0xff]  }
 0x210   :  { %v6370_v19 = vpop.f32.mrf.mxu0  ;;  %7177 = vmatprep.mubr.bf16.mxu1 %v18916_v17  ;;  %3687 = vst [vmem:[#allocation3 + $0x4a0] sm:$0xf] %v17665_v33 }
 0x211   :  { %v20498_v57 = vadd.f32 %v6657_v25, %v6369_v49  ;;  %v6659_v42 = vpop.f32.mrf.mxu1  ;;  %v17668_v19 = vpack.c.bf16 %v3370_v21, %v3370_v21  ;;  %3688 = vst [vmem:[#allocation3 + $0x4c4] sm:$0xf] %v17666_v45 }
 0x212   :  { %v6371_v2 = vpop.f32.mrf.mxu0  ;;  %6889 = vmatmul.mubr.bf16.gmra.mxu0 %v18915_v58  ;;  %v18925_v58 = vld [vmem:[#allocation3 + $0x6d8] ss:$36 sps:$4 sm:$0xff]  }
 0x213   :  { %v6372_v30 = vadd.f32 %v20492_v29, %v6371_v2  ;;  %v6660_v52 = vpop.f32.mrf.mxu1  ;;  %v20501_v17 = vld [vmem:[#allocation3 + $0x458] ss:$36 sps:$4 sm:$0xff]   ;;  %3690 = vst [vmem:[#allocation3 + $0x50c] sm:$0xf] %v17668_v19  ;;  %6896 = vmatprep.mubr.bf16.mxu0 %v18919_v1 }
 0x214   :  { %v6373_v43 = vpop.f32.mrf.mxu0  ;;  %11089 = vst [vmem:[#allocation3 + $0x458] sm:$0xf] %v17663_v23  ;;  %11090 = vst [vmem:[#allocation3 + $0x47c] sm:$0xf] %v17664_v48  ;;  %v18921_v23 = vld [vmem:[#allocation3 + $0x6d0] ss:$36 sps:$4 sm:$0xff]  }
 0x215   :  { %v20503_v25 = vadd.f32 %v6660_v52, %v6372_v30  ;;  %v6662_v49 = vpop.f32.mrf.mxu1  ;;  %v18990_v43 = vld [vmem:[%s21679_s3 + $0x8] sm:$0xff]   ;;  %v3371_v48 = vld [vmem:[#allocation2 + $0x212] sm:$0xff]  ;;  %v3372_v2 = vld [vmem:[#allocation2 + $0x21a] sm:$0xff] }
 0x216   :  { %v6376_v42 = vpop.f32.mrf.mxu0  ;;  %13511 = vmatpush1.bf16.msra.mxu1 %v18990_v43  ;;  %v17669_v21 = vpack.c.bf16 %v3371_v48, %v3371_v48  ;;  %v17670_v30 = vpack.c.bf16 %v3372_v2, %v3372_v2  ;;  %v18926_v49 = vld [vmem:[#allocation3 + $0x71c] ss:$36 sps:$4 sm:$0xff]  }
 0x217   :  { %v6377_v39 = vadd.f32 %v20492_v29, %v6376_v42  ;;  %v6665_v15 = vpop.f32.mrf.mxu1  ;;  %7178 = vmatmul.mubr.bf16.gmra.mxu1 %v18918_v41  ;;  %v3374_v41 = vld [vmem:[#allocation2 + $0x232] sm:$0xff]  ;;  %13512 = vmatprep.subr.bf16.mxu1 %v21692_v3 }
 0x218   :  { %v6378_v6 = vpop.f32.mrf.mxu0  ;;  %7185 = vmatprep.mubr.bf16.mxu1 %v18923_v16  ;;  %v17671_v16 = vpack.c.bf16 %v3373_v0, %v3373_v0  ;;  %v17672_v42 = vpack.c.bf16 %v3374_v41, %v3374_v41  ;;  %3691 = vst [vmem:[#allocation3 + $0x530] sm:$0xf] %v17669_v21  ;;  %3692 = vst [vmem:[#allocation3 + $0x554] sm:$0xf] %v17670_v30  ;;  %v18928_v41 = vld [vmem:[#allocation3 + $0x718] ss:$36 sps:$4 sm:$0xff]  }
 0x219   :  { %v20509_v52 = vadd.f32 %v6665_v15, %v6377_v39  ;;  %v6667_v45 = vpop.f32.mrf.mxu1  ;;  %v18929_v15 = vld [vmem:[#allocation3 + $0x724] ss:$36 sps:$4 sm:$0xff]  }
 0x21a   :  { %v6379_v33 = vpop.f32.mrf.mxu0  ;;  %3693 = vst [vmem:[#allocation3 + $0x578] sm:$0xf] %v17671_v16  ;;  %3694 = vst [vmem:[#allocation3 + $0x59c] sm:$0xf] %v17672_v42  ;;  %6897 = vmatmul.mubr.bf16.gmra.mxu0 %v18921_v23  ;;  %v3375_v21 = vld [vmem:[#allocation2 + $0x242] sm:$0xff]  ;;  %v3376_v30 = vld [vmem:[#allocation2 + $0x24a] sm:$0xff] }
 0x21b   :  { %v6380_v1 = vadd.f32 %v20492_v29, %v6379_v33  ;;  %v6668_v19 = vpop.f32.mrf.mxu1  ;;  %6904 = vmatprep.mubr.bf16.mxu0 %v18926_v49  ;;  %v17674_v16 = vpack.c.bf16 %v3376_v30, %v3376_v30  ;;  %v3377_v42 = vld [vmem:[#allocation2 + $0x25a] sm:$0xff] }
 0x21c   :  { %v6381_v39 = vpop.f32.mrf.mxu0 }
 0x21d   :  { %v20513_v43 = vadd.f32 %v6668_v19, %v6380_v1  ;;  %v6670_v6 = vpop.f32.mrf.mxu1  ;;  %v18931_v19 = vld [vmem:[#allocation3 + $0x720] ss:$36 sps:$4 sm:$0xff]   ;;  %v17673_v39 = vpack.c.bf16 %v3375_v21, %v3375_v21  ;;  %3696 = vst [vmem:[#allocation3 + $0x5e4] sm:$0xf] %v17674_v16 }
 0x21e   :  { %v6706_v45 = vpop.f32.mrf.mxu0  ;;  %v3378_v6 = vld [vmem:[#allocation2 + $0x262] sm:$0xff] }
 0x21f   :  { %v6707_v48 = vadd.f32 %v6706_v45, %v20242_v26  ;;  %v6995_v2 = vpop.f32.mrf.mxu1  ;;  %7186 = vmatmul.mubr.bf16.gmra.mxu1 %v18925_v58  ;;  %v18932_v45 = vld [vmem:[#allocation3 + $0x764] ss:$36 sps:$4 sm:$0xff]   ;;  %v17675_v58 = vpack.c.bf16 %v3377_v42, %v3377_v42  ;;  %v17676_v49 = vpack.c.bf16 %v3378_v6, %v3378_v6  ;;  %3695 = vst [vmem:[#allocation3 + $0x5c0] sm:$0xf] %v17673_v39  ;;  %v3379_v6 = vld [vmem:[#allocation2 + $0x272] sm:$0xff] }
 0x220   :  { %v6708_v29 = vpop.f32.mrf.mxu0  ;;  %7193 = vmatprep.mubr.bf16.mxu1 %v18929_v15  ;;  %v18935_v15 = vld [vmem:[#allocation3 + $0x76c] ss:$36 sps:$4 sm:$0xff]   ;;  %v18934_v42 = vld [vmem:[#allocation3 + $0x760] ss:$36 sps:$4 sm:$0xff]  }
 0x221   :  { %v20516_v33 = vadd.f32 %v6995_v2, %v6707_v48  ;;  %v6997_v0 = vpop.f32.mrf.mxu1  ;;  %3697 = vst [vmem:[#allocation3 + $0x608] sm:$0xf] %v17675_v58  ;;  %3698 = vst [vmem:[#allocation3 + $0x62c] sm:$0xf] %v17676_v49  ;;  %v17677_v58 = vpack.c.bf16 %v3379_v6, %v3379_v6  ;;  %v3381_v49 = vld [vmem:[#allocation2 + $0x28a] sm:$0xff] }
 0x222   :  { %v6709_v1 = vpop.f32.mrf.mxu0  ;;  %6905 = vmatmul.mubr.bf16.gmra.mxu0 %v18928_v41  ;;  %v18937_v41 = vld [vmem:[#allocation3 + $0x768] ss:$36 sps:$4 sm:$0xff]  }
 0x223   :  { %v6710_v23 = vadd.f32 %v6709_v1, %v20245_v53  ;;  %v6998_v26 = vpop.f32.mrf.mxu1  ;;  %6912 = vmatprep.mubr.bf16.mxu0 %v18932_v45  ;;  %v18995_v53 = vld [vmem:[%s21679_s3] sm:$0xff]   ;;  %3699 = vst [vmem:[#allocation3 + $0x650] sm:$0xf] %v17677_v58 }
 0x224   :  { %v6711_v29 = vpop.f32.mrf.mxu0  ;;  %13513 = vmatpush1.bf16.msra.mxu1 %v18995_v53  ;;  %v3383_v58 = vld [vmem:[#allocation2 + $0x2a2] sm:$0xff] }
 0x225   :  { %v20519_v48 = vadd.f32 %v6998_v26, %v6710_v23  ;;  %v7000_v2 = vpop.f32.mrf.mxu1  ;;  %v3380_v23 = vld [vmem:[#allocation2 + $0x27a] sm:$0xff]  ;;  %13514 = vmatprep.subr.bf16.mxu1 %v21692_v3 }
 0x226   :  { %v6714_v0 = vpop.f32.mrf.mxu0  ;;  %v18938_v2 = vld [vmem:[#allocation3 + $0x7ac] ss:$36 sps:$4 sm:$0xff]  }
 0x227   :  { %v6715_v21 = vadd.f32 %v6714_v0, %v20249_v10  ;;  %v7003_v30 = vpop.f32.mrf.mxu1  ;;  %7194 = vmatmul.mubr.bf16.gmra.mxu1 %v18931_v19  ;;  %v17678_v10 = vpack.c.bf16 %v3380_v23, %v3380_v23  ;;  %v3382_v19 = vld [vmem:[#allocation2 + $0x292] sm:$0xff] }
 0x228   :  { %v6716_v1 = vpop.f32.mrf.mxu0  ;;  %7201 = vmatprep.mubr.bf16.mxu1 %v18935_v15  ;;  %v17679_v15 = vpack.c.bf16 %v3381_v49, %v3381_v49  ;;  %v17680_v0 = vpack.c.bf16 %v3382_v19, %v3382_v19  ;;  %v18940_v19 = vld [vmem:[#allocation3 + $0x7a8] ss:$36 sps:$4 sm:$0xff]  }
 0x229   :  { %v20525_v39 = vadd.f32 %v7003_v30, %v6715_v21  ;;  %v7005_v16 = vpop.f32.mrf.mxu1  ;;  %v18941_v30 = vld [vmem:[#allocation3 + $0x7b4] ss:$36 sps:$4 sm:$0xff]   ;;  %3700 = vst [vmem:[#allocation3 + $0x674] sm:$0xf] %v17678_v10  ;;  %v3384_v10 = vld [vmem:[#allocation2 + $0x2aa] sm:$0xff] }
 0x22a   :  { %v6717_v26 = vpop.f32.mrf.mxu0  ;;  %3701 = vst [vmem:[#allocation3 + $0x698] sm:$0xf] %v17679_v15  ;;  %3702 = vst [vmem:[#allocation3 + $0x6bc] sm:$0xf] %v17680_v0  ;;  %6913 = vmatmul.mubr.bf16.gmra.mxu0 %v18934_v42  ;;  %v17682_v15 = vpack.c.bf16 %v3384_v10, %v3384_v10  ;;  %v3385_v0 = vld [vmem:[#allocation2 + $0x2ba] sm:$0xff] }
 0x22b   :  { %v6718_v45 = vadd.f32 %v6717_v26, %v20252_v18  ;;  %v7006_v29 = vpop.f32.mrf.mxu1  ;;  %6920 = vmatprep.mubr.bf16.mxu0 %v18938_v2 }
 0x22c   :  { %v6719_v21 = vpop.f32.mrf.mxu0  ;;  %3704 = vst [vmem:[#allocation3 + $0x704] sm:$0xf] %v17682_v15 }
 0x22d   :  { %v20529_v53 = vadd.f32 %v7006_v29, %v6718_v45  ;;  %v7008_v1 = vpop.f32.mrf.mxu1  ;;  %v18944_v29 = vld [vmem:[#allocation3 + $0x7b0] ss:$36 sps:$4 sm:$0xff]   ;;  %v17681_v21 = vpack.c.bf16 %v3383_v58, %v3383_v58 }
 0x22e   :  { %v6722_v16 = vpop.f32.mrf.mxu0  ;;  %v3386_v1 = vld [vmem:[#allocation2 + $0x2c2] sm:$0xff] }
 0x22f   :  { %v6723_v6 = vadd.f32 %v6722_v16, %v20255_v20  ;;  %v7011_v23 = vpop.f32.mrf.mxu1  ;;  %7202 = vmatmul.mubr.bf16.gmra.mxu1 %v18937_v41  ;;  %v18945_v16 = vld [vmem:[#allocation3 + $0x7f4] ss:$36 sps:$4 sm:$0xff]   ;;  %v17683_v41 = vpack.c.bf16 %v3385_v0, %v3385_v0  ;;  %v17684_v2 = vpack.c.bf16 %v3386_v1, %v3386_v1  ;;  %3703 = vst [vmem:[#allocation3 + $0x6e0] sm:$0xf] %v17681_v21 }
 0x230   :  { %v6724_v18 = vpop.f32.mrf.mxu0  ;;  %7209 = vmatprep.mubr.bf16.mxu1 %v18941_v30  ;;  %v18949_v30 = vld [vmem:[#allocation3 + $0x7fc] ss:$36 sps:$4 sm:$0xff]   ;;  %v18947_v0 = vld [vmem:[#allocation3 + $0x7f0] ss:$36 sps:$4 sm:$0xff]  }
 0x231   :  { %v20532_v26 = vadd.f32 %v7011_v23, %v6723_v6  ;;  %v7013_v49 = vpop.f32.mrf.mxu1  ;;  %3705 = vst [vmem:[#allocation3 + $0x728] sm:$0xf] %v17683_v41  ;;  %3706 = vst [vmem:[#allocation3 + $0x74c] sm:$0xf] %v17684_v2  ;;  %v3387_v1 = vld [vmem:[#allocation2 + $0x2d2] sm:$0xff]  ;;  %v3389_v2 = vld [vmem:[#allocation2 + $0x2ea] sm:$0xff] }
 0x232   :  { %v6725_v45 = vpop.f32.mrf.mxu0  ;;  %6921 = vmatmul.mubr.bf16.gmra.mxu0 %v18940_v19  ;;  %v18951_v19 = vld [vmem:[#allocation3 + $0x7f8] ss:$36 sps:$4 sm:$0xff]   ;;  %v17685_v41 = vpack.c.bf16 %v3387_v1, %v3387_v1 }
 0x233   :  { %v6726_v42 = vadd.f32 %v6725_v45, %v20258_v50  ;;  %v7014_v20 = vpop.f32.mrf.mxu1  ;;  %6928 = vmatprep.mubr.bf16.mxu0 %v18945_v16  ;;  %v19000_v50 = vld [vmem:[%s21679_s3 + $0x78] sm:$0xff]  }
 0x234   :  { %v6727_v18 = vpop.f32.mrf.mxu0  ;;  %13515 = vmatpush2.bf16.msra.mxu1 %v19000_v50  ;;  %3707 = vst [vmem:[#allocation3 + $0x770] sm:$0xf] %v17685_v41  ;;  %v3391_v41 = vld [vmem:[#allocation2 + $0x302] sm:$0xff] }
 0x235   :  { %v20535_v6 = vadd.f32 %v7014_v20, %v6726_v42  ;;  %v7016_v23 = vpop.f32.mrf.mxu1  ;;  %v3388_v42 = vld [vmem:[#allocation2 + $0x2da] sm:$0xff]  ;;  %13516 = vmatprep.subr.bf16.mxu1 %v21692_v3 }
 0x236   :  { %v6730_v49 = vpop.f32.mrf.mxu0  ;;  %v18952_v23 = vld [vmem:[#allocation3 + $0x83c] ss:$36 sps:$4 sm:$0xff]  }
 0x237   :  { %v6731_v58 = vadd.f32 %v6730_v49, %v20261_v22  ;;  %v7019_v10 = vpop.f32.mrf.mxu1  ;;  %7210 = vmatmul.mubr.bf16.gmra.mxu1 %v18944_v29  ;;  %v17686_v22 = vpack.c.bf16 %v3388_v42, %v3388_v42  ;;  %v3390_v29 = vld [vmem:[#allocation2 + $0x2f2] sm:$0xff] }
 0x238   :  { %v6732_v45 = vpop.f32.mrf.mxu0  ;;  %7217 = vmatprep.mubr.bf16.mxu1 %v18949_v30  ;;  %v17687_v30 = vpack.c.bf16 %v3389_v2, %v3389_v2  ;;  %v17688_v49 = vpack.c.bf16 %v3390_v29, %v3390_v29  ;;  %v18954_v29 = vld [vmem:[#allocation3 + $0x838] ss:$36 sps:$4 sm:$0xff]  }
 0x239   :  { %v20541_v21 = vadd.f32 %v7019_v10, %v6731_v58  ;;  %v7021_v15 = vpop.f32.mrf.mxu1  ;;  %v18955_v10 = vld [vmem:[#allocation3 + $0x844] ss:$36 sps:$4 sm:$0xff]   ;;  %3708 = vst [vmem:[#allocation3 + $0x794] sm:$0xf] %v17686_v22 }
 0x23a   :  { %v6733_v20 = vpop.f32.mrf.mxu0  ;;  %3709 = vst [vmem:[#allocation3 + $0x7b8] sm:$0xf] %v17687_v30  ;;  %3710 = vst [vmem:[#allocation3 + $0x7dc] sm:$0xf] %v17688_v49  ;;  %6929 = vmatmul.mubr.bf16.gmra.mxu0 %v18947_v0  ;;  %v3392_v22 = vld [vmem:[#allocation2 + $0x30a] sm:$0xff]  ;;  %v3393_v49 = vld [vmem:[#allocation2 + $0x31a] sm:$0xff] }
 0x23b   :  { %v6734_v16 = vadd.f32 %v6733_v20, %v20264_v51  ;;  %v7022_v18 = vpop.f32.mrf.mxu1  ;;  %6936 = vmatprep.mubr.bf16.mxu0 %v18952_v23  ;;  %v17690_v30 = vpack.c.bf16 %v3392_v22, %v3392_v22 }
 0x23c   :  { %v6735_v58 = vpop.f32.mrf.mxu0 }
 0x23d   :  { %v20545_v50 = vadd.f32 %v7022_v18, %v6734_v16  ;;  %v7024_v45 = vpop.f32.mrf.mxu1  ;;  %v18958_v18 = vld [vmem:[#allocation3 + $0x840] ss:$36 sps:$4 sm:$0xff]   ;;  %v17689_v58 = vpack.c.bf16 %v3391_v41, %v3391_v41  ;;  %3712 = vst [vmem:[#allocation3 + $0x824] sm:$0xf] %v17690_v30 }
 0x23e   :  { %v6738_v15 = vpop.f32.mrf.mxu0  ;;  %v3394_v45 = vld [vmem:[#allocation2 + $0x322] sm:$0xff] }
 0x23f   :  { %v6739_v1 = vadd.f32 %v6738_v15, %v20267_v56  ;;  %v7027_v42 = vpop.f32.mrf.mxu1  ;;  %7218 = vmatmul.mubr.bf16.gmra.mxu1 %v18951_v19  ;;  %v18959_v15 = vld [vmem:[#allocation3 + $0x884] ss:$36 sps:$4 sm:$0xff]   ;;  %v17691_v19 = vpack.c.bf16 %v3393_v49, %v3393_v49  ;;  %v17692_v23 = vpack.c.bf16 %v3394_v45, %v3394_v45  ;;  %3711 = vst [vmem:[#allocation3 + $0x800] sm:$0xf] %v17689_v58  ;;  %v3395_v45 = vld [vmem:[#allocation2 + $0x332] sm:$0xff] }
 0x240   :  { %v6740_v51 = vpop.f32.mrf.mxu0  ;;  %7225 = vmatprep.mubr.bf16.mxu1 %v18955_v10  ;;  %v18962_v10 = vld [vmem:[#allocation3 + $0x88c] ss:$36 sps:$4 sm:$0xff]   ;;  %v18961_v49 = vld [vmem:[#allocation3 + $0x880] ss:$36 sps:$4 sm:$0xff]  }
 0x241   :  { %v20548_v20 = vadd.f32 %v7027_v42, %v6739_v1  ;;  %v7029_v2 = vpop.f32.mrf.mxu1  ;;  %3713 = vst [vmem:[#allocation3 + $0x848] sm:$0xf] %v17691_v19  ;;  %3714 = vst [vmem:[#allocation3 + $0x86c] sm:$0xf] %v17692_v23  ;;  %v17693_v19 = vpack.c.bf16 %v3395_v45, %v3395_v45  ;;  %v3397_v23 = vld [vmem:[#allocation2 + $0x34a] sm:$0xff] }
 0x242   :  { %v6741_v16 = vpop.f32.mrf.mxu0  ;;  %6937 = vmatmul.mubr.bf16.gmra.mxu0 %v18954_v29  ;;  %v18964_v29 = vld [vmem:[#allocation3 + $0x888] ss:$36 sps:$4 sm:$0xff]  }
 0x243   :  { %v6742_v0 = vadd.f32 %v6741_v16, %v20270_v5  ;;  %v7030_v56 = vpop.f32.mrf.mxu1  ;;  %6944 = vmatprep.mubr.bf16.mxu0 %v18959_v15  ;;  %v19005_v5 = vld [vmem:[%s21679_s3 + $0x70] sm:$0xff]   ;;  %3715 = vst [vmem:[#allocation3 + $0x890] sm:$0xf] %v17693_v19 }
 0x244   :  { %v6743_v51 = vpop.f32.mrf.mxu0  ;;  %13517 = vmatpush2.bf16.msra.mxu1 %v19005_v5 }
 0x245   :  { %v20551_v1 = vadd.f32 %v7030_v56, %v6742_v0  ;;  %v7032_v42 = vpop.f32.mrf.mxu1  ;;  %v3396_v0 = vld [vmem:[#allocation2 + $0x33a] sm:$0xff]  ;;  %13518 = vmatprep.subr.bf16.mxu1 %v21692_v3 }
 0x246   :  { %v6746_v2 = vpop.f32.mrf.mxu0  ;;  %v18965_v42 = vld [vmem:[#allocation3 + $0x8cc] ss:$36 sps:$4 sm:$0xff]  }
 0x247   :  { %v6747_v41 = vadd.f32 %v6746_v2, %v20273_v14  ;;  %v7035_v22 = vpop.f32.mrf.mxu1  ;;  %7226 = vmatmul.mubr.bf16.gmra.mxu1 %v18958_v18  ;;  %v17694_v14 = vpack.c.bf16 %v3396_v0, %v3396_v0  ;;  %v3398_v18 = vld [vmem:[#allocation2 + $0x352] sm:$0xff] }
 0x248   :  { %v6748_v16 = vpop.f32.mrf.mxu0  ;;  %7233 = vmatprep.mubr.bf16.mxu1 %v18962_v10  ;;  %v17695_v10 = vpack.c.bf16 %v3397_v23, %v3397_v23  ;;  %v17696_v2 = vpack.c.bf16 %v3398_v18, %v3398_v18  ;;  %v4032_v0 = vld [vmem:[#allocation3 + $0x8d0] sm:$0xff]  ;;  %v18967_v18 = vld [vmem:[#allocation3 + $0x8c8] ss:$36 sps:$4 sm:$0xff]  }
 0x249   :  { %v20557_v58 = vadd.f32 %v7035_v22, %v6747_v41  ;;  %v7037_v30 = vpop.f32.mrf.mxu1  ;;  %3716 = vst [vmem:[#allocation3 + $0x8b4] sm:$0xf] %v17694_v14 }
 0x24a   :  { %v6749_v56 = vpop.f32.mrf.mxu0  ;;  %3717 = vst [vmem:[#allocation3 + $0x8d8] sm:$0xf] %v17695_v10  ;;  %3718 = vst [vmem:[#allocation3 + $0x8fc] sm:$0xf] %v17696_v2  ;;  %6945 = vmatmul.mubr.bf16.gmra.mxu0 %v18961_v49  ;;  %v18971_v49 = vld [vmem:[#allocation3 + $0x20] ss:$36 sps:$4 sm:$0xff]  }
 0x24b   :  { %v6750_v15 = vadd.f32 %v6749_v56, %v20278_v31  ;;  %v7038_v51 = vpop.f32.mrf.mxu1  ;;  %6952 = vmatprep.mubr.bf16.mxu0 %v18965_v42  ;;  %v4037_v56 = vld [vmem:[#allocation3 + $0x8f4] sm:$0xff] }
 0x24c   :  { %v6751_v41 = vpop.f32.mrf.mxu0 }
 0x24d   :  { %v20561_v22 = vadd.f32 %v7038_v51, %v6750_v15  ;;  %v7040_v5 = vpop.f32.mrf.mxu1  ;;  %v16105_v41 = vcombine.low %v4032_v0, %v4037_v56 }
 0x24e   :  { %v6754_v16 = vpop.f32.mrf.mxu0 }
 0x24f   :  { %v6755_v30 = vadd.f32 %v6754_v16, %v20283_v9  ;;  %v7043_v45 = vpop.f32.mrf.mxu1  ;;  %7234 = vmatmul.mubr.bf16.gmra.mxu1 %v18964_v29 }
 0x250   :  { %v6756_v31 = vpop.f32.mrf.mxu0  ;;  %7241 = vmatprep.mubr.bf16.mxu1 %v20432_v62 }
 0x251   :  { %v20565_v23 = vadd.f32 %v7043_v45, %v6755_v30  ;;  %v7045_v19 = vpop.f32.mrf.mxu1  ;;  %v20568_v9 = vld [vmem:[#allocation3 + $0x8d8] ss:$36 sps:$4 sm:$0xff]  }
 0x252   :  { %v6757_v14 = vpop.f32.mrf.mxu0  ;;  %11121 = vst [vmem:[#allocation3 + $0x8d8] sm:$0xf] %v17695_v10  ;;  %11122 = vst [vmem:[#allocation3 + $0x8fc] sm:$0xf] %v17696_v2  ;;  %6953 = vmatmul.mubr.bf16.gmra.mxu0 %v18967_v18  ;;  %v18972_v19 = vld [vmem:[#allocation3 + $0x68] ss:$36 sps:$4 sm:$0xff]  }
 0x253   :  { %v6758_v15 = vadd.f32 %v6757_v14, %v20286_v34  ;;  %v7046_v51 = vpop.f32.mrf.mxu1  ;;  %18369 = vmatprep.mubr.bf16.mxu0 %v18971_v49  ;;  %v19010_v34 = vld [vmem:[%s21679_s3 + $0x68] sm:$0xff]  }
 0x254   :  { %v6759_v5 = vpop.f32.mrf.mxu0  ;;  %13519 = vmatpush2.bf16.msra.mxu1 %v19010_v34 }
 0x255   :  { %v20570_v29 = vadd.f32 %v7046_v51, %v6758_v15  ;;  %v7048_v42 = vpop.f32.mrf.mxu1  ;;  %13520 = vmatprep.subr.bf16.mxu1 %v21692_v3 }
 0x256   :  { %v6762_v16 = vpop.f32.mrf.mxu0 }
 0x257   :  { %v6763_v62 = vadd.f32 %v6762_v16, %v20289_v40  ;;  %v7051_v30 = vpop.f32.mrf.mxu1  ;;  %7242 = vmatmul.mubr.bf16.gmra.mxu1 %v16105_v41  ;;  %v18973_v40 = vld [vmem:[#allocation3 + $0xb0] ss:$36 sps:$4 sm:$0xff]  }
 0x258   :  { %v6764_v45 = vpop.f32.mrf.mxu0 }
 0x259   :  { %v20576_v31 = vadd.f32 %v7051_v30, %v6763_v62  ;;  %v7053_v0 = vpop.f32.mrf.mxu1  ;;  %v18974_v30 = vld [vmem:[#allocation3 + $0xf8] ss:$36 sps:$4 sm:$0xff]   ;;  %v18976_v45 = vld [vmem:[#allocation3 + $0x140] ss:$36 sps:$4 sm:$0xff]  }
 0x25a   :  { %v6765_v56 = vpop.f32.mrf.mxu0  ;;  %18370 = vmatmul.mubr.bf16.vlgmr.msra.gmra.mxu0 %v18972_v19 }
 0x25b   :  { %v6766_v10 = vadd.f32 %v6765_v56, %v20296_v54  ;;  %v7054_v2 = vpop.f32.mrf.mxu1  ;;  %18373 = vmatprep.mubr.bf16.mxu0 %v18973_v40  ;;  %v19011_v40 = vld [vmem:[%s21679_s3 + $0x60] sm:$0xff]  }
 0x25c   :  { %v6767_v14 = vpop.f32.mrf.mxu0  ;;  %13521 = vmatpush2.bf16.msra.mxu1 %v19011_v40 }
 0x25d   :  { %v20580_v18 = vadd.f32 %v7054_v2, %v6766_v10  ;;  %v7056_v15 = vpop.f32.mrf.mxu1  ;;  %13522 = vmatprep.subr.bf16.mxu1 %v21692_v3 }
 0x25e   :  { %v6770_v51 = vpop.f32.mrf.mxu0 }
 0x25f   :  { %v6771_v41 = vadd.f32 %v6770_v51, %v20308_v59  ;;  %v7059_v49 = vpop.f32.mrf.mxu1 }
 0x260   :  { %v6772_v5 = vpop.f32.mrf.mxu0 }
 0x261   :  { %v20583_v42 = vadd.f32 %v7059_v49, %v6771_v41  ;;  %v7061_v16 = vpop.f32.mrf.mxu1  ;;  %v18977_v41 = vld [vmem:[#allocation3 + $0x188] ss:$36 sps:$4 sm:$0xff]  }
 0x262   :  { %v6773_v62 = vpop.f32.mrf.mxu0  ;;  %18374 = vmatmul.mubr.bf16.gmra.mxu0 %v18974_v30  ;;  %v18978_v16 = vld [vmem:[#allocation3 + $0x1d0] ss:$36 sps:$4 sm:$0xff]  }
 0x263   :  { %v6774_v54 = vadd.f32 %v6773_v62, %v20316_v55  ;;  %v7062_v34 = vpop.f32.mrf.mxu1  ;;  %18377 = vmatprep.mubr.bf16.mxu0 %v18976_v45 }
 0x264   :  { %v6775_v0 = vpop.f32.mrf.mxu0 }
 0x265   :  { %v20586_v56 = vadd.f32 %v7062_v34, %v6774_v54  ;;  %v7064_v10 = vpop.f32.mrf.mxu1 }
 0x266   :  { %v6778_v2 = vpop.f32.mrf.mxu0 }
 0x267   :  { %v6779_v59 = vadd.f32 %v6778_v2, %v20325_v12  ;;  %v7067_v19 = vpop.f32.mrf.mxu1 }
 0x268   :  { %v6780_v14 = vpop.f32.mrf.mxu0 }
 0x269   :  { %v20592_v15 = vadd.f32 %v7067_v19, %v6779_v59  ;;  %v7069_v55 = vpop.f32.mrf.mxu1  ;;  %v18979_v19 = vld [vmem:[#allocation3 + $0x218] ss:$36 sps:$4 sm:$0xff]   ;;  %v18981_v14 = vld [vmem:[#allocation3 + $0x260] ss:$36 sps:$4 sm:$0xff]  }
 0x26a   :  { %v6781_v51 = vpop.f32.mrf.mxu0  ;;  %18378 = vmatmul.mubr.bf16.gmra.mxu0 %v18977_v41 }
 0x26b   :  { %v6782_v49 = vadd.f32 %v6781_v51, %v20328_v27  ;;  %v7070_v5 = vpop.f32.mrf.mxu1  ;;  %18381 = vmatprep.mubr.bf16.mxu0 %v18978_v16  ;;  %v19012_v16 = vld [vmem:[%s21679_s3 + $0x58] sm:$0xff]  }
 0x26c   :  { %v6783_v12 = vpop.f32.mrf.mxu0  ;;  %13523 = vmatpush2.bf16.msra.mxu1 %v19012_v16  ;;  %v18984_v16 = vld [vmem:[#allocation3 + $0x338] ss:$36 sps:$4 sm:$0xff]  }
 0x26d   :  { %v20596_v62 = vadd.f32 %v7070_v5, %v6782_v49  ;;  %v7072_v30 = vpop.f32.mrf.mxu1  ;;  %13524 = vmatprep.subr.bf16.mxu1 %v21692_v3 }
 0x26e   :  { %v6786_v54 = vpop.f32.mrf.mxu0 }
 0x26f   :  { %v6787_v34 = vadd.f32 %v6786_v54, %v20331_v46  ;;  %v7075_v45 = vpop.f32.mrf.mxu1 }
 0x270   :  { %v6788_v0 = vpop.f32.mrf.mxu0 }
 0x271   :  { %v20599_v10 = vadd.f32 %v7075_v45, %v6787_v34  ;;  %v7077_v2 = vpop.f32.mrf.mxu1  ;;  %v18982_v34 = vld [vmem:[#allocation3 + $0x2a8] ss:$36 sps:$4 sm:$0xff]  }
 0x272   :  { %v6789_v59 = vpop.f32.mrf.mxu0  ;;  %18382 = vmatmul.mubr.bf16.gmra.mxu0 %v18979_v19  ;;  %v18983_v2 = vld [vmem:[#allocation3 + $0x2f0] ss:$36 sps:$4 sm:$0xff]  }
 0x273   :  { %v6790_v27 = vadd.f32 %v6789_v59, %v20334_v63  ;;  %v7078_v40 = vpop.f32.mrf.mxu1  ;;  %18385 = vmatprep.mubr.bf16.mxu0 %v18981_v14  ;;  %v19013_v59 = vld [vmem:[%s21679_s3 + $0xb8] sm:$0xff]  }
 0x274   :  { %v6791_v55 = vpop.f32.mrf.mxu0  ;;  %13788 = vmatpush1.bf16.msra.mxu0 %v19013_v59 }
 0x275   :  { %v20602_v51 = vadd.f32 %v7078_v40, %v6790_v27  ;;  %v7080_v49 = vpop.f32.mrf.mxu1  ;;  %13789 = vmatprep.subr.bf16.mxu0 %v21692_v3 }
 0x276   :  { %v6794_v5 = vpop.f32.mrf.mxu0 }
 0x277   :  { %v6795_v46 = vadd.f32 %v6794_v5, %v20337_v28  ;;  %v7083_v41 = vpop.f32.mrf.mxu1 }
 0x278   :  { %v6796_v12 = vpop.f32.mrf.mxu0 }
 0x279   :  { %v20608_v30 = vadd.f32 %v7083_v41, %v6795_v46  ;;  %v7085_v63 = vpop.f32.mrf.mxu1 }
 0x27a   :  { %v6797_v54 = vpop.f32.mrf.mxu0  ;;  %18386 = vmatmul.mubr.bf16.gmra.mxu0 %v18982_v34  ;;  %v19016_v34 = vld [vmem:[%s21679_s3 + $0xa8] sm:$0xff]  }
 0x27b   :  { %v6798_v45 = vadd.f32 %v6797_v54, %v20340_v60  ;;  %v7086_v0 = vpop.f32.mrf.mxu1  ;;  %18389 = vmatprep.mubr.bf16.mxu0 %v18983_v2  ;;  %v19014_v60 = vld [vmem:[%s21679_s3 + $0xb0] sm:$0xff]   ;;  %v18986_v54 = vld [vmem:[#allocation3 + $0x380] ss:$36 sps:$4 sm:$0xff]  }
 0x27c   :  { %v6799_v28 = vpop.f32.mrf.mxu0  ;;  %13790 = vmatpush1.bf16.msra.mxu0 %v19014_v60 }
 0x27d   :  { %v20615_v19 = vadd.f32 %v7086_v0, %v6798_v45  ;;  %v7088_v27 = vpop.f32.mrf.mxu1  ;;  %13791 = vmatprep.subr.bf16.mxu0 %v21692_v3 }
 0x27e   :  { %v6802_v40 = vpop.f32.mrf.mxu0 }
 0x27f   :  { %v6803_v14 = vadd.f32 %v6802_v40, %v20346_v13  ;;  %v7091_v55 = vpop.f32.mrf.mxu1  ;;  %v19017_v40 = vld [vmem:[%s21679_s3 + $0xa0] sm:$0xff]  }
 0x280   :  { %v6804_v49 = vpop.f32.mrf.mxu0  ;;  %13792 = vmatpush1.bf16.msra.mxu0 %v19016_v34 }
 0x281   :  { %v20622_v5 = vadd.f32 %v7091_v55, %v6803_v14  ;;  %v7093_v46 = vpop.f32.mrf.mxu1  ;;  %13793 = vmatprep.subr.bf16.mxu0 %v21692_v3 }
 0x282   :  { %v6805_v41 = vpop.f32.mrf.mxu0  ;;  %18390 = vmatmul.mubr.bf16.gmra.mxu0 %v18984_v16 }
 0x283   :  { %v6806_v12 = vadd.f32 %v6805_v41, %v20349_v37  ;;  %v7094_v63 = vpop.f32.mrf.mxu1  ;;  %18393 = vmatprep.mubr.bf16.mxu0 %v18986_v54  ;;  %v19015_v37 = vld [vmem:[%s21679_s3 + $0x50] sm:$0xff]  }
 0x284   :  { %v6807_v13 = vpop.f32.mrf.mxu0  ;;  %13525 = vmatpush2.bf16.msra.mxu1 %v19015_v37  ;;  %v18988_v41 = vld [vmem:[#allocation3 + $0x410] ss:$36 sps:$4 sm:$0xff]   ;;  %13794 = vmatpush1.bf16.msra.mxu0 %v19017_v40 }
 0x285   :  { %v20629_v45 = vadd.f32 %v7094_v63, %v6806_v12  ;;  %v7096_v0 = vpop.f32.mrf.mxu1  ;;  %13526 = vmatprep.subr.bf16.mxu1 %v21692_v3  ;;  %13795 = vmatprep.subr.bf16.mxu0 %v21692_v3  ;;  %v19018_v12 = vld [vmem:[%s21679_s3 + $0x98] sm:$0xff]  }
 0x286   :  { %v6810_v2 = vpop.f32.mrf.mxu0 }
 0x287   :  { %v6811_v28 = vadd.f32 %v6810_v2, %v20352_v61  ;;  %v7099_v59 = vpop.f32.mrf.mxu1  ;;  %v18987_v61 = vld [vmem:[#allocation3 + $0x3c8] ss:$36 sps:$4 sm:$0xff]   ;;  %v19019_v2 = vld [vmem:[%s21679_s3 + $0x90] sm:$0xff]  }
 0x288   :  { %v6812_v27 = vpop.f32.mrf.mxu0  ;;  %13796 = vmatpush1.bf16.msra.mxu0 %v19018_v12 }
 0x289   :  { %v20639_v14 = vadd.f32 %v7099_v59, %v6811_v28  ;;  %v7101_v55 = vpop.f32.mrf.mxu1  ;;  %13797 = vmatprep.subr.bf16.mxu0 %v21692_v3 }
 0x28a   :  { %v6813_v49 = vpop.f32.mrf.mxu0  ;;  %18394 = vmatmul.mubr.bf16.gmra.mxu0 %v18987_v61  ;;  %v18991_v55 = vld [vmem:[#allocation3 + $0x4a0] ss:$36 sps:$4 sm:$0xff]  }
 0x28b   :  { %v6814_v60 = vadd.f32 %v6813_v49, %v20355_v24  ;;  %v7102_v46 = vpop.f32.mrf.mxu1  ;;  %18397 = vmatprep.mubr.bf16.mxu0 %v18988_v41  ;;  %v19021_v49 = vld [vmem:[%s21679_s3 + $0x88] sm:$0xff]  }
 0x28c   :  { %v6815_v16 = vpop.f32.mrf.mxu0  ;;  %13798 = vmatpush1.bf16.msra.mxu0 %v19019_v2  ;;  %v18993_v2 = vld [vmem:[#allocation3 + $0x530] ss:$36 sps:$4 sm:$0xff]  }
 0x28d   :  { %v20647_v63 = vadd.f32 %v7102_v46, %v6814_v60  ;;  %v7104_v54 = vpop.f32.mrf.mxu1  ;;  %13799 = vmatprep.subr.bf16.mxu0 %v21692_v3 }
 0x28e   :  { %v6818_v13 = vpop.f32.mrf.mxu0  ;;  %v19022_v54 = vld [vmem:[%s21679_s3 + $0x80] sm:$0xff]  }
 0x28f   :  { %v6819_v34 = vadd.f32 %v6818_v13, %v20358_v47  ;;  %v7107_v0 = vpop.f32.mrf.mxu1 }
 0x290   :  { %v6820_v24 = vpop.f32.mrf.mxu0  ;;  %13800 = vmatpush1.bf16.msra.mxu0 %v19021_v49 }
 0x291   :  { %v20654_v28 = vadd.f32 %v7107_v0, %v6819_v34  ;;  %v7109_v59 = vpop.f32.mrf.mxu1  ;;  %13801 = vmatprep.subr.bf16.mxu0 %v21692_v3 }
 0x292   :  { %v6821_v37 = vpop.f32.mrf.mxu0  ;;  %18398 = vmatmul.mubr.bf16.gmra.mxu0 %v20501_v17 }
 0x293   :  { %v6822_v27 = vadd.f32 %v6821_v37, %v20361_v4  ;;  %v7110_v40 = vpop.f32.mrf.mxu1  ;;  %18401 = vmatprep.mubr.bf16.mxu0 %v18991_v55  ;;  %v19020_v4 = vld [vmem:[%s21679_s3 + $0x48] sm:$0xff]   ;;  %v19023_v37 = vld [vmem:[%s21679_s3 + $0xf8] sm:$0xff]  }
 0x294   :  { %v6823_v47 = vpop.f32.mrf.mxu0  ;;  %13527 = vmatpush2.bf16.msra.mxu1 %v19020_v4  ;;  %13802 = vmatpush1.bf16.msra.mxu0 %v19022_v54  ;;  %v18994_v4 = vld [vmem:[#allocation3 + $0x578] ss:$36 sps:$4 sm:$0xff]  }
 0x295   :  { %v20661_v61 = vadd.f32 %v7110_v40, %v6822_v27  ;;  %v7112_v60 = vpop.f32.mrf.mxu1  ;;  %13528 = vmatprep.subr.bf16.mxu1 %v21692_v3  ;;  %13803 = vmatprep.subr.bf16.mxu0 %v21692_v3 }
 0x296   :  { %v6826_v46 = vpop.f32.mrf.mxu0  ;;  %v19024_v60 = vld [vmem:[%s21679_s3 + $0xf0] sm:$0xff]  }
 0x297   :  { %v6827_v41 = vadd.f32 %v6826_v46, %v20364_v38  ;;  %v7115_v16 = vpop.f32.mrf.mxu1  ;;  %v18992_v38 = vld [vmem:[#allocation3 + $0x4e8] ss:$36 sps:$4 sm:$0xff]  }
 0x298   :  { %v6828_v12 = vpop.f32.mrf.mxu0  ;;  %13804 = vmatpush2.bf16.msra.mxu0 %v19023_v37  ;;  %v19027_v37 = vld [vmem:[%s21679_s3 + $0xe0] sm:$0xff]  }
 0x299   :  { %v20672_v13 = vadd.f32 %v7115_v16, %v6827_v41  ;;  %v7117_v34 = vpop.f32.mrf.mxu1  ;;  %13805 = vmatprep.subr.bf16.mxu0 %v21692_v3 }
 0x29a   :  { %v6829_v17 = vpop.f32.mrf.mxu0  ;;  %18402 = vmatmul.mubr.bf16.gmra.mxu0 %v18992_v38  ;;  %v18996_v34 = vld [vmem:[#allocation3 + $0x5c0] ss:$36 sps:$4 sm:$0xff]  }
 0x29b   :  { %v6830_v0 = vadd.f32 %v6829_v17, %v20367_v8  ;;  %v7118_v24 = vpop.f32.mrf.mxu1  ;;  %18405 = vmatprep.mubr.bf16.mxu0 %v18993_v2  ;;  %v19026_v17 = vld [vmem:[%s21679_s3 + $0xe8] sm:$0xff]  }
 0x29c   :  { %v6831_v59 = vpop.f32.mrf.mxu0  ;;  %13806 = vmatpush2.bf16.msra.mxu0 %v19024_v60 }
 0x29d   :  { %v20680_v27 = vadd.f32 %v7118_v24, %v6830_v0  ;;  %v7120_v40 = vpop.f32.mrf.mxu1  ;;  %13807 = vmatprep.subr.bf16.mxu0 %v21692_v3 }
 0x29e   :  { %v6834_v55 = vpop.f32.mrf.mxu0 }
 0x29f   :  { %v6835_v47 = vadd.f32 %v6834_v55, %v20373_v35  ;;  %v7123_v49 = vpop.f32.mrf.mxu1 }
 0x2a0   :  { %v6836_v8 = vpop.f32.mrf.mxu0  ;;  %13808 = vmatpush2.bf16.msra.mxu0 %v19026_v17 }
 0x2a1   :  { %v20687_v46 = vadd.f32 %v7123_v49, %v6835_v47  ;;  %v7125_v41 = vpop.f32.mrf.mxu1  ;;  %13809 = vmatprep.subr.bf16.mxu0 %v21692_v3  ;;  %v18997_v49 = vld [vmem:[#allocation3 + $0x608] ss:$36 sps:$4 sm:$0xff]   ;;  %v19025_v8 = vld [vmem:[%s21679_s3 + $0x40] sm:$0xff]  }
 0x2a2   :  { %v6837_v16 = vpop.f32.mrf.mxu0  ;;  %18406 = vmatmul.mubr.bf16.gmra.mxu0 %v18994_v4  ;;  %v18998_v41 = vld [vmem:[#allocation3 + $0x650] ss:$36 sps:$4 sm:$0xff]   ;;  %13529 = vmatpush2.bf16.msra.mxu1 %v19025_v8  ;;  %v19028_v4 = vld [vmem:[%s21679_s3 + $0xd8] sm:$0xff]  }
 0x2a3   :  { %v6838_v12 = vadd.f32 %v6837_v16, %v20376_v7  ;;  %v7126_v54 = vpop.f32.mrf.mxu1  ;;  %18409 = vmatprep.mubr.bf16.mxu0 %v18996_v34  ;;  %14076 = vmatprep.subr.bf16.mxu1 %v21692_v3 }
 0x2a4   :  { %v6839_v35 = vpop.f32.mrf.mxu0  ;;  %13810 = vmatpush2.bf16.msra.mxu0 %v19027_v37 }
 0x2a5   :  { %v20694_v38 = vadd.f32 %v7126_v54, %v6838_v12  ;;  %v7128_v0 = vpop.f32.mrf.mxu1  ;;  %13811 = vmatprep.subr.bf16.mxu0 %v21692_v3  ;;  %v19031_v12 = vld [vmem:[#allocation3 + $0x4] ss:$36 sps:$4 sm:$0xff]  }
 0x2a6   :  { %v6842_v24 = vpop.f32.mrf.mxu0  ;;  %v19029_v35 = vld [vmem:[#allocation3] ss:$36 sps:$4 sm:$0xff]   ;;  %13530 = vmatprep.mubr.bf16.mxu1 %v19031_v12 }
 0x2a7   :  { %v6843_v2 = vadd.f32 %v6842_v24, %v20379_v36  ;;  %v7131_v59 = vpop.f32.mrf.mxu1  ;;  %13531 = vmatmul.mubr.bf16.vlgmr.msra.gmra.mxu1 %v19029_v35  ;;  %v21712_v35 = vld [vmem:[#allocation9_spill] sm:$0xff] }
 0x2a8   :  { %v6844_v7 = vpop.f32.mrf.mxu0  ;;  %13812 = vmatpush2.bf16.msra.mxu0 %v19028_v4 }
 0x2a9   :  { %v20701_v40 = vadd.f32 %v7131_v59, %v6843_v2  ;;  %v7133_v55 = vpop.f32.mrf.mxu1  ;;  %13813 = vmatprep.subr.bf16.mxu0 %v21692_v3  ;;  %v19032_v59 = vld [vmem:[%s21679_s3 + $0xd0] sm:$0xff]  }
 0x2aa   :  { %v6845_v47 = vpop.f32.mrf.mxu0  ;;  %18410 = vmatmul.mubr.bf16.gmra.mxu0 %v18997_v49  ;;  %v21710_v49 = vld [vmem:[#allocation8_spill] sm:$0xff] }
 0x2ab   :  { %v6846_v36 = vadd.f32 %v6845_v47, %v20382_v11  ;;  %v7134_v60 = vpop.f32.mrf.mxu1  ;;  %v21708_v11 = vld [vmem:[#allocation7_spill] sm:$0xff]  ;;  %18413 = vmatprep.mubr.bf16.mxu0 %v18998_v41  ;;  %v18999_v47 = vld [vmem:[#allocation3 + $0x698] ss:$36 sps:$4 sm:$0xff]  }
 0x2ac   :  { %v6847_v16 = vpop.f32.mrf.mxu0  ;;  %13814 = vmatpush2.bf16.msra.mxu0 %v19032_v59 }
 0x2ad   :  { %v20711_v54 = vadd.f32 %v7134_v60, %v6846_v36  ;;  %v7136_v34 = vpop.f32.mrf.mxu1  ;;  %v19001_v60 = vld [vmem:[#allocation3 + $0x6e0] ss:$36 sps:$4 sm:$0xff]   ;;  %13815 = vmatprep.subr.bf16.mxu0 %v21692_v3  ;;  %v19033_v16 = vld [vmem:[%s21679_s3 + $0xc8] sm:$0xff]  }
 0x2ae   :  { %v6850_v17 = vpop.f32.mrf.mxu0 }
 0x2af   :  { %v6851_v0 = vadd.f32 %v6850_v17, %v21708_v11  ;;  %v7139_v24 = vpop.f32.mrf.mxu1 }
 0x2b0   :  { %v6852_v2 = vpop.f32.mrf.mxu0  ;;  %13816 = vmatpush2.bf16.msra.mxu0 %v19033_v16 }
 0x2b1   :  { %v20719_v7 = vadd.f32 %v7139_v24, %v6851_v0  ;;  %v7141_v37 = vpop.f32.mrf.mxu1  ;;  %13817 = vmatprep.subr.bf16.mxu0 %v21692_v3  ;;  %v19035_v24 = vld [vmem:[%s21679_s3 + $0xc0] sm:$0xff]  }
 0x2b2   :  { %v6853_v55 = vpop.f32.mrf.mxu0  ;;  %18414 = vmatmul.mubr.bf16.gmra.mxu0 %v18999_v47 }
 0x2b3   :  { %21709 = vst [vmem:[#allocation7_spill] sm:$0xff] %v20719_v7  ;;  %v6854_v8 = vadd.f32 %v6853_v55, %v21710_v49  ;;  %v7142_v36 = vpop.f32.mrf.mxu1  ;;  %18417 = vmatprep.mubr.bf16.mxu0 %v19001_v60  ;;  %v19002_v55 = vld [vmem:[#allocation3 + $0x728] ss:$36 sps:$4 sm:$0xff]   ;;  %v21714_v49 = vld [vmem:[#allocation10_spill] sm:$0xff]  ;;  %v21719_v7 = vld [vmem:[#allocation13_spill] sm:$0xff] }
 0x2b4   :  { %v6855_v41 = vpop.f32.mrf.mxu0  ;;  %v19034_v60 = vld [vmem:[%s21679_s3 + $0x138] sm:$0xff]   ;;  %13818 = vmatpush2.bf16.msra.mxu0 %v19035_v24 }
 0x2b5   :  { %v20726_v4 = vadd.f32 %v7142_v36, %v6854_v8  ;;  %v7144_v12 = vpop.f32.mrf.mxu1  ;;  %v19003_v36 = vld [vmem:[#allocation3 + $0x770] ss:$36 sps:$4 sm:$0xff]   ;;  %14365 = vmatprep.subr.bf16.mxu0 %v21692_v3  ;;  %14077 = vmatpush1.bf16.msra.mxu1 %v19034_v60 }
 0x2b6   :  { %v6858_v34 = vpop.f32.mrf.mxu0  ;;  %14078 = vmatprep.subr.bf16.mxu1 %v21692_v3 }
 0x2b7   :  { %21711 = vst [vmem:[#allocation8_spill] sm:$0xff] %v20726_v4  ;;  %v6859_v17 = vadd.f32 %v6858_v34, %v21712_v35  ;;  %v7147_v11 = vpop.f32.mrf.mxu1  ;;  %v21716_v35 = vld [vmem:[#allocation11_spill] sm:$0xff] }
 0x2b8   :  { %v6860_v0 = vpop.f32.mrf.mxu0 }
 0x2b9   :  { %v20733_v2 = vadd.f32 %v7147_v11, %v6859_v17  ;;  %v7149_v59 = vpop.f32.mrf.mxu1 }
 0x2ba   :  { %v6861_v37 = vpop.f32.mrf.mxu0  ;;  %18418 = vmatmul.mubr.bf16.gmra.mxu0 %v19002_v55 }
 0x2bb   :  { %21713 = vst [vmem:[#allocation9_spill] sm:$0xff] %v20733_v2  ;;  %v6862_v8 = vadd.f32 %v6861_v37, %v21714_v49  ;;  %v7150_v47 = vpop.f32.mrf.mxu1  ;;  %18421 = vmatprep.mubr.bf16.mxu0 %v19003_v36  ;;  %v19004_v49 = vld [vmem:[#allocation3 + $0x7b8] ss:$36 sps:$4 sm:$0xff]   ;;  %v19008_v2 = vld [vmem:[#allocation3 + $0x890] ss:$36 sps:$4 sm:$0xff]  }
 0x2bc   :  { %v6863_v41 = vpop.f32.mrf.mxu0 }
 0x2bd   :  { %v20740_v16 = vadd.f32 %v7150_v47, %v6862_v8  ;;  %v7152_v12 = vpop.f32.mrf.mxu1  ;;  %v21718_v41 = vld [vmem:[#allocation12_spill] sm:$0xff]  ;;  %v19006_v47 = vld [vmem:[#allocation3 + $0x800] ss:$36 sps:$4 sm:$0xff]  }
 0x2be   :  { %v6866_v34 = vpop.f32.mrf.mxu0 }
 0x2bf   :  { %21715 = vst [vmem:[#allocation10_spill] sm:$0xff] %v20740_v16  ;;  %v6867_v17 = vadd.f32 %v6866_v34, %v21716_v35  ;;  %v7155_v11 = vpop.f32.mrf.mxu1 }
 0x2c0   :  { %v6868_v0 = vpop.f32.mrf.mxu0 }
 0x2c1   :  { %v20744_v59 = vadd.f32 %v7155_v11, %v6867_v17  ;;  %v7157_v37 = vpop.f32.mrf.mxu1 }
 0x2c2   :  { %v6869_v24 = vpop.f32.mrf.mxu0  ;;  %18422 = vmatmul.mubr.bf16.gmra.mxu0 %v19004_v49  ;;  %v19007_v37 = vld [vmem:[#allocation3 + $0x848] ss:$36 sps:$4 sm:$0xff]  }
 0x2c3   :  { %21717 = vst [vmem:[#allocation11_spill] sm:$0xff] %v20744_v59  ;;  %v6870_v4 = vadd.f32 %v6869_v24, %v21718_v41  ;;  %v7158_v8 = vpop.f32.mrf.mxu1  ;;  %18425 = vmatprep.mubr.bf16.mxu0 %v19006_v47  ;;  %v21720_v59 = vld [vmem:[#allocation14_spill] sm:$0xff] }
 0x2c4   :  { %v6871_v12 = vpop.f32.mrf.mxu0 }
 0x2c5   :  { %v20747_v60 = vadd.f32 %v7158_v8, %v6870_v4  ;;  %v7160_v55 = vpop.f32.mrf.mxu1  ;;  %v19054_v4 = vld [vmem:[%s21679_s3 + $0x130] sm:$0xff]  }
 0x2c6   :  { %v6874_v16 = vpop.f32.mrf.mxu0  ;;  %14079 = vmatpush1.bf16.msra.mxu1 %v19054_v4 }
 0x2c7   :  { %v6875_v34 = vadd.f32 %v6874_v16, %v21719_v7  ;;  %v7163_v35 = vpop.f32.mrf.mxu1  ;;  %14080 = vmatprep.subr.bf16.mxu1 %v21692_v3 }
 0x2c8   :  { %v6876_v36 = vpop.f32.mrf.mxu0 }
 0x2c9   :  { %v20750_v17 = vadd.f32 %v7163_v35, %v6875_v34  ;;  %v7165_v11 = vpop.f32.mrf.mxu1 }
 0x2ca   :  { %v6877_v0 = vpop.f32.mrf.mxu0  ;;  %18426 = vmatmul.mubr.bf16.gmra.mxu0 %v19007_v37  ;;  %v21723_v37 = vld [vmem:[#allocation15_spill] sm:$0xff] }
 0x2cb   :  { %v6878_v24 = vadd.f32 %v6877_v0, %v21720_v59  ;;  %v7166_v41 = vpop.f32.mrf.mxu1  ;;  %18429 = vmatprep.mubr.bf16.mxu0 %v19008_v2 }
 0x2cc   :  { %v6879_v8 = vpop.f32.mrf.mxu0 }
 0x2cd   :  { %v20756_v49 = vadd.f32 %v7166_v41, %v6878_v24  ;;  %v7168_v7 = vpop.f32.mrf.mxu1 }
 0x2ce   :  { %v6882_v16 = vpop.f32.mrf.mxu0 }
 0x2cf   :  { %v6883_v47 = vadd.f32 %v6882_v16, %v20427_v32  ;;  %v7171_v12 = vpop.f32.mrf.mxu1 }
 0x2d0   :  { %v6884_v59 = vpop.f32.mrf.mxu0 }
 0x2d1   :  { %v20760_v55 = vadd.f32 %v7171_v12, %v6883_v47  ;;  %v7173_v34 = vpop.f32.mrf.mxu1  ;;  %v21725_v12 = vld [vmem:[#allocation16_spill] sm:$0xff] }
 0x2d2   :  { %v6885_v35 = vpop.f32.mrf.mxu0  ;;  %18430 = vmatmul.mubr.bf16.gmra.mxu0 %v20568_v9 }
 0x2d3   :  { %21721 = vst [vmem:[#allocation12_spill] sm:$0xff] %v20760_v55  ;;  %v6886_v36 = vadd.f32 %v6885_v35, %v20430_v44  ;;  %v7174_v11 = vpop.f32.mrf.mxu1  ;;  %v19067_v44 = vld [vmem:[%s21679_s3 + $0x128] sm:$0xff]  }
 0x2d4   :  { %v6887_v0 = vpop.f32.mrf.mxu0  ;;  %14081 = vmatpush1.bf16.msra.mxu1 %v19067_v44  ;;  %v21731_v44 = vld [vmem:[#allocation19_spill] sm:$0xff] }
 0x2d5   :  { %v20763_v24 = vadd.f32 %v7174_v11, %v6886_v36  ;;  %v7176_v41 = vpop.f32.mrf.mxu1  ;;  %14082 = vmatprep.subr.bf16.mxu1 %v21692_v3  ;;  %v21727_v0 = vld [vmem:[#allocation17_spill] sm:$0xff] }
 0x2d6   :  { %v6890_v4 = vpop.f32.mrf.mxu0 }
 0x2d7   :  { %21722 = vst [vmem:[#allocation13_spill] sm:$0xff] %v20763_v24  ;;  %v6891_v8 = vadd.f32 %v6890_v4, %v21723_v37  ;;  %v7179_v32 = vpop.f32.mrf.mxu1 }
 0x2d8   :  { %v6892_v7 = vpop.f32.mrf.mxu0 }
 0x2d9   :  { %v20767_v2 = vadd.f32 %v7179_v32, %v6891_v8  ;;  %v7181_v16 = vpop.f32.mrf.mxu1 }
 0x2da   :  { %v6893_v47 = vpop.f32.mrf.mxu0  ;;  %v21729_v16 = vld [vmem:[#allocation18_spill] sm:$0xff] }
 0x2db   :  { %21724 = vst [vmem:[#allocation14_spill] sm:$0xff] %v20767_v2  ;;  %v6894_v59 = vadd.f32 %v6893_v47, %v21725_v12  ;;  %v7182_v34 = vpop.f32.mrf.mxu1 }
 0x2dc   :  { %v6895_v35 = vpop.f32.mrf.mxu0 }
 0x2dd   :  { %v20773_v36 = vadd.f32 %v7182_v34, %v6894_v59  ;;  %v7184_v11 = vpop.f32.mrf.mxu1 }
 0x2de   :  { %v6898_v9 = vpop.f32.mrf.mxu0 }
 0x2df   :  { %21726 = vst [vmem:[#allocation15_spill] sm:$0xff] %v20773_v36  ;;  %v6899_v41 = vadd.f32 %v6898_v9, %v21727_v0  ;;  %v7187_v4 = vpop.f32.mrf.mxu1 }
 0x2e0   :  { %v6900_v37 = vpop.f32.mrf.mxu0 }
 0x2e1   :  { %v20777_v8 = vadd.f32 %v7187_v4, %v6899_v41  ;;  %v7189_v32 = vpop.f32.mrf.mxu1  ;;  %v21733_v41 = vld [vmem:[#allocation20_spill] sm:$0xff] }
 0x2e2   :  { %v6901_v7 = vpop.f32.mrf.mxu0  ;;  %v19080_v32 = vld [vmem:[%s21679_s3 + $0x120] sm:$0xff]  }
 0x2e3   :  { %21728 = vst [vmem:[#allocation16_spill] sm:$0xff] %v20777_v8  ;;  %v6902_v47 = vadd.f32 %v6901_v7, %v21729_v16  ;;  %v7190_v12 = vpop.f32.mrf.mxu1  ;;  %14083 = vmatpush1.bf16.msra.mxu1 %v19080_v32  ;;  %v21739_v32 = vld [vmem:[#allocation23_spill] sm:$0xff] }
 0x2e4   :  { %v6903_v24 = vpop.f32.mrf.mxu0  ;;  %14084 = vmatprep.subr.bf16.mxu1 %v21692_v3 }
 0x2e5   :  { %v20780_v35 = vadd.f32 %v7190_v12, %v6902_v47  ;;  %v7192_v59 = vpop.f32.mrf.mxu1 }
 0x2e6   :  { %v6906_v34 = vpop.f32.mrf.mxu0 }
 0x2e7   :  { %21730 = vst [vmem:[#allocation17_spill] sm:$0xff] %v20780_v35  ;;  %v6907_v11 = vadd.f32 %v6906_v34, %v21731_v44  ;;  %v7195_v36 = vpop.f32.mrf.mxu1 }
 0x2e8   :  { %v6908_v55 = vpop.f32.mrf.mxu0 }
 0x2e9   :  { %v20783_v2 = vadd.f32 %v7195_v36, %v6907_v11  ;;  %v7197_v9 = vpop.f32.mrf.mxu1  ;;  %v21735_v55 = vld [vmem:[#allocation21_spill] sm:$0xff] }
 0x2ea   :  { %v6909_v0 = vpop.f32.mrf.mxu0  ;;  %v21737_v9 = vld [vmem:[#allocation22_spill] sm:$0xff] }
 0x2eb   :  { %21732 = vst [vmem:[#allocation18_spill] sm:$0xff] %v20783_v2  ;;  %v6910_v4 = vadd.f32 %v6909_v0, %v21733_v41  ;;  %v7198_v37 = vpop.f32.mrf.mxu1 }
 0x2ec   :  { %v6911_v24 = vpop.f32.mrf.mxu0 }
 0x2ed   :  { %v20789_v7 = vadd.f32 %v7198_v37, %v6910_v4  ;;  %v7200_v16 = vpop.f32.mrf.mxu1 }
 0x2ee   :  { %v6914_v47 = vpop.f32.mrf.mxu0 }
 0x2ef   :  { %21734 = vst [vmem:[#allocation19_spill] sm:$0xff] %v20789_v7  ;;  %v6915_v36 = vadd.f32 %v6914_v47, %v21735_v55  ;;  %v7203_v12 = vpop.f32.mrf.mxu1 }
 0x2f0   :  { %v6916_v59 = vpop.f32.mrf.mxu0 }
 0x2f1   :  { %v20793_v34 = vadd.f32 %v7203_v12, %v6915_v36  ;;  %v7205_v44 = vpop.f32.mrf.mxu1  ;;  %v21741_v36 = vld [vmem:[#allocation24_spill] sm:$0xff] }
 0x2f2   :  { %v6917_v11 = vpop.f32.mrf.mxu0  ;;  %v19093_v44 = vld [vmem:[%s21679_s3 + $0x118] sm:$0xff]  }
 0x2f3   :  { %21736 = vst [vmem:[#allocation20_spill] sm:$0xff] %v20793_v34  ;;  %v6918_v0 = vadd.f32 %v6917_v11, %v21737_v9  ;;  %v7206_v41 = vpop.f32.mrf.mxu1  ;;  %14085 = vmatpush1.bf16.msra.mxu1 %v19093_v44  ;;  %v21746_v44 = vld [vmem:[#allocation27_spill] sm:$0xff] }
 0x2f4   :  { %v6919_v35 = vpop.f32.mrf.mxu0  ;;  %14086 = vmatprep.subr.bf16.mxu1 %v21692_v3 }
 0x2f5   :  { %v20796_v24 = vadd.f32 %v7206_v41, %v6918_v0  ;;  %v7208_v4 = vpop.f32.mrf.mxu1 }
 0x2f6   :  { %v6922_v37 = vpop.f32.mrf.mxu0 }
 0x2f7   :  { %21738 = vst [vmem:[#allocation21_spill] sm:$0xff] %v20796_v24  ;;  %v6923_v16 = vadd.f32 %v6922_v37, %v21739_v32  ;;  %v7211_v7 = vpop.f32.mrf.mxu1 }
 0x2f8   :  { %v6924_v8 = vpop.f32.mrf.mxu0 }
 0x2f9   :  { %v20799_v2 = vadd.f32 %v7211_v7, %v6923_v16  ;;  %v7213_v47 = vpop.f32.mrf.mxu1  ;;  %v21743_v8 = vld [vmem:[#allocation25_spill] sm:$0xff] }
 0x2fa   :  { %v6925_v55 = vpop.f32.mrf.mxu0  ;;  %v21744_v47 = vld [vmem:[#allocation26_spill] sm:$0xff] }
 0x2fb   :  { %21740 = vst [vmem:[#allocation22_spill] sm:$0xff] %v20799_v2  ;;  %v6926_v12 = vadd.f32 %v6925_v55, %v21741_v36  ;;  %v7214_v59 = vpop.f32.mrf.mxu1 }
 0x2fc   :  { %v6927_v35 = vpop.f32.mrf.mxu0 }
 0x2fd   :  { %v20805_v11 = vadd.f32 %v7214_v59, %v6926_v12  ;;  %v7216_v9 = vpop.f32.mrf.mxu1 }
 0x2fe   :  { %v6930_v0 = vpop.f32.mrf.mxu0 }
 0x2ff   :  { %21742 = vst [vmem:[#allocation23_spill] sm:$0xff] %v20805_v11  ;;  %v6931_v7 = vadd.f32 %v6930_v0, %v21743_v8  ;;  %v7219_v41 = vpop.f32.mrf.mxu1 }
 0x300   :  { %v6932_v4 = vpop.f32.mrf.mxu0 }
 0x301   :  { %v20809_v37 = vadd.f32 %v7219_v41, %v6931_v7  ;;  %v7221_v32 = vpop.f32.mrf.mxu1  ;;  %v21747_v7 = vld [vmem:[#allocation28_spill] sm:$0xff] }
 0x302   :  { %v6933_v16 = vpop.f32.mrf.mxu0  ;;  %v19106_v32 = vld [vmem:[%s21679_s3 + $0x110] sm:$0xff]  }
 0x303   :  { %v6934_v55 = vadd.f32 %v6933_v16, %v21744_v47  ;;  %v7222_v36 = vpop.f32.mrf.mxu1  ;;  %14087 = vmatpush1.bf16.msra.mxu1 %v19106_v32 }
 0x304   :  { %v6935_v24 = vpop.f32.mrf.mxu0  ;;  %14088 = vmatprep.subr.bf16.mxu1 %v21692_v3 }
 0x305   :  { %v20812_v35 = vadd.f32 %v7222_v36, %v6934_v55  ;;  %v7224_v12 = vpop.f32.mrf.mxu1 }
 0x306   :  { %v6938_v59 = vpop.f32.mrf.mxu0 }
 0x307   :  { %21745 = vst [vmem:[#allocation24_spill] sm:$0xff] %v20812_v35  ;;  %v6939_v9 = vadd.f32 %v6938_v59, %v21746_v44  ;;  %v7227_v11 = vpop.f32.mrf.mxu1 }
 0x308   :  { %v6940_v34 = vpop.f32.mrf.mxu0 }
 0x309   :  { %v20815_v2 = vadd.f32 %v7227_v11, %v6939_v9  ;;  %v7229_v0 = vpop.f32.mrf.mxu1 }
 0x30a   :  { %v6941_v8 = vpop.f32.mrf.mxu0 }
 0x30b   :  { %v6942_v41 = vadd.f32 %v6941_v8, %v21747_v7  ;;  %v7230_v4 = vpop.f32.mrf.mxu1 }
 0x30c   :  { %v6943_v24 = vpop.f32.mrf.mxu0 }
 0x30d   :  { %v20821_v16 = vadd.f32 %v7230_v4, %v6942_v41  ;;  %v7232_v47 = vpop.f32.mrf.mxu1 }
 0x30e   :  { %v6946_v55 = vpop.f32.mrf.mxu0 }
 0x30f   :  { %v6947_v34 = vadd.f32 %v6946_v55, %v20498_v57  ;;  %v7235_v11 = vpop.f32.mrf.mxu1 }
 0x310   :  { %v6948_v36 = vpop.f32.mrf.mxu0 }
 0x311   :  { %v20825_v12 = vadd.f32 %v7235_v11, %v6947_v34  ;;  %v7237_v59 = vpop.f32.mrf.mxu1 }
 0x312   :  { %v6949_v44 = vpop.f32.mrf.mxu0 }
 0x313   :  { %v6950_v9 = vadd.f32 %v6949_v44, %v20503_v25  ;;  %v7238_v0 = vpop.f32.mrf.mxu1  ;;  %v19119_v25 = vld [vmem:[%s21679_s3 + $0x108] sm:$0xff]  }
 0x314   :  { %v6951_v8 = vpop.f32.mrf.mxu0  ;;  %14089 = vmatpush1.bf16.msra.mxu1 %v19119_v25 }
 0x315   :  { %v20828_v7 = vadd.f32 %v7238_v0, %v6950_v9  ;;  %v7240_v41 = vpop.f32.mrf.mxu1  ;;  %14090 = vmatprep.subr.bf16.mxu1 %v21692_v3 }
 0x316   :  { %v6954_v4 = vpop.f32.mrf.mxu0 }
 0x317   :  { %v6955_v32 = vadd.f32 %v6954_v4, %v20509_v52  ;;  %v7243_v24 = vpop.f32.mrf.mxu1 }
 0x318   :  { %v6956_v47 = vpop.f32.mrf.mxu0 }
 0x319   :  { %v20831_v35 = vadd.f32 %v7243_v24, %v6955_v32  ;;  %v7245_v57 = vpop.f32.mrf.mxu1 }
 0x31a   :  { %v6957_v55 = vpop.f32.mrf.mxu0 }
 0x31b   :  { %v6958_v34 = vadd.f32 %v6957_v55, %v20513_v43  ;;  %v7246_v11 = vpop.f32.mrf.mxu1 }
 0x31c   :  { %v6959_v36 = vpop.f32.mrf.mxu0 }
 0x31d   :  { %v20837_v59 = vadd.f32 %v7246_v11, %v6958_v34  ;;  %v7248_v44 = vpop.f32.mrf.mxu1  ;;  %v19132_v36 = vld [vmem:[%s21679_s3 + $0x100] sm:$0xff]  }
 0x31e   :  { %v18371_v9 = vpop.f32.mrf.mxu0  ;;  %14091 = vmatpush1.bf16.msra.mxu1 %v19132_v36 }
 0x31f   :  { %v7293_v52 = vadd.f32 %v18371_v9, %v20525_v39  ;;  %14092 = vmatprep.subr.bf16.mxu1 %v21692_v3 }
 0x320   :  { %v7284_v0 = vpop.f32.mrf.mxu0 }
 0x321   :  { %v7541_v8 = vmax.f32 %v7293_v52, 0.0  ;;  %v7285_v41 = vadd.f32 %v7284_v0, %v20516_v33 }
 0x322   :  { %v18372_v43 = vpop.f32.mrf.mxu0 }
 0x323   :  { %7605 = vst [vmem:[#allocation2 + $0x31] sm:$0xff] %v7541_v8  ;;  %v7539_v4 = vmax.f32 %v7285_v41, 0.0  ;;  %v7296_v32 = vadd.f32 %v18372_v43, %v20529_v53  ;;  %v17765_v24 = vpack.c.bf16 %v7541_v8, %v7541_v8 }
 0x324   :  { %v7287_v47 = vpop.f32.mrf.mxu0 }
 0x325   :  { %7603 = vst [vmem:[#allocation2 + $0x19] sm:$0xff] %v7539_v4  ;;  %v7542_v57 = vmax.f32 %v7296_v32, 0.0  ;;  %v7288_v55 = vadd.f32 %v7287_v47, %v20519_v48  ;;  %v17763_v34 = vpack.c.bf16 %v7539_v4, %v7539_v4  ;;  %8375 = vst [vmem:[#allocation3 + $0x94] sm:$0xf] %v17765_v24 }
 0x326   :  { %v18375_v11 = vpop.f32.mrf.mxu0 }
 0x327   :  { %7606 = vst [vmem:[#allocation2 + $0x39] sm:$0xff] %v7542_v57  ;;  %v7540_v39 = vmax.f32 %v7288_v55, 0.0  ;;  %v7309_v25 = vadd.f32 %v18375_v11, %v20541_v21  ;;  %8373 = vst [vmem:[#allocation3 + $0x4c] sm:$0xf] %v17763_v34  ;;  %v17766_v33 = vpack.c.bf16 %v7542_v57, %v7542_v57 }
 0x328   :  { %v7300_v53 = vpop.f32.mrf.mxu0 }
 0x329   :  { %7604 = vst [vmem:[#allocation2 + $0x21] sm:$0xff] %v7540_v39  ;;  %v7545_v44 = vmax.f32 %v7309_v25, 0.0  ;;  %v7301_v9 = vadd.f32 %v7300_v53, %v20532_v26  ;;  %v17764_v52 = vpack.c.bf16 %v7540_v39, %v7540_v39  ;;  %8376 = vst [vmem:[#allocation3 + $0xb8] sm:$0xf] %v17766_v33 }
 0x32a   :  { %v18376_v48 = vpop.f32.mrf.mxu0  ;;  %v7671_v0 = vld [vmem:[#allocation2 + $0x30] sm:$0xff] }
 0x32b   :  { %v9205_v8 = vld [vmem:[#allocation2 + $0x31] sm:$0xff]  ;;  %7609 = vst [vmem:[#allocation2 + $0x61] sm:$0xff] %v7545_v44  ;;  %v7543_v21 = vmax.f32 %v7301_v9, 0.0  ;;  %v7312_v41 = vadd.f32 %v18376_v48, %v20545_v50  ;;  %8374 = vst [vmem:[#allocation3 + $0x70] sm:$0xf] %v17764_v52  ;;  %v17701_v43 = vpack.c.bf16 %v7671_v0, %v7671_v0  ;;  %v17769_v4 = vpack.c.bf16 %v7545_v44, %v7545_v44 }
 0x32c   :  { %v7303_v32 = vpop.f32.mrf.mxu0  ;;  %v7669_v24 = vld [vmem:[#allocation2 + $0x18] sm:$0xff]  ;;  %v17955_v57 = vpack.c.bf16 %v9205_v8, %v9205_v8 }
 0x32d   :  { %v9203_v47 = vld [vmem:[#allocation2 + $0x19] sm:$0xff]  ;;  %7607 = vst [vmem:[#allocation2 + $0x49] sm:$0xff] %v7543_v21  ;;  %v7546_v26 = vmax.f32 %v7312_v41, 0.0  ;;  %v7304_v55 = vadd.f32 %v7303_v32, %v20535_v6  ;;  %v17699_v34 = vpack.c.bf16 %v7669_v24, %v7669_v24  ;;  %7991 = vst [vmem:[#allocation3 + $0x90] sm:$0xf] %v17701_v43  ;;  %v17767_v11 = vpack.c.bf16 %v7543_v21, %v7543_v21 }
 0x32e   :  { %9141 = vst [vmem:[#allocation3 + $0x54] sm:$0xf] %v17701_v43  ;;  %8379 = vst [vmem:[#allocation3 + $0x124] sm:$0xf] %v17769_v4  ;;  %v18379_v39 = vpop.f32.mrf.mxu0  ;;  %v7672_v25 = vld [vmem:[#allocation2 + $0x38] sm:$0xff]  ;;  %v17953_v36 = vpack.c.bf16 %v9203_v47, %v9203_v47 }
 0x32f   :  { %v8439_v33 = vld [vmem:[#allocation2 + $0x32] sm:$0xff]  ;;  %v8440_v50 = vld [vmem:[#allocation2 + $0x3a] sm:$0xff]  ;;  %9525 = vst [vmem:[#allocation3 + $0x58] sm:$0xf] %v17955_v57  ;;  %10675 = vst [vmem:[#allocation3 + $0x1c] sm:$0xf] %v17955_v57  ;;  %v7325_v44 = vadd.f32 %v18379_v39, %v20557_v58  ;;  %v17702_v9 = vpack.c.bf16 %v7672_v25, %v7672_v25  ;;  %v17770_v43 = vpack.c.bf16 %v7546_v26, %v7546_v26 }
 0x330   :  { %7610 = vst [vmem:[#allocation2 + $0x69] sm:$0xff] %v7546_v26  ;;  %v7544_v53 = vmax.f32 %v7304_v55, 0.0  ;;  %7989 = vst [vmem:[#allocation3 + $0x48] sm:$0xf] %v17699_v34  ;;  %v17829_v6 = vpack.c.bf16 %v8439_v33, %v8439_v33  ;;  %v9206_v52 = vld [vmem:[#allocation2 + $0x39] sm:$0xff]  ;;  %v7316_v48 = vpop.f32.mrf.mxu0  ;;  %v8438_v21 = vld [vmem:[#allocation2 + $0x22] sm:$0xff]  ;;  %v17830_v41 = vpack.c.bf16 %v8440_v50, %v8440_v50 }
 0x331   :  { %9139 = vst [vmem:[#allocation3 + $0xc] sm:$0xf] %v17699_v34  ;;  %8377 = vst [vmem:[#allocation3 + $0xdc] sm:$0xf] %v17767_v11  ;;  %v7670_v0 = vld [vmem:[#allocation2 + $0x20] sm:$0xff]  ;;  %v17956_v4 = vpack.c.bf16 %v9206_v52, %v9206_v52  ;;  %v7549_v32 = vmax.f32 %v7325_v44, 0.0  ;;  %v7317_v24 = vadd.f32 %v7316_v48, %v20548_v20  ;;  %v17828_v39 = vpack.c.bf16 %v8438_v21, %v8438_v21 }
 0x332   :  { %v8437_v8 = vld [vmem:[#allocation2 + $0x1a] sm:$0xff]  ;;  %9523 = vst [vmem:[#allocation3 + $0x10] sm:$0xf] %v17953_v36  ;;  %7608 = vst [vmem:[#allocation2 + $0x51] sm:$0xff] %v7544_v53  ;;  %v17700_v47 = vpack.c.bf16 %v7670_v0, %v7670_v0  ;;  %v9588_v34 = vld [vmem:[#allocation2 + $0x22] sm:$0xff]  ;;  %v18380_v11 = vpop.f32.mrf.mxu0  ;;  %v17768_v25 = vpack.c.bf16 %v7544_v53, %v7544_v53 }
 0x333   :  { %7992 = vst [vmem:[#allocation3 + $0xb4] sm:$0xf] %v17702_v9  ;;  %v17827_v58 = vpack.c.bf16 %v8437_v8, %v8437_v8  ;;  %9142 = vst [vmem:[#allocation3 + $0x78] sm:$0xf] %v17702_v9  ;;  %v9204_v57 = vld [vmem:[#allocation2 + $0x21] sm:$0xff]  ;;  %v9589_v36 = vld [vmem:[#allocation2 + $0x32] sm:$0xff]  ;;  %v7328_v9 = vadd.f32 %v18380_v11, %v20561_v22  ;;  %v17773_v52 = vpack.c.bf16 %v7549_v32, %v7549_v32 }
 0x334   :  { %8759 = vst [vmem:[#allocation3 + $0x98] sm:$0xf] %v17829_v6  ;;  %v9587_v55 = vld [vmem:[#allocation2 + $0x1a] sm:$0xff]  ;;  %8760 = vst [vmem:[#allocation3 + $0xbc] sm:$0xf] %v17830_v41  ;;  %v17954_v26 = vpack.c.bf16 %v9204_v57, %v9204_v57  ;;  %v7547_v20 = vmax.f32 %v7317_v24, 0.0  ;;  %v7319_v48 = vpop.f32.mrf.mxu0  ;;  %v18018_v0 = vpack.c.bf16 %v9588_v34, %v9588_v34  ;;  %v18019_v8 = vpack.c.bf16 %v9589_v36, %v9589_v36 }
 0x335   :  { %v7675_v33 = vld [vmem:[#allocation2 + $0x60] sm:$0xff]  ;;  %8380 = vst [vmem:[#allocation3 + $0x148] sm:$0xf] %v17770_v43  ;;  %v18017_v50 = vpack.c.bf16 %v9587_v55, %v9587_v55  ;;  %9526 = vst [vmem:[#allocation3 + $0x7c] sm:$0xf] %v17956_v4  ;;  %v7673_v53 = vld [vmem:[#allocation2 + $0x48] sm:$0xff]  ;;  %v7320_v43 = vadd.f32 %v7319_v48, %v20551_v1 }
 0x336   :  { %v9590_v44 = vld [vmem:[#allocation2 + $0x3a] sm:$0xff]  ;;  %10676 = vst [vmem:[#allocation3 + $0x40] sm:$0xf] %v17956_v4  ;;  %7613 = vst [vmem:[#allocation2 + $0x91] sm:$0xff] %v7549_v32  ;;  %v17705_v6 = vpack.c.bf16 %v7675_v33, %v7675_v33  ;;  %v7550_v41 = vmax.f32 %v7328_v9, 0.0  ;;  %v17703_v4 = vpack.c.bf16 %v7673_v53, %v7673_v53  ;;  %v17771_v22 = vpack.c.bf16 %v7547_v20, %v7547_v20  ;;  %v18383_v24 = vpop.f32.mrf.mxu0  ;;  %v9971_v9 = vld [vmem:[#allocation2 + $0x30] sm:$0xff] }
 0x337   :  { %7990 = vst [vmem:[#allocation3 + $0x6c] sm:$0xf] %v17700_v47  ;;  %9140 = vst [vmem:[#allocation3 + $0x30] sm:$0xf] %v17700_v47  ;;  %v18020_v21 = vpack.c.bf16 %v9590_v44, %v9590_v44  ;;  %v7676_v32 = vld [vmem:[#allocation2 + $0x68] sm:$0xff]  ;;  %v7548_v47 = vmax.f32 %v7320_v43, 0.0 }
 0x338   :  { %8757 = vst [vmem:[#allocation3 + $0x50] sm:$0xf] %v17827_v58  ;;  %8758 = vst [vmem:[#allocation3 + $0x74] sm:$0xf] %v17828_v39  ;;  %v7341_v58 = vadd.f32 %v18383_v24, %v20576_v31  ;;  %v17706_v57 = vpack.c.bf16 %v7676_v32, %v7676_v32  ;;  %v8443_v55 = vld [vmem:[#allocation2 + $0x62] sm:$0xff]  ;;  %v8444_v1 = vld [vmem:[#allocation2 + $0x6a] sm:$0xff]  ;;  %v17774_v34 = vpack.c.bf16 %v7550_v41, %v7550_v41  ;;  %v7332_v39 = vpop.f32.mrf.mxu0 }
 0x339   :  { %8378 = vst [vmem:[#allocation3 + $0x100] sm:$0xf] %v17768_v25  ;;  %9524 = vst [vmem:[#allocation3 + $0x34] sm:$0xf] %v17954_v26  ;;  %v19145_v11 = vld [vmem:[%s21679_s3 + $0x178] sm:$0xff]   ;;  %v17833_v25 = vpack.c.bf16 %v8443_v55, %v8443_v55  ;;  %v17834_v33 = vpack.c.bf16 %v8444_v1, %v8444_v1  ;;  %v7674_v36 = vld [vmem:[#allocation2 + $0x50] sm:$0xff] }
 0x33a   :  { %9907 = vst [vmem:[#allocation3 + $0x14] sm:$0xf] %v18017_v50  ;;  %7611 = vst [vmem:[#allocation2 + $0x79] sm:$0xff] %v7547_v20  ;;  %v7553_v26 = vmax.f32 %v7341_v58, 0.0  ;;  %v7333_v50 = vadd.f32 %v7332_v39, %v20565_v23  ;;  %v8441_v31 = vld [vmem:[#allocation2 + $0x4a] sm:$0xff]  ;;  %v8442_v44 = vld [vmem:[#allocation2 + $0x52] sm:$0xff]  ;;  %v17772_v20 = vpack.c.bf16 %v7548_v47, %v7548_v47  ;;  %14093 = vmatpush2.bf16.msra.mxu1 %v19145_v11 }
 0x33b   :  { %7995 = vst [vmem:[#allocation3 + $0x120] sm:$0xf] %v17705_v6  ;;  %9145 = vst [vmem:[#allocation3 + $0xe4] sm:$0xf] %v17705_v6  ;;  %v18384_v6 = vpop.f32.mrf.mxu0  ;;  %v19038_v48 = vld [vmem:[#allocation3 + $0x4c] ss:$36 sps:$4 sm:$0xff]   ;;  %v17704_v53 = vpack.c.bf16 %v7674_v36, %v7674_v36  ;;  %14094 = vmatprep.subr.bf16.mxu1 %v21692_v3  ;;  %v18081_v11 = vpack.c.bf16 %v9971_v9, %v9971_v9 }
 0x33c   :  { %8383 = vst [vmem:[#allocation3 + $0x1b4] sm:$0xf] %v17773_v52  ;;  %9908 = vst [vmem:[#allocation3 + $0x38] sm:$0xf] %v18018_v0  ;;  %v17831_v0 = vpack.c.bf16 %v8441_v31, %v8441_v31  ;;  %v7551_v23 = vmax.f32 %v7333_v50, 0.0  ;;  %13538 = vmatprep.mubr.bf16.mxu1 %v19038_v48 }
 0x33d   :  { %9909 = vst [vmem:[#allocation3 + $0x5c] sm:$0xf] %v18019_v8  ;;  %9910 = vst [vmem:[#allocation3 + $0x80] sm:$0xf] %v18020_v21  ;;  %v17832_v8 = vpack.c.bf16 %v8442_v44, %v8442_v44  ;;  %v7344_v21 = vadd.f32 %v18384_v6, %v20580_v18  ;;  %v19044_v24 = vld [vmem:[#allocation3 + $0x94] ss:$36 sps:$4 sm:$0xff]  }
 0x33e   :  { %7614 = vst [vmem:[#allocation2 + $0x99] sm:$0xff] %v7550_v41  ;;  %7993 = vst [vmem:[#allocation3 + $0xd8] sm:$0xf] %v17703_v4  ;;  %v19036_v52 = vld [vmem:[#allocation3 + $0x48] ss:$36 sps:$4 sm:$0xff]   ;;  %v17775_v18 = vpack.c.bf16 %v7551_v23, %v7551_v23 }
 0x33f   :  { %9143 = vst [vmem:[#allocation3 + $0x9c] sm:$0xf] %v17703_v4  ;;  %8381 = vst [vmem:[#allocation3 + $0x16c] sm:$0xf] %v17771_v22  ;;  %v19039_v41 = vld [vmem:[#allocation3 + $0x8] ss:$36 sps:$4 sm:$0xff]   ;;  %v17777_v4 = vpack.c.bf16 %v7553_v26, %v7553_v26  ;;  %v7335_v22 = vpop.f32.mrf.mxu0  ;;  %13539 = vmatmul.mubr.bf16.gmra.mxu1 %v19036_v52 }
 0x340   :  { %7612 = vst [vmem:[#allocation2 + $0x81] sm:$0xff] %v7548_v47  ;;  %7996 = vst [vmem:[#allocation3 + $0x144] sm:$0xf] %v17706_v57  ;;  %v19041_v43 = vld [vmem:[#allocation3 + $0xc] ss:$36 sps:$4 sm:$0xff]   ;;  %v7554_v32 = vmax.f32 %v7344_v21, 0.0  ;;  %v7336_v47 = vadd.f32 %v7335_v22, %v20570_v29  ;;  %13546 = vmatprep.mubr.bf16.mxu1 %v19044_v24 }
 0x341   :  { %9146 = vst [vmem:[#allocation3 + $0x108] sm:$0xf] %v17706_v57  ;;  %8384 = vst [vmem:[#allocation3 + $0x1d8] sm:$0xf] %v17774_v34  ;;  %13819 = vmatprep.mubr.bf16.mxu0 %v19041_v43  ;;  %v19047_v58 = vld [vmem:[#allocation3 + $0x54] ss:$36 sps:$4 sm:$0xff]   ;;  %v18387_v55 = vpop.f32.mrf.mxu0 }
 0x342   :  { %8763 = vst [vmem:[#allocation3 + $0x128] sm:$0xf] %v17833_v25  ;;  %8764 = vst [vmem:[#allocation3 + $0x14c] sm:$0xf] %v17834_v33  ;;  %v7677_v57 = vld [vmem:[#allocation2 + $0x78] sm:$0xff]  ;;  %13820 = vmatmul.mubr.bf16.vlgmr.msra.gmra.mxu0 %v19039_v41  ;;  %v7679_v34 = vld [vmem:[#allocation2 + $0x90] sm:$0xff]  ;;  %v7357_v25 = vadd.f32 %v18387_v55, %v20592_v15  ;;  %v17778_v36 = vpack.c.bf16 %v7554_v32, %v7554_v32 }
 0x343   :  { %7617 = vst [vmem:[#allocation2 + $0xc1] sm:$0xff] %v7553_v26  ;;  %8382 = vst [vmem:[#allocation3 + $0x190] sm:$0xf] %v17772_v20  ;;  %v17707_v1 = vpack.c.bf16 %v7677_v57, %v7677_v57  ;;  %v7552_v39 = vmax.f32 %v7336_v47, 0.0  ;;  %13827 = vmatprep.mubr.bf16.mxu0 %v19047_v58  ;;  %v17709_v26 = vpack.c.bf16 %v7679_v34, %v7679_v34  ;;  %v7348_v31 = vpop.f32.mrf.mxu0  ;;  %v19045_v47 = vld [vmem:[#allocation3 + $0x50] ss:$36 sps:$4 sm:$0xff]  }
 0x344   :  { %7994 = vst [vmem:[#allocation3 + $0xfc] sm:$0xf] %v17704_v53  ;;  %9144 = vst [vmem:[#allocation3 + $0xc0] sm:$0xf] %v17704_v53  ;;  %v7557_v9 = vmax.f32 %v7357_v25, 0.0  ;;  %v7349_v52 = vadd.f32 %v7348_v31, %v20583_v42 }
 0x345   :  { %8761 = vst [vmem:[#allocation3 + $0xe0] sm:$0xf] %v17831_v0  ;;  %8762 = vst [vmem:[#allocation3 + $0x104] sm:$0xf] %v17832_v8  ;;  %v7680_v33 = vld [vmem:[#allocation2 + $0x98] sm:$0xff]  ;;  %v17776_v0 = vpack.c.bf16 %v7552_v39, %v7552_v39  ;;  %v18388_v8 = vpop.f32.mrf.mxu0 }
 0x346   :  { %7615 = vst [vmem:[#allocation2 + $0xa9] sm:$0xff] %v7551_v23  ;;  %8387 = vst [vmem:[#allocation3 + $0x244] sm:$0xf] %v17777_v4  ;;  %v8447_v29 = vld [vmem:[#allocation2 + $0x92] sm:$0xff]  ;;  %v8448_v50 = vld [vmem:[#allocation2 + $0x9a] sm:$0xff]  ;;  %v17710_v44 = vpack.c.bf16 %v7680_v33, %v7680_v33  ;;  %v7555_v22 = vmax.f32 %v7349_v52, 0.0  ;;  %v7360_v42 = vadd.f32 %v18388_v8, %v20596_v62 }
 0x347   :  { %7618 = vst [vmem:[#allocation2 + $0xc9] sm:$0xff] %v7554_v32  ;;  %8385 = vst [vmem:[#allocation3 + $0x1fc] sm:$0xf] %v17775_v18  ;;  %v17837_v20 = vpack.c.bf16 %v8447_v29, %v8447_v29  ;;  %v17838_v6 = vpack.c.bf16 %v8448_v50, %v8448_v50  ;;  %v7678_v48 = vld [vmem:[#allocation2 + $0x80] sm:$0xff]  ;;  %v19042_v4 = vld [vmem:[#allocation3 + $0x90] ss:$36 sps:$4 sm:$0xff]   ;;  %v17781_v32 = vpack.c.bf16 %v7557_v9, %v7557_v9  ;;  %v7351_v58 = vpop.f32.mrf.mxu0 }
 0x348   :  { %7997 = vst [vmem:[#allocation3 + $0x168] sm:$0xf] %v17707_v1  ;;  %9147 = vst [vmem:[#allocation3 + $0x12c] sm:$0xf] %v17707_v1  ;;  %v8445_v15 = vld [vmem:[#allocation2 + $0x7a] sm:$0xff]  ;;  %v8446_v53 = vld [vmem:[#allocation2 + $0x82] sm:$0xff]  ;;  %v17708_v23 = vpack.c.bf16 %v7678_v48, %v7678_v48  ;;  %v7352_v55 = vadd.f32 %v7351_v58, %v20586_v56  ;;  %13547 = vmatmul.mubr.bf16.gmra.mxu1 %v19042_v4  ;;  %v17779_v34 = vpack.c.bf16 %v7555_v22, %v7555_v22 }
 0x349   :  { %10291 = vst [vmem:[#allocation3 + $0x18] sm:$0xf] %v18081_v11  ;;  %7616 = vst [vmem:[#allocation2 + $0xb1] sm:$0xff] %v7552_v39  ;;  %v17835_v21 = vpack.c.bf16 %v8445_v15, %v8445_v15  ;;  %v17836_v41 = vpack.c.bf16 %v8446_v53, %v8446_v53  ;;  %v19050_v57 = vld [vmem:[#allocation3 + $0xdc] ss:$36 sps:$4 sm:$0xff]   ;;  %v7558_v18 = vmax.f32 %v7360_v42, 0.0  ;;  %v18391_v62 = vpop.f32.mrf.mxu0 }
 0x34a   :  { %7999 = vst [vmem:[#allocation3 + $0x1b0] sm:$0xf] %v17709_v26  ;;  %9149 = vst [vmem:[#allocation3 + $0x174] sm:$0xf] %v17709_v26  ;;  %v7683_v43 = vld [vmem:[#allocation2 + $0xc0] sm:$0xff]  ;;  %13828 = vmatmul.mubr.bf16.gmra.mxu0 %v19045_v47  ;;  %13554 = vmatprep.mubr.bf16.mxu1 %v19050_v57  ;;  %v7556_v25 = vmax.f32 %v7352_v55, 0.0  ;;  %v7373_v33 = vadd.f32 %v18391_v62, %v20608_v30 }
 0x34b   :  { %8388 = vst [vmem:[#allocation3 + $0x268] sm:$0xf] %v17778_v36  ;;  %8000 = vst [vmem:[#allocation3 + $0x1d4] sm:$0xf] %v17710_v44  ;;  %v17713_v24 = vpack.c.bf16 %v7683_v43, %v7683_v43  ;;  %v19053_v1 = vld [vmem:[#allocation3 + $0x9c] ss:$36 sps:$4 sm:$0xff]   ;;  %v7364_v50 = vpop.f32.mrf.mxu0 }
 0x34c   :  { %9150 = vst [vmem:[#allocation3 + $0x198] sm:$0xf] %v17710_v44  ;;  %8767 = vst [vmem:[#allocation3 + $0x1b8] sm:$0xf] %v17837_v20  ;;  %13835 = vmatprep.mubr.bf16.mxu0 %v19053_v1  ;;  %v17782_v20 = vpack.c.bf16 %v7558_v18, %v7558_v18  ;;  %v17780_v53 = vpack.c.bf16 %v7556_v25, %v7556_v25  ;;  %v19051_v4 = vld [vmem:[#allocation3 + $0x98] ss:$36 sps:$4 sm:$0xff]  }
 0x34d   :  { %8768 = vst [vmem:[#allocation3 + $0x1dc] sm:$0xf] %v17838_v6  ;;  %7621 = vst [vmem:[#allocation2 + $0xf1] sm:$0xff] %v7557_v9  ;;  %v7681_v11 = vld [vmem:[#allocation2 + $0xa8] sm:$0xff]  ;;  %v7561_v6 = vmax.f32 %v7373_v33, 0.0  ;;  %v7365_v9 = vadd.f32 %v7364_v50, %v20599_v10  ;;  %v18392_v30 = vpop.f32.mrf.mxu0 }
 0x34e   :  { %8386 = vst [vmem:[#allocation3 + $0x220] sm:$0xf] %v17776_v0  ;;  %7998 = vst [vmem:[#allocation3 + $0x18c] sm:$0xf] %v17708_v23  ;;  %v7684_v39 = vld [vmem:[#allocation2 + $0xc8] sm:$0xff]  ;;  %v17711_v26 = vpack.c.bf16 %v7681_v11, %v7681_v11 }
 0x34f   :  { %9148 = vst [vmem:[#allocation3 + $0x150] sm:$0xf] %v17708_v23  ;;  %8765 = vst [vmem:[#allocation3 + $0x170] sm:$0xf] %v17835_v21  ;;  %v17714_v29 = vpack.c.bf16 %v7684_v39, %v7684_v39  ;;  %v8451_v56 = vld [vmem:[#allocation2 + $0xc2] sm:$0xff]  ;;  %v8452_v0 = vld [vmem:[#allocation2 + $0xca] sm:$0xff] }
 0x350   :  { %8766 = vst [vmem:[#allocation3 + $0x194] sm:$0xf] %v17836_v41  ;;  %7619 = vst [vmem:[#allocation2 + $0xd9] sm:$0xff] %v7555_v22  ;;  %v7682_v36 = vld [vmem:[#allocation2 + $0xb0] sm:$0xff]  ;;  %v17841_v44 = vpack.c.bf16 %v8451_v56, %v8451_v56  ;;  %v19048_v23 = vld [vmem:[#allocation3 + $0xd8] ss:$36 sps:$4 sm:$0xff]   ;;  %v7376_v41 = vadd.f32 %v18392_v30, %v20615_v19  ;;  %v17842_v43 = vpack.c.bf16 %v8452_v0, %v8452_v0  ;;  %v7367_v22 = vpop.f32.mrf.mxu0 }
 0x351   :  { %8003 = vst [vmem:[#allocation3 + $0x240] sm:$0xf] %v17713_v24  ;;  %9153 = vst [vmem:[#allocation3 + $0x204] sm:$0xf] %v17713_v24  ;;  %v8449_v31 = vld [vmem:[#allocation2 + $0xaa] sm:$0xff]  ;;  %v17712_v52 = vpack.c.bf16 %v7682_v36, %v7682_v36  ;;  %v8450_v15 = vld [vmem:[#allocation2 + $0xb2] sm:$0xff]  ;;  %v7368_v58 = vadd.f32 %v7367_v22, %v20602_v51  ;;  %13555 = vmatmul.mubr.bf16.gmra.mxu1 %v19048_v23 }
 0x352   :  { %8391 = vst [vmem:[#allocation3 + $0x2d4] sm:$0xf] %v17781_v32  ;;  %7622 = vst [vmem:[#allocation2 + $0xf9] sm:$0xff] %v7558_v18  ;;  %v17839_v48 = vpack.c.bf16 %v8449_v31, %v8449_v31  ;;  %v7559_v21 = vmax.f32 %v7365_v9, 0.0  ;;  %v17840_v10 = vpack.c.bf16 %v8450_v15, %v8450_v15  ;;  %v19057_v42 = vld [vmem:[#allocation3 + $0x124] ss:$36 sps:$4 sm:$0xff]   ;;  %v17785_v32 = vpack.c.bf16 %v7561_v6, %v7561_v6  ;;  %v18395_v18 = vpop.f32.mrf.mxu0 }
 0x353   :  { %8389 = vst [vmem:[#allocation3 + $0x28c] sm:$0xf] %v17779_v34  ;;  %7620 = vst [vmem:[#allocation2 + $0xe1] sm:$0xff] %v7556_v25  ;;  %v7562_v47 = vmax.f32 %v7376_v41, 0.0  ;;  %v19060_v57 = vld [vmem:[#allocation3 + $0xe4] ss:$36 sps:$4 sm:$0xff]   ;;  %13836 = vmatmul.mubr.bf16.gmra.mxu0 %v19051_v4  ;;  %13562 = vmatprep.mubr.bf16.mxu1 %v19057_v42  ;;  %v7389_v34 = vadd.f32 %v18395_v18, %v20639_v14 }
 0x354   :  { %8001 = vst [vmem:[#allocation3 + $0x1f8] sm:$0xf] %v17711_v26  ;;  %9151 = vst [vmem:[#allocation3 + $0x1bc] sm:$0xf] %v17711_v26  ;;  %v7687_v8 = vld [vmem:[#allocation2 + $0xf0] sm:$0xff]  ;;  %v17783_v19 = vpack.c.bf16 %v7559_v21, %v7559_v21  ;;  %v7560_v1 = vmax.f32 %v7368_v58, 0.0  ;;  %13843 = vmatprep.mubr.bf16.mxu0 %v19060_v57  ;;  %v7380_v33 = vpop.f32.mrf.mxu0 }
 0x355   :  { %8004 = vst [vmem:[#allocation3 + $0x264] sm:$0xf] %v17714_v29  ;;  %9154 = vst [vmem:[#allocation3 + $0x228] sm:$0xf] %v17714_v29  ;;  %v17717_v24 = vpack.c.bf16 %v7687_v8, %v7687_v8  ;;  %v17786_v25 = vpack.c.bf16 %v7562_v47, %v7562_v47  ;;  %v7565_v50 = vmax.f32 %v7389_v34, 0.0  ;;  %v7381_v36 = vadd.f32 %v7380_v33, %v20622_v5 }
 0x356   :  { %8771 = vst [vmem:[#allocation3 + $0x248] sm:$0xf] %v17841_v44  ;;  %8392 = vst [vmem:[#allocation3 + $0x2f8] sm:$0xf] %v17782_v20  ;;  %v17784_v44 = vpack.c.bf16 %v7560_v1, %v7560_v1  ;;  %v18396_v14 = vpop.f32.mrf.mxu0  ;;  %v19058_v9 = vld [vmem:[#allocation3 + $0xe0] ss:$36 sps:$4 sm:$0xff]  }
 0x357   :  { %7625 = vst [vmem:[#allocation2 + $0x121] sm:$0xff] %v7561_v6  ;;  %8002 = vst [vmem:[#allocation3 + $0x21c] sm:$0xf] %v17712_v52  ;;  %v7685_v55 = vld [vmem:[#allocation2 + $0xd8] sm:$0xff]  ;;  %v19055_v6 = vld [vmem:[#allocation3 + $0x120] ss:$36 sps:$4 sm:$0xff]  }
 0x358   :  { %9152 = vst [vmem:[#allocation3 + $0x1e0] sm:$0xf] %v17712_v52  ;;  %8769 = vst [vmem:[#allocation3 + $0x200] sm:$0xf] %v17839_v48  ;;  %v17715_v62 = vpack.c.bf16 %v7685_v55, %v7685_v55  ;;  %v7563_v52 = vmax.f32 %v7381_v36, 0.0  ;;  %v7392_v48 = vadd.f32 %v18396_v14, %v20647_v63  ;;  %v7383_v30 = vpop.f32.mrf.mxu0 }
 0x359   :  { %8390 = vst [vmem:[#allocation3 + $0x2b0] sm:$0xf] %v17780_v53  ;;  %7623 = vst [vmem:[#allocation2 + $0x109] sm:$0xff] %v7559_v21  ;;  %v7688_v11 = vld [vmem:[#allocation2 + $0xf8] sm:$0xff]  ;;  %v19063_v5 = vld [vmem:[#allocation3 + $0x16c] ss:$36 sps:$4 sm:$0xff]   ;;  %v7384_v53 = vadd.f32 %v7383_v30, %v20629_v45  ;;  %13563 = vmatmul.mubr.bf16.gmra.mxu1 %v19055_v6 }
 0x35a   :  { %8770 = vst [vmem:[#allocation3 + $0x224] sm:$0xf] %v17840_v10  ;;  %8772 = vst [vmem:[#allocation3 + $0x26c] sm:$0xf] %v17842_v43  ;;  %v8455_v51 = vld [vmem:[#allocation2 + $0xf2] sm:$0xff]  ;;  %v8456_v39 = vld [vmem:[#allocation2 + $0xfa] sm:$0xff]  ;;  %v17718_v26 = vpack.c.bf16 %v7688_v11, %v7688_v11  ;;  %v17787_v23 = vpack.c.bf16 %v7563_v52, %v7563_v52  ;;  %v18399_v21 = vpop.f32.mrf.mxu0  ;;  %13570 = vmatprep.mubr.bf16.mxu1 %v19063_v5 }
 0x35b   :  { %8007 = vst [vmem:[#allocation3 + $0x2d0] sm:$0xf] %v17717_v24  ;;  %9157 = vst [vmem:[#allocation3 + $0x294] sm:$0xf] %v17717_v24  ;;  %v17845_v29 = vpack.c.bf16 %v8455_v51, %v8455_v51  ;;  %v17846_v56 = vpack.c.bf16 %v8456_v39, %v8456_v39  ;;  %v7686_v31 = vld [vmem:[#allocation2 + $0xe0] sm:$0xff]  ;;  %v20875_v15 = vmax.f32 %v7392_v48, 0.0  ;;  %13844 = vmatmul.mubr.bf16.gmra.mxu0 %v19058_v9 }
 0x35c   :  { %8395 = vst [vmem:[#allocation3 + $0x364] sm:$0xf] %v17785_v32  ;;  %7626 = vst [vmem:[#allocation2 + $0x129] sm:$0xff] %v7562_v47  ;;  %v17716_v20 = vpack.c.bf16 %v7686_v31, %v7686_v31  ;;  %v19066_v0 = vld [vmem:[#allocation3 + $0x12c] ss:$36 sps:$4 sm:$0xff]   ;;  %v8453_v8 = vld [vmem:[#allocation2 + $0xda] sm:$0xff]  ;;  %v7405_v22 = vadd.f32 %v18399_v21, %v20672_v13  ;;  %v7396_v58 = vpop.f32.mrf.mxu0 }
 0x35d   :  { %8393 = vst [vmem:[#allocation3 + $0x31c] sm:$0xf] %v17783_v19  ;;  %7624 = vst [vmem:[#allocation2 + $0x111] sm:$0xff] %v7560_v1  ;;  %v8454_v41 = vld [vmem:[#allocation2 + $0xe2] sm:$0xff]  ;;  %v17843_v10 = vpack.c.bf16 %v8453_v8, %v8453_v8  ;;  %v7564_v4 = vmax.f32 %v7384_v53, 0.0  ;;  %13851 = vmatprep.mubr.bf16.mxu0 %v19066_v0  ;;  %v19158_v5 = vld [vmem:[%s21679_s3 + $0x170] sm:$0xff]  }
 0x35e   :  { %8005 = vst [vmem:[#allocation3 + $0x288] sm:$0xf] %v17715_v62  ;;  %9155 = vst [vmem:[#allocation3 + $0x24c] sm:$0xf] %v17715_v62  ;;  %v7691_v43 = vld [vmem:[#allocation2 + $0x120] sm:$0xff]  ;;  %v17844_v42 = vpack.c.bf16 %v8454_v41, %v8454_v41  ;;  %v7569_v34 = vmax.f32 %v7405_v22, 0.0  ;;  %v7397_v62 = vadd.f32 %v7396_v58, %v20654_v28  ;;  %v18400_v51 = vpop.f32.mrf.mxu0  ;;  %14095 = vmatpush2.bf16.msra.mxu1 %v19158_v5 }
 0x35f   :  { %8396 = vst [vmem:[#allocation3 + $0x388] sm:$0xf] %v17786_v25  ;;  %8008 = vst [vmem:[#allocation3 + $0x2f4] sm:$0xf] %v17718_v26  ;;  %v17721_v19 = vpack.c.bf16 %v7691_v43, %v7691_v43  ;;  %v17788_v11 = vpack.c.bf16 %v7564_v4, %v7564_v4  ;;  %v19061_v28 = vld [vmem:[#allocation3 + $0x168] ss:$36 sps:$4 sm:$0xff]   ;;  %14096 = vmatprep.subr.bf16.mxu1 %v21692_v3 }
 0x360   :  { %9158 = vst [vmem:[#allocation3 + $0x2b8] sm:$0xf] %v17718_v26  ;;  %8775 = vst [vmem:[#allocation3 + $0x2d8] sm:$0xf] %v17845_v29  ;;  %v7689_v63 = vld [vmem:[#allocation2 + $0x108] sm:$0xff]  ;;  %v17790_v26 = vpack.c.bf16 %v20875_v15, %v20875_v15  ;;  %v7567_v29 = vmax.f32 %v7397_v62, 0.0  ;;  %v7399_v14 = vpop.f32.mrf.mxu0 }
 0x361   :  { %8776 = vst [vmem:[#allocation3 + $0x2fc] sm:$0xf] %v17846_v56  ;;  %7629 = vst [vmem:[#allocation2 + $0x151] sm:$0xff] %v7565_v50  ;;  %v17719_v24 = vpack.c.bf16 %v7689_v63, %v7689_v63  ;;  %v7408_v56 = vadd.f32 %v18400_v51, %v20680_v27  ;;  %v19070_v50 = vld [vmem:[#allocation3 + $0x1b4] ss:$36 sps:$4 sm:$0xff]   ;;  %13571 = vmatmul.mubr.bf16.gmra.mxu1 %v19061_v28  ;;  %v19171_v43 = vld [vmem:[%s21679_s3 + $0x168] sm:$0xff]  }
 0x362   :  { %8394 = vst [vmem:[#allocation3 + $0x340] sm:$0xf] %v17784_v44  ;;  %8006 = vst [vmem:[#allocation3 + $0x2ac] sm:$0xf] %v17716_v20  ;;  %v19064_v44 = vld [vmem:[#allocation3 + $0x128] ss:$36 sps:$4 sm:$0xff]   ;;  %v17791_v30 = vpack.c.bf16 %v7567_v29, %v7567_v29  ;;  %13578 = vmatprep.mubr.bf16.mxu1 %v19070_v50  ;;  %14097 = vmatpush2.bf16.msra.mxu1 %v19171_v43 }
 0x363   :  { %9156 = vst [vmem:[#allocation3 + $0x270] sm:$0xf] %v17716_v20  ;;  %7627 = vst [vmem:[#allocation2 + $0x139] sm:$0xff] %v7563_v52  ;;  %v7692_v45 = vld [vmem:[#allocation2 + $0x128] sm:$0xff]  ;;  %v19073_v20 = vld [vmem:[#allocation3 + $0x174] ss:$36 sps:$4 sm:$0xff]   ;;  %v7400_v52 = vadd.f32 %v7399_v14, %v20661_v61  ;;  %13852 = vmatmul.mubr.bf16.gmra.mxu0 %v19064_v44  ;;  %14098 = vmatprep.subr.bf16.mxu1 %v21692_v3 }
 0x364   :  { %7630 = vst [vmem:[#allocation2 + $0x159] sm:$0xff] %v20875_v15  ;;  %8397 = vst [vmem:[#allocation3 + $0x3ac] sm:$0xf] %v17787_v23  ;;  %v8459_v32 = vld [vmem:[#allocation2 + $0x122] sm:$0xff]  ;;  %v8460_v47 = vld [vmem:[#allocation2 + $0x12a] sm:$0xff]  ;;  %v17722_v18 = vpack.c.bf16 %v7692_v45, %v7692_v45  ;;  %v7570_v9 = vmax.f32 %v7408_v56, 0.0  ;;  %v18403_v15 = vpop.f32.mrf.mxu0  ;;  %13859 = vmatprep.mubr.bf16.mxu0 %v19073_v20 }
 0x365   :  { %8773 = vst [vmem:[#allocation3 + $0x290] sm:$0xf] %v17843_v10  ;;  %v7690_v57 = vld [vmem:[#allocation2 + $0x110] sm:$0xff]  ;;  %v17849_v55 = vpack.c.bf16 %v8459_v32, %v8459_v32  ;;  %v17850_v1 = vpack.c.bf16 %v8460_v47, %v8460_v47  ;;  %7628 = vst [vmem:[#allocation2 + $0x141] sm:$0xff] %v7564_v4  ;;  %v7568_v21 = vmax.f32 %v7400_v52, 0.0  ;;  %v7421_v41 = vadd.f32 %v18403_v15, %v20701_v40  ;;  %v19172_v4 = vld [vmem:[%s21679_s3 + $0x1b8] sm:$0xff]  }
 0x366   :  { %8774 = vst [vmem:[#allocation3 + $0x2b4] sm:$0xf] %v17844_v42  ;;  %v17720_v13 = vpack.c.bf16 %v7690_v57, %v7690_v57  ;;  %8009 = vst [vmem:[#allocation3 + $0x318] sm:$0xf] %v17719_v24  ;;  %v8457_v39 = vld [vmem:[#allocation2 + $0x10a] sm:$0xff]  ;;  %v8458_v25 = vld [vmem:[#allocation2 + $0x112] sm:$0xff]  ;;  %v7412_v22 = vpop.f32.mrf.mxu0  ;;  %14366 = vmatpush1.bf16.msra.mxu0 %v19172_v4 }
 0x367   :  { %9159 = vst [vmem:[#allocation3 + $0x2dc] sm:$0xf] %v17719_v24  ;;  %8011 = vst [vmem:[#allocation3 + $0x360] sm:$0xf] %v17721_v19  ;;  %v17847_v36 = vpack.c.bf16 %v8457_v39, %v8457_v39  ;;  %v17848_v31 = vpack.c.bf16 %v8458_v25, %v8458_v25  ;;  %v7573_v40 = vmax.f32 %v7421_v41, 0.0  ;;  %v7413_v24 = vadd.f32 %v7412_v22, %v20687_v46  ;;  %v21748_v39 = vld [vmem:[#allocation9_spill] sm:$0xff] }
 0x368   :  { %8012 = vst [vmem:[#allocation3 + $0x384] sm:$0xf] %v17722_v18  ;;  %9161 = vst [vmem:[#allocation3 + $0x324] sm:$0xf] %v17721_v19  ;;  %v7695_v33 = vld [vmem:[#allocation2 + $0x150] sm:$0xff]  ;;  %v17792_v45 = vpack.c.bf16 %v7568_v21, %v7568_v21  ;;  %v18404_v32 = vpop.f32.mrf.mxu0  ;;  %14367 = vmatprep.subr.bf16.mxu0 %v21692_v3  ;;  %v21749_v56 = vld [vmem:[#allocation7_spill] sm:$0xff] }
 0x369   :  { %9162 = vst [vmem:[#allocation3 + $0x348] sm:$0xf] %v17722_v18  ;;  %8779 = vst [vmem:[#allocation3 + $0x368] sm:$0xf] %v17849_v55  ;;  %v17725_v6 = vpack.c.bf16 %v7695_v33, %v7695_v33  ;;  %v8079_v27 = vld [vmem:[#allocation2 + $0x151] sm:$0xff]  ;;  %v7571_v58 = vmax.f32 %v7413_v24, 0.0  ;;  %v7424_v57 = vadd.f32 %v18404_v32, %v20711_v54 }
 0x36a   :  { %8780 = vst [vmem:[#allocation3 + $0x38c] sm:$0xf] %v17850_v1  ;;  %7633 = vst [vmem:[#allocation2 + $0x181] sm:$0xff] %v7569_v34  ;;  %v7693_v48 = vld [vmem:[#allocation2 + $0x138] sm:$0xff]  ;;  %v17789_v8 = vpack.c.bf16 %v8079_v27, %v8079_v27  ;;  %v19068_v47 = vld [vmem:[#allocation3 + $0x1b0] ss:$36 sps:$4 sm:$0xff]   ;;  %v7415_v18 = vpop.f32.mrf.mxu0 }
 0x36b   :  { %8010 = vst [vmem:[#allocation3 + $0x33c] sm:$0xf] %v17720_v13  ;;  %9160 = vst [vmem:[#allocation3 + $0x300] sm:$0xf] %v17720_v13  ;;  %v17723_v53 = vpack.c.bf16 %v7693_v48, %v7693_v48  ;;  %v7696_v0 = vld [vmem:[#allocation2 + $0x158] sm:$0xff]  ;;  %v7574_v46 = vmax.f32 %v7424_v57, 0.0  ;;  %v7416_v1 = vadd.f32 %v7415_v18, %v20694_v38  ;;  %13579 = vmatmul.mubr.bf16.gmra.mxu1 %v19068_v47 }
 0x36c   :  { %8398 = vst [vmem:[#allocation3 + $0x3d0] sm:$0xf] %v17788_v11  ;;  %8400 = vst [vmem:[#allocation3 + $0x418] sm:$0xf] %v17790_v26  ;;  %v8463_v23 = vld [vmem:[#allocation2 + $0x152] sm:$0xff]  ;;  %v8464_v61 = vld [vmem:[#allocation2 + $0x15a] sm:$0xff]  ;;  %v17726_v10 = vpack.c.bf16 %v7696_v0, %v7696_v0  ;;  %v17795_v62 = vpack.c.bf16 %v7571_v58, %v7571_v58  ;;  %v18407_v13 = vpop.f32.mrf.mxu0 }
 0x36d   :  { %7631 = vst [vmem:[#allocation2 + $0x169] sm:$0xff] %v7567_v29  ;;  %8777 = vst [vmem:[#allocation3 + $0x320] sm:$0xf] %v17847_v36  ;;  %v17853_v63 = vpack.c.bf16 %v8463_v23, %v8463_v23  ;;  %v17854_v42 = vpack.c.bf16 %v8464_v61, %v8464_v61  ;;  %v19071_v19 = vld [vmem:[#allocation3 + $0x170] ss:$36 sps:$4 sm:$0xff]   ;;  %v7694_v11 = vld [vmem:[#allocation2 + $0x140] sm:$0xff]  ;;  %v7437_v25 = vadd.f32 %v18407_v13, %v21748_v39 }
 0x36e   :  { %8778 = vst [vmem:[#allocation3 + $0x344] sm:$0xf] %v17848_v31  ;;  %8015 = vst [vmem:[#allocation3 + $0x3f0] sm:$0xf] %v17725_v6  ;;  %v19076_v55 = vld [vmem:[#allocation3 + $0x1fc] ss:$36 sps:$4 sm:$0xff]   ;;  %13860 = vmatmul.mubr.bf16.gmra.mxu0 %v19071_v19  ;;  %v17724_v33 = vpack.c.bf16 %v7694_v11, %v7694_v11  ;;  %v7428_v28 = vpop.f32.mrf.mxu0 }
 0x36f   :  { %9165 = vst [vmem:[#allocation3 + $0x3b4] sm:$0xf] %v17725_v6  ;;  %7634 = vst [vmem:[#allocation2 + $0x189] sm:$0xff] %v7570_v9  ;;  %v19079_v34 = vld [vmem:[#allocation3 + $0x1bc] ss:$36 sps:$4 sm:$0xff]   ;;  %13586 = vmatprep.mubr.bf16.mxu1 %v19076_v55  ;;  %v7572_v54 = vmax.f32 %v7416_v1, 0.0  ;;  %v7429_v50 = vadd.f32 %v7428_v28, %v21749_v56 }
 0x370   :  { %8401 = vst [vmem:[#allocation3 + $0x43c] sm:$0xf] %v17791_v30  ;;  %8013 = vst [vmem:[#allocation3 + $0x3a8] sm:$0xf] %v17723_v53  ;;  %v8461_v51 = vld [vmem:[#allocation2 + $0x13a] sm:$0xff]  ;;  %13867 = vmatprep.mubr.bf16.mxu0 %v19079_v34  ;;  %v7577_v29 = vmax.f32 %v7437_v25, 0.0  ;;  %v18408_v6 = vpop.f32.mrf.mxu0 }
 0x371   :  { %9163 = vst [vmem:[#allocation3 + $0x36c] sm:$0xf] %v17723_v53  ;;  %8399 = vst [vmem:[#allocation3 + $0x3f4] sm:$0xf] %v17789_v8  ;;  %v17851_v26 = vpack.c.bf16 %v8461_v51, %v8461_v51  ;;  %v19074_v38 = vld [vmem:[#allocation3 + $0x1f8] ss:$36 sps:$4 sm:$0xff]   ;;  %v17796_v14 = vpack.c.bf16 %v7572_v54, %v7572_v54 }
 0x372   :  { %7632 = vst [vmem:[#allocation2 + $0x171] sm:$0xff] %v7568_v21  ;;  %8016 = vst [vmem:[#allocation3 + $0x414] sm:$0xf] %v17726_v10  ;;  %v8462_v36 = vld [vmem:[#allocation2 + $0x142] sm:$0xff]  ;;  %v19077_v20 = vld [vmem:[#allocation3 + $0x1b8] ss:$36 sps:$4 sm:$0xff]  }
 0x373   :  { %9166 = vst [vmem:[#allocation3 + $0x3d8] sm:$0xf] %v17726_v10  ;;  %8783 = vst [vmem:[#allocation3 + $0x3f8] sm:$0xf] %v17853_v63  ;;  %v19083_v9 = vld [vmem:[#allocation3 + $0x244] ss:$36 sps:$4 sm:$0xff]   ;;  %v17852_v52 = vpack.c.bf16 %v8462_v36, %v8462_v36  ;;  %v7431_v63 = vpop.f32.mrf.mxu0  ;;  %13587 = vmatmul.mubr.bf16.gmra.mxu1 %v19074_v38 }
 0x374   :  { %8784 = vst [vmem:[#allocation3 + $0x41c] sm:$0xf] %v17854_v42  ;;  %7637 = vst [vmem:[#allocation2 + $0x1e1] sm:$0xff] %v7573_v40  ;;  %v7697_v31 = vld [vmem:[#allocation2 + $0x168] sm:$0xff]  ;;  %v8849_v15 = vld [vmem:[#allocation2 + $0x180] sm:$0xff]  ;;  %v7575_v53 = vmax.f32 %v7429_v50, 0.0  ;;  %13594 = vmatprep.mubr.bf16.mxu1 %v19083_v9 }
 0x375   :  { %8402 = vst [vmem:[#allocation3 + $0x460] sm:$0xf] %v17792_v45  ;;  %7635 = vst [vmem:[#allocation2 + $0x1c9] sm:$0xff] %v7571_v58  ;;  %v17727_v48 = vpack.c.bf16 %v7697_v31, %v7697_v31  ;;  %v21750_v0 = vld [vmem:[#allocation10_spill] sm:$0xff]  ;;  %v17919_v43 = vpack.c.bf16 %v8849_v15, %v8849_v15  ;;  %v19186_v45 = vld [vmem:[%s21679_s3 + $0x1b0] sm:$0xff]   ;;  %v18411_v18 = vpop.f32.mrf.mxu0 }
 0x376   :  { %7638 = vst [vmem:[#allocation2 + $0x1e9] sm:$0xff] %v7574_v46  ;;  %8405 = vst [vmem:[#allocation3 + $0x4cc] sm:$0xf] %v17795_v62  ;;  %v7440_v8 = vadd.f32 %v18408_v6, %v21750_v0  ;;  %v8850_v21 = vld [vmem:[#allocation2 + $0x188] sm:$0xff]  ;;  %v19185_v24 = vld [vmem:[%s21679_s3 + $0x160] sm:$0xff]   ;;  %13868 = vmatmul.mubr.bf16.gmra.mxu0 %v19077_v20  ;;  %v7453_v62 = vadd.f32 %v18411_v18, %v20750_v17 }
 0x377   :  { %7636 = vst [vmem:[#allocation2 + $0x1d1] sm:$0xff] %v7572_v54  ;;  %8014 = vst [vmem:[#allocation3 + $0x3cc] sm:$0xf] %v17724_v33  ;;  %v17920_v4 = vpack.c.bf16 %v8850_v21, %v8850_v21  ;;  %v21751_v47 = vld [vmem:[#allocation8_spill] sm:$0xff]  ;;  %14099 = vmatpush2.bf16.msra.mxu1 %v19185_v24  ;;  %v7444_v54 = vpop.f32.mrf.mxu0  ;;  %14368 = vmatpush1.bf16.msra.mxu0 %v19186_v45  ;;  %v21752_v28 = vld [vmem:[#allocation11_spill] sm:$0xff] }
 0x378   :  { %9164 = vst [vmem:[#allocation3 + $0x390] sm:$0xf] %v17724_v33  ;;  %8781 = vst [vmem:[#allocation3 + $0x3b0] sm:$0xf] %v17851_v26  ;;  %v7578_v32 = vmax.f32 %v7440_v8, 0.0  ;;  %v7432_v58 = vadd.f32 %v7431_v63, %v21751_v47  ;;  %v20912_v33 = vpop.f32.mrf.mxu1  ;;  %14100 = vmatprep.subr.bf16.mxu1 %v21692_v3  ;;  %v7581_v26 = vmax.f32 %v7453_v62, 0.0  ;;  %14369 = vmatprep.subr.bf16.mxu0 %v21692_v3 }
 0x379   :  { %v7698_v44 = vld [vmem:[#allocation2 + $0x170] sm:$0xff]  ;;  %7641 = vst [vmem:[#allocation2 + $0x211] sm:$0xff] %v7577_v29  ;;  %8406 = vst [vmem:[#allocation3 + $0x4f0] sm:$0xf] %v17796_v14  ;;  %v19086_v57 = vld [vmem:[#allocation3 + $0x204] ss:$36 sps:$4 sm:$0xff]   ;;  %v7445_v29 = vadd.f32 %v7444_v54, %v21752_v28  ;;  %v18412_v38 = vpop.f32.mrf.mxu0 }
 0x37a   :  { %v17728_v27 = vpack.c.bf16 %v7698_v44, %v7698_v44  ;;  %v8465_v30 = vld [vmem:[#allocation2 + $0x16a] sm:$0xff]  ;;  %v8466_v5 = vld [vmem:[#allocation2 + $0x172] sm:$0xff]  ;;  %8782 = vst [vmem:[#allocation3 + $0x3d4] sm:$0xf] %v17852_v52  ;;  %8017 = vst [vmem:[#allocation3 + $0x438] sm:$0xf] %v17727_v48  ;;  %13875 = vmatprep.mubr.bf16.mxu0 %v19086_v57  ;;  %v13534_v36 = vpop.f32.mrf.mxu1  ;;  %v7456_v20 = vadd.f32 %v18412_v38, %v20756_v49 }
 0x37b   :  { %v17855_v23 = vpack.c.bf16 %v8465_v30, %v8465_v30  ;;  %v17856_v61 = vpack.c.bf16 %v8466_v5, %v8466_v5  ;;  %v7703_v41 = vld [vmem:[#allocation2 + $0x1e0] sm:$0xff]  ;;  %9167 = vst [vmem:[#allocation3 + $0x3fc] sm:$0xf] %v17727_v48  ;;  %7639 = vst [vmem:[#allocation2 + $0x1f9] sm:$0xff] %v7575_v53  ;;  %v7576_v34 = vmax.f32 %v7432_v58, 0.0  ;;  %v7579_v14 = vmax.f32 %v7445_v29, 0.0  ;;  %v7447_v52 = vpop.f32.mrf.mxu0 }
 0x37c   :  { %v8087_v10 = vld [vmem:[#allocation2 + $0x1e1] sm:$0xff]  ;;  %8018 = vst [vmem:[#allocation3 + $0x45c] sm:$0xf] %v17728_v27  ;;  %9168 = vst [vmem:[#allocation3 + $0x420] sm:$0xf] %v17728_v27  ;;  %v17733_v42 = vpack.c.bf16 %v7703_v41, %v7703_v41  ;;  %v20918_v27 = vpop.f32.mrf.mxu1  ;;  %v7582_v30 = vmax.f32 %v7456_v20, 0.0  ;;  %v7448_v5 = vadd.f32 %v7447_v52, %v20747_v60 }
 0x37d   :  { %v7701_v22 = vld [vmem:[#allocation2 + $0x1c8] sm:$0xff]  ;;  %v17797_v40 = vpack.c.bf16 %v8087_v10, %v8087_v10  ;;  %8785 = vst [vmem:[#allocation3 + $0x440] sm:$0xf] %v17855_v23  ;;  %8786 = vst [vmem:[#allocation3 + $0x464] sm:$0xf] %v17856_v61  ;;  %v17800_v17 = vpack.c.bf16 %v7576_v34, %v7576_v34  ;;  %v18415_v53 = vpop.f32.mrf.mxu0  ;;  %v21753_v8 = vld [vmem:[#allocation14_spill] sm:$0xff] }
 0x37e   :  { %v17731_v19 = vpack.c.bf16 %v7701_v22, %v7701_v22  ;;  %9169 = vst [vmem:[#allocation3 + $0x444] sm:$0xf] %v17919_v43  ;;  %9170 = vst [vmem:[#allocation3 + $0x468] sm:$0xf] %v17920_v4  ;;  %v7704_v55 = vld [vmem:[#allocation2 + $0x1e8] sm:$0xff]  ;;  %v7702_v56 = vld [vmem:[#allocation2 + $0x1d0] sm:$0xff]  ;;  %v13537_v49 = vpop.f32.mrf.mxu1  ;;  %v7469_v23 = vadd.f32 %v18415_v53, %v21753_v8 }
 0x37f   :  { %8023 = vst [vmem:[#allocation3 + $0x510] sm:$0xf] %v17733_v42  ;;  %v8088_v46 = vld [vmem:[#allocation2 + $0x1e9] sm:$0xff]  ;;  %8407 = vst [vmem:[#allocation3 + $0x514] sm:$0xf] %v17797_v40  ;;  %v17734_v13 = vpack.c.bf16 %v7704_v55, %v7704_v55  ;;  %v17732_v6 = vpack.c.bf16 %v7702_v56, %v7702_v56  ;;  %v7580_v0 = vmax.f32 %v7448_v5, 0.0  ;;  %v7460_v61 = vpop.f32.mrf.mxu0 }
 0x380   :  { %9173 = vst [vmem:[#allocation3 + $0x4d4] sm:$0xf] %v17733_v42  ;;  %v8471_v1 = vld [vmem:[#allocation2 + $0x1e2] sm:$0xff]  ;;  %7642 = vst [vmem:[#allocation2 + $0x219] sm:$0xff] %v7578_v32  ;;  %v17798_v11 = vpack.c.bf16 %v8088_v46, %v8088_v46  ;;  %v8472_v51 = vld [vmem:[#allocation2 + $0x1ea] sm:$0xff]  ;;  %v7585_v21 = vmax.f32 %v7469_v23, 0.0 }
 0x381   :  { %8021 = vst [vmem:[#allocation3 + $0x4c8] sm:$0xf] %v17731_v19  ;;  %9171 = vst [vmem:[#allocation3 + $0x48c] sm:$0xf] %v17731_v19  ;;  %v17861_v39 = vpack.c.bf16 %v8471_v1, %v8471_v1  ;;  %v17862_v25 = vpack.c.bf16 %v8472_v51, %v8472_v51  ;;  %v8469_v50 = vld [vmem:[#allocation2 + $0x1ca] sm:$0xff]  ;;  %v18416_v63 = vpop.f32.mrf.mxu0  ;;  %v8470_v43 = vld [vmem:[#allocation2 + $0x1d2] sm:$0xff] }
 0x382   :  { %7640 = vst [vmem:[#allocation2 + $0x201] sm:$0xff] %v7576_v34  ;;  %8024 = vst [vmem:[#allocation3 + $0x534] sm:$0xf] %v17734_v13  ;;  %v19081_v31 = vld [vmem:[#allocation3 + $0x240] ss:$36 sps:$4 sm:$0xff]   ;;  %v17859_v9 = vpack.c.bf16 %v8469_v50, %v8469_v50  ;;  %v21754_v10 = vld [vmem:[#allocation12_spill] sm:$0xff]  ;;  %v17860_v45 = vpack.c.bf16 %v8470_v43, %v8470_v43 }
 0x383   :  { %8408 = vst [vmem:[#allocation3 + $0x538] sm:$0xf] %v17798_v11  ;;  %9174 = vst [vmem:[#allocation3 + $0x4f8] sm:$0xf] %v17734_v13  ;;  %v19084_v44 = vld [vmem:[#allocation3 + $0x200] ss:$36 sps:$4 sm:$0xff]   ;;  %13595 = vmatmul.mubr.bf16.gmra.mxu1 %v19081_v31  ;;  %v7461_v60 = vadd.f32 %v7460_v61, %v21754_v10  ;;  %v7463_v18 = vpop.f32.mrf.mxu0 }
 0x384   :  { %8791 = vst [vmem:[#allocation3 + $0x518] sm:$0xf] %v17861_v39  ;;  %8792 = vst [vmem:[#allocation3 + $0x53c] sm:$0xf] %v17862_v25  ;;  %v19089_v48 = vld [vmem:[#allocation3 + $0x28c] ss:$36 sps:$4 sm:$0xff]   ;;  %13876 = vmatmul.mubr.bf16.gmra.mxu0 %v19084_v44 }
 0x385   :  { %7645 = vst [vmem:[#allocation2 + $0x241] sm:$0xff] %v7581_v26  ;;  %8410 = vst [vmem:[#allocation3 + $0x580] sm:$0xf] %v17800_v17  ;;  %v19092_v15 = vld [vmem:[#allocation3 + $0x24c] ss:$36 sps:$4 sm:$0xff]   ;;  %13602 = vmatprep.mubr.bf16.mxu1 %v19089_v48  ;;  %v7705_v4 = vld [vmem:[#allocation2 + $0x1f8] sm:$0xff]  ;;  %v18419_v39 = vpop.f32.mrf.mxu0 }
 0x386   :  { %7643 = vst [vmem:[#allocation2 + $0x229] sm:$0xff] %v7579_v14  ;;  %8022 = vst [vmem:[#allocation3 + $0x4ec] sm:$0xf] %v17732_v6  ;;  %13883 = vmatprep.mubr.bf16.mxu0 %v19092_v15  ;;  %v19087_v41 = vld [vmem:[#allocation3 + $0x288] ss:$36 sps:$4 sm:$0xff]   ;;  %v7583_v42 = vmax.f32 %v7461_v60, 0.0  ;;  %v17735_v32 = vpack.c.bf16 %v7705_v4, %v7705_v4 }
 0x387   :  { %9172 = vst [vmem:[#allocation3 + $0x4b0] sm:$0xf] %v17732_v6  ;;  %8789 = vst [vmem:[#allocation3 + $0x4d0] sm:$0xf] %v17859_v9  ;;  %v21755_v40 = vld [vmem:[#allocation15_spill] sm:$0xff]  ;;  %v8089_v47 = vld [vmem:[#allocation2 + $0x1f9] sm:$0xff]  ;;  %v7476_v44 = vpop.f32.mrf.mxu0 }
 0x388   :  { %7646 = vst [vmem:[#allocation2 + $0x249] sm:$0xff] %v7582_v30  ;;  %7644 = vst [vmem:[#allocation2 + $0x231] sm:$0xff] %v7580_v0  ;;  %v7472_v24 = vadd.f32 %v18416_v63, %v21755_v40  ;;  %v7707_v58 = vld [vmem:[#allocation2 + $0x210] sm:$0xff]  ;;  %v7708_v57 = vld [vmem:[#allocation2 + $0x218] sm:$0xff]  ;;  %v17799_v1 = vpack.c.bf16 %v8089_v47, %v8089_v47 }
 0x389   :  { %v7706_v22 = vld [vmem:[#allocation2 + $0x200] sm:$0xff]  ;;  %7649 = vst [vmem:[#allocation2 + $0x271] sm:$0xff] %v7585_v21  ;;  %v19090_v19 = vld [vmem:[#allocation3 + $0x248] ss:$36 sps:$4 sm:$0xff]   ;;  %v19096_v55 = vld [vmem:[#allocation3 + $0x2d4] ss:$36 sps:$4 sm:$0xff]   ;;  %v17737_v34 = vpack.c.bf16 %v7707_v58, %v7707_v58  ;;  %v17738_v62 = vpack.c.bf16 %v7708_v57, %v7708_v57  ;;  %v18420_v21 = vpop.f32.mrf.mxu0 }
 0x38a   :  { %v17736_v46 = vpack.c.bf16 %v7706_v22, %v7706_v22  ;;  %7647 = vst [vmem:[#allocation2 + $0x259] sm:$0xff] %v7583_v42  ;;  %v7586_v13 = vmax.f32 %v7472_v24, 0.0  ;;  %v21756_v11 = vld [vmem:[#allocation13_spill] sm:$0xff]  ;;  %8790 = vst [vmem:[#allocation3 + $0x4f4] sm:$0xf] %v17860_v45  ;;  %v21757_v29 = vld [vmem:[#allocation18_spill] sm:$0xff] }
 0x38b   :  { %v7464_v51 = vadd.f32 %v7463_v18, %v21756_v11  ;;  %13603 = vmatmul.mubr.bf16.gmra.mxu1 %v19087_v41  ;;  %v19099_v54 = vld [vmem:[#allocation3 + $0x294] ss:$36 sps:$4 sm:$0xff]   ;;  %8025 = vst [vmem:[#allocation3 + $0x558] sm:$0xf] %v17735_v32  ;;  %9175 = vst [vmem:[#allocation3 + $0x51c] sm:$0xf] %v17735_v32  ;;  %v7485_v17 = vadd.f32 %v18419_v39, %v21757_v29  ;;  %v7479_v18 = vpop.f32.mrf.mxu0 }
 0x38c   :  { %13884 = vmatmul.mubr.bf16.gmra.mxu0 %v19090_v19  ;;  %13610 = vmatprep.mubr.bf16.mxu1 %v19096_v55  ;;  %8026 = vst [vmem:[#allocation3 + $0x57c] sm:$0xf] %v17736_v46  ;;  %8409 = vst [vmem:[#allocation3 + $0x55c] sm:$0xf] %v17799_v1  ;;  %v8091_v25 = vld [vmem:[#allocation2 + $0x211] sm:$0xff]  ;;  %v8092_v26 = vld [vmem:[#allocation2 + $0x219] sm:$0xff] }
 0x38d   :  { %9176 = vst [vmem:[#allocation3 + $0x540] sm:$0xf] %v17736_v46  ;;  %8027 = vst [vmem:[#allocation3 + $0x5a0] sm:$0xf] %v17737_v34  ;;  %v7584_v28 = vmax.f32 %v7464_v51, 0.0  ;;  %13891 = vmatprep.mubr.bf16.mxu0 %v19099_v54  ;;  %v17801_v38 = vpack.c.bf16 %v8091_v25, %v8091_v25  ;;  %v17802_v56 = vpack.c.bf16 %v8092_v26, %v8092_v26  ;;  %v8473_v50 = vld [vmem:[#allocation2 + $0x1fa] sm:$0xff]  ;;  %v18423_v39 = vpop.f32.mrf.mxu0 }
 0x38e   :  { %8028 = vst [vmem:[#allocation3 + $0x5c4] sm:$0xf] %v17738_v62  ;;  %9177 = vst [vmem:[#allocation3 + $0x564] sm:$0xf] %v17737_v34  ;;  %v8474_v36 = vld [vmem:[#allocation2 + $0x202] sm:$0xff]  ;;  %v17863_v14 = vpack.c.bf16 %v8473_v50, %v8473_v50  ;;  %v7589_v30 = vmax.f32 %v7485_v17, 0.0 }
 0x38f   :  { %9178 = vst [vmem:[#allocation3 + $0x588] sm:$0xf] %v17738_v62  ;;  %7650 = vst [vmem:[#allocation2 + $0x279] sm:$0xff] %v7586_v13  ;;  %v7709_v31 = vld [vmem:[#allocation2 + $0x228] sm:$0xff]  ;;  %v17864_v20 = vpack.c.bf16 %v8474_v36, %v8474_v36  ;;  %v7710_v6 = vld [vmem:[#allocation2 + $0x230] sm:$0xff]  ;;  %v7492_v17 = vpop.f32.mrf.mxu0 }
 0x390   :  { %v17739_v9 = vpack.c.bf16 %v7709_v31, %v7709_v31  ;;  %v8093_v52 = vld [vmem:[#allocation2 + $0x229] sm:$0xff]  ;;  %v8094_v48 = vld [vmem:[#allocation2 + $0x231] sm:$0xff]  ;;  %7648 = vst [vmem:[#allocation2 + $0x261] sm:$0xff] %v7584_v28  ;;  %8411 = vst [vmem:[#allocation3 + $0x5a4] sm:$0xf] %v17801_v38  ;;  %v17740_v49 = vpack.c.bf16 %v7710_v6, %v7710_v6 }
 0x391   :  { %v19094_v5 = vld [vmem:[#allocation3 + $0x2d0] ss:$36 sps:$4 sm:$0xff]   ;;  %8412 = vst [vmem:[#allocation3 + $0x5c8] sm:$0xf] %v17802_v56  ;;  %v17803_v0 = vpack.c.bf16 %v8093_v52, %v8093_v52  ;;  %v8476_v23 = vld [vmem:[#allocation2 + $0x21a] sm:$0xff]  ;;  %v17804_v41 = vpack.c.bf16 %v8094_v48, %v8094_v48  ;;  %v7712_v63 = vld [vmem:[#allocation2 + $0x248] sm:$0xff]  ;;  %v18424_v31 = vpop.f32.mrf.mxu0 }
 0x392   :  { %v21758_v15 = vld [vmem:[#allocation16_spill] sm:$0xff]  ;;  %v8475_v8 = vld [vmem:[#allocation2 + $0x212] sm:$0xff]  ;;  %v7711_v61 = vld [vmem:[#allocation2 + $0x240] sm:$0xff]  ;;  %8793 = vst [vmem:[#allocation3 + $0x560] sm:$0xf] %v17863_v14  ;;  %v17866_v60 = vpack.c.bf16 %v8476_v23, %v8476_v23  ;;  %v17742_v45 = vpack.c.bf16 %v7712_v63, %v7712_v63 }
 0x393   :  { %v7477_v53 = vadd.f32 %v7476_v44, %v21758_v15  ;;  %8794 = vst [vmem:[#allocation3 + $0x584] sm:$0xf] %v17864_v20  ;;  %8029 = vst [vmem:[#allocation3 + $0x5e8] sm:$0xf] %v17739_v9  ;;  %v17865_v10 = vpack.c.bf16 %v8475_v8, %v8475_v8  ;;  %v17741_v43 = vpack.c.bf16 %v7711_v61, %v7711_v61  ;;  %v8095_v4 = vld [vmem:[#allocation2 + $0x241] sm:$0xff]  ;;  %v8096_v22 = vld [vmem:[#allocation2 + $0x249] sm:$0xff]  ;;  %13611 = vmatmul.mubr.bf16.gmra.mxu1 %v19094_v5  ;;  %v7495_v52 = vpop.f32.mrf.mxu0 }
 0x394   :  { %9179 = vst [vmem:[#allocation3 + $0x5ac] sm:$0xf] %v17739_v9  ;;  %7653 = vst [vmem:[#allocation2 + $0x2a1] sm:$0xff] %v7589_v30  ;;  %v21759_v40 = vld [vmem:[#allocation19_spill] sm:$0xff]  ;;  %v17805_v32 = vpack.c.bf16 %v8095_v4, %v8095_v4  ;;  %v8477_v47 = vld [vmem:[#allocation2 + $0x22a] sm:$0xff]  ;;  %v17806_v46 = vpack.c.bf16 %v8096_v22, %v8096_v22 }
 0x395   :  { %v7587_v42 = vmax.f32 %v7477_v53, 0.0  ;;  %v7488_v24 = vadd.f32 %v18420_v21, %v21759_v40  ;;  %8030 = vst [vmem:[#allocation3 + $0x60c] sm:$0xf] %v17740_v49  ;;  %8413 = vst [vmem:[#allocation3 + $0x5ec] sm:$0xf] %v17803_v0  ;;  %v8478_v58 = vld [vmem:[#allocation2 + $0x232] sm:$0xff]  ;;  %v17867_v1 = vpack.c.bf16 %v8477_v47, %v8477_v47 }
 0x396   :  { %9180 = vst [vmem:[#allocation3 + $0x5d0] sm:$0xf] %v17740_v49  ;;  %v8479_v57 = vld [vmem:[#allocation2 + $0x242] sm:$0xff]  ;;  %v19097_v19 = vld [vmem:[#allocation3 + $0x290] ss:$36 sps:$4 sm:$0xff]   ;;  %v17868_v34 = vpack.c.bf16 %v8478_v58, %v8478_v58  ;;  %v21761_v26 = vld [vmem:[#allocation22_spill] sm:$0xff]  ;;  %v18427_v49 = vpop.f32.mrf.mxu0 }
 0x397   :  { %v19102_v55 = vld [vmem:[#allocation3 + $0x31c] ss:$36 sps:$4 sm:$0xff]   ;;  %8414 = vst [vmem:[#allocation3 + $0x610] sm:$0xf] %v17804_v41  ;;  %8795 = vst [vmem:[#allocation3 + $0x5a8] sm:$0xf] %v17865_v10  ;;  %v17869_v62 = vpack.c.bf16 %v8479_v57, %v8479_v57  ;;  %13892 = vmatmul.mubr.bf16.gmra.mxu0 %v19097_v19  ;;  %v7501_v28 = vadd.f32 %v18423_v39, %v21761_v26  ;;  %v7517_v8 = vadd.f32 %v18427_v49, %v20815_v2 }
 0x398   :  { %8796 = vst [vmem:[#allocation3 + $0x5cc] sm:$0xf] %v17866_v60  ;;  %8031 = vst [vmem:[#allocation3 + $0x630] sm:$0xf] %v17741_v43  ;;  %v7590_v13 = vmax.f32 %v7488_v24, 0.0  ;;  %v21760_v11 = vld [vmem:[#allocation17_spill] sm:$0xff]  ;;  %13618 = vmatprep.mubr.bf16.mxu1 %v19102_v55  ;;  %v7508_v23 = vpop.f32.mrf.mxu0 }
 0x399   :  { %9181 = vst [vmem:[#allocation3 + $0x5f4] sm:$0xf] %v17741_v43  ;;  %7651 = vst [vmem:[#allocation2 + $0x289] sm:$0xff] %v7587_v42  ;;  %v7480_v51 = vadd.f32 %v7479_v18, %v21760_v11  ;;  %v19105_v54 = vld [vmem:[#allocation3 + $0x2dc] ss:$36 sps:$4 sm:$0xff]   ;;  %v7593_v56 = vmax.f32 %v7501_v28, 0.0  ;;  %v7509_v63 = vadd.f32 %v7508_v23, %v20809_v37 }
 0x39a   :  { %8032 = vst [vmem:[#allocation3 + $0x654] sm:$0xf] %v17742_v45  ;;  %8415 = vst [vmem:[#allocation3 + $0x634] sm:$0xf] %v17805_v32  ;;  %13899 = vmatprep.mubr.bf16.mxu0 %v19105_v54  ;;  %v7713_v29 = vld [vmem:[#allocation2 + $0x258] sm:$0xff]  ;;  %v21762_v50 = vld [vmem:[#allocation20_spill] sm:$0xff]  ;;  %v18428_v24 = vpop.f32.mrf.mxu0 }
 0x39b   :  { %9182 = vst [vmem:[#allocation3 + $0x618] sm:$0xf] %v17742_v45  ;;  %8416 = vst [vmem:[#allocation3 + $0x658] sm:$0xf] %v17806_v46  ;;  %v7588_v25 = vmax.f32 %v7480_v51, 0.0  ;;  %v17743_v38 = vpack.c.bf16 %v7713_v29, %v7713_v29  ;;  %v7493_v36 = vadd.f32 %v7492_v17, %v21762_v50  ;;  %v21763_v6 = vld [vmem:[#allocation23_spill] sm:$0xff]  ;;  %v7520_v55 = vadd.f32 %v18428_v24, %v20821_v16 }
 0x39c   :  { %8797 = vst [vmem:[#allocation3 + $0x5f0] sm:$0xf] %v17867_v1  ;;  %8798 = vst [vmem:[#allocation3 + $0x614] sm:$0xf] %v17868_v34  ;;  %v19100_v44 = vld [vmem:[#allocation3 + $0x318] ss:$36 sps:$4 sm:$0xff]   ;;  %v7504_v9 = vadd.f32 %v18424_v31, %v21763_v6  ;;  %v7511_v11 = vpop.f32.mrf.mxu0 }
 0x39d   :  { %8799 = vst [vmem:[#allocation3 + $0x638] sm:$0xf] %v17869_v62  ;;  %7654 = vst [vmem:[#allocation2 + $0x2a9] sm:$0xff] %v7590_v13  ;;  %v19103_v14 = vld [vmem:[#allocation3 + $0x2d8] ss:$36 sps:$4 sm:$0xff]   ;;  %v7591_v20 = vmax.f32 %v7493_v36, 0.0  ;;  %13619 = vmatmul.mubr.bf16.gmra.mxu1 %v19100_v44 }
 0x39e   :  { %7652 = vst [vmem:[#allocation2 + $0x291] sm:$0xff] %v7588_v25  ;;  %8033 = vst [vmem:[#allocation3 + $0x678] sm:$0xf] %v17743_v38  ;;  %v19109_v48 = vld [vmem:[#allocation3 + $0x364] ss:$36 sps:$4 sm:$0xff]   ;;  %v7594_v30 = vmax.f32 %v7504_v9, 0.0 }
 0x39f   :  { %9183 = vst [vmem:[#allocation3 + $0x63c] sm:$0xf] %v17743_v38  ;;  %7657 = vst [vmem:[#allocation2 + $0x2d1] sm:$0xff] %v7593_v56  ;;  %v21764_v5 = vld [vmem:[#allocation21_spill] sm:$0xff]  ;;  %v19112_v53 = vld [vmem:[#allocation3 + $0x324] ss:$36 sps:$4 sm:$0xff]   ;;  %13900 = vmatmul.mubr.bf16.gmra.mxu0 %v19103_v14  ;;  %13626 = vmatprep.mubr.bf16.mxu1 %v19109_v48  ;;  %v18431_v14 = vpop.f32.mrf.mxu0 }
 0x3a0   :  { %7655 = vst [vmem:[#allocation2 + $0x2b9] sm:$0xff] %v7591_v20  ;;  %v7496_v15 = vadd.f32 %v7495_v52, %v21764_v5  ;;  %7658 = vst [vmem:[#allocation2 + $0x2d9] sm:$0xff] %v7594_v30  ;;  %13907 = vmatprep.mubr.bf16.mxu0 %v19112_v53  ;;  %v7714_v61 = vld [vmem:[#allocation2 + $0x260] sm:$0xff]  ;;  %v7597_v10 = vmax.f32 %v7517_v8, 0.0  ;;  %v8480_v22 = vld [vmem:[#allocation2 + $0x24a] sm:$0xff]  ;;  %v7595_v18 = vmax.f32 %v7509_v63, 0.0 }
 0x3a1   :  { %v8097_v21 = vld [vmem:[#allocation2 + $0x259] sm:$0xff]  ;;  %v8098_v41 = vld [vmem:[#allocation2 + $0x261] sm:$0xff]  ;;  %v17744_v43 = vpack.c.bf16 %v7714_v61, %v7714_v61  ;;  %v7715_v42 = vld [vmem:[#allocation2 + $0x270] sm:$0xff]  ;;  %v17870_v47 = vpack.c.bf16 %v8480_v22, %v8480_v22  ;;  %v7598_v29 = vmax.f32 %v7520_v55, 0.0  ;;  %v7524_v61 = vpop.f32.mrf.mxu0 }
 0x3a2   :  { %v7592_v0 = vmax.f32 %v7496_v15, 0.0  ;;  %v19107_v60 = vld [vmem:[#allocation3 + $0x360] ss:$36 sps:$4 sm:$0xff]   ;;  %v17807_v4 = vpack.c.bf16 %v8097_v21, %v8097_v21  ;;  %v19115_v45 = vld [vmem:[#allocation3 + $0x3ac] ss:$36 sps:$4 sm:$0xff]   ;;  %v17808_v32 = vpack.c.bf16 %v8098_v41, %v8098_v41  ;;  %v7716_v2 = vld [vmem:[#allocation2 + $0x278] sm:$0xff]  ;;  %v17745_v58 = vpack.c.bf16 %v7715_v42, %v7715_v42 }
 0x3a3   :  { %v19110_v40 = vld [vmem:[#allocation3 + $0x320] ss:$36 sps:$4 sm:$0xff]   ;;  %v8099_v57 = vld [vmem:[#allocation2 + $0x271] sm:$0xff]  ;;  %7661 = vst [vmem:[#allocation2 + $0x301] sm:$0xff] %v7597_v10  ;;  %8034 = vst [vmem:[#allocation3 + $0x69c] sm:$0xf] %v17744_v43  ;;  %v17746_v37 = vpack.c.bf16 %v7716_v2, %v7716_v2  ;;  %v7533_v15 = vadd.f32 %v18431_v14, %v20831_v35 }
 0x3a4   :  { %7656 = vst [vmem:[#allocation2 + $0x2c1] sm:$0xff] %v7592_v0  ;;  %v8100_v19 = vld [vmem:[#allocation2 + $0x279] sm:$0xff]  ;;  %v19118_v46 = vld [vmem:[#allocation3 + $0x36c] ss:$36 sps:$4 sm:$0xff]   ;;  %8417 = vst [vmem:[#allocation3 + $0x67c] sm:$0xf] %v17807_v4  ;;  %v17809_v1 = vpack.c.bf16 %v8099_v57, %v8099_v57  ;;  %v7525_v4 = vadd.f32 %v7524_v61, %v20825_v12 }
 0x3a5   :  { %9184 = vst [vmem:[#allocation3 + $0x660] sm:$0xf] %v17744_v43  ;;  %v8481_v34 = vld [vmem:[#allocation2 + $0x25a] sm:$0xff]  ;;  %v8482_v62 = vld [vmem:[#allocation2 + $0x262] sm:$0xff]  ;;  %8418 = vst [vmem:[#allocation3 + $0x6a0] sm:$0xf] %v17808_v32  ;;  %v17810_v51 = vpack.c.bf16 %v8100_v19, %v8100_v19  ;;  %13627 = vmatmul.mubr.bf16.gmra.mxu1 %v19107_v60  ;;  %v18432_v32 = vpop.f32.mrf.mxu0 }
 0x3a6   :  { %v7717_v13 = vld [vmem:[#allocation2 + $0x288] sm:$0xff]  ;;  %8800 = vst [vmem:[#allocation3 + $0x65c] sm:$0xf] %v17870_v47  ;;  %8035 = vst [vmem:[#allocation3 + $0x6c0] sm:$0xf] %v17745_v58  ;;  %v17871_v54 = vpack.c.bf16 %v8481_v34, %v8481_v34  ;;  %v17872_v39 = vpack.c.bf16 %v8482_v62, %v8482_v62  ;;  %v7718_v25 = vld [vmem:[#allocation2 + $0x290] sm:$0xff]  ;;  %13634 = vmatprep.mubr.bf16.mxu1 %v19115_v45 }
 0x3a7   :  { %9185 = vst [vmem:[#allocation3 + $0x684] sm:$0xf] %v17745_v58  ;;  %v17747_v26 = vpack.c.bf16 %v7717_v13, %v7717_v13  ;;  %v8101_v16 = vld [vmem:[#allocation2 + $0x289] sm:$0xff]  ;;  %v8102_v28 = vld [vmem:[#allocation2 + $0x291] sm:$0xff]  ;;  %7659 = vst [vmem:[#allocation2 + $0x2e9] sm:$0xff] %v7595_v18  ;;  %v17748_v56 = vpack.c.bf16 %v7718_v25, %v7718_v25  ;;  %13908 = vmatmul.mubr.bf16.gmra.mxu0 %v19110_v40  ;;  %v7601_v43 = vmax.f32 %v7533_v15, 0.0  ;;  %v7527_v34 = vpop.f32.mrf.mxu0 }
 0x3a8   :  { %v21765_v17 = vld [vmem:[#allocation24_spill] sm:$0xff]  ;;  %8036 = vst [vmem:[#allocation3 + $0x6e4] sm:$0xf] %v17746_v37  ;;  %8419 = vst [vmem:[#allocation3 + $0x6c4] sm:$0xf] %v17809_v1  ;;  %v17811_v50 = vpack.c.bf16 %v8101_v16, %v8101_v16  ;;  %v8483_v36 = vld [vmem:[#allocation2 + $0x272] sm:$0xff]  ;;  %v17812_v20 = vpack.c.bf16 %v8102_v28, %v8102_v28  ;;  %13915 = vmatprep.mubr.bf16.mxu0 %v19118_v46  ;;  %v7536_v46 = vadd.f32 %v18432_v32, %v20837_v59 }
 0x3a9   :  { %v7512_v38 = vadd.f32 %v7511_v11, %v21765_v17  ;;  %9186 = vst [vmem:[#allocation3 + $0x6a8] sm:$0xf] %v17746_v37  ;;  %v8484_v31 = vld [vmem:[#allocation2 + $0x27a] sm:$0xff]  ;;  %8420 = vst [vmem:[#allocation3 + $0x6e8] sm:$0xf] %v17810_v51  ;;  %v17873_v6 = vpack.c.bf16 %v8483_v36, %v8483_v36  ;;  %v19200_v52 = vld [vmem:[%s21679_s3 + $0x1a8] sm:$0xff]   ;;  %v7528_v11 = vadd.f32 %v7527_v34, %v20828_v7 }
 0x3aa   :  { %v19199_v44 = vld [vmem:[%s21679_s3 + $0x158] sm:$0xff]   ;;  %8801 = vst [vmem:[#allocation3 + $0x680] sm:$0xf] %v17871_v54  ;;  %8802 = vst [vmem:[#allocation3 + $0x6a4] sm:$0xf] %v17872_v39  ;;  %v17874_v9 = vpack.c.bf16 %v8484_v31, %v8484_v31  ;;  %v7719_v48 = vld [vmem:[#allocation2 + $0x2a0] sm:$0xff]  ;;  %14370 = vmatpush1.bf16.msra.mxu0 %v19200_v52 }
 0x3ab   :  { %8037 = vst [vmem:[#allocation3 + $0x708] sm:$0xf] %v17747_v26  ;;  %9187 = vst [vmem:[#allocation3 + $0x6cc] sm:$0xf] %v17747_v26  ;;  %v7720_v30 = vld [vmem:[#allocation2 + $0x2a8] sm:$0xff]  ;;  %v7596_v5 = vmax.f32 %v7512_v38, 0.0  ;;  %14101 = vmatpush2.bf16.msra.mxu1 %v19199_v44  ;;  %v17749_v53 = vpack.c.bf16 %v7719_v48, %v7719_v48  ;;  %14371 = vmatprep.subr.bf16.mxu0 %v21692_v3 }
 0x3ac   :  { %7662 = vst [vmem:[#allocation2 + $0x309] sm:$0xff] %v7598_v29  ;;  %8038 = vst [vmem:[#allocation3 + $0x72c] sm:$0xf] %v17748_v56  ;;  %v17750_v49 = vpack.c.bf16 %v7720_v30, %v7720_v30  ;;  %v8103_v0 = vld [vmem:[#allocation2 + $0x2a1] sm:$0xff]  ;;  %v8104_v8 = vld [vmem:[#allocation2 + $0x2a9] sm:$0xff]  ;;  %14102 = vmatprep.subr.bf16.mxu1 %v21692_v3  ;;  %v7599_v55 = vmax.f32 %v7525_v4, 0.0 }
 0x3ad   :  { %8421 = vst [vmem:[#allocation3 + $0x70c] sm:$0xf] %v17811_v50  ;;  %9188 = vst [vmem:[#allocation3 + $0x6f0] sm:$0xf] %v17748_v56  ;;  %v8485_v23 = vld [vmem:[#allocation2 + $0x28a] sm:$0xff]  ;;  %v17813_v21 = vpack.c.bf16 %v8103_v0, %v8103_v0  ;;  %v17814_v41 = vpack.c.bf16 %v8104_v8, %v8104_v8  ;;  %v8486_v10 = vld [vmem:[#allocation2 + $0x292] sm:$0xff] }
 0x3ae   :  { %8422 = vst [vmem:[#allocation3 + $0x730] sm:$0xf] %v17812_v20  ;;  %8803 = vst [vmem:[#allocation3 + $0x6c8] sm:$0xf] %v17873_v6  ;;  %v17875_v60 = vpack.c.bf16 %v8485_v23, %v8485_v23  ;;  %v7721_v35 = vld [vmem:[#allocation2 + $0x2b8] sm:$0xff]  ;;  %v7722_v63 = vld [vmem:[#allocation2 + $0x2c0] sm:$0xff]  ;;  %v17876_v22 = vpack.c.bf16 %v8486_v10, %v8486_v10 }
 0x3af   :  { %8804 = vst [vmem:[#allocation3 + $0x6ec] sm:$0xf] %v17874_v9  ;;  %7660 = vst [vmem:[#allocation2 + $0x2f1] sm:$0xff] %v7596_v5  ;;  %v17751_v42 = vpack.c.bf16 %v7721_v35, %v7721_v35  ;;  %v8105_v40 = vld [vmem:[#allocation2 + $0x2b9] sm:$0xff]  ;;  %v8106_v24 = vld [vmem:[#allocation2 + $0x2c1] sm:$0xff]  ;;  %v17752_v47 = vpack.c.bf16 %v7722_v63, %v7722_v63  ;;  %v7602_v13 = vmax.f32 %v7536_v46, 0.0 }
 0x3b0   :  { %8039 = vst [vmem:[#allocation3 + $0x750] sm:$0xf] %v17749_v53  ;;  %8040 = vst [vmem:[#allocation3 + $0x774] sm:$0xf] %v17750_v49  ;;  %v8487_v45 = vld [vmem:[#allocation2 + $0x2a2] sm:$0xff]  ;;  %v17815_v2 = vpack.c.bf16 %v8105_v40, %v8105_v40  ;;  %v17816_v58 = vpack.c.bf16 %v8106_v24, %v8106_v24  ;;  %v8488_v57 = vld [vmem:[#allocation2 + $0x2aa] sm:$0xff] }
 0x3b1   :  { %9189 = vst [vmem:[#allocation3 + $0x714] sm:$0xf] %v17749_v53  ;;  %9190 = vst [vmem:[#allocation3 + $0x738] sm:$0xf] %v17750_v49  ;;  %v17877_v12 = vpack.c.bf16 %v8487_v45, %v8487_v45  ;;  %v19213_v19 = vld [vmem:[%s21679_s3 + $0x150] sm:$0xff]   ;;  %v17878_v37 = vpack.c.bf16 %v8488_v57, %v8488_v57  ;;  %v7600_v59 = vmax.f32 %v7528_v11, 0.0 }
 0x3b2   :  { %8423 = vst [vmem:[#allocation3 + $0x754] sm:$0xf] %v17813_v21  ;;  %8424 = vst [vmem:[#allocation3 + $0x778] sm:$0xf] %v17814_v41  ;;  %v19113_v18 = vld [vmem:[#allocation3 + $0x3a8] ss:$36 sps:$4 sm:$0xff]   ;;  %14103 = vmatpush2.bf16.msra.mxu1 %v19213_v19 }
 0x3b3   :  { %8805 = vst [vmem:[#allocation3 + $0x710] sm:$0xf] %v17875_v60  ;;  %7665 = vst [vmem:[#allocation2 + $0x331] sm:$0xff] %v7601_v43  ;;  %v19116_v1 = vld [vmem:[#allocation3 + $0x368] ss:$36 sps:$4 sm:$0xff]   ;;  %13635 = vmatmul.mubr.bf16.gmra.mxu1 %v19113_v18  ;;  %14104 = vmatprep.subr.bf16.mxu1 %v21692_v3  ;;  %v19214_v7 = vld [vmem:[%s21679_s3 + $0x1a0] sm:$0xff]  }
 0x3b4   :  { %8806 = vst [vmem:[#allocation3 + $0x734] sm:$0xf] %v17876_v22  ;;  %8041 = vst [vmem:[#allocation3 + $0x798] sm:$0xf] %v17751_v42  ;;  %v19122_v62 = vld [vmem:[#allocation3 + $0x3f4] ss:$36 sps:$4 sm:$0xff]   ;;  %13916 = vmatmul.mubr.bf16.gmra.mxu0 %v19116_v1 }
 0x3b5   :  { %9191 = vst [vmem:[#allocation3 + $0x75c] sm:$0xf] %v17751_v42  ;;  %8042 = vst [vmem:[#allocation3 + $0x7bc] sm:$0xf] %v17752_v47  ;;  %v19125_v51 = vld [vmem:[#allocation3 + $0x3b4] ss:$36 sps:$4 sm:$0xff]   ;;  %13642 = vmatprep.mubr.bf16.mxu1 %v19122_v62  ;;  %14372 = vmatpush1.bf16.msra.mxu0 %v19214_v7 }
 0x3b6   :  { %8425 = vst [vmem:[#allocation3 + $0x79c] sm:$0xf] %v17815_v2  ;;  %8426 = vst [vmem:[#allocation3 + $0x7c0] sm:$0xf] %v17816_v58  ;;  %13923 = vmatprep.mubr.bf16.mxu0 %v19125_v51  ;;  %v19120_v54 = vld [vmem:[#allocation3 + $0x3f0] ss:$36 sps:$4 sm:$0xff]   ;;  %14373 = vmatprep.subr.bf16.mxu0 %v21692_v3 }
 0x3b7   :  { %8807 = vst [vmem:[#allocation3 + $0x758] sm:$0xf] %v17877_v12  ;;  %9192 = vst [vmem:[#allocation3 + $0x780] sm:$0xf] %v17752_v47  ;;  %v19123_v39 = vld [vmem:[#allocation3 + $0x3b0] ss:$36 sps:$4 sm:$0xff]  }
 0x3b8   :  { %7663 = vst [vmem:[#allocation2 + $0x319] sm:$0xff] %v7599_v55  ;;  %8808 = vst [vmem:[#allocation3 + $0x77c] sm:$0xf] %v17878_v37  ;;  %v19128_v25 = vld [vmem:[#allocation3 + $0x43c] ss:$36 sps:$4 sm:$0xff]   ;;  %v7723_v28 = vld [vmem:[#allocation2 + $0x2d0] sm:$0xff] }
 0x3b9   :  { %7666 = vst [vmem:[#allocation2 + $0x339] sm:$0xff] %v7602_v13  ;;  %7664 = vst [vmem:[#allocation2 + $0x321] sm:$0xff] %v7600_v59  ;;  %v19131_v26 = vld [vmem:[#allocation3 + $0x3fc] ss:$36 sps:$4 sm:$0xff]   ;;  %v19138_v16 = vld [vmem:[#allocation3 + $0x484] ss:$36 sps:$4 sm:$0xff]   ;;  %v17753_v56 = vpack.c.bf16 %v7723_v28, %v7723_v28 }
 0x3ba   :  { %v7724_v29 = vld [vmem:[#allocation2 + $0x2d8] sm:$0xff]  ;;  %v8490_v14 = vld [vmem:[#allocation2 + $0x2c2] sm:$0xff]  ;;  %v7726_v5 = vld [vmem:[#allocation2 + $0x2f0] sm:$0xff] }
 0x3bb   :  { %13643 = vmatmul.mubr.bf16.gmra.mxu1 %v19120_v54  ;;  %v8107_v17 = vld [vmem:[#allocation2 + $0x2d1] sm:$0xff]  ;;  %v17754_v50 = vpack.c.bf16 %v7724_v29, %v7724_v29  ;;  %v8108_v36 = vld [vmem:[#allocation2 + $0x2d9] sm:$0xff]  ;;  %v17880_v52 = vpack.c.bf16 %v8490_v14, %v8490_v14  ;;  %v7725_v30 = vld [vmem:[#allocation2 + $0x2e8] sm:$0xff]  ;;  %8043 = vst [vmem:[#allocation3 + $0x7e0] sm:$0xf] %v17753_v56  ;;  %v17756_v0 = vpack.c.bf16 %v7726_v5, %v7726_v5 }
 0x3bc   :  { %13924 = vmatmul.mubr.bf16.gmra.mxu0 %v19123_v39  ;;  %13650 = vmatprep.mubr.bf16.mxu1 %v19128_v25  ;;  %v19126_v38 = vld [vmem:[#allocation3 + $0x438] ss:$36 sps:$4 sm:$0xff]   ;;  %v17817_v31 = vpack.c.bf16 %v8107_v17, %v8107_v17  ;;  %v17818_v6 = vpack.c.bf16 %v8108_v36, %v8108_v36  ;;  %9193 = vst [vmem:[#allocation3 + $0x7a4] sm:$0xf] %v17753_v56  ;;  %v8109_v53 = vld [vmem:[#allocation2 + $0x2e9] sm:$0xff]  ;;  %v7727_v43 = vld [vmem:[#allocation2 + $0x300] sm:$0xff] }
 0x3bd   :  { %13931 = vmatprep.mubr.bf16.mxu0 %v19131_v26  ;;  %v8489_v44 = vld [vmem:[#allocation2 + $0x2ba] sm:$0xff]  ;;  %8044 = vst [vmem:[#allocation3 + $0x804] sm:$0xf] %v17754_v50  ;;  %9194 = vst [vmem:[#allocation3 + $0x7c8] sm:$0xf] %v17754_v50  ;;  %v17755_v15 = vpack.c.bf16 %v7725_v30, %v7725_v30  ;;  %v8110_v49 = vld [vmem:[#allocation2 + $0x2f1] sm:$0xff]  ;;  %v17819_v8 = vpack.c.bf16 %v8109_v53, %v8109_v53  ;;  %v17757_v22 = vpack.c.bf16 %v7727_v43, %v7727_v43 }
 0x3be   :  { %v19129_v20 = vld [vmem:[#allocation3 + $0x3f8] ss:$36 sps:$4 sm:$0xff]   ;;  %v17879_v9 = vpack.c.bf16 %v8489_v44, %v8489_v44  ;;  %8427 = vst [vmem:[#allocation3 + $0x7e4] sm:$0xf] %v17817_v31  ;;  %8428 = vst [vmem:[#allocation3 + $0x808] sm:$0xf] %v17818_v6  ;;  %v17820_v23 = vpack.c.bf16 %v8110_v49, %v8110_v49 }
 0x3bf   :  { %v19221_v48 = vld [vmem:[%s21679_s3 + $0x198] sm:$0xff]   ;;  %8810 = vst [vmem:[#allocation3 + $0x7c4] sm:$0xf] %v17880_v52  ;;  %v19229_v41 = vld [vmem:[%s21679_s3 + $0x148] sm:$0xff]   ;;  %v19222_v60 = vld [vmem:[%s21679_s3 + $0x190] sm:$0xff]  }
 0x3c0   :  { %8809 = vst [vmem:[#allocation3 + $0x7a0] sm:$0xf] %v17879_v9  ;;  %v8491_v61 = vld [vmem:[#allocation2 + $0x2d2] sm:$0xff]  ;;  %v8492_v21 = vld [vmem:[#allocation2 + $0x2da] sm:$0xff]  ;;  %v19135_v10 = vld [vmem:[#allocation3 + $0x444] ss:$36 sps:$4 sm:$0xff]   ;;  %14374 = vmatpush1.bf16.msra.mxu0 %v19221_v48  ;;  %14105 = vmatpush2.bf16.msra.mxu1 %v19229_v41 }
 0x3c1   :  { %8045 = vst [vmem:[#allocation3 + $0x828] sm:$0xf] %v17755_v15  ;;  %v17881_v35 = vpack.c.bf16 %v8491_v61, %v8491_v61  ;;  %v17882_v63 = vpack.c.bf16 %v8492_v21, %v8492_v21  ;;  %9195 = vst [vmem:[#allocation3 + $0x7ec] sm:$0xf] %v17755_v15  ;;  %v7728_v4 = vld [vmem:[#allocation2 + $0x308] sm:$0xff]  ;;  %14375 = vmatprep.subr.bf16.mxu0 %v21692_v3  ;;  %v8494_v58 = vld [vmem:[#allocation2 + $0x2f2] sm:$0xff]  ;;  %14106 = vmatprep.subr.bf16.mxu1 %v21692_v3 }
 0x3c2   :  { %8046 = vst [vmem:[#allocation3 + $0x84c] sm:$0xf] %v17756_v0  ;;  %8429 = vst [vmem:[#allocation3 + $0x82c] sm:$0xf] %v17819_v8  ;;  %v8111_v42 = vld [vmem:[#allocation2 + $0x301] sm:$0xff]  ;;  %v8112_v40 = vld [vmem:[#allocation2 + $0x309] sm:$0xff]  ;;  %v17758_v45 = vpack.c.bf16 %v7728_v4, %v7728_v4  ;;  %v17884_v19 = vpack.c.bf16 %v8494_v58, %v8494_v58 }
 0x3c3   :  { %13651 = vmatmul.mubr.bf16.gmra.mxu1 %v19126_v38  ;;  %8430 = vst [vmem:[#allocation3 + $0x850] sm:$0xf] %v17820_v23  ;;  %9196 = vst [vmem:[#allocation3 + $0x810] sm:$0xf] %v17756_v0  ;;  %v19136_v24 = vld [vmem:[#allocation3 + $0x480] ss:$36 sps:$4 sm:$0xff]   ;;  %v17821_v32 = vpack.c.bf16 %v8111_v42, %v8111_v42  ;;  %v17822_v47 = vpack.c.bf16 %v8112_v40, %v8112_v40 }
 0x3c4   :  { %13932 = vmatmul.mubr.bf16.gmra.mxu0 %v19129_v20  ;;  %13658 = vmatprep.mubr.bf16.mxu1 %v19138_v16  ;;  %8811 = vst [vmem:[#allocation3 + $0x7e8] sm:$0xf] %v17881_v35  ;;  %8812 = vst [vmem:[#allocation3 + $0x80c] sm:$0xf] %v17882_v63  ;;  %v8493_v2 = vld [vmem:[#allocation2 + $0x2ea] sm:$0xff]  ;;  %v7729_v18 = vld [vmem:[#allocation2 + $0x318] sm:$0xff] }
 0x3c5   :  { %13939 = vmatprep.mubr.bf16.mxu0 %v19135_v10  ;;  %v19230_v57 = vld [vmem:[%s21679_s3 + $0x188] sm:$0xff]   ;;  %8047 = vst [vmem:[#allocation3 + $0x870] sm:$0xf] %v17757_v22  ;;  %v17883_v12 = vpack.c.bf16 %v8493_v2, %v8493_v2  ;;  %9197 = vst [vmem:[#allocation3 + $0x834] sm:$0xf] %v17757_v22  ;;  %v7730_v55 = vld [vmem:[#allocation2 + $0x320] sm:$0xff]  ;;  %14376 = vmatpush1.bf16.msra.mxu0 %v19222_v60  ;;  %v17759_v46 = vpack.c.bf16 %v7729_v18, %v7729_v18 }
 0x3c6   :  { %8048 = vst [vmem:[#allocation3 + $0x894] sm:$0xf] %v17758_v45  ;;  %8431 = vst [vmem:[#allocation3 + $0x874] sm:$0xf] %v17821_v32  ;;  %v17760_v37 = vpack.c.bf16 %v7730_v55, %v7730_v55  ;;  %v8113_v1 = vld [vmem:[#allocation2 + $0x319] sm:$0xff]  ;;  %v8114_v34 = vld [vmem:[#allocation2 + $0x321] sm:$0xff]  ;;  %14377 = vmatprep.subr.bf16.mxu0 %v21692_v3 }
 0x3c7   :  { %8432 = vst [vmem:[#allocation3 + $0x898] sm:$0xf] %v17822_v47  ;;  %9198 = vst [vmem:[#allocation3 + $0x858] sm:$0xf] %v17758_v45  ;;  %v8495_v62 = vld [vmem:[#allocation2 + $0x302] sm:$0xff]  ;;  %v17823_v13 = vpack.c.bf16 %v8113_v1, %v8113_v1  ;;  %v17824_v11 = vpack.c.bf16 %v8114_v34, %v8114_v34  ;;  %v8496_v51 = vld [vmem:[#allocation2 + $0x30a] sm:$0xff] }
 0x3c8   :  { %8813 = vst [vmem:[#allocation3 + $0x830] sm:$0xf] %v17883_v12  ;;  %8814 = vst [vmem:[#allocation3 + $0x854] sm:$0xf] %v17884_v19  ;;  %v17885_v59 = vpack.c.bf16 %v8495_v62, %v8495_v62  ;;  %v19246_v54 = vld [vmem:[%s21679_s3 + $0x140] sm:$0xff]   ;;  %v17886_v26 = vpack.c.bf16 %v8496_v51, %v8496_v51  ;;  %v19238_v28 = vld [vmem:[%s21679_s3 + $0x1f8] sm:$0xff]  }
 0x3c9   :  { %v19133_v39 = vld [vmem:[#allocation3 + $0x440] ss:$36 sps:$4 sm:$0xff]   ;;  %v19141_v25 = vld [vmem:[#allocation3 + $0x4cc] ss:$36 sps:$4 sm:$0xff]   ;;  %8049 = vst [vmem:[#allocation3 + $0x8b8] sm:$0xf] %v17759_v46  ;;  %14107 = vmatpush2.bf16.msra.mxu1 %v19246_v54  ;;  %14378 = vmatpush1.bf16.msra.mxu0 %v19230_v57 }
 0x3ca   :  { %8050 = vst [vmem:[#allocation3 + $0x8dc] sm:$0xf] %v17760_v37  ;;  %9199 = vst [vmem:[#allocation3 + $0x87c] sm:$0xf] %v17759_v46  ;;  %v19144_v7 = vld [vmem:[#allocation3 + $0x48c] ss:$36 sps:$4 sm:$0xff]   ;;  %14379 = vmatprep.subr.bf16.mxu0 %v21692_v3 }
 0x3cb   :  { %9200 = vst [vmem:[#allocation3 + $0x8a0] sm:$0xf] %v17760_v37  ;;  %8433 = vst [vmem:[#allocation3 + $0x8bc] sm:$0xf] %v17823_v13  ;;  %13659 = vmatmul.mubr.bf16.gmra.mxu1 %v19136_v24  ;;  %v19231_v16 = vld [vmem:[%s21679_s3 + $0x180] sm:$0xff]   ;;  %v19239_v50 = vld [vmem:[%s21679_s3 + $0x1f0] sm:$0xff]  }
 0x3cc   :  { %8434 = vst [vmem:[#allocation3 + $0x8e0] sm:$0xf] %v17824_v11  ;;  %8815 = vst [vmem:[#allocation3 + $0x878] sm:$0xf] %v17885_v59  ;;  %13940 = vmatmul.mubr.bf16.gmra.mxu0 %v19133_v39  ;;  %13666 = vmatprep.mubr.bf16.mxu1 %v19141_v25  ;;  %v19148_v29 = vld [vmem:[#allocation3 + $0x514] ss:$36 sps:$4 sm:$0xff]  }
 0x3cd   :  { %8816 = vst [vmem:[#allocation3 + $0x89c] sm:$0xf] %v17886_v26  ;;  %13947 = vmatprep.mubr.bf16.mxu0 %v19144_v7  ;;  %14380 = vmatpush1.bf16.msra.mxu0 %v19231_v16  ;;  %v19139_v17 = vld [vmem:[#allocation3 + $0x4c8] ss:$36 sps:$4 sm:$0xff]   ;;  %v19151_v56 = vld [vmem:[#allocation3 + $0x4d4] ss:$36 sps:$4 sm:$0xff]  }
 0x3ce   :  { %14381 = vmatprep.subr.bf16.mxu0 %v21692_v3  ;;  %v19142_v38 = vld [vmem:[#allocation3 + $0x488] ss:$36 sps:$4 sm:$0xff]   ;;  %v8497_v36 = vld [vmem:[#allocation2 + $0x31a] sm:$0xff]  ;;  %v8881_v44 = vld [vmem:[#allocation2 + $0x330] sm:$0xff] }
 0x3cf   :  { %v8498_v31 = vld [vmem:[#allocation2 + $0x322] sm:$0xff]  ;;  %v17887_v14 = vpack.c.bf16 %v8497_v36, %v8497_v36  ;;  %v8882_v6 = vld [vmem:[#allocation2 + $0x338] sm:$0xff]  ;;  %v17951_v9 = vpack.c.bf16 %v8881_v44, %v8881_v44  ;;  %v19146_v30 = vld [vmem:[#allocation3 + $0x510] ss:$36 sps:$4 sm:$0xff]  }
 0x3d0   :  { %v17888_v20 = vpack.c.bf16 %v8498_v31, %v8498_v31  ;;  %v17952_v52 = vpack.c.bf16 %v8882_v6, %v8882_v6  ;;  %v19257_v48 = vld [vmem:[%s21679_s3 + $0x238] sm:$0xff]   ;;  %v19247_v5 = vld [vmem:[%s21679_s3 + $0x1e8] sm:$0xff]   ;;  %v19149_v53 = vld [vmem:[#allocation3 + $0x4d0] ss:$36 sps:$4 sm:$0xff]  }
 0x3d1   :  { %14382 = vmatpush2.bf16.msra.mxu0 %v19238_v28  ;;  %8817 = vst [vmem:[#allocation3 + $0x8c0] sm:$0xf] %v17887_v14  ;;  %9201 = vst [vmem:[#allocation3 + $0x8c4] sm:$0xf] %v17951_v9  ;;  %v9972_v15 = vld [vmem:[#allocation2 + $0x38] sm:$0xff]  ;;  %18433 = vmatprep.subr.bf16.mxu1 %v19257_v48  ;;  %v9207_v8 = vld [vmem:[#allocation2 + $0x49] sm:$0xff] }
 0x3d2   :  { %14383 = vmatprep.subr.bf16.mxu0 %v21692_v3  ;;  %8818 = vst [vmem:[#allocation3 + $0x8e4] sm:$0xf] %v17888_v20  ;;  %v19154_v49 = vld [vmem:[#allocation3 + $0x55c] ss:$36 sps:$4 sm:$0xff]   ;;  %9202 = vst [vmem:[#allocation3 + $0x8e8] sm:$0xf] %v17952_v52  ;;  %v18082_v0 = vpack.c.bf16 %v9972_v15, %v9972_v15  ;;  %v17957_v41 = vpack.c.bf16 %v9207_v8, %v9207_v8 }
 0x3d3   :  { %13667 = vmatmul.mubr.bf16.gmra.mxu1 %v19139_v17  ;;  %v9208_v23 = vld [vmem:[#allocation2 + $0x51] sm:$0xff]  ;;  %v19157_v61 = vld [vmem:[#allocation3 + $0x51c] ss:$36 sps:$4 sm:$0xff]   ;;  %v9973_v63 = vld [vmem:[#allocation2 + $0x48] sm:$0xff] }
 0x3d4   :  { %13948 = vmatmul.mubr.bf16.gmra.mxu0 %v19142_v38  ;;  %13674 = vmatprep.mubr.bf16.mxu1 %v19148_v29  ;;  %v19248_v21 = vld [vmem:[%s21679_s3 + $0x1e0] sm:$0xff]   ;;  %v17958_v10 = vpack.c.bf16 %v9208_v23, %v9208_v23  ;;  %v9591_v60 = vld [vmem:[#allocation2 + $0x4a] sm:$0xff]  ;;  %v9592_v35 = vld [vmem:[#allocation2 + $0x52] sm:$0xff]  ;;  %10292 = vst [vmem:[#allocation3 + $0x3c] sm:$0xf] %v18082_v0  ;;  %v18083_v42 = vpack.c.bf16 %v9973_v63, %v9973_v63 }
 0x3d5   :  { %13955 = vmatprep.mubr.bf16.mxu0 %v19151_v56  ;;  %14384 = vmatpush2.bf16.msra.mxu0 %v19239_v50  ;;  %v18021_v43 = vpack.c.bf16 %v9591_v60, %v9591_v60  ;;  %v18022_v4 = vpack.c.bf16 %v9592_v35, %v9592_v35  ;;  %v9974_v22 = vld [vmem:[#allocation2 + $0x50] sm:$0xff]  ;;  %v9209_v40 = vld [vmem:[#allocation2 + $0x61] sm:$0xff]  ;;  %9527 = vst [vmem:[#allocation3 + $0xa0] sm:$0xf] %v17957_v41  ;;  %10677 = vst [vmem:[#allocation3 + $0x64] sm:$0xf] %v17957_v41 }
 0x3d6   :  { %14385 = vmatprep.subr.bf16.mxu0 %v21692_v3  ;;  %v9210_v24 = vld [vmem:[#allocation2 + $0x69] sm:$0xff]  ;;  %9528 = vst [vmem:[#allocation3 + $0xc4] sm:$0xf] %v17958_v10  ;;  %v18084_v45 = vpack.c.bf16 %v9974_v22, %v9974_v22  ;;  %10678 = vst [vmem:[#allocation3 + $0x88] sm:$0xf] %v17958_v10  ;;  %v17959_v32 = vpack.c.bf16 %v9209_v40, %v9209_v40  ;;  %v9975_v57 = vld [vmem:[#allocation2 + $0x60] sm:$0xff] }
 0x3d7   :  { %v17960_v47 = vpack.c.bf16 %v9210_v24, %v9210_v24  ;;  %v9593_v2 = vld [vmem:[#allocation2 + $0x62] sm:$0xff]  ;;  %v9594_v58 = vld [vmem:[#allocation2 + $0x6a] sm:$0xff]  ;;  %9911 = vst [vmem:[#allocation3 + $0xa4] sm:$0xf] %v18021_v43  ;;  %9912 = vst [vmem:[#allocation3 + $0xc8] sm:$0xf] %v18022_v4  ;;  %v18085_v55 = vpack.c.bf16 %v9975_v57, %v9975_v57 }
 0x3d8   :  { %10293 = vst [vmem:[#allocation3 + $0x60] sm:$0xf] %v18083_v42  ;;  %v18023_v12 = vpack.c.bf16 %v9593_v2, %v9593_v2  ;;  %v18024_v19 = vpack.c.bf16 %v9594_v58, %v9594_v58  ;;  %v9976_v18 = vld [vmem:[#allocation2 + $0x68] sm:$0xff]  ;;  %v9211_v46 = vld [vmem:[#allocation2 + $0x79] sm:$0xff]  ;;  %10294 = vst [vmem:[#allocation3 + $0x84] sm:$0xf] %v18084_v45 }
 0x3d9   :  { %14386 = vmatpush2.bf16.msra.mxu0 %v19247_v5  ;;  %v9212_v37 = vld [vmem:[#allocation2 + $0x81] sm:$0xff]  ;;  %9529 = vst [vmem:[#allocation3 + $0xe8] sm:$0xf] %v17959_v32  ;;  %9530 = vst [vmem:[#allocation3 + $0x10c] sm:$0xf] %v17960_v47  ;;  %v18086_v1 = vpack.c.bf16 %v9976_v18, %v9976_v18  ;;  %v17961_v34 = vpack.c.bf16 %v9211_v46, %v9211_v46  ;;  %v9977_v51 = vld [vmem:[#allocation2 + $0x78] sm:$0xff] }
 0x3da   :  { %14387 = vmatprep.subr.bf16.mxu0 %v21692_v3  ;;  %10679 = vst [vmem:[#allocation3 + $0xac] sm:$0xf] %v17959_v32  ;;  %10680 = vst [vmem:[#allocation3 + $0xd0] sm:$0xf] %v17960_v47  ;;  %v17962_v62 = vpack.c.bf16 %v9212_v37, %v9212_v37  ;;  %v9595_v13 = vld [vmem:[#allocation2 + $0x7a] sm:$0xff]  ;;  %v9596_v11 = vld [vmem:[#allocation2 + $0x82] sm:$0xff]  ;;  %v18087_v25 = vpack.c.bf16 %v9977_v51, %v9977_v51 }
 0x3db   :  { %13675 = vmatmul.mubr.bf16.gmra.mxu1 %v19146_v30  ;;  %9913 = vst [vmem:[#allocation3 + $0xec] sm:$0xf] %v18023_v12  ;;  %9914 = vst [vmem:[#allocation3 + $0x110] sm:$0xf] %v18024_v19  ;;  %v18025_v59 = vpack.c.bf16 %v9595_v13, %v9595_v13  ;;  %v18026_v54 = vpack.c.bf16 %v9596_v11, %v9596_v11  ;;  %v9978_v39 = vld [vmem:[#allocation2 + $0x80] sm:$0xff]  ;;  %v9213_v26 = vld [vmem:[#allocation2 + $0x91] sm:$0xff] }
 0x3dc   :  { %13956 = vmatmul.mubr.bf16.gmra.mxu0 %v19149_v53  ;;  %13682 = vmatprep.mubr.bf16.mxu1 %v19154_v49  ;;  %10295 = vst [vmem:[#allocation3 + $0xa8] sm:$0xf] %v18085_v55  ;;  %v19152_v7 = vld [vmem:[#allocation3 + $0x558] ss:$36 sps:$4 sm:$0xff]   ;;  %10296 = vst [vmem:[#allocation3 + $0xcc] sm:$0xf] %v18086_v1  ;;  %v18088_v28 = vpack.c.bf16 %v9978_v39, %v9978_v39  ;;  %v17963_v29 = vpack.c.bf16 %v9213_v26, %v9213_v26 }
 0x3dd   :  { %13963 = vmatprep.mubr.bf16.mxu0 %v19157_v61  ;;  %14388 = vmatpush2.bf16.msra.mxu0 %v19248_v21  ;;  %v19255_v16 = vld [vmem:[%s21679_s3 + $0x1d8] sm:$0xff]   ;;  %9531 = vst [vmem:[#allocation3 + $0x130] sm:$0xf] %v17961_v34  ;;  %9532 = vst [vmem:[#allocation3 + $0x154] sm:$0xf] %v17962_v62  ;;  %v9979_v6 = vld [vmem:[#allocation2 + $0x90] sm:$0xff] }
 0x3de   :  { %10681 = vst [vmem:[#allocation3 + $0xf4] sm:$0xf] %v17961_v34  ;;  %10682 = vst [vmem:[#allocation3 + $0x118] sm:$0xf] %v17962_v62  ;;  %v19155_v17 = vld [vmem:[#allocation3 + $0x518] ss:$36 sps:$4 sm:$0xff]   ;;  %14389 = vmatprep.subr.bf16.mxu0 %v21692_v3  ;;  %v18089_v30 = vpack.c.bf16 %v9979_v6, %v9979_v6 }
 0x3df   :  { %9915 = vst [vmem:[#allocation3 + $0x134] sm:$0xf] %v18025_v59  ;;  %9916 = vst [vmem:[#allocation3 + $0x158] sm:$0xf] %v18026_v54  ;;  %v9214_v38 = vld [vmem:[#allocation2 + $0x99] sm:$0xff]  ;;  %v9215_v52 = vld [vmem:[#allocation2 + $0xa9] sm:$0xff] }
 0x3e0   :  { %10297 = vst [vmem:[#allocation3 + $0xf0] sm:$0xf] %v18087_v25  ;;  %v9597_v56 = vld [vmem:[#allocation2 + $0x92] sm:$0xff]  ;;  %v9598_v50 = vld [vmem:[#allocation2 + $0x9a] sm:$0xff]  ;;  %v19161_v36 = vld [vmem:[#allocation3 + $0x5a4] ss:$36 sps:$4 sm:$0xff]   ;;  %v17964_v44 = vpack.c.bf16 %v9214_v38, %v9214_v38  ;;  %v17965_v15 = vpack.c.bf16 %v9215_v52, %v9215_v52 }
 0x3e1   :  { %v19164_v31 = vld [vmem:[#allocation3 + $0x564] ss:$36 sps:$4 sm:$0xff]   ;;  %10298 = vst [vmem:[#allocation3 + $0x114] sm:$0xf] %v18088_v28  ;;  %9533 = vst [vmem:[#allocation3 + $0x178] sm:$0xf] %v17963_v29  ;;  %v18027_v14 = vpack.c.bf16 %v9597_v56, %v9597_v56  ;;  %v18028_v20 = vpack.c.bf16 %v9598_v50, %v9598_v50  ;;  %14390 = vmatpush2.bf16.msra.mxu0 %v19255_v16 }
 0x3e2   :  { %10683 = vst [vmem:[#allocation3 + $0x13c] sm:$0xf] %v17963_v29  ;;  %v9980_v9 = vld [vmem:[#allocation2 + $0x98] sm:$0xff]  ;;  %v19256_v48 = vld [vmem:[%s21679_s3 + $0x1d0] sm:$0xff]   ;;  %9534 = vst [vmem:[#allocation3 + $0x19c] sm:$0xf] %v17964_v44  ;;  %14391 = vmatprep.subr.bf16.mxu0 %v21692_v3 }
 0x3e3   :  { %13683 = vmatmul.mubr.bf16.gmra.mxu1 %v19152_v7  ;;  %9917 = vst [vmem:[#allocation3 + $0x17c] sm:$0xf] %v18027_v14  ;;  %9918 = vst [vmem:[#allocation3 + $0x1a0] sm:$0xf] %v18028_v20  ;;  %v18090_v5 = vpack.c.bf16 %v9980_v9, %v9980_v9  ;;  %v19261_v53 = vld [vmem:[%s21679_s3 + $0x1c8] sm:$0xff]   ;;  %v19265_v61 = vld [vmem:[%s21679_s3 + $0x1c0] sm:$0xff]  }
 0x3e4   :  { %10684 = vst [vmem:[#allocation3 + $0x160] sm:$0xf] %v17964_v44  ;;  %13964 = vmatmul.mubr.bf16.gmra.mxu0 %v19155_v17  ;;  %13690 = vmatprep.mubr.bf16.mxu1 %v19161_v36  ;;  %10299 = vst [vmem:[#allocation3 + $0x138] sm:$0xf] %v18089_v30  ;;  %v19159_v49 = vld [vmem:[#allocation3 + $0x5a0] ss:$36 sps:$4 sm:$0xff]  }
 0x3e5   :  { %13971 = vmatprep.mubr.bf16.mxu0 %v19164_v31  ;;  %10300 = vst [vmem:[#allocation3 + $0x15c] sm:$0xf] %v18090_v5  ;;  %9535 = vst [vmem:[#allocation3 + $0x1c0] sm:$0xf] %v17965_v15  ;;  %14392 = vmatpush2.bf16.msra.mxu0 %v19256_v48  ;;  %v19162_v0 = vld [vmem:[#allocation3 + $0x560] ss:$36 sps:$4 sm:$0xff]  }
 0x3e6   :  { %10685 = vst [vmem:[#allocation3 + $0x184] sm:$0xf] %v17965_v15  ;;  %14393 = vmatprep.subr.bf16.mxu0 %v21692_v3  ;;  %v19167_v8 = vld [vmem:[#allocation3 + $0x5ec] ss:$36 sps:$4 sm:$0xff]   ;;  %v9217_v42 = vld [vmem:[#allocation2 + $0xc1] sm:$0xff]  ;;  %v9219_v37 = vld [vmem:[#allocation2 + $0xd9] sm:$0xff] }
 0x3e7   :  { %v19170_v23 = vld [vmem:[#allocation3 + $0x5ac] ss:$36 sps:$4 sm:$0xff]   ;;  %v19175_v24 = vld [vmem:[#allocation3 + $0x634] ss:$36 sps:$4 sm:$0xff]   ;;  %v17967_v2 = vpack.c.bf16 %v9217_v42, %v9217_v42  ;;  %v9601_v58 = vld [vmem:[#allocation2 + $0xc2] sm:$0xff]  ;;  %v17969_v13 = vpack.c.bf16 %v9219_v37, %v9219_v37 }
 0x3e8   :  { %v9216_v21 = vld [vmem:[#allocation2 + $0xb1] sm:$0xff]  ;;  %v19165_v60 = vld [vmem:[#allocation3 + $0x5e8] ss:$36 sps:$4 sm:$0xff]   ;;  %v18031_v19 = vpack.c.bf16 %v9601_v58, %v9601_v58  ;;  %v9983_v55 = vld [vmem:[#allocation2 + $0xc0] sm:$0xff] }
 0x3e9   :  { %14394 = vmatpush2.bf16.msra.mxu0 %v19261_v53  ;;  %v9599_v41 = vld [vmem:[#allocation2 + $0xaa] sm:$0xff]  ;;  %v9600_v10 = vld [vmem:[#allocation2 + $0xb2] sm:$0xff]  ;;  %v17966_v35 = vpack.c.bf16 %v9216_v21, %v9216_v21  ;;  %9537 = vst [vmem:[#allocation3 + $0x208] sm:$0xf] %v17967_v2  ;;  %v18093_v1 = vpack.c.bf16 %v9983_v55, %v9983_v55  ;;  %10687 = vst [vmem:[#allocation3 + $0x1cc] sm:$0xf] %v17967_v2 }
 0x3ea   :  { %14395 = vmatprep.subr.bf16.mxu0 %v21692_v3  ;;  %v18029_v63 = vpack.c.bf16 %v9599_v41, %v9599_v41  ;;  %v18030_v43 = vpack.c.bf16 %v9600_v10, %v9600_v10  ;;  %v9981_v4 = vld [vmem:[#allocation2 + $0xa8] sm:$0xff]  ;;  %v9982_v22 = vld [vmem:[#allocation2 + $0xb0] sm:$0xff]  ;;  %v9603_v11 = vld [vmem:[#allocation2 + $0xda] sm:$0xff]  ;;  %9921 = vst [vmem:[#allocation3 + $0x20c] sm:$0xf] %v18031_v19 }
 0x3eb   :  { %13691 = vmatmul.mubr.bf16.gmra.mxu1 %v19159_v49  ;;  %v19168_v40 = vld [vmem:[#allocation3 + $0x5a8] ss:$36 sps:$4 sm:$0xff]   ;;  %v18091_v45 = vpack.c.bf16 %v9981_v4, %v9981_v4  ;;  %v18092_v32 = vpack.c.bf16 %v9982_v22, %v9982_v22  ;;  %v19178_v3 = vld [vmem:[#allocation3 + $0x5f4] ss:$36 sps:$4 sm:$0xff]   ;;  %9536 = vst [vmem:[#allocation3 + $0x1e4] sm:$0xf] %v17966_v35  ;;  %v18033_v54 = vpack.c.bf16 %v9603_v11, %v9603_v11 }
 0x3ec   :  { %13972 = vmatmul.mubr.bf16.gmra.mxu0 %v19162_v0  ;;  %13698 = vmatprep.mubr.bf16.mxu1 %v19167_v8  ;;  %v9218_v47 = vld [vmem:[#allocation2 + $0xc9] sm:$0xff]  ;;  %9919 = vst [vmem:[#allocation3 + $0x1c4] sm:$0xf] %v18029_v63  ;;  %9920 = vst [vmem:[#allocation3 + $0x1e8] sm:$0xf] %v18030_v43  ;;  %v9220_v62 = vld [vmem:[#allocation2 + $0xe1] sm:$0xff] }
 0x3ed   :  { %13979 = vmatprep.mubr.bf16.mxu0 %v19170_v23  ;;  %14396 = vmatpush2.bf16.msra.mxu0 %v19265_v61  ;;  %v9602_v57 = vld [vmem:[#allocation2 + $0xca] sm:$0xff]  ;;  %10686 = vst [vmem:[#allocation3 + $0x1a8] sm:$0xf] %v17966_v35  ;;  %v17968_v12 = vpack.c.bf16 %v9218_v47, %v9218_v47  ;;  %10301 = vst [vmem:[#allocation3 + $0x180] sm:$0xf] %v18091_v45  ;;  %v9604_v51 = vld [vmem:[#allocation2 + $0xe2] sm:$0xff]  ;;  %v17970_v59 = vpack.c.bf16 %v9220_v62, %v9220_v62 }
 0x3ee   :  { %v18032_v18 = vpack.c.bf16 %v9602_v57, %v9602_v57  ;;  %v9984_v46 = vld [vmem:[#allocation2 + $0xc8] sm:$0xff]  ;;  %10302 = vst [vmem:[#allocation3 + $0x1a4] sm:$0xf] %v18092_v32  ;;  %v18034_v39 = vpack.c.bf16 %v9604_v51, %v9604_v51  ;;  %v9985_v25 = vld [vmem:[#allocation2 + $0xd8] sm:$0xff]  ;;  %v9986_v26 = vld [vmem:[#allocation2 + $0xe0] sm:$0xff] }
 0x3ef   :  { %v18094_v34 = vpack.c.bf16 %v9984_v46, %v9984_v46  ;;  %9538 = vst [vmem:[#allocation3 + $0x22c] sm:$0xf] %v17968_v12  ;;  %10688 = vst [vmem:[#allocation3 + $0x1f0] sm:$0xf] %v17968_v12  ;;  %v9221_v7 = vld [vmem:[#allocation2 + $0xf1] sm:$0xff]  ;;  %v18095_v16 = vpack.c.bf16 %v9985_v25, %v9985_v25  ;;  %v18096_v28 = vpack.c.bf16 %v9986_v26, %v9986_v26  ;;  %v9222_v29 = vld [vmem:[#allocation2 + $0xf9] sm:$0xff] }
 0x3f0   :  { %9922 = vst [vmem:[#allocation3 + $0x230] sm:$0xf] %v18032_v18  ;;  %10303 = vst [vmem:[#allocation3 + $0x1c8] sm:$0xf] %v18093_v1  ;;  %v17971_v17 = vpack.c.bf16 %v9221_v7, %v9221_v7  ;;  %v9605_v38 = vld [vmem:[#allocation2 + $0xf2] sm:$0xff]  ;;  %v9606_v56 = vld [vmem:[#allocation2 + $0xfa] sm:$0xff]  ;;  %v17972_v50 = vpack.c.bf16 %v9222_v29, %v9222_v29 }
 0x3f1   :  { %10304 = vst [vmem:[#allocation3 + $0x1ec] sm:$0xf] %v18094_v34  ;;  %9539 = vst [vmem:[#allocation3 + $0x250] sm:$0xf] %v17969_v13  ;;  %v18035_v36 = vpack.c.bf16 %v9605_v38, %v9605_v38  ;;  %v18036_v31 = vpack.c.bf16 %v9606_v56, %v9606_v56  ;;  %v9987_v44 = vld [vmem:[#allocation2 + $0xf0] sm:$0xff]  ;;  %v9988_v14 = vld [vmem:[#allocation2 + $0xf8] sm:$0xff] }
 0x3f2   :  { %10689 = vst [vmem:[#allocation3 + $0x214] sm:$0xf] %v17969_v13  ;;  %9540 = vst [vmem:[#allocation3 + $0x274] sm:$0xf] %v17970_v59  ;;  %v9223_v20 = vld [vmem:[#allocation2 + $0x109] sm:$0xff]  ;;  %v18097_v6 = vpack.c.bf16 %v9987_v44, %v9987_v44  ;;  %v18098_v9 = vpack.c.bf16 %v9988_v14, %v9988_v14  ;;  %v9224_v52 = vld [vmem:[#allocation2 + $0x111] sm:$0xff] }
 0x3f3   :  { %13699 = vmatmul.mubr.bf16.gmra.mxu1 %v19165_v60  ;;  %9923 = vst [vmem:[#allocation3 + $0x254] sm:$0xf] %v18033_v54  ;;  %9924 = vst [vmem:[#allocation3 + $0x278] sm:$0xf] %v18034_v39  ;;  %v17973_v48 = vpack.c.bf16 %v9223_v20, %v9223_v20  ;;  %v9607_v30 = vld [vmem:[#allocation2 + $0x10a] sm:$0xff]  ;;  %v9608_v5 = vld [vmem:[#allocation2 + $0x112] sm:$0xff]  ;;  %v17974_v15 = vpack.c.bf16 %v9224_v52, %v9224_v52 }
 0x3f4   :  { %13980 = vmatmul.mubr.bf16.gmra.mxu0 %v19168_v40  ;;  %13706 = vmatprep.mubr.bf16.mxu1 %v19175_v24  ;;  %10690 = vst [vmem:[#allocation3 + $0x238] sm:$0xf] %v17970_v59  ;;  %10305 = vst [vmem:[#allocation3 + $0x210] sm:$0xf] %v18095_v16  ;;  %v18037_v53 = vpack.c.bf16 %v9607_v30, %v9607_v30  ;;  %v18038_v49 = vpack.c.bf16 %v9608_v5, %v9608_v5  ;;  %v9989_v0 = vld [vmem:[#allocation2 + $0x108] sm:$0xff]  ;;  %v9990_v8 = vld [vmem:[#allocation2 + $0x110] sm:$0xff] }
 0x3f5   :  { %13987 = vmatprep.mubr.bf16.mxu0 %v19178_v3  ;;  %10306 = vst [vmem:[#allocation3 + $0x234] sm:$0xf] %v18096_v28  ;;  %9541 = vst [vmem:[#allocation3 + $0x298] sm:$0xf] %v17971_v17  ;;  %v9225_v23 = vld [vmem:[#allocation2 + $0x121] sm:$0xff]  ;;  %v18099_v61 = vpack.c.bf16 %v9989_v0, %v9989_v0  ;;  %v18100_v21 = vpack.c.bf16 %v9990_v8, %v9990_v8  ;;  %v9226_v40 = vld [vmem:[#allocation2 + $0x129] sm:$0xff] }
 0x3f6   :  { %10691 = vst [vmem:[#allocation3 + $0x25c] sm:$0xf] %v17971_v17  ;;  %9542 = vst [vmem:[#allocation3 + $0x2bc] sm:$0xf] %v17972_v50  ;;  %v17975_v41 = vpack.c.bf16 %v9225_v23, %v9225_v23  ;;  %v19173_v10 = vld [vmem:[#allocation3 + $0x630] ss:$36 sps:$4 sm:$0xff]   ;;  %v17976_v45 = vpack.c.bf16 %v9226_v40, %v9226_v40 }
 0x3f7   :  { %9925 = vst [vmem:[#allocation3 + $0x29c] sm:$0xf] %v18035_v36  ;;  %9926 = vst [vmem:[#allocation3 + $0x2c0] sm:$0xf] %v18036_v31  ;;  %v19176_v60 = vld [vmem:[#allocation3 + $0x5f0] ss:$36 sps:$4 sm:$0xff]  }
 0x3f8   :  { %10692 = vst [vmem:[#allocation3 + $0x280] sm:$0xf] %v17972_v50  ;;  %10307 = vst [vmem:[#allocation3 + $0x258] sm:$0xf] %v18097_v6  ;;  %v19181_v35 = vld [vmem:[#allocation3 + $0x67c] ss:$36 sps:$4 sm:$0xff]  }
 0x3f9   :  { %10308 = vst [vmem:[#allocation3 + $0x27c] sm:$0xf] %v18098_v9  ;;  %9543 = vst [vmem:[#allocation3 + $0x2e0] sm:$0xf] %v17973_v48  ;;  %v19184_v63 = vld [vmem:[#allocation3 + $0x63c] ss:$36 sps:$4 sm:$0xff]  }
 0x3fa   :  { %10693 = vst [vmem:[#allocation3 + $0x2a4] sm:$0xf] %v17973_v48  ;;  %9544 = vst [vmem:[#allocation3 + $0x304] sm:$0xf] %v17974_v15  ;;  %v19179_v43 = vld [vmem:[#allocation3 + $0x678] ss:$36 sps:$4 sm:$0xff]  }
 0x3fb   :  { %9927 = vst [vmem:[#allocation3 + $0x2e4] sm:$0xf] %v18037_v53  ;;  %9928 = vst [vmem:[#allocation3 + $0x308] sm:$0xf] %v18038_v49  ;;  %13707 = vmatmul.mubr.bf16.gmra.mxu1 %v19173_v10  ;;  %v19182_v4 = vld [vmem:[#allocation3 + $0x638] ss:$36 sps:$4 sm:$0xff]  }
 0x3fc   :  { %10694 = vst [vmem:[#allocation3 + $0x2c8] sm:$0xf] %v17974_v15  ;;  %10309 = vst [vmem:[#allocation3 + $0x2a0] sm:$0xf] %v18099_v61  ;;  %13988 = vmatmul.mubr.bf16.gmra.mxu0 %v19176_v60  ;;  %13714 = vmatprep.mubr.bf16.mxu1 %v19181_v35  ;;  %v19189_v22 = vld [vmem:[#allocation3 + $0x6c4] ss:$36 sps:$4 sm:$0xff]  }
 0x3fd   :  { %10310 = vst [vmem:[#allocation3 + $0x2c4] sm:$0xf] %v18100_v21  ;;  %9545 = vst [vmem:[#allocation3 + $0x328] sm:$0xf] %v17975_v41  ;;  %13995 = vmatprep.mubr.bf16.mxu0 %v19184_v63  ;;  %v19192_v42 = vld [vmem:[#allocation3 + $0x684] ss:$36 sps:$4 sm:$0xff]  }
 0x3fe   :  { %10695 = vst [vmem:[#allocation3 + $0x2ec] sm:$0xf] %v17975_v41  ;;  %v9609_v24 = vld [vmem:[#allocation2 + $0x122] sm:$0xff]  ;;  %v9610_v32 = vld [vmem:[#allocation2 + $0x12a] sm:$0xff]  ;;  %v9227_v18 = vld [vmem:[#allocation2 + $0x139] sm:$0xff] }
 0x3ff   :  { %v18039_v47 = vpack.c.bf16 %v9609_v24, %v9609_v24  ;;  %v9991_v2 = vld [vmem:[#allocation2 + $0x120] sm:$0xff]  ;;  %v9992_v58 = vld [vmem:[#allocation2 + $0x128] sm:$0xff]  ;;  %v18040_v3 = vpack.c.bf16 %v9610_v32, %v9610_v32  ;;  %9546 = vst [vmem:[#allocation3 + $0x34c] sm:$0xf] %v17976_v45  ;;  %10696 = vst [vmem:[#allocation3 + $0x310] sm:$0xf] %v17976_v45  ;;  %v17977_v34 = vpack.c.bf16 %v9227_v18, %v9227_v18 }
 0x400   :  { %v19187_v57 = vld [vmem:[#allocation3 + $0x6c0] ss:$36 sps:$4 sm:$0xff]   ;;  %v18101_v12 = vpack.c.bf16 %v9991_v2, %v9991_v2  ;;  %v18102_v19 = vpack.c.bf16 %v9992_v58, %v9992_v58  ;;  %v19195_v1 = vld [vmem:[#allocation3 + $0x70c] ss:$36 sps:$4 sm:$0xff]   ;;  %v9993_v51 = vld [vmem:[#allocation2 + $0x138] sm:$0xff] }
 0x401   :  { %v9228_v55 = vld [vmem:[#allocation2 + $0x141] sm:$0xff]  ;;  %9929 = vst [vmem:[#allocation3 + $0x32c] sm:$0xf] %v18039_v47  ;;  %v19198_v54 = vld [vmem:[#allocation3 + $0x6cc] ss:$36 sps:$4 sm:$0xff]   ;;  %v18103_v25 = vpack.c.bf16 %v9993_v51, %v9993_v51  ;;  %v9230_v16 = vld [vmem:[#allocation2 + $0x159] sm:$0xff] }
 0x402   :  { %v9611_v46 = vld [vmem:[#allocation2 + $0x13a] sm:$0xff]  ;;  %v17978_v62 = vpack.c.bf16 %v9228_v55, %v9228_v55  ;;  %v9612_v13 = vld [vmem:[#allocation2 + $0x142] sm:$0xff]  ;;  %9930 = vst [vmem:[#allocation3 + $0x350] sm:$0xf] %v18040_v3  ;;  %10311 = vst [vmem:[#allocation3 + $0x2e8] sm:$0xf] %v18101_v12  ;;  %v17980_v17 = vpack.c.bf16 %v9230_v16, %v9230_v16  ;;  %v13821_v12 = vpop.f32.mrf.mxu0 }
 0x403   :  { %13715 = vmatmul.mubr.bf16.gmra.mxu1 %v19179_v43  ;;  %v19190_v37 = vld [vmem:[#allocation3 + $0x680] ss:$36 sps:$4 sm:$0xff]   ;;  %v18041_v11 = vpack.c.bf16 %v9611_v46, %v9611_v46  ;;  %10312 = vst [vmem:[#allocation3 + $0x30c] sm:$0xf] %v18102_v19  ;;  %v18042_v39 = vpack.c.bf16 %v9612_v13, %v9612_v13  ;;  %v9229_v7 = vld [vmem:[#allocation2 + $0x151] sm:$0xff]  ;;  %v9231_v20 = vld [vmem:[#allocation2 + $0x169] sm:$0xff] }
 0x404   :  { %13996 = vmatmul.mubr.bf16.gmra.mxu0 %v19182_v4  ;;  %13722 = vmatprep.mubr.bf16.mxu1 %v19189_v22  ;;  %v9994_v59 = vld [vmem:[#allocation2 + $0x140] sm:$0xff]  ;;  %v9613_v28 = vld [vmem:[#allocation2 + $0x152] sm:$0xff]  ;;  %9547 = vst [vmem:[#allocation3 + $0x370] sm:$0xf] %v17977_v34  ;;  %9548 = vst [vmem:[#allocation3 + $0x394] sm:$0xf] %v17978_v62  ;;  %v17979_v29 = vpack.c.bf16 %v9229_v7, %v9229_v7  ;;  %v17981_v52 = vpack.c.bf16 %v9231_v20, %v9231_v20  ;;  %v13823_v55 = vpop.f32.mrf.mxu0 }
 0x405   :  { %14003 = vmatprep.mubr.bf16.mxu0 %v19192_v42  ;;  %v18104_v26 = vpack.c.bf16 %v9994_v59, %v9994_v59  ;;  %9931 = vst [vmem:[#allocation3 + $0x374] sm:$0xf] %v18041_v11  ;;  %10697 = vst [vmem:[#allocation3 + $0x334] sm:$0xf] %v17977_v34  ;;  %v9614_v38 = vld [vmem:[#allocation2 + $0x15a] sm:$0xff]  ;;  %v18043_v56 = vpack.c.bf16 %v9613_v28, %v9613_v28  ;;  %v9995_v50 = vld [vmem:[#allocation2 + $0x150] sm:$0xff] }
 0x406   :  { %10698 = vst [vmem:[#allocation3 + $0x358] sm:$0xf] %v17978_v62  ;;  %v9996_v36 = vld [vmem:[#allocation2 + $0x158] sm:$0xff]  ;;  %9932 = vst [vmem:[#allocation3 + $0x398] sm:$0xf] %v18042_v39  ;;  %v18044_v31 = vpack.c.bf16 %v9614_v38, %v9614_v38  ;;  %v18105_v44 = vpack.c.bf16 %v9995_v50, %v9995_v50  ;;  %v9615_v9 = vld [vmem:[#allocation2 + $0x16a] sm:$0xff]  ;;  %v13824_v34 = vpop.f32.mrf.mxu0 }
 0x407   :  { %10313 = vst [vmem:[#allocation3 + $0x330] sm:$0xf] %v18103_v25  ;;  %10314 = vst [vmem:[#allocation3 + $0x354] sm:$0xf] %v18104_v26  ;;  %v18106_v14 = vpack.c.bf16 %v9996_v36, %v9996_v36  ;;  %v9232_v6 = vld [vmem:[#allocation2 + $0x171] sm:$0xff]  ;;  %v18045_v5 = vpack.c.bf16 %v9615_v9, %v9615_v9  ;;  %v9997_v15 = vld [vmem:[#allocation2 + $0x168] sm:$0xff] }
 0x408   :  { %9549 = vst [vmem:[#allocation3 + $0x3b8] sm:$0xf] %v17979_v29  ;;  %9550 = vst [vmem:[#allocation3 + $0x3dc] sm:$0xf] %v17980_v17  ;;  %v17982_v48 = vpack.c.bf16 %v9232_v6, %v9232_v6  ;;  %v9616_v30 = vld [vmem:[#allocation2 + $0x172] sm:$0xff]  ;;  %v18107_v0 = vpack.c.bf16 %v9997_v15, %v9997_v15  ;;  %v9233_v23 = vld [vmem:[#allocation2 + $0x181] sm:$0xff]  ;;  %v13826_v11 = vpop.f32.mrf.mxu0 }
 0x409   :  { %9933 = vst [vmem:[#allocation3 + $0x3bc] sm:$0xf] %v18043_v56  ;;  %10699 = vst [vmem:[#allocation3 + $0x37c] sm:$0xf] %v17979_v29  ;;  %v9998_v53 = vld [vmem:[#allocation2 + $0x170] sm:$0xff]  ;;  %v18046_v49 = vpack.c.bf16 %v9616_v30, %v9616_v30  ;;  %v17983_v21 = vpack.c.bf16 %v9233_v23, %v9233_v23  ;;  %v9617_v10 = vld [vmem:[#allocation2 + $0x182] sm:$0xff] }
 0x40a   :  { %10700 = vst [vmem:[#allocation3 + $0x3a0] sm:$0xf] %v17980_v17  ;;  %9934 = vst [vmem:[#allocation3 + $0x3e0] sm:$0xf] %v18044_v31  ;;  %v18108_v8 = vpack.c.bf16 %v9998_v53, %v9998_v53  ;;  %v9234_v61 = vld [vmem:[#allocation2 + $0x189] sm:$0xff]  ;;  %v9999_v35 = vld [vmem:[#allocation2 + $0x180] sm:$0xff]  ;;  %v18047_v63 = vpack.c.bf16 %v9617_v10, %v9617_v10  ;;  %v13829_v25 = vpop.f32.mrf.mxu0 }
 0x40b   :  { %13723 = vmatmul.mubr.bf16.gmra.mxu1 %v19187_v57  ;;  %10315 = vst [vmem:[#allocation3 + $0x378] sm:$0xf] %v18105_v44  ;;  %10316 = vst [vmem:[#allocation3 + $0x39c] sm:$0xf] %v18106_v14  ;;  %v17984_v41 = vpack.c.bf16 %v9234_v61, %v9234_v61  ;;  %v9618_v60 = vld [vmem:[#allocation2 + $0x18a] sm:$0xff]  ;;  %v18109_v22 = vpack.c.bf16 %v9999_v35, %v9999_v35  ;;  %v13540_v57 = vpop.f32.mrf.mxu1  ;;  %v9620_v28 = vld [vmem:[#allocation2 + $0x1d2] sm:$0xff] }
 0x40c   :  { %14004 = vmatmul.mubr.bf16.gmra.mxu0 %v19190_v37  ;;  %13730 = vmatprep.mubr.bf16.mxu1 %v19195_v1  ;;  %9551 = vst [vmem:[#allocation3 + $0x400] sm:$0xf] %v17981_v52  ;;  %9552 = vst [vmem:[#allocation3 + $0x424] sm:$0xf] %v17982_v48  ;;  %v18048_v43 = vpack.c.bf16 %v9618_v60, %v9618_v60  ;;  %v10000_v4 = vld [vmem:[#allocation2 + $0x188] sm:$0xff]  ;;  %v9236_v7 = vld [vmem:[#allocation2 + $0x1d1] sm:$0xff]  ;;  %v13831_v29 = vpop.f32.mrf.mxu0  ;;  %v18050_v56 = vpack.c.bf16 %v9620_v28, %v9620_v28 }
 0x40d   :  { %14011 = vmatprep.mubr.bf16.mxu0 %v19198_v54  ;;  %9935 = vst [vmem:[#allocation3 + $0x404] sm:$0xf] %v18045_v5  ;;  %10701 = vst [vmem:[#allocation3 + $0x3c4] sm:$0xf] %v17981_v52  ;;  %v9235_v42 = vld [vmem:[#allocation2 + $0x1c9] sm:$0xff]  ;;  %v18110_v45 = vpack.c.bf16 %v10000_v4, %v10000_v4  ;;  %v13542_v18 = vpop.f32.mrf.mxu1  ;;  %v17986_v17 = vpack.c.bf16 %v9236_v7, %v9236_v7  ;;  %v9237_v50 = vld [vmem:[#allocation2 + $0x1e1] sm:$0xff] }
 0x40e   :  { %10702 = vst [vmem:[#allocation3 + $0x3e8] sm:$0xf] %v17982_v48  ;;  %9936 = vst [vmem:[#allocation3 + $0x428] sm:$0xf] %v18046_v49  ;;  %v21017_v40 = vld [vmem:[%s21680_s4] ss:$0 sm:$0xff]  ;;  %v17985_v32 = vpack.c.bf16 %v9235_v42, %v9235_v42  ;;  %v17987_v6 = vpack.c.bf16 %v9237_v50, %v9237_v50  ;;  %v13832_v53 = vpop.f32.mrf.mxu0 }
 0x40f   :  { %10317 = vst [vmem:[#allocation3 + $0x3c0] sm:$0xf] %v18107_v0  ;;  %10318 = vst [vmem:[#allocation3 + $0x3e4] sm:$0xf] %v18108_v8  ;;  %v19193_v24 = vld [vmem:[#allocation3 + $0x708] ss:$36 sps:$4 sm:$0xff]   ;;  %v13533_v58 = vadd.f32 %v21017_v40, %v20912_v33  ;;  %v13536_v46 = vadd.f32 %v21017_v40, %v20918_v27  ;;  %v13543_v37 = vpop.f32.mrf.mxu1  ;;  %v13541_v59 = vadd.f32 %v21017_v40, %v13540_v57 }
 0x410   :  { %9553 = vst [vmem:[#allocation3 + $0x448] sm:$0xf] %v17983_v21  ;;  %9554 = vst [vmem:[#allocation3 + $0x46c] sm:$0xf] %v17984_v41  ;;  %v19196_v47 = vld [vmem:[#allocation3 + $0x6c8] ss:$36 sps:$4 sm:$0xff]   ;;  %v13544_v44 = vadd.f32 %v21017_v40, %v13543_v37 }
 0x411   :  { %10703 = vst [vmem:[#allocation3 + $0x40c] sm:$0xf] %v17983_v21  ;;  %10704 = vst [vmem:[#allocation3 + $0x430] sm:$0xf] %v17984_v41  ;;  %v19203_v2 = vld [vmem:[#allocation3 + $0x754] ss:$36 sps:$4 sm:$0xff]   ;;  %v21021_v19 = vadd.f32 %v13821_v12, %v13533_v58  ;;  %v21025_v13 = vadd.f32 %v13824_v34, %v13536_v46  ;;  %v13545_v33 = vpop.f32.mrf.mxu1  ;;  %v21030_v26 = vadd.f32 %v13829_v25, %v13541_v59 }
 0x412   :  { %9937 = vst [vmem:[#allocation3 + $0x44c] sm:$0xf] %v18047_v63  ;;  %9938 = vst [vmem:[#allocation3 + $0x470] sm:$0xf] %v18048_v43  ;;  %v19206_v3 = vld [vmem:[#allocation3 + $0x714] ss:$36 sps:$4 sm:$0xff]   ;;  %v21035_v10 = vadd.f32 %v13832_v53, %v13544_v44 }
 0x413   :  { %10319 = vst [vmem:[#allocation3 + $0x408] sm:$0xf] %v18109_v22  ;;  %10320 = vst [vmem:[#allocation3 + $0x42c] sm:$0xf] %v18110_v45  ;;  %13731 = vmatmul.mubr.bf16.gmra.mxu1 %v19193_v24  ;;  %v19201_v1 = vld [vmem:[#allocation3 + $0x750] ss:$36 sps:$4 sm:$0xff]   ;;  %v21028_v54 = vpop.f32.mrf.mxu1  ;;  %v13834_v45 = vpop.f32.mrf.mxu0 }
 0x414   :  { %9555 = vst [vmem:[#allocation3 + $0x490] sm:$0xf] %v17985_v32  ;;  %14012 = vmatmul.mubr.bf16.gmra.mxu0 %v19196_v47  ;;  %13738 = vmatprep.mubr.bf16.mxu1 %v19203_v2  ;;  %v19204_v62 = vld [vmem:[#allocation3 + $0x710] ss:$36 sps:$4 sm:$0xff]   ;;  %v19209_v51 = vld [vmem:[#allocation3 + $0x79c] ss:$36 sps:$4 sm:$0xff]   ;;  %v13549_v12 = vadd.f32 %v21017_v40, %v21028_v54 }
 0x415   :  { %14019 = vmatprep.mubr.bf16.mxu0 %v19206_v3  ;;  %v19212_v39 = vld [vmem:[#allocation3 + $0x75c] ss:$36 sps:$4 sm:$0xff]   ;;  %v13550_v27 = vpop.f32.mrf.mxu1  ;;  %v9619_v16 = vld [vmem:[#allocation2 + $0x1ca] sm:$0xff]  ;;  %9556 = vst [vmem:[#allocation3 + $0x4b4] sm:$0xf] %v17986_v17  ;;  %v9625_v3 = vld [vmem:[#allocation2 + $0x212] sm:$0xff]  ;;  %v13837_v33 = vpop.f32.mrf.mxu0 }
 0x416   :  { %v18049_v38 = vpack.c.bf16 %v9619_v16, %v9619_v16  ;;  %v9238_v36 = vld [vmem:[#allocation2 + $0x1e9] sm:$0xff]  ;;  %v19207_v14 = vld [vmem:[#allocation3 + $0x798] ss:$36 sps:$4 sm:$0xff]   ;;  %v10003_v30 = vld [vmem:[#allocation2 + $0x1e0] sm:$0xff]  ;;  %9940 = vst [vmem:[#allocation3 + $0x4b8] sm:$0xf] %v18050_v56  ;;  %v21041_v25 = vadd.f32 %v13837_v33, %v13549_v12 }
 0x417   :  { %v9621_v31 = vld [vmem:[#allocation2 + $0x1e2] sm:$0xff]  ;;  %v21033_v20 = vpop.f32.mrf.mxu1  ;;  %v17988_v9 = vpack.c.bf16 %v9238_v36, %v9238_v36  ;;  %v9622_v52 = vld [vmem:[#allocation2 + $0x1ea] sm:$0xff]  ;;  %v19210_v15 = vld [vmem:[#allocation3 + $0x758] ss:$36 sps:$4 sm:$0xff]   ;;  %v18113_v8 = vpack.c.bf16 %v10003_v30, %v10003_v30  ;;  %9557 = vst [vmem:[#allocation3 + $0x4d8] sm:$0xf] %v17987_v6  ;;  %v13839_v56 = vpop.f32.mrf.mxu0 }
 0x418   :  { %v18051_v48 = vpack.c.bf16 %v9621_v31, %v9621_v31  ;;  %v10004_v5 = vld [vmem:[#allocation2 + $0x1e8] sm:$0xff]  ;;  %9939 = vst [vmem:[#allocation3 + $0x494] sm:$0xf] %v18049_v38  ;;  %v18052_v0 = vpack.c.bf16 %v9622_v52, %v9622_v52  ;;  %v9239_v61 = vld [vmem:[#allocation2 + $0x1f9] sm:$0xff]  ;;  %10707 = vst [vmem:[#allocation3 + $0x49c] sm:$0xf] %v17987_v6  ;;  %v13552_v52 = vadd.f32 %v21017_v40, %v21033_v20 }
 0x419   :  { %v19217_v49 = vld [vmem:[#allocation3 + $0x7e4] ss:$36 sps:$4 sm:$0xff]   ;;  %v18114_v23 = vpack.c.bf16 %v10004_v5, %v10004_v5  ;;  %v9623_v41 = vld [vmem:[#allocation2 + $0x1fa] sm:$0xff]  ;;  %v13553_v60 = vpop.f32.mrf.mxu1  ;;  %9558 = vst [vmem:[#allocation3 + $0x4fc] sm:$0xf] %v17988_v9  ;;  %v17989_v63 = vpack.c.bf16 %v9239_v61, %v9239_v61  ;;  %v9241_v58 = vld [vmem:[#allocation2 + $0x211] sm:$0xff]  ;;  %v13840_v53 = vpop.f32.mrf.mxu0 }
 0x41a   :  { %v9240_v21 = vld [vmem:[#allocation2 + $0x201] sm:$0xff]  ;;  %9941 = vst [vmem:[#allocation3 + $0x4dc] sm:$0xf] %v18051_v48  ;;  %10708 = vst [vmem:[#allocation3 + $0x4c0] sm:$0xf] %v17988_v9  ;;  %v18053_v22 = vpack.c.bf16 %v9623_v41, %v9623_v41  ;;  %v10005_v42 = vld [vmem:[#allocation2 + $0x1f8] sm:$0xff]  ;;  %v17991_v55 = vpack.c.bf16 %v9241_v58, %v9241_v58 }
 0x41b   :  { %13739 = vmatmul.mubr.bf16.gmra.mxu1 %v19201_v1  ;;  %v19220_v35 = vld [vmem:[#allocation3 + $0x7a4] ss:$36 sps:$4 sm:$0xff]   ;;  %v17990_v43 = vpack.c.bf16 %v9240_v21, %v9240_v21  ;;  %9942 = vst [vmem:[#allocation3 + $0x500] sm:$0xf] %v18052_v0  ;;  %10323 = vst [vmem:[#allocation3 + $0x498] sm:$0xf] %v18113_v8  ;;  %v18115_v47 = vpack.c.bf16 %v10005_v42, %v10005_v42  ;;  %v21039_v18 = vpop.f32.mrf.mxu1  ;;  %v18055_v1 = vpack.c.bf16 %v9625_v3, %v9625_v3  ;;  %v13842_v21 = vpop.f32.mrf.mxu0 }
 0x41c   :  { %14020 = vmatmul.mubr.bf16.gmra.mxu0 %v19204_v62  ;;  %13746 = vmatprep.mubr.bf16.mxu1 %v19209_v51  ;;  %v9624_v4 = vld [vmem:[#allocation2 + $0x202] sm:$0xff]  ;;  %10324 = vst [vmem:[#allocation3 + $0x4bc] sm:$0xf] %v18114_v23  ;;  %v9242_v57 = vld [vmem:[#allocation2 + $0x219] sm:$0xff]  ;;  %9559 = vst [vmem:[#allocation3 + $0x520] sm:$0xf] %v17989_v63  ;;  %v21045_v23 = vadd.f32 %v13840_v53, %v13552_v52  ;;  %v13557_v60 = vadd.f32 %v21017_v40, %v21039_v18 }
 0x41d   :  { %14027 = vmatprep.mubr.bf16.mxu0 %v19212_v39  ;;  %v10006_v24 = vld [vmem:[#allocation2 + $0x200] sm:$0xff]  ;;  %v18054_v32 = vpack.c.bf16 %v9624_v4, %v9624_v4  ;;  %9560 = vst [vmem:[#allocation3 + $0x544] sm:$0xf] %v17990_v43  ;;  %9943 = vst [vmem:[#allocation3 + $0x524] sm:$0xf] %v18053_v22  ;;  %v17992_v46 = vpack.c.bf16 %v9242_v57, %v9242_v57  ;;  %v10007_v34 = vld [vmem:[#allocation2 + $0x210] sm:$0xff]  ;;  %v13558_v27 = vpop.f32.mrf.mxu1 }
 0x41e   :  { %v18116_v2 = vpack.c.bf16 %v10006_v24, %v10006_v24  ;;  %10709 = vst [vmem:[#allocation3 + $0x4e4] sm:$0xf] %v17989_v63  ;;  %10710 = vst [vmem:[#allocation3 + $0x508] sm:$0xf] %v17990_v43  ;;  %v9626_v37 = vld [vmem:[#allocation2 + $0x21a] sm:$0xff]  ;;  %v18117_v51 = vpack.c.bf16 %v10007_v34, %v10007_v34  ;;  %v9243_v59 = vld [vmem:[#allocation2 + $0x229] sm:$0xff]  ;;  %v13845_v43 = vpop.f32.mrf.mxu0 }
 0x41f   :  { %v10008_v62 = vld [vmem:[#allocation2 + $0x218] sm:$0xff]  ;;  %9944 = vst [vmem:[#allocation3 + $0x548] sm:$0xf] %v18054_v32  ;;  %10325 = vst [vmem:[#allocation3 + $0x4e0] sm:$0xf] %v18115_v47  ;;  %v18056_v11 = vpack.c.bf16 %v9626_v37, %v9626_v37  ;;  %v9627_v39 = vld [vmem:[#allocation2 + $0x22a] sm:$0xff]  ;;  %v17993_v16 = vpack.c.bf16 %v9243_v59, %v9243_v59  ;;  %v13559_v48 = vpop.f32.mrf.mxu1  ;;  %v21049_v4 = vadd.f32 %v13845_v43, %v13557_v60 }
 0x420   :  { %10326 = vst [vmem:[#allocation3 + $0x504] sm:$0xf] %v18116_v2  ;;  %v9244_v54 = vld [vmem:[#allocation2 + $0x231] sm:$0xff]  ;;  %9561 = vst [vmem:[#allocation3 + $0x568] sm:$0xf] %v17991_v55  ;;  %v18118_v7 = vpack.c.bf16 %v10008_v62, %v10008_v62  ;;  %v10009_v17 = vld [vmem:[#allocation2 + $0x228] sm:$0xff]  ;;  %v18057_v50 = vpack.c.bf16 %v9627_v39, %v9627_v39  ;;  %v13847_v42 = vpop.f32.mrf.mxu0  ;;  %v13560_v24 = vadd.f32 %v21017_v40, %v13559_v48 }
 0x421   :  { %9562 = vst [vmem:[#allocation3 + $0x58c] sm:$0xf] %v17992_v46  ;;  %9945 = vst [vmem:[#allocation3 + $0x56c] sm:$0xf] %v18055_v1  ;;  %v17994_v28 = vpack.c.bf16 %v9244_v54, %v9244_v54  ;;  %v9628_v29 = vld [vmem:[#allocation2 + $0x232] sm:$0xff]  ;;  %v18119_v31 = vpack.c.bf16 %v10009_v17, %v10009_v17  ;;  %v9246_v6 = vld [vmem:[#allocation2 + $0x249] sm:$0xff]  ;;  %v13561_v20 = vpop.f32.mrf.mxu1 }
 0x422   :  { %10711 = vst [vmem:[#allocation3 + $0x52c] sm:$0xf] %v17991_v55  ;;  %10712 = vst [vmem:[#allocation3 + $0x550] sm:$0xf] %v17992_v46  ;;  %v10010_v38 = vld [vmem:[#allocation2 + $0x230] sm:$0xff]  ;;  %v18058_v36 = vpack.c.bf16 %v9628_v29, %v9628_v29  ;;  %v9629_v9 = vld [vmem:[#allocation2 + $0x242] sm:$0xff]  ;;  %v17996_v5 = vpack.c.bf16 %v9246_v6, %v9246_v6  ;;  %v13848_v47 = vpop.f32.mrf.mxu0 }
 0x423   :  { %13747 = vmatmul.mubr.bf16.gmra.mxu1 %v19207_v14  ;;  %9946 = vst [vmem:[#allocation3 + $0x590] sm:$0xf] %v18056_v11  ;;  %10327 = vst [vmem:[#allocation3 + $0x528] sm:$0xf] %v18117_v51  ;;  %v18120_v44 = vpack.c.bf16 %v10010_v38, %v10010_v38  ;;  %v9245_v14 = vld [vmem:[#allocation2 + $0x241] sm:$0xff]  ;;  %v21052_v58 = vadd.f32 %v13848_v47, %v13560_v24  ;;  %v9247_v11 = vld [vmem:[#allocation2 + $0x259] sm:$0xff] }
 0x424   :  { %14028 = vmatmul.mubr.bf16.gmra.mxu0 %v19210_v15  ;;  %13754 = vmatprep.mubr.bf16.mxu1 %v19217_v49  ;;  %10328 = vst [vmem:[#allocation3 + $0x54c] sm:$0xf] %v18118_v7  ;;  %9563 = vst [vmem:[#allocation3 + $0x5b0] sm:$0xf] %v17993_v16  ;;  %v17995_v30 = vpack.c.bf16 %v9245_v14, %v9245_v14  ;;  %v18059_v15 = vpack.c.bf16 %v9629_v9, %v9629_v9  ;;  %v9630_v49 = vld [vmem:[#allocation2 + $0x24a] sm:$0xff]  ;;  %v13850_v3 = vpop.f32.mrf.mxu0  ;;  %v10011_v62 = vld [vmem:[#allocation2 + $0x240] sm:$0xff] }
 0x425   :  { %14035 = vmatprep.mubr.bf16.mxu0 %v19220_v35  ;;  %9564 = vst [vmem:[#allocation3 + $0x5d4] sm:$0xf] %v17994_v28  ;;  %10713 = vst [vmem:[#allocation3 + $0x574] sm:$0xf] %v17993_v16  ;;  %v19215_v0 = vld [vmem:[#allocation3 + $0x7e0] ss:$36 sps:$4 sm:$0xff]   ;;  %v18060_v61 = vpack.c.bf16 %v9630_v49, %v9630_v49  ;;  %v13564_v35 = vpop.f32.mrf.mxu1  ;;  %v18121_v59 = vpack.c.bf16 %v10011_v62, %v10011_v62  ;;  %v17997_v27 = vpack.c.bf16 %v9247_v11, %v9247_v11 }
 0x426   :  { %10714 = vst [vmem:[#allocation3 + $0x598] sm:$0xf] %v17994_v28  ;;  %9947 = vst [vmem:[#allocation3 + $0x5b4] sm:$0xf] %v18057_v50  ;;  %v19218_v8 = vld [vmem:[#allocation3 + $0x7a0] ss:$36 sps:$4 sm:$0xff]   ;;  %v13565_v18 = vadd.f32 %v21017_v40, %v13564_v35  ;;  %v13853_v37 = vpop.f32.mrf.mxu0 }
 0x427   :  { %9948 = vst [vmem:[#allocation3 + $0x5d8] sm:$0xf] %v18058_v36  ;;  %10329 = vst [vmem:[#allocation3 + $0x570] sm:$0xf] %v18119_v31  ;;  %v19225_v41 = vld [vmem:[#allocation3 + $0x82c] ss:$36 sps:$4 sm:$0xff]   ;;  %v13566_v22 = vpop.f32.mrf.mxu1 }
 0x428   :  { %10330 = vst [vmem:[#allocation3 + $0x594] sm:$0xf] %v18120_v44  ;;  %9565 = vst [vmem:[#allocation3 + $0x5f8] sm:$0xf] %v17995_v30  ;;  %v19228_v63 = vld [vmem:[#allocation3 + $0x7ec] ss:$36 sps:$4 sm:$0xff]   ;;  %v21057_v1 = vadd.f32 %v13853_v37, %v13565_v18  ;;  %v13855_v51 = vpop.f32.mrf.mxu0 }
 0x429   :  { %9566 = vst [vmem:[#allocation3 + $0x61c] sm:$0xf] %v17996_v5  ;;  %9949 = vst [vmem:[#allocation3 + $0x5fc] sm:$0xf] %v18059_v15  ;;  %v13567_v45 = vpop.f32.mrf.mxu1  ;;  %v19223_v32 = vld [vmem:[#allocation3 + $0x828] ss:$36 sps:$4 sm:$0xff]  }
 0x42a   :  { %10715 = vst [vmem:[#allocation3 + $0x5bc] sm:$0xf] %v17995_v30  ;;  %10716 = vst [vmem:[#allocation3 + $0x5e0] sm:$0xf] %v17996_v5  ;;  %v19226_v2 = vld [vmem:[#allocation3 + $0x7e8] ss:$36 sps:$4 sm:$0xff]   ;;  %v13568_v28 = vadd.f32 %v21017_v40, %v13567_v45  ;;  %v13856_v6 = vpop.f32.mrf.mxu0 }
 0x42b   :  { %13755 = vmatmul.mubr.bf16.gmra.mxu1 %v19215_v0  ;;  %9950 = vst [vmem:[#allocation3 + $0x620] sm:$0xf] %v18060_v61  ;;  %v13569_v57 = vpop.f32.mrf.mxu1  ;;  %v19234_v12 = vld [vmem:[#allocation3 + $0x874] ss:$36 sps:$4 sm:$0xff]   ;;  %v10012_v33 = vld [vmem:[#allocation2 + $0x248] sm:$0xff]  ;;  %v10014_v31 = vld [vmem:[#allocation2 + $0x260] sm:$0xff] }
 0x42c   :  { %14036 = vmatmul.mubr.bf16.gmra.mxu0 %v19218_v8  ;;  %13762 = vmatprep.mubr.bf16.mxu1 %v19225_v41  ;;  %v19237_v46 = vld [vmem:[#allocation3 + $0x834] ss:$36 sps:$4 sm:$0xff]   ;;  %v18122_v54 = vpack.c.bf16 %v10012_v33, %v10012_v33  ;;  %v9248_v39 = vld [vmem:[#allocation2 + $0x261] sm:$0xff]  ;;  %10331 = vst [vmem:[#allocation3 + $0x5b8] sm:$0xf] %v18121_v59  ;;  %v18124_v48 = vpack.c.bf16 %v10014_v31, %v10014_v31  ;;  %v9251_v35 = vld [vmem:[#allocation2 + $0x289] sm:$0xff] }
 0x42d   :  { %14043 = vmatprep.mubr.bf16.mxu0 %v19228_v63  ;;  %v21055_v55 = vpop.f32.mrf.mxu1  ;;  %v9631_v7 = vld [vmem:[#allocation2 + $0x25a] sm:$0xff]  ;;  %v9632_v16 = vld [vmem:[#allocation2 + $0x262] sm:$0xff]  ;;  %v19232_v29 = vld [vmem:[#allocation3 + $0x870] ss:$36 sps:$4 sm:$0xff]   ;;  %v17998_v38 = vpack.c.bf16 %v9248_v39, %v9248_v39  ;;  %9567 = vst [vmem:[#allocation3 + $0x640] sm:$0xf] %v17997_v27  ;;  %v21062_v49 = vadd.f32 %v13856_v6, %v13568_v28  ;;  %v13858_v63 = vpop.f32.mrf.mxu0  ;;  %v18001_v24 = vpack.c.bf16 %v9251_v35, %v9251_v35 }
 0x42e   :  { %v18061_v56 = vpack.c.bf16 %v9631_v7, %v9631_v7  ;;  %v18062_v50 = vpack.c.bf16 %v9632_v16, %v9632_v16  ;;  %v10013_v36 = vld [vmem:[#allocation2 + $0x258] sm:$0xff]  ;;  %v19235_v14 = vld [vmem:[#allocation3 + $0x830] ss:$36 sps:$4 sm:$0xff]   ;;  %10332 = vst [vmem:[#allocation3 + $0x5dc] sm:$0xf] %v18122_v54  ;;  %v13573_v47 = vadd.f32 %v21017_v40, %v21055_v55  ;;  %v10017_v18 = vld [vmem:[#allocation2 + $0x288] sm:$0xff] }
 0x42f   :  { %v13574_v34 = vpop.f32.mrf.mxu1  ;;  %v9249_v44 = vld [vmem:[#allocation2 + $0x271] sm:$0xff]  ;;  %v19242_v9 = vld [vmem:[#allocation3 + $0x8bc] ss:$36 sps:$4 sm:$0xff]   ;;  %v18123_v52 = vpack.c.bf16 %v10013_v36, %v10013_v36  ;;  %10717 = vst [vmem:[#allocation3 + $0x604] sm:$0xf] %v17997_v27  ;;  %v18127_v55 = vpack.c.bf16 %v10017_v18, %v10017_v18  ;;  %v9254_v33 = vld [vmem:[#allocation2 + $0x2a9] sm:$0xff] }
 0x430   :  { %v9250_v30 = vld [vmem:[#allocation2 + $0x279] sm:$0xff]  ;;  %v17999_v5 = vpack.c.bf16 %v9249_v44, %v9249_v44  ;;  %9568 = vst [vmem:[#allocation3 + $0x664] sm:$0xf] %v17998_v38  ;;  %9951 = vst [vmem:[#allocation3 + $0x644] sm:$0xf] %v18061_v56  ;;  %v10015_v41 = vld [vmem:[#allocation2 + $0x270] sm:$0xff]  ;;  %v13861_v34 = vpop.f32.mrf.mxu0  ;;  %v18004_v27 = vpack.c.bf16 %v9254_v33, %v9254_v33 }
 0x431   :  { %v21060_v17 = vpop.f32.mrf.mxu1  ;;  %v9633_v15 = vld [vmem:[#allocation2 + $0x272] sm:$0xff]  ;;  %v9634_v53 = vld [vmem:[#allocation2 + $0x27a] sm:$0xff]  ;;  %9952 = vst [vmem:[#allocation3 + $0x668] sm:$0xf] %v18062_v50  ;;  %10718 = vst [vmem:[#allocation3 + $0x628] sm:$0xf] %v17998_v38  ;;  %v18000_v20 = vpack.c.bf16 %v9250_v30, %v9250_v30  ;;  %v18125_v43 = vpack.c.bf16 %v10015_v41, %v10015_v41  ;;  %v21068_v59 = vadd.f32 %v13861_v34, %v13573_v47 }
 0x432   :  { %v19245_v8 = vld [vmem:[#allocation3 + $0x87c] ss:$36 sps:$4 sm:$0xff]   ;;  %v18063_v61 = vpack.c.bf16 %v9633_v15, %v9633_v15  ;;  %v18064_v21 = vpack.c.bf16 %v9634_v53, %v9634_v53  ;;  %10333 = vst [vmem:[#allocation3 + $0x600] sm:$0xf] %v18123_v52  ;;  %10334 = vst [vmem:[#allocation3 + $0x624] sm:$0xf] %v18124_v48  ;;  %v13863_v38 = vpop.f32.mrf.mxu0 }
 0x433   :  { %13763 = vmatmul.mubr.bf16.gmra.mxu1 %v19223_v32  ;;  %v13577_v0 = vpop.f32.mrf.mxu1  ;;  %v10016_v60 = vld [vmem:[#allocation2 + $0x278] sm:$0xff]  ;;  %9569 = vst [vmem:[#allocation3 + $0x688] sm:$0xf] %v17999_v5  ;;  %10719 = vst [vmem:[#allocation3 + $0x64c] sm:$0xf] %v17999_v5  ;;  %v9635_v45 = vld [vmem:[#allocation2 + $0x28a] sm:$0xff] }
 0x434   :  { %14044 = vmatmul.mubr.bf16.gmra.mxu0 %v19226_v2  ;;  %13770 = vmatprep.mubr.bf16.mxu1 %v19234_v12  ;;  %v18126_v22 = vpack.c.bf16 %v10016_v60, %v10016_v60  ;;  %v9252_v42 = vld [vmem:[#allocation2 + $0x291] sm:$0xff]  ;;  %9570 = vst [vmem:[#allocation3 + $0x6ac] sm:$0xf] %v18000_v20  ;;  %9953 = vst [vmem:[#allocation3 + $0x68c] sm:$0xf] %v18063_v61  ;;  %v18065_v3 = vpack.c.bf16 %v9635_v45, %v9635_v45  ;;  %v9253_v37 = vld [vmem:[#allocation2 + $0x2a1] sm:$0xff]  ;;  %v13864_v15 = vpop.f32.mrf.mxu0 }
 0x435   :  { %14051 = vmatprep.mubr.bf16.mxu0 %v19237_v46  ;;  %v9636_v32 = vld [vmem:[#allocation2 + $0x292] sm:$0xff]  ;;  %v21066_v2 = vpop.f32.mrf.mxu1  ;;  %9954 = vst [vmem:[#allocation3 + $0x6b0] sm:$0xf] %v18064_v21  ;;  %10720 = vst [vmem:[#allocation3 + $0x670] sm:$0xf] %v18000_v20  ;;  %v18002_v57 = vpack.c.bf16 %v9252_v42, %v9252_v42  ;;  %v9637_v11 = vld [vmem:[#allocation2 + $0x2a2] sm:$0xff]  ;;  %v18003_v39 = vpack.c.bf16 %v9253_v37, %v9253_v37 }
 0x436   :  { %v18066_v12 = vpack.c.bf16 %v9636_v32, %v9636_v32  ;;  %v10018_v46 = vld [vmem:[#allocation2 + $0x290] sm:$0xff]  ;;  %10335 = vst [vmem:[#allocation3 + $0x648] sm:$0xf] %v18125_v43  ;;  %10336 = vst [vmem:[#allocation3 + $0x66c] sm:$0xf] %v18126_v22  ;;  %v18067_v7 = vpack.c.bf16 %v9637_v11, %v9637_v11  ;;  %v10019_v16 = vld [vmem:[#allocation2 + $0x2a0] sm:$0xff]  ;;  %v13866_v20 = vpop.f32.mrf.mxu0  ;;  %v13581_v21 = vadd.f32 %v21017_v40, %v21066_v2 }
 0x437   :  { %9571 = vst [vmem:[#allocation3 + $0x6d0] sm:$0xf] %v18001_v24  ;;  %v18128_v62 = vpack.c.bf16 %v10018_v46, %v10018_v46  ;;  %10721 = vst [vmem:[#allocation3 + $0x694] sm:$0xf] %v18001_v24  ;;  %v9638_v51 = vld [vmem:[#allocation2 + $0x2aa] sm:$0xff]  ;;  %v13582_v54 = vpop.f32.mrf.mxu1  ;;  %v18129_v50 = vpack.c.bf16 %v10019_v16, %v10019_v16  ;;  %v9256_v31 = vld [vmem:[#allocation2 + $0x2c1] sm:$0xff] }
 0x438   :  { %9572 = vst [vmem:[#allocation3 + $0x6f4] sm:$0xf] %v18002_v57  ;;  %9955 = vst [vmem:[#allocation3 + $0x6d4] sm:$0xf] %v18065_v3  ;;  %v10020_v28 = vld [vmem:[#allocation2 + $0x2a8] sm:$0xff]  ;;  %v18068_v56 = vpack.c.bf16 %v9638_v51, %v9638_v51  ;;  %v18006_v48 = vpack.c.bf16 %v9256_v31, %v9256_v31  ;;  %v13869_v35 = vpop.f32.mrf.mxu0  ;;  %v19284_v18 = vld [vmem:[%s21679_s3 + $0x230] sm:$0xff]  }
 0x439   :  { %9956 = vst [vmem:[#allocation3 + $0x6f8] sm:$0xf] %v18066_v12  ;;  %10722 = vst [vmem:[#allocation3 + $0x6b8] sm:$0xf] %v18002_v57  ;;  %v18130_v36 = vpack.c.bf16 %v10020_v28, %v10020_v28  ;;  %v9640_v6 = vld [vmem:[#allocation2 + $0x2c2] sm:$0xff]  ;;  %v13583_v52 = vpop.f32.mrf.mxu1  ;;  %v21076_v63 = vadd.f32 %v13869_v35, %v13581_v21  ;;  %v19494_v33 = vld [vmem:[%s21679_s3 + $0x238] sm:$0xff]  }
 0x43a   :  { %10337 = vst [vmem:[#allocation3 + $0x690] sm:$0xf] %v18127_v55  ;;  %10338 = vst [vmem:[#allocation3 + $0x6b4] sm:$0xf] %v18128_v62  ;;  %v18070_v5 = vpack.c.bf16 %v9640_v6, %v9640_v6  ;;  %v19240_v53 = vld [vmem:[#allocation3 + $0x8b8] ss:$36 sps:$4 sm:$0xff]   ;;  %v13871_v22 = vpop.f32.mrf.mxu0  ;;  %v13584_v42 = vadd.f32 %v21017_v40, %v13583_v52 }
 0x43b   :  { %13771 = vmatmul.mubr.bf16.gmra.mxu1 %v19232_v29  ;;  %v9255_v29 = vld [vmem:[#allocation2 + $0x2b9] sm:$0xff]  ;;  %9573 = vst [vmem:[#allocation3 + $0x718] sm:$0xf] %v18003_v39  ;;  %9574 = vst [vmem:[#allocation3 + $0x73c] sm:$0xf] %v18004_v27  ;;  %v21095_v51 = vld [vmem:[%s21679_s3 + $0x228] sm:$0xff]  }
 0x43c   :  { %14052 = vmatmul.mubr.bf16.gmra.mxu0 %v19235_v14  ;;  %13778 = vmatprep.mubr.bf16.mxu1 %v19242_v9  ;;  %v18005_v44 = vpack.c.bf16 %v9255_v29, %v9255_v29  ;;  %v9639_v14 = vld [vmem:[#allocation2 + $0x2ba] sm:$0xff]  ;;  %v13576_v9 = vadd.f32 %v21017_v40, %v21060_v17  ;;  %9957 = vst [vmem:[#allocation3 + $0x71c] sm:$0xf] %v18067_v7  ;;  %10723 = vst [vmem:[#allocation3 + $0x6dc] sm:$0xf] %v18003_v39  ;;  %v13872_v45 = vpop.f32.mrf.mxu0  ;;  %v9257_v28 = vld [vmem:[#allocation2 + $0x2d1] sm:$0xff] }
 0x43d   :  { %14059 = vmatprep.mubr.bf16.mxu0 %v19245_v8  ;;  %10724 = vst [vmem:[#allocation3 + $0x700] sm:$0xf] %v18004_v27  ;;  %v18069_v30 = vpack.c.bf16 %v9639_v14, %v9639_v14  ;;  %9958 = vst [vmem:[#allocation3 + $0x740] sm:$0xf] %v18068_v56  ;;  %v13585_v8 = vpop.f32.mrf.mxu1  ;;  %v19243_v17 = vld [vmem:[#allocation3 + $0x878] ss:$36 sps:$4 sm:$0xff]   ;;  %v21079_v47 = vadd.f32 %v13872_v45, %v13584_v42  ;;  %v18007_v31 = vpack.c.bf16 %v9257_v28, %v9257_v28 }
 0x43e   :  { %10339 = vst [vmem:[#allocation3 + $0x6d8] sm:$0xf] %v18129_v50  ;;  %10340 = vst [vmem:[#allocation3 + $0x6fc] sm:$0xf] %v18130_v36  ;;  %v21072_v0 = vadd.f32 %v13864_v15, %v13576_v9  ;;  %v19254_v61 = vld [vmem:[#allocation3 + $0x14] ss:$36 sps:$4 sm:$0xff]   ;;  %v13874_v12 = vpop.f32.mrf.mxu0 }
 0x43f   :  { %9575 = vst [vmem:[#allocation3 + $0x760] sm:$0xf] %v18005_v44  ;;  %10725 = vst [vmem:[#allocation3 + $0x724] sm:$0xf] %v18005_v44  ;;  %v13588_v41 = vpop.f32.mrf.mxu1  ;;  %v19251_v60 = vld [vmem:[#allocation3 + $0x8c4] ss:$36 sps:$4 sm:$0xff]  }
 0x440   :  { %9576 = vst [vmem:[#allocation3 + $0x784] sm:$0xf] %v18006_v48  ;;  %9959 = vst [vmem:[#allocation3 + $0x764] sm:$0xf] %v18069_v30  ;;  %v19252_v32 = vld [vmem:[#allocation3 + $0x10] ss:$36 sps:$4 sm:$0xff]   ;;  %v13589_v46 = vadd.f32 %v21017_v40, %v13588_v41 }
 0x441   :  { %9960 = vst [vmem:[#allocation3 + $0x788] sm:$0xf] %v18070_v5  ;;  %10726 = vst [vmem:[#allocation3 + $0x748] sm:$0xf] %v18006_v48  ;;  %v13590_v43 = vpop.f32.mrf.mxu1  ;;  %v19260_v2 = vld [vmem:[#allocation3 + $0x5c] ss:$36 sps:$4 sm:$0xff]  }
 0x442   :  { %v19249_v3 = vld [vmem:[#allocation3 + $0x8c0] ss:$36 sps:$4 sm:$0xff]   ;;  %v10021_v54 = vld [vmem:[#allocation2 + $0x2b8] sm:$0xff]  ;;  %v10023_v9 = vld [vmem:[#allocation2 + $0x2d0] sm:$0xff]  ;;  %9577 = vst [vmem:[#allocation3 + $0x7a8] sm:$0xf] %v18007_v31 }
 0x443   :  { %13779 = vmatmul.mubr.bf16.gmra.mxu1 %v19240_v53  ;;  %v13591_v24 = vpop.f32.mrf.mxu1  ;;  %v19264_v34 = vld [vmem:[#allocation3 + $0x1c] ss:$36 sps:$4 sm:$0xff]   ;;  %v18131_v7 = vpack.c.bf16 %v10021_v54, %v10021_v54  ;;  %v9641_v38 = vld [vmem:[#allocation2 + $0x2d2] sm:$0xff]  ;;  %v19268_v5 = vld [vmem:[#allocation3 + $0xa4] ss:$36 sps:$4 sm:$0xff]   ;;  %v18133_v8 = vpack.c.bf16 %v10023_v9, %v10023_v9 }
 0x444   :  { %14060 = vmatmul.mubr.bf16.gmra.mxu0 %v19243_v17  ;;  %14108 = vmatprep.mubr.bf16.mxu1 %v19254_v61  ;;  %v13877_v55 = vpop.f32.mrf.mxu0  ;;  %v10022_v39 = vld [vmem:[#allocation2 + $0x2c0] sm:$0xff]  ;;  %v13592_v56 = vadd.f32 %v21017_v40, %v13591_v24  ;;  %v19258_v50 = vld [vmem:[#allocation3 + $0x58] ss:$36 sps:$4 sm:$0xff]   ;;  %v18071_v6 = vpack.c.bf16 %v9641_v38, %v9641_v38  ;;  %v9259_v20 = vld [vmem:[#allocation2 + $0x2e9] sm:$0xff]  ;;  %10727 = vst [vmem:[#allocation3 + $0x76c] sm:$0xf] %v18007_v31 }
 0x445   :  { %14067 = vmatprep.mubr.bf16.mxu0 %v19251_v60  ;;  %v13593_v57 = vpop.f32.mrf.mxu1  ;;  %v21087_v62 = vadd.f32 %v13877_v55, %v13589_v46  ;;  %v18132_v16 = vpack.c.bf16 %v10022_v39, %v10022_v39  ;;  %v9258_v29 = vld [vmem:[#allocation2 + $0x2d9] sm:$0xff]  ;;  %10341 = vst [vmem:[#allocation3 + $0x720] sm:$0xf] %v18131_v7  ;;  %v9260_v61 = vld [vmem:[#allocation2 + $0x2f1] sm:$0xff]  ;;  %v19271_v35 = vld [vmem:[#allocation3 + $0x64] ss:$36 sps:$4 sm:$0xff]   ;;  %v18009_v43 = vpack.c.bf16 %v9259_v20, %v9259_v20 }
 0x446   :  { %v13879_v27 = vpop.f32.mrf.mxu0  ;;  %v18008_v44 = vpack.c.bf16 %v9258_v29, %v9258_v29  ;;  %v9642_v14 = vld [vmem:[#allocation2 + $0x2da] sm:$0xff]  ;;  %v9643_v21 = vld [vmem:[#allocation2 + $0x2ea] sm:$0xff]  ;;  %9961 = vst [vmem:[#allocation3 + $0x7ac] sm:$0xf] %v18071_v6  ;;  %v18010_v22 = vpack.c.bf16 %v9260_v61, %v9260_v61  ;;  %v9644_v42 = vld [vmem:[#allocation2 + $0x2f2] sm:$0xff] }
 0x447   :  { %v21085_v37 = vpop.f32.mrf.mxu1  ;;  %v10024_v52 = vld [vmem:[#allocation2 + $0x2d8] sm:$0xff]  ;;  %v21101_v15 = vld [vmem:[%s21679_s3 + $0x220] sm:$0xff]   ;;  %10342 = vst [vmem:[#allocation3 + $0x744] sm:$0xf] %v18132_v16  ;;  %v18072_v53 = vpack.c.bf16 %v9642_v14, %v9642_v14  ;;  %v18073_v24 = vpack.c.bf16 %v9643_v21, %v9643_v21  ;;  %v10025_v45 = vld [vmem:[#allocation2 + $0x2e8] sm:$0xff] }
 0x448   :  { %v19262_v48 = vld [vmem:[#allocation3 + $0x18] ss:$36 sps:$4 sm:$0xff]   ;;  %v13880_v30 = vpop.f32.mrf.mxu0  ;;  %v18134_v17 = vpack.c.bf16 %v10024_v52, %v10024_v52  ;;  %9578 = vst [vmem:[#allocation3 + $0x7cc] sm:$0xf] %v18008_v44  ;;  %10728 = vst [vmem:[#allocation3 + $0x790] sm:$0xf] %v18008_v44  ;;  %v13597_v55 = vadd.f32 %v21017_v40, %v21085_v37 }
 0x449   :  { %v13598_v11 = vpop.f32.mrf.mxu1  ;;  %v21103_v41 = vadd.f32 %v13880_v30, %v13592_v56  ;;  %9962 = vst [vmem:[#allocation3 + $0x7d0] sm:$0xf] %v18072_v53  ;;  %10343 = vst [vmem:[#allocation3 + $0x768] sm:$0xf] %v18133_v8  ;;  %v9262_v46 = vld [vmem:[#allocation2 + $0x309] sm:$0xff]  ;;  %v10027_v7 = vld [vmem:[#allocation2 + $0x300] sm:$0xff] }
 0x44a   :  { %v13882_v57 = vpop.f32.mrf.mxu0  ;;  %10344 = vst [vmem:[#allocation3 + $0x78c] sm:$0xf] %v18134_v17  ;;  %9579 = vst [vmem:[#allocation3 + $0x7f0] sm:$0xf] %v18009_v43  ;;  %v18012_v54 = vpack.c.bf16 %v9262_v46, %v9262_v46  ;;  %v9646_v39 = vld [vmem:[#allocation2 + $0x30a] sm:$0xff]  ;;  %v21114_v37 = vld [vmem:[%s21679_s3 + $0x218] sm:$0xff]   ;;  %v18137_v56 = vpack.c.bf16 %v10027_v7, %v10027_v7 }
 0x44b   :  { %14109 = vmatmul.mubr.bf16.vlgmr.msra.gmra.mxu1 %v19252_v32  ;;  %v13599_v36 = vpop.f32.mrf.mxu1  ;;  %v10026_v32 = vld [vmem:[#allocation2 + $0x2f0] sm:$0xff]  ;;  %9580 = vst [vmem:[#allocation3 + $0x814] sm:$0xf] %v18010_v22  ;;  %9963 = vst [vmem:[#allocation3 + $0x7f4] sm:$0xf] %v18073_v24  ;;  %v10028_v16 = vld [vmem:[#allocation2 + $0x308] sm:$0xff]  ;;  %v18076_v38 = vpack.c.bf16 %v9646_v39, %v9646_v39 }
 0x44c   :  { %14068 = vmatmul.mubr.bf16.gmra.mxu0 %v19249_v3  ;;  %14116 = vmatprep.mubr.bf16.mxu1 %v19260_v2  ;;  %v18074_v2 = vpack.c.bf16 %v9644_v42, %v9644_v42  ;;  %v18135_v3 = vpack.c.bf16 %v10025_v45, %v10025_v45  ;;  %v18136_v12 = vpack.c.bf16 %v10026_v32, %v10026_v32  ;;  %v13885_v29 = vpop.f32.mrf.mxu0  ;;  %v9264_v31 = vld [vmem:[#allocation2 + $0x321] sm:$0xff]  ;;  %v10029_v52 = vld [vmem:[#allocation2 + $0x318] sm:$0xff]  ;;  %v21127_v46 = vld [vmem:[%s21680_s4] ss:$0 sm:$0xff] }
 0x44d   :  { %14397 = vmatprep.mubr.bf16.mxu0 %v19264_v34  ;;  %18434 = vmatpush3.bf16.msra.mxu1 %v19494_v33  ;;  %v13601_v60 = vpop.f32.mrf.mxu1  ;;  %v9645_v34 = vld [vmem:[#allocation2 + $0x302] sm:$0xff]  ;;  %10729 = vst [vmem:[#allocation3 + $0x7b4] sm:$0xf] %v18009_v43  ;;  %10730 = vst [vmem:[#allocation3 + $0x7d8] sm:$0xf] %v18010_v22  ;;  %v13600_v28 = vadd.f32 %v21017_v40, %v13599_v36  ;;  %v9647_v44 = vld [vmem:[#allocation2 + $0x31a] sm:$0xff]  ;;  %v21116_v14 = vadd.f32 %v13885_v29, %v13597_v55 }
 0x44e   :  { %18435 = vmatprep.subr.bf16.mxu1 %v19284_v18  ;;  %v18075_v27 = vpack.c.bf16 %v9645_v34, %v9645_v34  ;;  %9964 = vst [vmem:[#allocation3 + $0x818] sm:$0xf] %v18074_v2  ;;  %10345 = vst [vmem:[#allocation3 + $0x7b0] sm:$0xf] %v18135_v3  ;;  %v18138_v36 = vpack.c.bf16 %v10028_v16, %v10028_v16  ;;  %v9648_v9 = vld [vmem:[#allocation2 + $0x322] sm:$0xff]  ;;  %v13887_v30 = vpop.f32.mrf.mxu0  ;;  %v18077_v53 = vpack.c.bf16 %v9647_v44, %v9647_v44  ;;  %v9266_v20 = vld [vmem:[#allocation2 + $0x339] sm:$0xff] }
 0x44f   :  { %v21108_v33 = vpop.f32.mrf.mxu1  ;;  %10346 = vst [vmem:[#allocation3 + $0x7d4] sm:$0xf] %v18136_v12  ;;  %9582 = vst [vmem:[#allocation3 + $0x85c] sm:$0xf] %v18012_v54  ;;  %v18078_v8 = vpack.c.bf16 %v9648_v9, %v9648_v9  ;;  %v18139_v17 = vpack.c.bf16 %v10029_v52, %v10029_v52  ;;  %v9649_v61 = vld [vmem:[#allocation2 + $0x332] sm:$0xff]  ;;  %v18016_v43 = vpack.c.bf16 %v9266_v20, %v9266_v20  ;;  %v9650_v24 = vld [vmem:[#allocation2 + $0x33a] sm:$0xff] }
 0x450   :  { %9965 = vst [vmem:[#allocation3 + $0x83c] sm:$0xf] %v18075_v27  ;;  %10732 = vst [vmem:[#allocation3 + $0x820] sm:$0xf] %v18012_v54  ;;  %v18079_v22 = vpack.c.bf16 %v9649_v61, %v9649_v61  ;;  %v13888_v42 = vpop.f32.mrf.mxu0  ;;  %v19266_v45 = vld [vmem:[#allocation3 + $0xa0] ss:$36 sps:$4 sm:$0xff]   ;;  %v18080_v3 = vpack.c.bf16 %v9650_v24, %v9650_v24  ;;  %v13605_v34 = vadd.f32 %v21127_v46, %v21108_v33 }
 0x451   :  { %18436 = vmatpush3.bf16.msra.mxu1 %v19284_v18  ;;  %v9261_v18 = vld [vmem:[#allocation2 + $0x301] sm:$0xff]  ;;  %v13606_v40 = vpop.f32.mrf.mxu1  ;;  %9966 = vst [vmem:[#allocation3 + $0x860] sm:$0xf] %v18076_v38  ;;  %10347 = vst [vmem:[#allocation3 + $0x7f8] sm:$0xf] %v18137_v56  ;;  %v21120_v57 = vadd.f32 %v13888_v42, %v13600_v28  ;;  %v10741_v61 = vld [vmem:[#allocation2 + $0x4a] sm:$0xff] }
 0x452   :  { %18437 = vmatprep.subr.bf16.mxu1 %v21095_v51  ;;  %v18011_v11 = vpack.c.bf16 %v9261_v18, %v9261_v18  ;;  %10348 = vst [vmem:[#allocation3 + $0x81c] sm:$0xf] %v18138_v36  ;;  %9967 = vst [vmem:[#allocation3 + $0x884] sm:$0xf] %v18077_v53  ;;  %v19269_v32 = vld [vmem:[#allocation3 + $0x60] ss:$36 sps:$4 sm:$0xff]   ;;  %v13890_v12 = vpop.f32.mrf.mxu0  ;;  %v18211_v42 = vpack.c.bf16 %v10741_v61, %v10741_v61 }
 0x453   :  { %14117 = vmatmul.mubr.bf16.gmra.mxu1 %v19258_v50  ;;  %v9263_v50 = vld [vmem:[#allocation2 + $0x319] sm:$0xff]  ;;  %v13607_v21 = vpop.f32.mrf.mxu1  ;;  %9968 = vst [vmem:[#allocation3 + $0x8a8] sm:$0xf] %v18078_v8  ;;  %10349 = vst [vmem:[#allocation3 + $0x840] sm:$0xf] %v18139_v17 }
 0x454   :  { %14398 = vmatmul.mubr.bf16.vlgmr.msra.gmra.mxu0 %v19262_v48  ;;  %14124 = vmatprep.mubr.bf16.mxu1 %v19268_v5  ;;  %9581 = vst [vmem:[#allocation3 + $0x838] sm:$0xf] %v18011_v11  ;;  %10731 = vst [vmem:[#allocation3 + $0x7fc] sm:$0xf] %v18011_v11  ;;  %v18013_v6 = vpack.c.bf16 %v9263_v50, %v9263_v50  ;;  %v10030_v48 = vld [vmem:[#allocation2 + $0x320] sm:$0xff]  ;;  %v18014_v5 = vpack.c.bf16 %v9264_v31, %v9264_v31 }
 0x455   :  { %14405 = vmatprep.mubr.bf16.mxu0 %v19271_v35  ;;  %18438 = vmatpush3.bf16.msra.mxu1 %v21095_v51  ;;  %v9265_v51 = vld [vmem:[#allocation2 + $0x331] sm:$0xff]  ;;  %v18140_v60 = vpack.c.bf16 %v10030_v48, %v10030_v48  ;;  %v13609_v2 = vpop.f32.mrf.mxu1  ;;  %9586 = vst [vmem:[#allocation3 + $0x8ec] sm:$0xf] %v18016_v43  ;;  %9969 = vst [vmem:[#allocation3 + $0x8cc] sm:$0xf] %v18079_v22  ;;  %v13608_v7 = vadd.f32 %v21127_v46, %v13607_v21  ;;  %v10740_v53 = vld [vmem:[#allocation2 + $0x3a] sm:$0xff] }
 0x456   :  { %18439 = vmatprep.subr.bf16.mxu1 %v21101_v15  ;;  %9583 = vst [vmem:[#allocation3 + $0x880] sm:$0xf] %v18013_v6  ;;  %10733 = vst [vmem:[#allocation3 + $0x844] sm:$0xf] %v18013_v6  ;;  %v18015_v35 = vpack.c.bf16 %v9265_v51, %v9265_v51  ;;  %v19274_v18 = vld [vmem:[#allocation3 + $0xec] ss:$36 sps:$4 sm:$0xff]   ;;  %v18210_v20 = vpack.c.bf16 %v10740_v53, %v10740_v53 }
 0x457   :  { %9584 = vst [vmem:[#allocation3 + $0x8a4] sm:$0xf] %v18014_v5  ;;  %10734 = vst [vmem:[#allocation3 + $0x868] sm:$0xf] %v18014_v5  ;;  %v19277_v55 = vld [vmem:[#allocation3 + $0xac] ss:$36 sps:$4 sm:$0xff]   ;;  %v13893_v11 = vpop.f32.mrf.mxu0 }
 0x458   :  { %10350 = vst [vmem:[#allocation3 + $0x864] sm:$0xf] %v18140_v60  ;;  %9585 = vst [vmem:[#allocation3 + $0x8c8] sm:$0xf] %v18015_v35  ;;  %v21131_v54 = vadd.f32 %v13893_v11, %v13605_v34  ;;  %v19272_v29 = vld [vmem:[#allocation3 + $0xe8] ss:$36 sps:$4 sm:$0xff]  }
 0x459   :  { %18440 = vmatpush3.bf16.msra.mxu1 %v21101_v15  ;;  %10735 = vst [vmem:[#allocation3 + $0x88c] sm:$0xf] %v18015_v35  ;;  %10736 = vst [vmem:[#allocation3 + $0x8b0] sm:$0xf] %v18016_v43  ;;  %v13612_v15 = vpop.f32.mrf.mxu1  ;;  %v13895_v27 = vpop.f32.mrf.mxu0  ;;  %v19275_v33 = vld [vmem:[#allocation3 + $0xa8] ss:$36 sps:$4 sm:$0xff]  }
 0x45a   :  { %18441 = vmatprep.subr.bf16.mxu1 %v21114_v37  ;;  %9970 = vst [vmem:[#allocation3 + $0x8f0] sm:$0xf] %v18080_v3  ;;  %v19280_v31 = vld [vmem:[#allocation3 + $0x134] ss:$36 sps:$4 sm:$0xff]   ;;  %v13613_v44 = vadd.f32 %v21127_v46, %v13612_v15  ;;  %v10743_v60 = vld [vmem:[#allocation2 + $0x62] sm:$0xff] }
 0x45b   :  { %14125 = vmatmul.mubr.bf16.gmra.mxu1 %v19266_v45  ;;  %v13614_v39 = vpop.f32.mrf.mxu1  ;;  %v13896_v28 = vpop.f32.mrf.mxu0  ;;  %v19283_v36 = vld [vmem:[#allocation3 + $0xf4] ss:$36 sps:$4 sm:$0xff]   ;;  %v10744_v45 = vld [vmem:[#allocation2 + $0x6a] sm:$0xff]  ;;  %v10746_v3 = vld [vmem:[#allocation2 + $0x82] sm:$0xff]  ;;  %11060 = vst [vmem:[#allocation3 + $0x44] sm:$0xf] %v18210_v20 }
 0x45c   :  { %14406 = vmatmul.mubr.bf16.gmra.mxu0 %v19269_v32  ;;  %14132 = vmatprep.mubr.bf16.mxu1 %v19274_v18  ;;  %v21135_v38 = vadd.f32 %v13896_v28, %v13608_v7  ;;  %v10032_v48 = vld [vmem:[#allocation2 + $0x338] sm:$0xff]  ;;  %v19278_v43 = vld [vmem:[#allocation3 + $0x130] ss:$36 sps:$4 sm:$0xff]   ;;  %v18213_v32 = vpack.c.bf16 %v10743_v60, %v10743_v60  ;;  %v18214_v15 = vpack.c.bf16 %v10744_v45, %v10744_v45  ;;  %v10759_v45 = vld [vmem:[#allocation2 + $0x122] sm:$0xff] }
 0x45d   :  { %14413 = vmatprep.mubr.bf16.mxu0 %v19277_v55  ;;  %18442 = vmatpush3.bf16.msra.mxu1 %v21114_v37  ;;  %v13615_v16 = vpop.f32.mrf.mxu1  ;;  %v13898_v50 = vpop.f32.mrf.mxu0  ;;  %v10031_v37 = vld [vmem:[#allocation2 + $0x330] sm:$0xff]  ;;  %v18142_v17 = vpack.c.bf16 %v10032_v48, %v10032_v48  ;;  %v10745_v2 = vld [vmem:[#allocation2 + $0x7a] sm:$0xff]  ;;  %v18216_v11 = vpack.c.bf16 %v10746_v3, %v10746_v3  ;;  %11061 = vst [vmem:[#allocation3 + $0x68] sm:$0xf] %v18211_v42 }
 0x45e   :  { %v18141_v30 = vpack.c.bf16 %v10031_v37, %v10031_v37  ;;  %v10739_v5 = vld [vmem:[#allocation2 + $0x32] sm:$0xff]  ;;  %v13616_v35 = vadd.f32 %v21127_v46, %v13615_v16  ;;  %v19287_v34 = vld [vmem:[#allocation3 + $0x17c] ss:$36 sps:$4 sm:$0xff]   ;;  %v18215_v55 = vpack.c.bf16 %v10745_v2, %v10745_v2  ;;  %v10749_v7 = vld [vmem:[#allocation2 + $0xaa] sm:$0xff]  ;;  %11063 = vst [vmem:[#allocation3 + $0xb0] sm:$0xf] %v18213_v32 }
 0x45f   :  { %v13617_v56 = vpop.f32.mrf.mxu1  ;;  %v13901_v6 = vpop.f32.mrf.mxu0  ;;  %v18209_v51 = vpack.c.bf16 %v10739_v5, %v10739_v5  ;;  %v10742_v21 = vld [vmem:[#allocation2 + $0x52] sm:$0xff]  ;;  %10352 = vst [vmem:[#allocation3 + $0x8ac] sm:$0xf] %v18142_v17  ;;  %v10748_v27 = vld [vmem:[#allocation2 + $0x9a] sm:$0xff]  ;;  %11064 = vst [vmem:[#allocation3 + $0xd4] sm:$0xf] %v18214_v15 }
 0x460   :  { %v21140_v9 = vadd.f32 %v13901_v6, %v13613_v44  ;;  %10351 = vst [vmem:[#allocation3 + $0x888] sm:$0xf] %v18141_v30  ;;  %v18212_v24 = vpack.c.bf16 %v10742_v21, %v10742_v21  ;;  %v19281_v12 = vld [vmem:[#allocation3 + $0xf0] ss:$36 sps:$4 sm:$0xff]   ;;  %v18218_v56 = vpack.c.bf16 %v10748_v27, %v10748_v27  ;;  %v10751_v44 = vld [vmem:[#allocation2 + $0xc2] sm:$0xff]  ;;  %v10753_v30 = vld [vmem:[#allocation2 + $0xda] sm:$0xff] }
 0x461   :  { %v21138_v40 = vpop.f32.mrf.mxu1  ;;  %v13903_v8 = vpop.f32.mrf.mxu0  ;;  %11059 = vst [vmem:[#allocation3 + $0x20] sm:$0xf] %v18209_v51  ;;  %v10747_v39 = vld [vmem:[#allocation2 + $0x92] sm:$0xff]  ;;  %11065 = vst [vmem:[#allocation3 + $0xf8] sm:$0xf] %v18215_v55  ;;  %v10754_v5 = vld [vmem:[#allocation2 + $0xe2] sm:$0xff]  ;;  %v18223_v51 = vpack.c.bf16 %v10753_v30, %v10753_v30 }
 0x462   :  { %11062 = vst [vmem:[#allocation3 + $0x8c] sm:$0xf] %v18212_v24  ;;  %v10750_v50 = vld [vmem:[#allocation2 + $0xb2] sm:$0xff]  ;;  %11066 = vst [vmem:[#allocation3 + $0x11c] sm:$0xf] %v18216_v11  ;;  %v13621_v8 = vadd.f32 %v21127_v46, %v21138_v40  ;;  %v18224_v20 = vpack.c.bf16 %v10754_v5, %v10754_v5  ;;  %v10756_v61 = vld [vmem:[#allocation2 + $0xfa] sm:$0xff] }
 0x463   :  { %14133 = vmatmul.mubr.bf16.gmra.mxu1 %v19272_v29  ;;  %v13622_v52 = vpop.f32.mrf.mxu1  ;;  %v13904_v18 = vpop.f32.mrf.mxu0  ;;  %v19290_v29 = vld [vmem:[#allocation3 + $0x13c] ss:$36 sps:$4 sm:$0xff]   ;;  %v18220_v37 = vpack.c.bf16 %v10750_v50, %v10750_v50  ;;  %v10755_v53 = vld [vmem:[#allocation2 + $0xf2] sm:$0xff]  ;;  %11068 = vst [vmem:[#allocation3 + $0x164] sm:$0xf] %v18218_v56  ;;  %v10757_v60 = vld [vmem:[#allocation2 + $0x10a] sm:$0xff]  ;;  %v18226_v24 = vpack.c.bf16 %v10756_v61, %v10756_v61 }
 0x464   :  { %14414 = vmatmul.mubr.bf16.gmra.mxu0 %v19275_v33  ;;  %14140 = vmatprep.mubr.bf16.mxu1 %v19280_v31  ;;  %v21145_v16 = vadd.f32 %v13904_v18, %v13616_v35  ;;  %v18217_v33 = vpack.c.bf16 %v10747_v39, %v10747_v39  ;;  %v18219_v31 = vpack.c.bf16 %v10749_v7, %v10749_v7  ;;  %v10758_v35 = vld [vmem:[#allocation2 + $0x112] sm:$0xff]  ;;  %v10760_v32 = vld [vmem:[#allocation2 + $0x12a] sm:$0xff]  ;;  %v10762_v55 = vld [vmem:[#allocation2 + $0x142] sm:$0xff] }
 0x465   :  { %14421 = vmatprep.mubr.bf16.mxu0 %v19283_v36  ;;  %v21143_v22 = vpop.f32.mrf.mxu1  ;;  %v10752_v36 = vld [vmem:[#allocation2 + $0xca] sm:$0xff]  ;;  %v13906_v6 = vpop.f32.mrf.mxu0  ;;  %v18221_v52 = vpack.c.bf16 %v10751_v44, %v10751_v44  ;;  %v18225_v21 = vpack.c.bf16 %v10755_v53, %v10755_v53  ;;  %11070 = vst [vmem:[#allocation3 + $0x1ac] sm:$0xf] %v18220_v37  ;;  %v18227_v40 = vpack.c.bf16 %v10757_v60, %v10757_v60  ;;  %11073 = vst [vmem:[#allocation3 + $0x218] sm:$0xf] %v18223_v51  ;;  %v10763_v11 = vld [vmem:[#allocation2 + $0x152] sm:$0xff] }
 0x466   :  { %v18222_v48 = vpack.c.bf16 %v10752_v36, %v10752_v36  ;;  %11067 = vst [vmem:[#allocation3 + $0x140] sm:$0xf] %v18217_v33  ;;  %11069 = vst [vmem:[#allocation3 + $0x188] sm:$0xf] %v18219_v31  ;;  %v19384_v18 = vld [vmem:[%s21679_s3 + $0x210] sm:$0xff]   ;;  %v18230_v15 = vpack.c.bf16 %v10760_v32, %v10760_v32  ;;  %v18232_v7 = vpack.c.bf16 %v10762_v55, %v10762_v55 }
 0x467   :  { %v13625_v28 = vpop.f32.mrf.mxu1  ;;  %v13909_v42 = vpop.f32.mrf.mxu0  ;;  %11071 = vst [vmem:[#allocation3 + $0x1d0] sm:$0xf] %v18221_v52  ;;  %11074 = vst [vmem:[#allocation3 + $0x23c] sm:$0xf] %v18224_v20  ;;  %v10765_v33 = vld [vmem:[#allocation2 + $0x16a] sm:$0xff]  ;;  %v13624_v56 = vadd.f32 %v21127_v46, %v21143_v22  ;;  %18443 = vmatprep.subr.bf16.mxu1 %v19384_v18 }
 0x468   :  { %11072 = vst [vmem:[#allocation3 + $0x1f4] sm:$0xf] %v18222_v48  ;;  %v21151_v2 = vadd.f32 %v13909_v42, %v13621_v8  ;;  %11075 = vst [vmem:[#allocation3 + $0x260] sm:$0xf] %v18225_v21  ;;  %v10764_v28 = vld [vmem:[#allocation2 + $0x15a] sm:$0xff]  ;;  %v18235_v44 = vpack.c.bf16 %v10765_v33, %v10765_v33  ;;  %18444 = vmatpush3.bf16.msra.mxu1 %v19384_v18  ;;  %v10771_v33 = vld [vmem:[#allocation2 + $0x1e2] sm:$0xff] }
 0x469   :  { %v21149_v17 = vpop.f32.mrf.mxu1  ;;  %v13911_v39 = vpop.f32.mrf.mxu0  ;;  %11076 = vst [vmem:[#allocation3 + $0x284] sm:$0xf] %v18226_v24  ;;  %11077 = vst [vmem:[#allocation3 + $0x2a8] sm:$0xf] %v18227_v40  ;;  %v18234_v31 = vpack.c.bf16 %v10764_v28, %v10764_v28  ;;  %v19285_v36 = vld [vmem:[#allocation3 + $0x178] ss:$36 sps:$4 sm:$0xff]  }
 0x46a   :  { %11080 = vst [vmem:[#allocation3 + $0x314] sm:$0xf] %v18230_v15  ;;  %11082 = vst [vmem:[#allocation3 + $0x35c] sm:$0xf] %v18232_v7  ;;  %v19288_v37 = vld [vmem:[#allocation3 + $0x138] ss:$36 sps:$4 sm:$0xff]   ;;  %v13629_v5 = vadd.f32 %v21127_v46, %v21149_v17 }
 0x46b   :  { %14141 = vmatmul.mubr.bf16.gmra.mxu1 %v19278_v43  ;;  %v10761_v43 = vld [vmem:[#allocation2 + $0x13a] sm:$0xff]  ;;  %v13630_v3 = vpop.f32.mrf.mxu1  ;;  %v13912_v6 = vpop.f32.mrf.mxu0  ;;  %11084 = vst [vmem:[#allocation3 + $0x3a4] sm:$0xf] %v18234_v31  ;;  %11085 = vst [vmem:[#allocation3 + $0x3c8] sm:$0xf] %v18235_v44  ;;  %v10767_v39 = vld [vmem:[#allocation2 + $0x182] sm:$0xff] }
 0x46c   :  { %14422 = vmatmul.mubr.bf16.gmra.mxu0 %v19281_v12  ;;  %14148 = vmatprep.mubr.bf16.mxu1 %v19287_v34  ;;  %v18228_v12 = vpack.c.bf16 %v10758_v35, %v10758_v35  ;;  %v18229_v34 = vpack.c.bf16 %v10759_v45, %v10759_v45  ;;  %v18231_v27 = vpack.c.bf16 %v10761_v43, %v10761_v43  ;;  %v19293_v30 = vld [vmem:[#allocation3 + $0x1c4] ss:$36 sps:$4 sm:$0xff]   ;;  %v19299_v43 = vld [vmem:[#allocation3 + $0x20c] ss:$36 sps:$4 sm:$0xff]  }
 0x46d   :  { %14429 = vmatprep.mubr.bf16.mxu0 %v19290_v29  ;;  %v18233_v29 = vpack.c.bf16 %v10763_v11, %v10763_v11  ;;  %v13631_v50 = vpop.f32.mrf.mxu1  ;;  %v21158_v52 = vadd.f32 %v13912_v6, %v13624_v56  ;;  %v13914_v22 = vpop.f32.mrf.mxu0  ;;  %v19296_v8 = vld [vmem:[#allocation3 + $0x184] ss:$36 sps:$4 sm:$0xff]   ;;  %v10766_v11 = vld [vmem:[#allocation2 + $0x172] sm:$0xff]  ;;  %v18241_v6 = vpack.c.bf16 %v10771_v33, %v10771_v33  ;;  %v10784_v33 = vld [vmem:[#allocation2 + $0x27a] sm:$0xff] }
 0x46e   :  { %11078 = vst [vmem:[#allocation3 + $0x2cc] sm:$0xf] %v18228_v12  ;;  %11079 = vst [vmem:[#allocation3 + $0x2f0] sm:$0xf] %v18229_v34  ;;  %v13632_v60 = vadd.f32 %v21127_v46, %v13631_v50  ;;  %v19291_v42 = vld [vmem:[#allocation3 + $0x1c0] ss:$36 sps:$4 sm:$0xff]   ;;  %v18236_v7 = vpack.c.bf16 %v10766_v11, %v10766_v11 }
 0x46f   :  { %11081 = vst [vmem:[#allocation3 + $0x338] sm:$0xf] %v18231_v27  ;;  %11083 = vst [vmem:[#allocation3 + $0x380] sm:$0xf] %v18233_v29  ;;  %v13633_v48 = vpop.f32.mrf.mxu1  ;;  %v19294_v40 = vld [vmem:[#allocation3 + $0x180] ss:$36 sps:$4 sm:$0xff]   ;;  %v18237_v29 = vpack.c.bf16 %v10767_v39, %v10767_v39 }
 0x470   :  { %v19302_v12 = vld [vmem:[#allocation3 + $0x1cc] ss:$36 sps:$4 sm:$0xff]   ;;  %v10773_v48 = vld [vmem:[#allocation2 + $0x1fa] sm:$0xff]  ;;  %v10774_v22 = vld [vmem:[#allocation2 + $0x202] sm:$0xff]  ;;  %11086 = vst [vmem:[#allocation3 + $0x3ec] sm:$0xf] %v18236_v7 }
 0x471   :  { %v10768_v28 = vld [vmem:[#allocation2 + $0x18a] sm:$0xff]  ;;  %11087 = vst [vmem:[#allocation3 + $0x410] sm:$0xf] %v18237_v29  ;;  %11091 = vst [vmem:[#allocation3 + $0x4a0] sm:$0xf] %v18241_v6  ;;  %v10782_v7 = vld [vmem:[#allocation2 + $0x262] sm:$0xff] }
 0x472   :  { %v10772_v56 = vld [vmem:[#allocation2 + $0x1ea] sm:$0xff]  ;;  %v10783_v29 = vld [vmem:[#allocation2 + $0x272] sm:$0xff] }
 0x473   :  { %v13636_v53 = vpop.f32.mrf.mxu1  ;;  %14149 = vmatmul.mubr.bf16.gmra.mxu1 %v19285_v36  ;;  %v19297_v31 = vld [vmem:[#allocation3 + $0x208] ss:$36 sps:$4 sm:$0xff]   ;;  %v18238_v36 = vpack.c.bf16 %v10768_v28, %v10768_v28  ;;  %v18253_v6 = vpack.c.bf16 %v10783_v29, %v10783_v29 }
 0x474   :  { %v13917_v51 = vpop.f32.mrf.mxu0  ;;  %14430 = vmatmul.mubr.bf16.gmra.mxu0 %v19288_v37  ;;  %14156 = vmatprep.mubr.bf16.mxu1 %v19293_v30  ;;  %v13637_v3 = vadd.f32 %v21127_v46, %v13636_v53  ;;  %v18242_v37 = vpack.c.bf16 %v10772_v56, %v10772_v56  ;;  %v10775_v30 = vld [vmem:[#allocation2 + $0x212] sm:$0xff] }
 0x475   :  { %v21162_v20 = vadd.f32 %v13917_v51, %v13629_v5  ;;  %14437 = vmatprep.mubr.bf16.mxu0 %v19296_v8  ;;  %v13638_v61 = vpop.f32.mrf.mxu1  ;;  %v19300_v5 = vld [vmem:[#allocation3 + $0x1c8] ss:$36 sps:$4 sm:$0xff]   ;;  %v19305_v8 = vld [vmem:[#allocation3 + $0x254] ss:$36 sps:$4 sm:$0xff]   ;;  %v18243_v51 = vpack.c.bf16 %v10773_v48, %v10773_v48  ;;  %11088 = vst [vmem:[#allocation3 + $0x434] sm:$0xf] %v18238_v36  ;;  %v18252_v36 = vpack.c.bf16 %v10782_v7, %v10782_v7 }
 0x476   :  { %v13919_v21 = vpop.f32.mrf.mxu0  ;;  %v18244_v61 = vpack.c.bf16 %v10774_v22, %v10774_v22  ;;  %11092 = vst [vmem:[#allocation3 + $0x4c4] sm:$0xf] %v18242_v37  ;;  %v18254_v37 = vpack.c.bf16 %v10784_v33, %v10784_v33  ;;  %v10785_v48 = vld [vmem:[#allocation2 + $0x28a] sm:$0xff]  ;;  %v10786_v22 = vld [vmem:[#allocation2 + $0x292] sm:$0xff]  ;;  %11103 = vst [vmem:[#allocation3 + $0x650] sm:$0xf] %v18253_v6 }
 0x477   :  { %v13639_v35 = vpop.f32.mrf.mxu1  ;;  %v10776_v21 = vld [vmem:[#allocation2 + $0x21a] sm:$0xff]  ;;  %11093 = vst [vmem:[#allocation3 + $0x4e8] sm:$0xf] %v18243_v51  ;;  %v18255_v51 = vpack.c.bf16 %v10785_v48, %v10785_v48  ;;  %11102 = vst [vmem:[#allocation3 + $0x62c] sm:$0xf] %v18252_v36 }
 0x478   :  { %v13920_v24 = vpop.f32.mrf.mxu0  ;;  %v13640_v50 = vadd.f32 %v21127_v46, %v13639_v35  ;;  %v10778_v35 = vld [vmem:[#allocation2 + $0x232] sm:$0xff]  ;;  %11094 = vst [vmem:[#allocation3 + $0x50c] sm:$0xf] %v18244_v61  ;;  %v10788_v61 = vld [vmem:[#allocation2 + $0x2aa] sm:$0xff]  ;;  %11104 = vst [vmem:[#allocation3 + $0x674] sm:$0xf] %v18254_v37 }
 0x479   :  { %v21165_v45 = vadd.f32 %v13920_v24, %v13632_v60  ;;  %v13641_v17 = vpop.f32.mrf.mxu1  ;;  %v18245_v60 = vpack.c.bf16 %v10775_v30, %v10775_v30  ;;  %v10787_v30 = vld [vmem:[#allocation2 + $0x2a2] sm:$0xff]  ;;  %11105 = vst [vmem:[#allocation3 + $0x698] sm:$0xf] %v18255_v51  ;;  %v19303_v36 = vld [vmem:[#allocation3 + $0x250] ss:$36 sps:$4 sm:$0xff]  }
 0x47a   :  { %v13922_v32 = vpop.f32.mrf.mxu0  ;;  %v19308_v17 = vld [vmem:[#allocation3 + $0x214] ss:$36 sps:$4 sm:$0xff]  }
 0x47b   :  { %v13644_v18 = vpop.f32.mrf.mxu1  ;;  %14157 = vmatmul.mubr.bf16.gmra.mxu1 %v19291_v42  ;;  %v10777_v42 = vld [vmem:[#allocation2 + $0x22a] sm:$0xff]  ;;  %v18246_v32 = vpack.c.bf16 %v10776_v21, %v10776_v21  ;;  %11095 = vst [vmem:[#allocation3 + $0x530] sm:$0xf] %v18245_v60  ;;  %v10789_v21 = vld [vmem:[#allocation2 + $0x2ba] sm:$0xff] }
 0x47c   :  { %v13925_v34 = vpop.f32.mrf.mxu0  ;;  %14438 = vmatmul.mubr.bf16.gmra.mxu0 %v19294_v40  ;;  %14164 = vmatprep.mubr.bf16.mxu1 %v19299_v43  ;;  %v18247_v43 = vpack.c.bf16 %v10777_v42, %v10777_v42  ;;  %v13645_v56 = vadd.f32 %v21127_v46, %v13644_v18  ;;  %v18256_v18 = vpack.c.bf16 %v10786_v22, %v10786_v22  ;;  %v19306_v37 = vld [vmem:[#allocation3 + $0x210] ss:$36 sps:$4 sm:$0xff]  }
 0x47d   :  { %v21168_v15 = vadd.f32 %v13925_v34, %v13637_v3  ;;  %14445 = vmatprep.mubr.bf16.mxu0 %v19302_v12  ;;  %v13646_v55 = vpop.f32.mrf.mxu1  ;;  %v18248_v3 = vpack.c.bf16 %v10778_v35, %v10778_v35  ;;  %v10779_v12 = vld [vmem:[#allocation2 + $0x242] sm:$0xff]  ;;  %v10780_v34 = vld [vmem:[#allocation2 + $0x24a] sm:$0xff]  ;;  %11096 = vst [vmem:[#allocation3 + $0x554] sm:$0xf] %v18246_v32  ;;  %v18257_v35 = vpack.c.bf16 %v10787_v30, %v10787_v30 }
 0x47e   :  { %v13927_v27 = vpop.f32.mrf.mxu0  ;;  %v10781_v55 = vld [vmem:[#allocation2 + $0x25a] sm:$0xff]  ;;  %v18249_v39 = vpack.c.bf16 %v10779_v12, %v10779_v12  ;;  %11097 = vst [vmem:[#allocation3 + $0x578] sm:$0xf] %v18247_v43  ;;  %v18259_v32 = vpack.c.bf16 %v10789_v21, %v10789_v21  ;;  %v10793_v43 = vld [vmem:[#allocation2 + $0x2ea] sm:$0xff]  ;;  %11106 = vst [vmem:[#allocation3 + $0x6bc] sm:$0xf] %v18256_v18 }
 0x47f   :  { %v21171_v44 = vpop.f32.mrf.mxu1  ;;  %v18250_v27 = vpack.c.bf16 %v10780_v34, %v10780_v34  ;;  %v18251_v28 = vpack.c.bf16 %v10781_v55, %v10781_v55  ;;  %11098 = vst [vmem:[#allocation3 + $0x59c] sm:$0xf] %v18248_v3  ;;  %11107 = vst [vmem:[#allocation3 + $0x6e0] sm:$0xf] %v18257_v35  ;;  %v19312_v30 = vld [vmem:[#allocation3 + $0x29c] ss:$36 sps:$4 sm:$0xff]  }
 0x480   :  { %v13928_v53 = vpop.f32.mrf.mxu0  ;;  %11099 = vst [vmem:[#allocation3 + $0x5c0] sm:$0xf] %v18249_v39  ;;  %v18263_v39 = vpack.c.bf16 %v10793_v43, %v10793_v43  ;;  %v13648_v7 = vadd.f32 %v21127_v46, %v21171_v44  ;;  %11109 = vst [vmem:[#allocation3 + $0x728] sm:$0xf] %v18259_v32  ;;  %v19315_v18 = vld [vmem:[#allocation3 + $0x25c] ss:$36 sps:$4 sm:$0xff]  }
 0x481   :  { %v21173_v24 = vadd.f32 %v13928_v53, %v13640_v50  ;;  %v13649_v40 = vpop.f32.mrf.mxu1  ;;  %11100 = vst [vmem:[#allocation3 + $0x5e4] sm:$0xf] %v18250_v27  ;;  %11101 = vst [vmem:[#allocation3 + $0x608] sm:$0xf] %v18251_v28  ;;  %v10795_v27 = vld [vmem:[#allocation2 + $0x302] sm:$0xff] }
 0x482   :  { %v13930_v11 = vpop.f32.mrf.mxu0  ;;  %v18258_v40 = vpack.c.bf16 %v10788_v61, %v10788_v61  ;;  %v18265_v33 = vpack.c.bf16 %v10795_v27, %v10795_v27  ;;  %11113 = vst [vmem:[#allocation3 + $0x7b8] sm:$0xf] %v18263_v39  ;;  %v19321_v39 = vld [vmem:[#allocation3 + $0x2a4] ss:$36 sps:$4 sm:$0xff]  }
 0x483   :  { %v21176_v50 = vpop.f32.mrf.mxu1  ;;  %14165 = vmatmul.mubr.bf16.gmra.mxu1 %v19297_v31  ;;  %v10790_v31 = vld [vmem:[#allocation2 + $0x2c2] sm:$0xff]  ;;  %v10794_v11 = vld [vmem:[#allocation2 + $0x2f2] sm:$0xff] }
 0x484   :  { %v13933_v53 = vpop.f32.mrf.mxu0  ;;  %14446 = vmatmul.mubr.bf16.gmra.mxu0 %v19300_v5  ;;  %14172 = vmatprep.mubr.bf16.mxu1 %v19305_v8  ;;  %v10791_v5 = vld [vmem:[#allocation2 + $0x2d2] sm:$0xff]  ;;  %v10792_v8 = vld [vmem:[#allocation2 + $0x2da] sm:$0xff]  ;;  %v18260_v12 = vpack.c.bf16 %v10790_v31, %v10790_v31  ;;  %11108 = vst [vmem:[#allocation3 + $0x704] sm:$0xf] %v18258_v40  ;;  %v18264_v29 = vpack.c.bf16 %v10794_v11, %v10794_v11  ;;  %11115 = vst [vmem:[#allocation3 + $0x800] sm:$0xf] %v18265_v33 }
 0x485   :  { %v21178_v60 = vadd.f32 %v13933_v53, %v13645_v56  ;;  %14453 = vmatprep.mubr.bf16.mxu0 %v19308_v17  ;;  %v13654_v42 = vpop.f32.mrf.mxu1  ;;  %v18261_v34 = vpack.c.bf16 %v10791_v5, %v10791_v5  ;;  %v18262_v55 = vpack.c.bf16 %v10792_v8, %v10792_v8  ;;  %v10796_v17 = vld [vmem:[#allocation2 + $0x30a] sm:$0xff]  ;;  %v13653_v53 = vadd.f32 %v21127_v46, %v21176_v50  ;;  %v19310_v50 = vld [vmem:[#allocation3 + $0x298] ss:$36 sps:$4 sm:$0xff]   ;;  %v10798_v33 = vld [vmem:[#allocation2 + $0x322] sm:$0xff] }
 0x486   :  { %v13935_v3 = vpop.f32.mrf.mxu0  ;;  %v18266_v56 = vpack.c.bf16 %v10796_v17, %v10796_v17  ;;  %11110 = vst [vmem:[#allocation3 + $0x74c] sm:$0xf] %v18260_v12  ;;  %11114 = vst [vmem:[#allocation3 + $0x7dc] sm:$0xf] %v18264_v29  ;;  %v19409_v42 = vld [vmem:[%s21679_s3 + $0x208] sm:$0xff]   ;;  %v10797_v29 = vld [vmem:[#allocation2 + $0x31a] sm:$0xff] }
 0x487   :  { %v13655_v28 = vpop.f32.mrf.mxu1  ;;  %11111 = vst [vmem:[#allocation3 + $0x770] sm:$0xf] %v18261_v34  ;;  %11112 = vst [vmem:[#allocation3 + $0x794] sm:$0xf] %v18262_v55  ;;  %18445 = vmatprep.subr.bf16.mxu1 %v19409_v42  ;;  %v19313_v8 = vld [vmem:[#allocation3 + $0x258] ss:$36 sps:$4 sm:$0xff]  }
 0x488   :  { %v13936_v6 = vpop.f32.mrf.mxu0  ;;  %11116 = vst [vmem:[#allocation3 + $0x824] sm:$0xf] %v18266_v56  ;;  %v13656_v40 = vadd.f32 %v21127_v46, %v13655_v28  ;;  %18446 = vmatpush3.bf16.msra.mxu1 %v19409_v42  ;;  %v19318_v34 = vld [vmem:[#allocation3 + $0x2e4] ss:$36 sps:$4 sm:$0xff]   ;;  %v10799_v56 = vld [vmem:[#allocation2 + $0x332] sm:$0xff] }
 0x489   :  { %v21182_v48 = vadd.f32 %v13936_v6, %v13648_v7  ;;  %v13657_v22 = vpop.f32.mrf.mxu1  ;;  %v19319_v42 = vld [vmem:[#allocation3 + $0x2a0] ss:$36 sps:$4 sm:$0xff]  }
 0x48a   :  { %v13938_v44 = vpop.f32.mrf.mxu0  ;;  %v18268_v22 = vpack.c.bf16 %v10798_v33, %v10798_v33 }
 0x48b   :  { %v13660_v51 = vpop.f32.mrf.mxu1  ;;  %14173 = vmatmul.mubr.bf16.gmra.mxu1 %v19303_v36  ;;  %v10800_v44 = vld [vmem:[#allocation2 + $0x33a] sm:$0xff] }
 0x48c   :  { %v13941_v61 = vpop.f32.mrf.mxu0  ;;  %14454 = vmatmul.mubr.bf16.gmra.mxu0 %v19306_v37  ;;  %14180 = vmatprep.mubr.bf16.mxu1 %v19312_v30  ;;  %v13661_v55 = vadd.f32 %v21127_v46, %v13660_v51  ;;  %v18267_v37 = vpack.c.bf16 %v10797_v29, %v10797_v29  ;;  %v18269_v30 = vpack.c.bf16 %v10799_v56, %v10799_v56  ;;  %v19330_v56 = vld [vmem:[#allocation3 + $0x374] ss:$36 sps:$4 sm:$0xff]  }
 0x48d   :  { %v21186_v21 = vadd.f32 %v13941_v61, %v13653_v53  ;;  %14461 = vmatprep.mubr.bf16.mxu0 %v19315_v18  ;;  %v13662_v31 = vpop.f32.mrf.mxu1  ;;  %v18270_v51 = vpack.c.bf16 %v10800_v44, %v10800_v44  ;;  %v19316_v18 = vld [vmem:[#allocation3 + $0x2e0] ss:$36 sps:$4 sm:$0xff]   ;;  %11118 = vst [vmem:[#allocation3 + $0x86c] sm:$0xf] %v18268_v22  ;;  %v19333_v22 = vld [vmem:[#allocation3 + $0x334] ss:$36 sps:$4 sm:$0xff]  }
 0x48e   :  { %v13943_v35 = vpop.f32.mrf.mxu0  ;;  %11117 = vst [vmem:[#allocation3 + $0x848] sm:$0xf] %v18267_v37  ;;  %11119 = vst [vmem:[#allocation3 + $0x890] sm:$0xf] %v18269_v30 }
 0x48f   :  { %v13663_v32 = vpop.f32.mrf.mxu1  ;;  %11120 = vst [vmem:[#allocation3 + $0x8b4] sm:$0xf] %v18270_v51 }
 0x490   :  { %v13944_v5 = vpop.f32.mrf.mxu0  ;;  %v13664_v36 = vadd.f32 %v21127_v46, %v13663_v32 }
 0x491   :  { %v21192_v43 = vadd.f32 %v13944_v5, %v13656_v40  ;;  %v13665_v3 = vpop.f32.mrf.mxu1  ;;  %v19324_v40 = vld [vmem:[#allocation3 + $0x32c] ss:$36 sps:$4 sm:$0xff]  }
 0x492   :  { %v13946_v12 = vpop.f32.mrf.mxu0  ;;  %v19327_v5 = vld [vmem:[#allocation3 + $0x2ec] ss:$36 sps:$4 sm:$0xff]  }
 0x493   :  { %v13668_v11 = vpop.f32.mrf.mxu1  ;;  %14181 = vmatmul.mubr.bf16.gmra.mxu1 %v19310_v50 }
 0x494   :  { %v13949_v27 = vpop.f32.mrf.mxu0  ;;  %14462 = vmatmul.mubr.bf16.gmra.mxu0 %v19313_v8  ;;  %14188 = vmatprep.mubr.bf16.mxu1 %v19318_v34  ;;  %v13669_v32 = vadd.f32 %v21127_v46, %v13668_v11  ;;  %v19325_v11 = vld [vmem:[#allocation3 + $0x2e8] ss:$36 sps:$4 sm:$0xff]  }
 0x495   :  { %v21195_v17 = vadd.f32 %v13949_v27, %v13661_v55  ;;  %14469 = vmatprep.mubr.bf16.mxu0 %v19321_v39  ;;  %v13670_v7 = vpop.f32.mrf.mxu1 }
 0x496   :  { %v13951_v28 = vpop.f32.mrf.mxu0  ;;  %v19322_v7 = vld [vmem:[#allocation3 + $0x328] ss:$36 sps:$4 sm:$0xff]  }
 0x497   :  { %v13671_v6 = vpop.f32.mrf.mxu1 }
 0x498   :  { %v13952_v53 = vpop.f32.mrf.mxu0  ;;  %v13672_v55 = vadd.f32 %v21127_v46, %v13671_v6 }
 0x499   :  { %v21198_v61 = vadd.f32 %v13952_v53, %v13664_v36  ;;  %v13673_v31 = vpop.f32.mrf.mxu1 }
 0x49a   :  { %v13954_v35 = vpop.f32.mrf.mxu0 }
 0x49b   :  { %v13676_v50 = vpop.f32.mrf.mxu1  ;;  %14189 = vmatmul.mubr.bf16.gmra.mxu1 %v19316_v18 }
 0x49c   :  { %v13957_v8 = vpop.f32.mrf.mxu0  ;;  %14470 = vmatmul.mubr.bf16.gmra.mxu0 %v19319_v42  ;;  %14196 = vmatprep.mubr.bf16.mxu1 %v19324_v40  ;;  %v13677_v36 = vadd.f32 %v21127_v46, %v13676_v50  ;;  %v19328_v42 = vld [vmem:[#allocation3 + $0x370] ss:$36 sps:$4 sm:$0xff]  }
 0x49d   :  { %v21201_v3 = vadd.f32 %v13957_v8, %v13669_v32  ;;  %14477 = vmatprep.mubr.bf16.mxu0 %v19327_v5  ;;  %v13678_v12 = vpop.f32.mrf.mxu1  ;;  %v19331_v32 = vld [vmem:[#allocation3 + $0x330] ss:$36 sps:$4 sm:$0xff]   ;;  %v19337_v5 = vld [vmem:[#allocation3 + $0x3bc] ss:$36 sps:$4 sm:$0xff]  }
 0x49e   :  { %v13959_v34 = vpop.f32.mrf.mxu0 }
 0x49f   :  { %v13679_v39 = vpop.f32.mrf.mxu1  ;;  %v19340_v34 = vld [vmem:[#allocation3 + $0x37c] ss:$36 sps:$4 sm:$0xff]  }
 0x4a0   :  { %v13960_v27 = vpop.f32.mrf.mxu0  ;;  %v13680_v51 = vadd.f32 %v21127_v46, %v13679_v39 }
 0x4a1   :  { %v21204_v28 = vadd.f32 %v13960_v27, %v13672_v55  ;;  %v13681_v29 = vpop.f32.mrf.mxu1 }
 0x4a2   :  { %v13962_v33 = vpop.f32.mrf.mxu0 }
 0x4a3   :  { %v13684_v37 = vpop.f32.mrf.mxu1  ;;  %14197 = vmatmul.mubr.bf16.gmra.mxu1 %v19322_v7  ;;  %v19434_v7 = vld [vmem:[%s21679_s3 + $0x200] sm:$0xff]  }
 0x4a4   :  { %v13965_v44 = vpop.f32.mrf.mxu0  ;;  %14478 = vmatmul.mubr.bf16.gmra.mxu0 %v19325_v11  ;;  %14204 = vmatprep.mubr.bf16.mxu1 %v19330_v56  ;;  %v13685_v8 = vadd.f32 %v21127_v46, %v13684_v37 }
 0x4a5   :  { %v21207_v30 = vadd.f32 %v13965_v44, %v13677_v36  ;;  %14485 = vmatprep.mubr.bf16.mxu0 %v19333_v22  ;;  %v13686_v6 = vpop.f32.mrf.mxu1  ;;  %18447 = vmatprep.subr.bf16.mxu1 %v19434_v7  ;;  %v19335_v36 = vld [vmem:[#allocation3 + $0x3b8] ss:$36 sps:$4 sm:$0xff]  }
 0x4a6   :  { %v13967_v53 = vpop.f32.mrf.mxu0  ;;  %18448 = vmatpush3.bf16.msra.mxu1 %v19434_v7  ;;  %v19338_v44 = vld [vmem:[#allocation3 + $0x378] ss:$36 sps:$4 sm:$0xff]  }
 0x4a7   :  { %v13687_v18 = vpop.f32.mrf.mxu1  ;;  %v19343_v53 = vld [vmem:[#allocation3 + $0x404] ss:$36 sps:$4 sm:$0xff]  }
 0x4a8   :  { %v13968_v31 = vpop.f32.mrf.mxu0  ;;  %v13688_v11 = vadd.f32 %v21127_v46, %v13687_v18 }
 0x4a9   :  { %v21210_v35 = vadd.f32 %v13968_v31, %v13680_v51  ;;  %v13689_v40 = vpop.f32.mrf.mxu1 }
 0x4aa   :  { %v13970_v50 = vpop.f32.mrf.mxu0 }
 0x4ab   :  { %v13692_v12 = vpop.f32.mrf.mxu1  ;;  %14205 = vmatmul.mubr.bf16.gmra.mxu1 %v19328_v42  ;;  %v19346_v42 = vld [vmem:[#allocation3 + $0x3c4] ss:$36 sps:$4 sm:$0xff]  }
 0x4ac   :  { %v13973_v55 = vpop.f32.mrf.mxu0  ;;  %14486 = vmatmul.mubr.bf16.gmra.mxu0 %v19331_v32  ;;  %14212 = vmatprep.mubr.bf16.mxu1 %v19337_v5  ;;  %v13693_v51 = vadd.f32 %v21127_v46, %v13692_v12  ;;  %v19344_v12 = vld [vmem:[#allocation3 + $0x3c0] ss:$36 sps:$4 sm:$0xff]  }
 0x4ad   :  { %v21213_v27 = vadd.f32 %v13973_v55, %v13685_v8  ;;  %14493 = vmatprep.mubr.bf16.mxu0 %v19340_v34  ;;  %v13694_v39 = vpop.f32.mrf.mxu1  ;;  %v19341_v55 = vld [vmem:[#allocation3 + $0x400] ss:$36 sps:$4 sm:$0xff]  }
 0x4ae   :  { %v13975_v29 = vpop.f32.mrf.mxu0 }
 0x4af   :  { %v13695_v33 = vpop.f32.mrf.mxu1 }
 0x4b0   :  { %v13976_v56 = vpop.f32.mrf.mxu0  ;;  %v13696_v5 = vadd.f32 %v21127_v46, %v13695_v33 }
 0x4b1   :  { %v21219_v37 = vadd.f32 %v13976_v56, %v13688_v11  ;;  %v13697_v22 = vpop.f32.mrf.mxu1  ;;  %v19349_v11 = vld [vmem:[#allocation3 + $0x44c] ss:$36 sps:$4 sm:$0xff]   ;;  %v21230_v56 = vld [vmem:[%s21680_s4] ss:$0 sm:$0xff] }
 0x4b2   :  { %v13978_v6 = vpop.f32.mrf.mxu0 }
 0x4b3   :  { %v13700_v31 = vpop.f32.mrf.mxu1  ;;  %14213 = vmatmul.mubr.bf16.gmra.mxu1 %v19335_v36 }
 0x4b4   :  { %v13981_v40 = vpop.f32.mrf.mxu0  ;;  %14494 = vmatmul.mubr.bf16.gmra.mxu0 %v19338_v44  ;;  %14220 = vmatprep.mubr.bf16.mxu1 %v19343_v53  ;;  %v13701_v36 = vadd.f32 %v21230_v56, %v13700_v31  ;;  %v19352_v44 = vld [vmem:[#allocation3 + $0x40c] ss:$36 sps:$4 sm:$0xff]   ;;  %v19358_v31 = vld [vmem:[#allocation3 + $0x454] ss:$36 sps:$4 sm:$0xff]  }
 0x4b5   :  { %v21222_v18 = vadd.f32 %v13981_v40, %v13693_v51  ;;  %14501 = vmatprep.mubr.bf16.mxu0 %v19346_v42  ;;  %v13702_v32 = vpop.f32.mrf.mxu1 }
 0x4b6   :  { %v13983_v50 = vpop.f32.mrf.mxu0  ;;  %v19347_v32 = vld [vmem:[#allocation3 + $0x448] ss:$36 sps:$4 sm:$0xff]  }
 0x4b7   :  { %v13703_v8 = vpop.f32.mrf.mxu1 }
 0x4b8   :  { %v13984_v34 = vpop.f32.mrf.mxu0  ;;  %v13704_v51 = vadd.f32 %v21230_v56, %v13703_v8 }
 0x4b9   :  { %v21225_v39 = vadd.f32 %v13984_v34, %v13696_v5  ;;  %v13705_v7 = vpop.f32.mrf.mxu1  ;;  %v19350_v34 = vld [vmem:[#allocation3 + $0x408] ss:$36 sps:$4 sm:$0xff]  }
 0x4ba   :  { %v13986_v29 = vpop.f32.mrf.mxu0  ;;  %v19355_v7 = vld [vmem:[#allocation3 + $0x494] ss:$36 sps:$4 sm:$0xff]  }
 0x4bb   :  { %v13708_v22 = vpop.f32.mrf.mxu1  ;;  %14221 = vmatmul.mubr.bf16.gmra.mxu1 %v19341_v55 }
 0x4bc   :  { %v13989_v46 = vpop.f32.mrf.mxu0  ;;  %14502 = vmatmul.mubr.bf16.gmra.mxu0 %v19344_v12  ;;  %14228 = vmatprep.mubr.bf16.mxu1 %v19349_v11  ;;  %v13709_v12 = vadd.f32 %v21230_v56, %v13708_v22 }
 0x4bd   :  { %v21233_v33 = vadd.f32 %v13989_v46, %v13701_v36  ;;  %14509 = vmatprep.mubr.bf16.mxu0 %v19352_v44  ;;  %v13710_v6 = vpop.f32.mrf.mxu1 }
 0x4be   :  { %v13991_v53 = vpop.f32.mrf.mxu0 }
 0x4bf   :  { %v13711_v42 = vpop.f32.mrf.mxu1 }
 0x4c0   :  { %v13992_v40 = vpop.f32.mrf.mxu0  ;;  %v13712_v46 = vadd.f32 %v21230_v56, %v13711_v42 }
 0x4c1   :  { %v21236_v50 = vadd.f32 %v13992_v40, %v13704_v51  ;;  %v13713_v5 = vpop.f32.mrf.mxu1  ;;  %v19356_v51 = vld [vmem:[#allocation3 + $0x450] ss:$36 sps:$4 sm:$0xff]  }
 0x4c2   :  { %v13994_v55 = vpop.f32.mrf.mxu0  ;;  %v19353_v40 = vld [vmem:[#allocation3 + $0x490] ss:$36 sps:$4 sm:$0xff]  }
 0x4c3   :  { %21766 = vst [vmem:[#allocation25_spill] sm:$0xff] %v21236_v50  ;;  %v13716_v29 = vpop.f32.mrf.mxu1  ;;  %14229 = vmatmul.mubr.bf16.gmra.mxu1 %v19347_v32  ;;  %v19362_v50 = vld [vmem:[#allocation3 + $0x4dc] ss:$36 sps:$4 sm:$0xff]  }
 0x4c4   :  { %v13997_v11 = vpop.f32.mrf.mxu0  ;;  %14510 = vmatmul.mubr.bf16.gmra.mxu0 %v19350_v34  ;;  %14236 = vmatprep.mubr.bf16.mxu1 %v19355_v7  ;;  %v13717_v32 = vadd.f32 %v21230_v56, %v13716_v29  ;;  %v19365_v7 = vld [vmem:[#allocation3 + $0x49c] ss:$36 sps:$4 sm:$0xff]  }
 0x4c5   :  { %v21239_v36 = vadd.f32 %v13997_v11, %v13709_v12  ;;  %v13718_v8 = vpop.f32.mrf.mxu1  ;;  %14517 = vmatprep.mubr.bf16.mxu0 %v19358_v31  ;;  %v19363_v29 = vld [vmem:[#allocation3 + $0x498] ss:$36 sps:$4 sm:$0xff]  }
 0x4c6   :  { %v13999_v44 = vpop.f32.mrf.mxu0 }
 0x4c7   :  { %21767 = vst [vmem:[#allocation26_spill] sm:$0xff] %v21239_v36  ;;  %v13719_v6 = vpop.f32.mrf.mxu1 }
 0x4c8   :  { %v14000_v53 = vpop.f32.mrf.mxu0  ;;  %v13720_v8 = vadd.f32 %v21230_v56, %v13719_v6 }
 0x4c9   :  { %v21242_v5 = vadd.f32 %v14000_v53, %v13712_v46  ;;  %v13721_v55 = vpop.f32.mrf.mxu1  ;;  %v19360_v53 = vld [vmem:[#allocation3 + $0x4d8] ss:$36 sps:$4 sm:$0xff]  }
 0x4ca   :  { %v14002_v22 = vpop.f32.mrf.mxu0 }
 0x4cb   :  { %21768 = vst [vmem:[#allocation27_spill] sm:$0xff] %v21242_v5  ;;  %v13724_v34 = vpop.f32.mrf.mxu1  ;;  %14237 = vmatmul.mubr.bf16.gmra.mxu1 %v19353_v40  ;;  %v19368_v40 = vld [vmem:[#allocation3 + $0x524] ss:$36 sps:$4 sm:$0xff]  }
 0x4cc   :  { %v14005_v12 = vpop.f32.mrf.mxu0  ;;  %14518 = vmatmul.mubr.bf16.gmra.mxu0 %v19356_v51  ;;  %14244 = vmatprep.mubr.bf16.mxu1 %v19362_v50  ;;  %v13725_v36 = vadd.f32 %v21230_v56, %v13724_v34  ;;  %v19371_v50 = vld [vmem:[#allocation3 + $0x4e4] ss:$36 sps:$4 sm:$0xff]  }
 0x4cd   :  { %v21245_v31 = vadd.f32 %v14005_v12, %v13717_v32  ;;  %14525 = vmatprep.mubr.bf16.mxu0 %v19365_v7  ;;  %v13726_v42 = vpop.f32.mrf.mxu1  ;;  %v19369_v34 = vld [vmem:[#allocation3 + $0x4e0] ss:$36 sps:$4 sm:$0xff]  }
 0x4ce   :  { %v14007_v11 = vpop.f32.mrf.mxu0 }
 0x4cf   :  { %21769 = vst [vmem:[#allocation28_spill] sm:$0xff] %v21245_v31  ;;  %v13727_v44 = vpop.f32.mrf.mxu1 }
 0x4d0   :  { %v14008_v46 = vpop.f32.mrf.mxu0  ;;  %v13728_v42 = vadd.f32 %v21230_v56, %v13727_v44 }
 0x4d1   :  { %v21248_v55 = vadd.f32 %v14008_v46, %v13720_v8  ;;  %v13729_v22 = vpop.f32.mrf.mxu1  ;;  %v19366_v46 = vld [vmem:[#allocation3 + $0x520] ss:$36 sps:$4 sm:$0xff]  }
 0x4d2   :  { %v14010_v5 = vpop.f32.mrf.mxu0 }
 0x4d3   :  { %21770 = vst [vmem:[#allocation9_spill] sm:$0xff] %v21248_v55  ;;  %v13732_v51 = vpop.f32.mrf.mxu1  ;;  %14245 = vmatmul.mubr.bf16.gmra.mxu1 %v19360_v53  ;;  %v19374_v53 = vld [vmem:[#allocation3 + $0x56c] ss:$36 sps:$4 sm:$0xff]  }
 0x4d4   :  { %v14013_v32 = vpop.f32.mrf.mxu0  ;;  %14526 = vmatmul.mubr.bf16.gmra.mxu0 %v19363_v29  ;;  %14252 = vmatprep.mubr.bf16.mxu1 %v19368_v40  ;;  %v13733_v31 = vadd.f32 %v21230_v56, %v13732_v51  ;;  %v19375_v51 = vld [vmem:[#allocation3 + $0x528] ss:$36 sps:$4 sm:$0xff]  }
 0x4d5   :  { %v21251_v7 = vadd.f32 %v14013_v32, %v13725_v36  ;;  %14533 = vmatprep.mubr.bf16.mxu0 %v19371_v50  ;;  %v13734_v6 = vpop.f32.mrf.mxu1  ;;  %v19377_v36 = vld [vmem:[#allocation3 + $0x52c] ss:$36 sps:$4 sm:$0xff]  }
 0x4d6   :  { %v14015_v12 = vpop.f32.mrf.mxu0 }
 0x4d7   :  { %21771 = vst [vmem:[#allocation7_spill] sm:$0xff] %v21251_v7  ;;  %v13735_v11 = vpop.f32.mrf.mxu1 }
 0x4d8   :  { %v14016_v8 = vpop.f32.mrf.mxu0  ;;  %v13736_v6 = vadd.f32 %v21230_v56, %v13735_v11 }
 0x4d9   :  { %v21254_v5 = vadd.f32 %v14016_v8, %v13728_v42  ;;  %v13737_v22 = vpop.f32.mrf.mxu1  ;;  %v19372_v8 = vld [vmem:[#allocation3 + $0x568] ss:$36 sps:$4 sm:$0xff]  }
 0x4da   :  { %v14018_v55 = vpop.f32.mrf.mxu0 }
 0x4db   :  { %21772 = vst [vmem:[#allocation10_spill] sm:$0xff] %v21254_v5  ;;  %v13740_v29 = vpop.f32.mrf.mxu1  ;;  %14253 = vmatmul.mubr.bf16.gmra.mxu1 %v19366_v46  ;;  %v19380_v46 = vld [vmem:[#allocation3 + $0x5b4] ss:$36 sps:$4 sm:$0xff]  }
 0x4dc   :  { %v14021_v40 = vpop.f32.mrf.mxu0  ;;  %14534 = vmatmul.mubr.bf16.gmra.mxu0 %v19369_v34  ;;  %14260 = vmatprep.mubr.bf16.mxu1 %v19374_v53  ;;  %v13741_v7 = vadd.f32 %v21230_v56, %v13740_v29  ;;  %v19381_v29 = vld [vmem:[#allocation3 + $0x570] ss:$36 sps:$4 sm:$0xff]  }
 0x4dd   :  { %v21257_v50 = vadd.f32 %v14021_v40, %v13733_v31  ;;  %14541 = vmatprep.mubr.bf16.mxu0 %v19377_v36  ;;  %v13742_v44 = vpop.f32.mrf.mxu1  ;;  %v19383_v31 = vld [vmem:[#allocation3 + $0x574] ss:$36 sps:$4 sm:$0xff]  }
 0x4de   :  { %v14023_v32 = vpop.f32.mrf.mxu0 }
 0x4df   :  { %21773 = vst [vmem:[#allocation8_spill] sm:$0xff] %v21257_v50  ;;  %v13743_v12 = vpop.f32.mrf.mxu1 }
 0x4e0   :  { %v14024_v42 = vpop.f32.mrf.mxu0  ;;  %v13744_v44 = vadd.f32 %v21230_v56, %v13743_v12 }
 0x4e1   :  { %v21260_v55 = vadd.f32 %v14024_v42, %v13736_v6  ;;  %v13745_v22 = vpop.f32.mrf.mxu1  ;;  %v19378_v42 = vld [vmem:[#allocation3 + $0x5b0] ss:$36 sps:$4 sm:$0xff]  }
 0x4e2   :  { %v14026_v5 = vpop.f32.mrf.mxu0 }
 0x4e3   :  { %21774 = vst [vmem:[#allocation11_spill] sm:$0xff] %v21260_v55  ;;  %v13748_v34 = vpop.f32.mrf.mxu1  ;;  %14261 = vmatmul.mubr.bf16.gmra.mxu1 %v19372_v8  ;;  %v19387_v8 = vld [vmem:[#allocation3 + $0x5fc] ss:$36 sps:$4 sm:$0xff]  }
 0x4e4   :  { %v14029_v53 = vpop.f32.mrf.mxu0  ;;  %14542 = vmatmul.mubr.bf16.gmra.mxu0 %v19375_v51  ;;  %14268 = vmatprep.mubr.bf16.mxu1 %v19380_v46  ;;  %v13749_v50 = vadd.f32 %v21230_v56, %v13748_v34  ;;  %v19388_v34 = vld [vmem:[#allocation3 + $0x5b8] ss:$36 sps:$4 sm:$0xff]  }
 0x4e5   :  { %v21263_v36 = vadd.f32 %v14029_v53, %v13741_v7  ;;  %14549 = vmatprep.mubr.bf16.mxu0 %v19383_v31  ;;  %v13750_v11 = vpop.f32.mrf.mxu1  ;;  %v19390_v7 = vld [vmem:[#allocation3 + $0x5bc] ss:$36 sps:$4 sm:$0xff]  }
 0x4e6   :  { %v14031_v40 = vpop.f32.mrf.mxu0 }
 0x4e7   :  { %21775 = vst [vmem:[#allocation14_spill] sm:$0xff] %v21263_v36  ;;  %v13751_v32 = vpop.f32.mrf.mxu1 }
 0x4e8   :  { %v14032_v6 = vpop.f32.mrf.mxu0  ;;  %v13752_v11 = vadd.f32 %v21230_v56, %v13751_v32 }
 0x4e9   :  { %v21266_v5 = vadd.f32 %v14032_v6, %v13744_v44  ;;  %v13753_v22 = vpop.f32.mrf.mxu1  ;;  %v19385_v6 = vld [vmem:[#allocation3 + $0x5f8] ss:$36 sps:$4 sm:$0xff]  }
 0x4ea   :  { %v14034_v55 = vpop.f32.mrf.mxu0 }
 0x4eb   :  { %21776 = vst [vmem:[#allocation12_spill] sm:$0xff] %v21266_v5  ;;  %v13756_v51 = vpop.f32.mrf.mxu1  ;;  %14269 = vmatmul.mubr.bf16.gmra.mxu1 %v19378_v42  ;;  %v19393_v42 = vld [vmem:[#allocation3 + $0x644] ss:$36 sps:$4 sm:$0xff]  }
 0x4ec   :  { %v14037_v46 = vpop.f32.mrf.mxu0  ;;  %14550 = vmatmul.mubr.bf16.gmra.mxu0 %v19381_v29  ;;  %14276 = vmatprep.mubr.bf16.mxu1 %v19387_v8  ;;  %v13757_v36 = vadd.f32 %v21230_v56, %v13756_v51  ;;  %v19394_v51 = vld [vmem:[#allocation3 + $0x600] ss:$36 sps:$4 sm:$0xff]  }
 0x4ed   :  { %v21269_v31 = vadd.f32 %v14037_v46, %v13749_v50  ;;  %14557 = vmatprep.mubr.bf16.mxu0 %v19390_v7  ;;  %v13758_v12 = vpop.f32.mrf.mxu1  ;;  %v19396_v50 = vld [vmem:[#allocation3 + $0x604] ss:$36 sps:$4 sm:$0xff]  }
 0x4ee   :  { %v14039_v53 = vpop.f32.mrf.mxu0 }
 0x4ef   :  { %21777 = vst [vmem:[#allocation15_spill] sm:$0xff] %v21269_v31  ;;  %v13759_v40 = vpop.f32.mrf.mxu1 }
 0x4f0   :  { %v14040_v44 = vpop.f32.mrf.mxu0  ;;  %v13760_v12 = vadd.f32 %v21230_v56, %v13759_v40 }
 0x4f1   :  { %v21272_v55 = vadd.f32 %v14040_v44, %v13752_v11  ;;  %v13761_v22 = vpop.f32.mrf.mxu1  ;;  %v19391_v44 = vld [vmem:[#allocation3 + $0x640] ss:$36 sps:$4 sm:$0xff]  }
 0x4f2   :  { %v14042_v5 = vpop.f32.mrf.mxu0 }
 0x4f3   :  { %21778 = vst [vmem:[#allocation13_spill] sm:$0xff] %v21272_v55  ;;  %v13764_v29 = vpop.f32.mrf.mxu1  ;;  %14277 = vmatmul.mubr.bf16.gmra.mxu1 %v19385_v6  ;;  %v19399_v6 = vld [vmem:[#allocation3 + $0x68c] ss:$36 sps:$4 sm:$0xff]  }
 0x4f4   :  { %v14045_v8 = vpop.f32.mrf.mxu0  ;;  %14558 = vmatmul.mubr.bf16.gmra.mxu0 %v19388_v34  ;;  %14284 = vmatprep.mubr.bf16.mxu1 %v19393_v42  ;;  %v13765_v31 = vadd.f32 %v21230_v56, %v13764_v29  ;;  %v19400_v29 = vld [vmem:[#allocation3 + $0x648] ss:$36 sps:$4 sm:$0xff]  }
 0x4f5   :  { %v21275_v7 = vadd.f32 %v14045_v8, %v13757_v36  ;;  %14565 = vmatprep.mubr.bf16.mxu0 %v19396_v50  ;;  %v13766_v32 = vpop.f32.mrf.mxu1  ;;  %v19402_v36 = vld [vmem:[#allocation3 + $0x64c] ss:$36 sps:$4 sm:$0xff]  }
 0x4f6   :  { %v14047_v46 = vpop.f32.mrf.mxu0 }
 0x4f7   :  { %21779 = vst [vmem:[#allocation18_spill] sm:$0xff] %v21275_v7  ;;  %v13767_v53 = vpop.f32.mrf.mxu1 }
 0x4f8   :  { %v14048_v11 = vpop.f32.mrf.mxu0  ;;  %v13768_v32 = vadd.f32 %v21230_v56, %v13767_v53 }
 0x4f9   :  { %v21278_v5 = vadd.f32 %v14048_v11, %v13760_v12  ;;  %v13769_v22 = vpop.f32.mrf.mxu1  ;;  %v19397_v11 = vld [vmem:[#allocation3 + $0x688] ss:$36 sps:$4 sm:$0xff]  }
 0x4fa   :  { %v14050_v55 = vpop.f32.mrf.mxu0 }
 0x4fb   :  { %21780 = vst [vmem:[#allocation16_spill] sm:$0xff] %v21278_v5  ;;  %v13772_v34 = vpop.f32.mrf.mxu1  ;;  %14285 = vmatmul.mubr.bf16.gmra.mxu1 %v19391_v44  ;;  %v19405_v44 = vld [vmem:[#allocation3 + $0x6d4] ss:$36 sps:$4 sm:$0xff]  }
 0x4fc   :  { %v14053_v42 = vpop.f32.mrf.mxu0  ;;  %14566 = vmatmul.mubr.bf16.gmra.mxu0 %v19394_v51  ;;  %14292 = vmatprep.mubr.bf16.mxu1 %v19399_v6  ;;  %v13773_v7 = vadd.f32 %v21230_v56, %v13772_v34  ;;  %v19406_v34 = vld [vmem:[#allocation3 + $0x690] ss:$36 sps:$4 sm:$0xff]  }
 0x4fd   :  { %v21281_v50 = vadd.f32 %v14053_v42, %v13765_v31  ;;  %14573 = vmatprep.mubr.bf16.mxu0 %v19402_v36  ;;  %v13774_v40 = vpop.f32.mrf.mxu1  ;;  %v19408_v31 = vld [vmem:[#allocation3 + $0x694] ss:$36 sps:$4 sm:$0xff]  }
 0x4fe   :  { %v14055_v8 = vpop.f32.mrf.mxu0 }
 0x4ff   :  { %21781 = vst [vmem:[#allocation19_spill] sm:$0xff] %v21281_v50  ;;  %v13775_v46 = vpop.f32.mrf.mxu1 }
 0x500   :  { %v14056_v12 = vpop.f32.mrf.mxu0  ;;  %v13776_v40 = vadd.f32 %v21230_v56, %v13775_v46 }
 0x501   :  { %v21284_v55 = vadd.f32 %v14056_v12, %v13768_v32  ;;  %v13777_v22 = vpop.f32.mrf.mxu1  ;;  %v19403_v12 = vld [vmem:[#allocation3 + $0x6d0] ss:$36 sps:$4 sm:$0xff]  }
 0x502   :  { %v14058_v5 = vpop.f32.mrf.mxu0 }
 0x503   :  { %21782 = vst [vmem:[#allocation17_spill] sm:$0xff] %v21284_v55  ;;  %v13780_v51 = vpop.f32.mrf.mxu1  ;;  %14293 = vmatmul.mubr.bf16.gmra.mxu1 %v19397_v11  ;;  %v19412_v11 = vld [vmem:[#allocation3 + $0x71c] ss:$36 sps:$4 sm:$0xff]  }
 0x504   :  { %v14061_v6 = vpop.f32.mrf.mxu0  ;;  %14574 = vmatmul.mubr.bf16.gmra.mxu0 %v19400_v29  ;;  %14300 = vmatprep.mubr.bf16.mxu1 %v19405_v44  ;;  %v13781_v50 = vadd.f32 %v21230_v56, %v13780_v51  ;;  %v19410_v51 = vld [vmem:[#allocation3 + $0x718] ss:$36 sps:$4 sm:$0xff]  }
 0x505   :  { %v21287_v36 = vadd.f32 %v14061_v6, %v13773_v7  ;;  %14581 = vmatprep.mubr.bf16.mxu0 %v19408_v31  ;;  %v13782_v53 = vpop.f32.mrf.mxu1  ;;  %v19415_v7 = vld [vmem:[#allocation3 + $0x6dc] ss:$36 sps:$4 sm:$0xff]  }
 0x506   :  { %v14063_v42 = vpop.f32.mrf.mxu0 }
 0x507   :  { %21783 = vst [vmem:[#allocation22_spill] sm:$0xff] %v21287_v36  ;;  %v13783_v8 = vpop.f32.mrf.mxu1 }
 0x508   :  { %v14064_v32 = vpop.f32.mrf.mxu0  ;;  %v13784_v42 = vadd.f32 %v21230_v56, %v13783_v8 }
 0x509   :  { %v21290_v5 = vadd.f32 %v14064_v32, %v13776_v40  ;;  %v13785_v22 = vpop.f32.mrf.mxu1 }
 0x50a   :  { %v14066_v55 = vpop.f32.mrf.mxu0 }
 0x50b   :  { %21784 = vst [vmem:[#allocation20_spill] sm:$0xff] %v21290_v5  ;;  %v14110_v29 = vpop.f32.mrf.mxu1  ;;  %14301 = vmatmul.mubr.bf16.gmra.mxu1 %v19403_v12  ;;  %v19413_v5 = vld [vmem:[#allocation3 + $0x6d8] ss:$36 sps:$4 sm:$0xff]  }
 0x50c   :  { %v14069_v44 = vpop.f32.mrf.mxu0  ;;  %v14111_v31 = vadd.f32 %v14110_v29, %v21021_v19  ;;  %14582 = vmatmul.mubr.bf16.gmra.mxu0 %v19406_v34  ;;  %14308 = vmatprep.mubr.bf16.mxu1 %v19412_v11  ;;  %v19418_v19 = vld [vmem:[#allocation3 + $0x764] ss:$36 sps:$4 sm:$0xff]  }
 0x50d   :  { %v21294_v46 = vadd.f32 %v14069_v44, %v13781_v50  ;;  %14589 = vmatprep.mubr.bf16.mxu0 %v19415_v7  ;;  %v14112_v6 = vpop.f32.mrf.mxu1  ;;  %v19421_v50 = vld [vmem:[#allocation3 + $0x724] ss:$36 sps:$4 sm:$0xff]  }
 0x50e   :  { %v14071_v53 = vpop.f32.mrf.mxu0 }
 0x50f   :  { %v14113_v40 = vpop.f32.mrf.mxu1  ;;  %v19416_v53 = vld [vmem:[#allocation3 + $0x760] ss:$36 sps:$4 sm:$0xff]  }
 0x510   :  { %v14072_v55 = vpop.f32.mrf.mxu0  ;;  %v14114_v32 = vadd.f32 %v14113_v40, %v21025_v13  ;;  %v19419_v40 = vld [vmem:[#allocation3 + $0x720] ss:$36 sps:$4 sm:$0xff]  }
 0x511   :  { %v21298_v22 = vadd.f32 %v14072_v55, %v13784_v42  ;;  %v14115_v12 = vpop.f32.mrf.mxu1 }
 0x512   :  { %v14074_v36 = vpop.f32.mrf.mxu0 }
 0x513   :  { %v14118_v34 = vpop.f32.mrf.mxu1  ;;  %14309 = vmatmul.mubr.bf16.gmra.mxu1 %v19410_v51  ;;  %v19424_v51 = vld [vmem:[#allocation3 + $0x7ac] ss:$36 sps:$4 sm:$0xff]  }
 0x514   :  { %v14119_v11 = vadd.f32 %v14118_v34, %v21030_v26  ;;  %v14399_v29 = vpop.f32.mrf.mxu0  ;;  %14590 = vmatmul.mubr.bf16.gmra.mxu0 %v19413_v5  ;;  %14316 = vmatprep.mubr.bf16.mxu1 %v19418_v19  ;;  %v19427_v5 = vld [vmem:[#allocation3 + $0x76c] ss:$36 sps:$4 sm:$0xff]  }
 0x515   :  { %v21301_v56 = vadd.f32 %v14399_v29, %v14111_v31  ;;  %14597 = vmatprep.mubr.bf16.mxu0 %v19421_v50  ;;  %v14120_v8 = vpop.f32.mrf.mxu1 }
 0x516   :  { %v14401_v13 = vpop.f32.mrf.mxu0  ;;  %v19422_v8 = vld [vmem:[#allocation3 + $0x7a8] ss:$36 sps:$4 sm:$0xff]  }
 0x517   :  { %v14121_v7 = vpop.f32.mrf.mxu1 }
 0x518   :  { %v14122_v44 = vadd.f32 %v14121_v7, %v21035_v10  ;;  %v14402_v6 = vpop.f32.mrf.mxu0 }
 0x519   :  { %v21304_v36 = vadd.f32 %v14402_v6, %v14114_v32  ;;  %v14123_v42 = vpop.f32.mrf.mxu1  ;;  %v19425_v6 = vld [vmem:[#allocation3 + $0x768] ss:$36 sps:$4 sm:$0xff]  }
 0x51a   :  { %v14404_v55 = vpop.f32.mrf.mxu0  ;;  %v19430_v42 = vld [vmem:[#allocation3 + $0x7f4] ss:$36 sps:$4 sm:$0xff]  }
 0x51b   :  { %v14126_v26 = vpop.f32.mrf.mxu1  ;;  %14317 = vmatmul.mubr.bf16.gmra.mxu1 %v19416_v53 }
 0x51c   :  { %v14127_v31 = vadd.f32 %v14126_v26, %v21041_v25  ;;  %v14407_v12 = vpop.f32.mrf.mxu0  ;;  %14598 = vmatmul.mubr.bf16.gmra.mxu0 %v19419_v40  ;;  %14324 = vmatprep.mubr.bf16.mxu1 %v19424_v51  ;;  %v19433_v40 = vld [vmem:[#allocation3 + $0x7b4] ss:$36 sps:$4 sm:$0xff]  }
 0x51d   :  { %v21307_v19 = vadd.f32 %v14407_v12, %v14119_v11  ;;  %14605 = vmatprep.mubr.bf16.mxu0 %v19427_v5  ;;  %v14128_v10 = vpop.f32.mrf.mxu1 }
 0x51e   :  { %v14409_v34 = vpop.f32.mrf.mxu0  ;;  %v19428_v10 = vld [vmem:[#allocation3 + $0x7f0] ss:$36 sps:$4 sm:$0xff]  }
 0x51f   :  { %v14129_v50 = vpop.f32.mrf.mxu1 }
 0x520   :  { %v14130_v32 = vadd.f32 %v14129_v50, %v21045_v23  ;;  %v14410_v29 = vpop.f32.mrf.mxu0 }
 0x521   :  { %v21310_v13 = vadd.f32 %v14410_v29, %v14122_v44  ;;  %v14131_v7 = vpop.f32.mrf.mxu1  ;;  %v19431_v29 = vld [vmem:[#allocation3 + $0x7b0] ss:$36 sps:$4 sm:$0xff]  }
 0x522   :  { %v14412_v53 = vpop.f32.mrf.mxu0  ;;  %v19437_v7 = vld [vmem:[#allocation3 + $0x83c] ss:$36 sps:$4 sm:$0xff]  }
 0x523   :  { %v14134_v25 = vpop.f32.mrf.mxu1  ;;  %14325 = vmatmul.mubr.bf16.gmra.mxu1 %v19422_v8 }
 0x524   :  { %v14135_v11 = vadd.f32 %v14134_v25, %v21049_v4  ;;  %v14415_v55 = vpop.f32.mrf.mxu0  ;;  %14606 = vmatmul.mubr.bf16.gmra.mxu0 %v19425_v6  ;;  %14332 = vmatprep.mubr.bf16.mxu1 %v19430_v42  ;;  %v19440_v6 = vld [vmem:[#allocation3 + $0x7fc] ss:$36 sps:$4 sm:$0xff]  }
 0x525   :  { %v21313_v51 = vadd.f32 %v14415_v55, %v14127_v31  ;;  %14613 = vmatprep.mubr.bf16.mxu0 %v19433_v40  ;;  %v14136_v23 = vpop.f32.mrf.mxu1 }
 0x526   :  { %v14417_v26 = vpop.f32.mrf.mxu0  ;;  %v19435_v23 = vld [vmem:[#allocation3 + $0x838] ss:$36 sps:$4 sm:$0xff]  }
 0x527   :  { %v14137_v5 = vpop.f32.mrf.mxu1 }
 0x528   :  { %v14138_v44 = vadd.f32 %v14137_v5, %v21052_v58  ;;  %v14418_v12 = vpop.f32.mrf.mxu0 }
 0x529   :  { %v21316_v34 = vadd.f32 %v14418_v12, %v14130_v32  ;;  %v14139_v50 = vpop.f32.mrf.mxu1  ;;  %v19438_v12 = vld [vmem:[#allocation3 + $0x7f8] ss:$36 sps:$4 sm:$0xff]  }
 0x52a   :  { %v14420_v8 = vpop.f32.mrf.mxu0  ;;  %v19443_v50 = vld [vmem:[#allocation3 + $0x884] ss:$36 sps:$4 sm:$0xff]  }
 0x52b   :  { %v14142_v4 = vpop.f32.mrf.mxu1  ;;  %14333 = vmatmul.mubr.bf16.gmra.mxu1 %v19428_v10 }
 0x52c   :  { %v14143_v31 = vadd.f32 %v14142_v4, %v21057_v1  ;;  %v14423_v53 = vpop.f32.mrf.mxu0  ;;  %14614 = vmatmul.mubr.bf16.gmra.mxu0 %v19431_v29  ;;  %14340 = vmatprep.mubr.bf16.mxu1 %v19437_v7  ;;  %v19446_v29 = vld [vmem:[#allocation3 + $0x844] ss:$36 sps:$4 sm:$0xff]  }
 0x52d   :  { %v21319_v42 = vadd.f32 %v14423_v53, %v14135_v11  ;;  %14621 = vmatprep.mubr.bf16.mxu0 %v19440_v6  ;;  %v14144_v58 = vpop.f32.mrf.mxu1 }
 0x52e   :  { %v14425_v25 = vpop.f32.mrf.mxu0  ;;  %v19441_v58 = vld [vmem:[#allocation3 + $0x880] ss:$36 sps:$4 sm:$0xff]  }
 0x52f   :  { %v14145_v40 = vpop.f32.mrf.mxu1 }
 0x530   :  { %v14146_v32 = vadd.f32 %v14145_v40, %v21062_v49  ;;  %v14426_v55 = vpop.f32.mrf.mxu0 }
 0x531   :  { %v21322_v26 = vadd.f32 %v14426_v55, %v14138_v44  ;;  %v14147_v5 = vpop.f32.mrf.mxu1  ;;  %v19444_v55 = vld [vmem:[#allocation3 + $0x840] ss:$36 sps:$4 sm:$0xff]  }
 0x532   :  { %v14428_v10 = vpop.f32.mrf.mxu0  ;;  %v19449_v5 = vld [vmem:[#allocation3 + $0x8cc] ss:$36 sps:$4 sm:$0xff]  }
 0x533   :  { %v14150_v1 = vpop.f32.mrf.mxu1  ;;  %14341 = vmatmul.mubr.bf16.gmra.mxu1 %v19435_v23 }
 0x534   :  { %v14151_v11 = vadd.f32 %v14150_v1, %v21068_v59  ;;  %v14431_v8 = vpop.f32.mrf.mxu0  ;;  %14622 = vmatmul.mubr.bf16.gmra.mxu0 %v19438_v12  ;;  %14348 = vmatprep.mubr.bf16.mxu1 %v19443_v50  ;;  %v19452_v12 = vld [vmem:[#allocation3 + $0x88c] ss:$36 sps:$4 sm:$0xff]  }
 0x535   :  { %v21325_v7 = vadd.f32 %v14431_v8, %v14143_v31  ;;  %14629 = vmatprep.mubr.bf16.mxu0 %v19446_v29  ;;  %v14152_v49 = vpop.f32.mrf.mxu1 }
 0x536   :  { %v14433_v4 = vpop.f32.mrf.mxu0  ;;  %v19447_v49 = vld [vmem:[#allocation3 + $0x8c8] ss:$36 sps:$4 sm:$0xff]  }
 0x537   :  { %v14153_v6 = vpop.f32.mrf.mxu1 }
 0x538   :  { %v14154_v44 = vadd.f32 %v14153_v6, %v21072_v0  ;;  %v14434_v53 = vpop.f32.mrf.mxu0 }
 0x539   :  { %v21328_v25 = vadd.f32 %v14434_v53, %v14146_v32  ;;  %v14155_v40 = vpop.f32.mrf.mxu1  ;;  %v19456_v53 = vld [vmem:[#allocation3 + $0x8d4] ss:$36 sps:$4 sm:$0xff]  }
 0x53a   :  { %v14436_v23 = vpop.f32.mrf.mxu0 }
 0x53b   :  { %v14158_v59 = vpop.f32.mrf.mxu1  ;;  %14349 = vmatmul.mubr.bf16.gmra.mxu1 %v19441_v58  ;;  %v19450_v58 = vld [vmem:[#allocation3 + $0x888] ss:$36 sps:$4 sm:$0xff]  }
 0x53c   :  { %v14159_v31 = vadd.f32 %v14158_v59, %v21076_v63  ;;  %v14439_v10 = vpop.f32.mrf.mxu0  ;;  %14630 = vmatmul.mubr.bf16.gmra.mxu0 %v19444_v55  ;;  %14356 = vmatprep.mubr.bf16.mxu1 %v19449_v5  ;;  %v19453_v63 = vld [vmem:[#allocation3 + $0x20] ss:$36 sps:$4 sm:$0xff]  }
 0x53d   :  { %v21331_v50 = vadd.f32 %v14439_v10, %v14151_v11  ;;  %14637 = vmatprep.mubr.bf16.mxu0 %v19452_v12  ;;  %v14160_v0 = vpop.f32.mrf.mxu1 }
 0x53e   :  { %v14441_v1 = vpop.f32.mrf.mxu0  ;;  %v19454_v0 = vld [vmem:[#allocation3 + $0x8d0] ss:$36 sps:$4 sm:$0xff]  }
 0x53f   :  { %v14161_v29 = vpop.f32.mrf.mxu1 }
 0x540   :  { %v14162_v32 = vadd.f32 %v14161_v29, %v21079_v47  ;;  %v14442_v8 = vpop.f32.mrf.mxu0 }
 0x541   :  { %v21334_v4 = vadd.f32 %v14442_v8, %v14154_v44  ;;  %v14163_v6 = vpop.f32.mrf.mxu1  ;;  %v19457_v8 = vld [vmem:[#allocation3 + $0x68] ss:$36 sps:$4 sm:$0xff]  }
 0x542   :  { %v14444_v40 = vpop.f32.mrf.mxu0  ;;  %v19458_v6 = vld [vmem:[#allocation3 + $0xb0] ss:$36 sps:$4 sm:$0xff]  }
 0x543   :  { %v14166_v23 = vpop.f32.mrf.mxu1  ;;  %14357 = vmatmul.mubr.bf16.gmra.mxu1 %v19447_v49 }
 0x544   :  { %v14167_v11 = vadd.f32 %v14166_v23, %v21087_v62  ;;  %v14447_v55 = vpop.f32.mrf.mxu0  ;;  %14638 = vmatmul.mubr.bf16.gmra.mxu0 %v19450_v58  ;;  %18449 = vmatprep.mubr.bf16.mxu1 %v19453_v63 }
 0x545   :  { %v21337_v5 = vadd.f32 %v14447_v55, %v14159_v31  ;;  %v14168_v59 = vpop.f32.mrf.mxu1  ;;  %14645 = vmatprep.mubr.bf16.mxu0 %v19456_v53 }
 0x546   :  { %v14449_v47 = vpop.f32.mrf.mxu0 }
 0x547   :  { %v14169_v12 = vpop.f32.mrf.mxu1  ;;  %v19459_v47 = vld [vmem:[#allocation3 + $0xf8] ss:$36 sps:$4 sm:$0xff]  }
 0x548   :  { %v14170_v44 = vadd.f32 %v14169_v12, %v21103_v41  ;;  %v14450_v10 = vpop.f32.mrf.mxu0 }
 0x549   :  { %v21340_v1 = vadd.f32 %v14450_v10, %v14162_v32  ;;  %v14171_v29 = vpop.f32.mrf.mxu1  ;;  %v19460_v10 = vld [vmem:[#allocation3 + $0x140] ss:$36 sps:$4 sm:$0xff]  }
 0x54a   :  { %v14452_v49 = vpop.f32.mrf.mxu0 }
 0x54b   :  { %v14174_v62 = vpop.f32.mrf.mxu1  ;;  %18450 = vmatmul.mubr.bf16.vlgmr.msra.gmra.mxu1 %v19457_v8 }
 0x54c   :  { %v14175_v58 = vadd.f32 %v14174_v62, %v21116_v14  ;;  %v14455_v31 = vpop.f32.mrf.mxu0  ;;  %14646 = vmatmul.mubr.bf16.gmra.mxu0 %v19454_v0  ;;  %18453 = vmatprep.mubr.bf16.mxu1 %v19458_v6 }
 0x54d   :  { %v21343_v53 = vadd.f32 %v14455_v31, %v14167_v11  ;;  %v14176_v40 = vpop.f32.mrf.mxu1 }
 0x54e   :  { %v14457_v63 = vpop.f32.mrf.mxu0  ;;  %v19461_v40 = vld [vmem:[#allocation3 + $0x188] ss:$36 sps:$4 sm:$0xff]  }
 0x54f   :  { %v14177_v41 = vpop.f32.mrf.mxu1 }
 0x550   :  { %v14178_v23 = vadd.f32 %v14177_v41, %v21120_v57  ;;  %v14458_v32 = vpop.f32.mrf.mxu0  ;;  %v19462_v41 = vld [vmem:[#allocation3 + $0x1d0] ss:$36 sps:$4 sm:$0xff]  }
 0x551   :  { %v21346_v55 = vadd.f32 %v14458_v32, %v14170_v44  ;;  %v14179_v59 = vpop.f32.mrf.mxu1 }
 0x552   :  { %v14460_v12 = vpop.f32.mrf.mxu0 }
 0x553   :  { %v14182_v29 = vpop.f32.mrf.mxu1  ;;  %18454 = vmatmul.mubr.bf16.gmra.mxu1 %v19459_v47 }
 0x554   :  { %v14183_v14 = vadd.f32 %v14182_v29, %v21131_v54  ;;  %v14463_v0 = vpop.f32.mrf.mxu0  ;;  %18457 = vmatprep.mubr.bf16.mxu1 %v19460_v10 }
 0x555   :  { %v21349_v11 = vadd.f32 %v14463_v0, %v14175_v58  ;;  %v14184_v8 = vpop.f32.mrf.mxu1 }
 0x556   :  { %v14465_v49 = vpop.f32.mrf.mxu0  ;;  %v19463_v8 = vld [vmem:[#allocation3 + $0x218] ss:$36 sps:$4 sm:$0xff]  }
 0x557   :  { %v14185_v6 = vpop.f32.mrf.mxu1 }
 0x558   :  { %v14186_v57 = vadd.f32 %v14185_v6, %v21135_v38  ;;  %v14466_v62 = vpop.f32.mrf.mxu0  ;;  %v19464_v6 = vld [vmem:[#allocation3 + $0x260] ss:$36 sps:$4 sm:$0xff]  }
 0x559   :  { %v21352_v44 = vadd.f32 %v14466_v62, %v14178_v23  ;;  %v14187_v31 = vpop.f32.mrf.mxu1 }
 0x55a   :  { %v14468_v63 = vpop.f32.mrf.mxu0 }
 0x55b   :  { %v14190_v32 = vpop.f32.mrf.mxu1  ;;  %18458 = vmatmul.mubr.bf16.gmra.mxu1 %v19461_v40 }
 0x55c   :  { %v14191_v54 = vadd.f32 %v14190_v32, %v21140_v9  ;;  %v14471_v59 = vpop.f32.mrf.mxu0  ;;  %18461 = vmatprep.mubr.bf16.mxu1 %v19462_v41 }
 0x55d   :  { %v21355_v58 = vadd.f32 %v14471_v59, %v14183_v14  ;;  %v14192_v47 = vpop.f32.mrf.mxu1 }
 0x55e   :  { %v14473_v12 = vpop.f32.mrf.mxu0  ;;  %v19465_v47 = vld [vmem:[#allocation3 + $0x2a8] ss:$36 sps:$4 sm:$0xff]  }
 0x55f   :  { %v14193_v10 = vpop.f32.mrf.mxu1 }
 0x560   :  { %v14194_v38 = vadd.f32 %v14193_v10, %v21145_v16  ;;  %v14474_v29 = vpop.f32.mrf.mxu0  ;;  %v19466_v10 = vld [vmem:[#allocation3 + $0x2f0] ss:$36 sps:$4 sm:$0xff]  }
 0x561   :  { %v21358_v23 = vadd.f32 %v14474_v29, %v14186_v57  ;;  %v14195_v0 = vpop.f32.mrf.mxu1 }
 0x562   :  { %v14476_v49 = vpop.f32.mrf.mxu0 }
 0x563   :  { %v14198_v62 = vpop.f32.mrf.mxu1  ;;  %18462 = vmatmul.mubr.bf16.gmra.mxu1 %v19463_v8 }
 0x564   :  { %v14199_v9 = vadd.f32 %v14198_v62, %v21151_v2  ;;  %v14479_v31 = vpop.f32.mrf.mxu0  ;;  %18465 = vmatprep.mubr.bf16.mxu1 %v19464_v6 }
 0x565   :  { %v21361_v14 = vadd.f32 %v14479_v31, %v14191_v54  ;;  %v14200_v40 = vpop.f32.mrf.mxu1 }
 0x566   :  { %v14481_v63 = vpop.f32.mrf.mxu0  ;;  %v19467_v40 = vld [vmem:[#allocation3 + $0x338] ss:$36 sps:$4 sm:$0xff]  }
 0x567   :  { %v14201_v41 = vpop.f32.mrf.mxu1 }
 0x568   :  { %v14202_v16 = vadd.f32 %v14201_v41, %v21158_v52  ;;  %v14482_v32 = vpop.f32.mrf.mxu0  ;;  %v19468_v41 = vld [vmem:[#allocation3 + $0x380] ss:$36 sps:$4 sm:$0xff]  }
 0x569   :  { %v21364_v57 = vadd.f32 %v14482_v32, %v14194_v38  ;;  %v14203_v59 = vpop.f32.mrf.mxu1 }
 0x56a   :  { %v14484_v12 = vpop.f32.mrf.mxu0 }
 0x56b   :  { %v14206_v29 = vpop.f32.mrf.mxu1  ;;  %18466 = vmatmul.mubr.bf16.gmra.mxu1 %v19465_v47 }
 0x56c   :  { %v14207_v2 = vadd.f32 %v14206_v29, %v21162_v20  ;;  %v14487_v0 = vpop.f32.mrf.mxu0  ;;  %18469 = vmatprep.mubr.bf16.mxu1 %v19466_v10 }
 0x56d   :  { %v21367_v54 = vadd.f32 %v14487_v0, %v14199_v9  ;;  %v14208_v8 = vpop.f32.mrf.mxu1 }
 0x56e   :  { %v14489_v49 = vpop.f32.mrf.mxu0  ;;  %v19469_v8 = vld [vmem:[#allocation3 + $0x3c8] ss:$36 sps:$4 sm:$0xff]  }
 0x56f   :  { %v14209_v6 = vpop.f32.mrf.mxu1 }
 0x570   :  { %v14210_v52 = vadd.f32 %v14209_v6, %v21165_v45  ;;  %v14490_v62 = vpop.f32.mrf.mxu0  ;;  %v19470_v6 = vld [vmem:[#allocation3 + $0x410] ss:$36 sps:$4 sm:$0xff]  }
 0x571   :  { %v21370_v38 = vadd.f32 %v14490_v62, %v14202_v16  ;;  %v14211_v31 = vpop.f32.mrf.mxu1 }
 0x572   :  { %v14492_v63 = vpop.f32.mrf.mxu0 }
 0x573   :  { %v14214_v32 = vpop.f32.mrf.mxu1  ;;  %18470 = vmatmul.mubr.bf16.gmra.mxu1 %v19467_v40 }
 0x574   :  { %v14215_v20 = vadd.f32 %v14214_v32, %v21168_v15  ;;  %v14495_v59 = vpop.f32.mrf.mxu0  ;;  %18473 = vmatprep.mubr.bf16.mxu1 %v19468_v41  ;;  %v19471_v32 = vld [vmem:[#allocation3 + $0x458] ss:$36 sps:$4 sm:$0xff]  }
 0x575   :  { %v21373_v9 = vadd.f32 %v14495_v59, %v14207_v2  ;;  %v14216_v47 = vpop.f32.mrf.mxu1 }
 0x576   :  { %v14497_v12 = vpop.f32.mrf.mxu0 }
 0x577   :  { %v14217_v10 = vpop.f32.mrf.mxu1 }
 0x578   :  { %v14218_v45 = vadd.f32 %v14217_v10, %v21173_v24  ;;  %v14498_v29 = vpop.f32.mrf.mxu0  ;;  %v19472_v10 = vld [vmem:[#allocation3 + $0x4a0] ss:$36 sps:$4 sm:$0xff]  }
 0x579   :  { %v21376_v16 = vadd.f32 %v14498_v29, %v14210_v52  ;;  %v14219_v0 = vpop.f32.mrf.mxu1 }
 0x57a   :  { %v14500_v49 = vpop.f32.mrf.mxu0 }
 0x57b   :  { %v14222_v62 = vpop.f32.mrf.mxu1  ;;  %18474 = vmatmul.mubr.bf16.gmra.mxu1 %v19469_v8 }
 0x57c   :  { %v14223_v15 = vadd.f32 %v14222_v62, %v21178_v60  ;;  %v14503_v31 = vpop.f32.mrf.mxu0  ;;  %18477 = vmatprep.mubr.bf16.mxu1 %v19470_v6 }
 0x57d   :  { %v21379_v2 = vadd.f32 %v14503_v31, %v14215_v20  ;;  %v14224_v40 = vpop.f32.mrf.mxu1 }
 0x57e   :  { %v14505_v63 = vpop.f32.mrf.mxu0  ;;  %v19473_v40 = vld [vmem:[#allocation3 + $0x4e8] ss:$36 sps:$4 sm:$0xff]  }
 0x57f   :  { %v14225_v41 = vpop.f32.mrf.mxu1 }
 0x580   :  { %v14226_v24 = vadd.f32 %v14225_v41, %v21182_v48  ;;  %v14506_v52 = vpop.f32.mrf.mxu0  ;;  %v19474_v41 = vld [vmem:[#allocation3 + $0x530] ss:$36 sps:$4 sm:$0xff]  }
 0x581   :  { %v21382_v59 = vadd.f32 %v14506_v52, %v14218_v45  ;;  %v14227_v47 = vpop.f32.mrf.mxu1 }
 0x582   :  { %v14508_v12 = vpop.f32.mrf.mxu0 }
 0x583   :  { %v14230_v29 = vpop.f32.mrf.mxu1  ;;  %18478 = vmatmul.mubr.bf16.gmra.mxu1 %v19471_v32 }
 0x584   :  { %v14231_v60 = vadd.f32 %v14230_v29, %v21186_v21  ;;  %v14511_v0 = vpop.f32.mrf.mxu0  ;;  %18481 = vmatprep.mubr.bf16.mxu1 %v19472_v10 }
 0x585   :  { %v21385_v20 = vadd.f32 %v14511_v0, %v14223_v15  ;;  %v14232_v8 = vpop.f32.mrf.mxu1 }
 0x586   :  { %v14513_v49 = vpop.f32.mrf.mxu0  ;;  %v19475_v8 = vld [vmem:[#allocation3 + $0x578] ss:$36 sps:$4 sm:$0xff]  }
 0x587   :  { %v14233_v6 = vpop.f32.mrf.mxu1 }
 0x588   :  { %v14234_v62 = vadd.f32 %v14233_v6, %v21192_v43  ;;  %v14514_v48 = vpop.f32.mrf.mxu0  ;;  %v19476_v6 = vld [vmem:[#allocation3 + $0x5c0] ss:$36 sps:$4 sm:$0xff]  }
 0x589   :  { %v21388_v31 = vadd.f32 %v14514_v48, %v14226_v24  ;;  %v14235_v45 = vpop.f32.mrf.mxu1 }
 0x58a   :  { %v14516_v63 = vpop.f32.mrf.mxu0 }
 0x58b   :  { %v14238_v52 = vpop.f32.mrf.mxu1  ;;  %18482 = vmatmul.mubr.bf16.gmra.mxu1 %v19473_v40 }
 0x58c   :  { %v14239_v21 = vadd.f32 %v14238_v52, %v21195_v17  ;;  %v14519_v32 = vpop.f32.mrf.mxu0  ;;  %18485 = vmatprep.mubr.bf16.mxu1 %v19474_v41 }
 0x58d   :  { %v21391_v15 = vadd.f32 %v14519_v32, %v14231_v60  ;;  %v14240_v47 = vpop.f32.mrf.mxu1 }
 0x58e   :  { %v14521_v12 = vpop.f32.mrf.mxu0  ;;  %v19477_v47 = vld [vmem:[#allocation3 + $0x608] ss:$36 sps:$4 sm:$0xff]  }
 0x58f   :  { %v14241_v10 = vpop.f32.mrf.mxu1 }
 0x590   :  { %v14242_v43 = vadd.f32 %v14241_v10, %v21198_v61  ;;  %v14522_v29 = vpop.f32.mrf.mxu0  ;;  %v19478_v10 = vld [vmem:[#allocation3 + $0x650] ss:$36 sps:$4 sm:$0xff]  }
 0x591   :  { %v21394_v24 = vadd.f32 %v14522_v29, %v14234_v62  ;;  %v14243_v0 = vpop.f32.mrf.mxu1 }
 0x592   :  { %v14524_v49 = vpop.f32.mrf.mxu0 }
 0x593   :  { %v14246_v48 = vpop.f32.mrf.mxu1  ;;  %18486 = vmatmul.mubr.bf16.gmra.mxu1 %v19475_v8 }
 0x594   :  { %v14247_v17 = vadd.f32 %v14246_v48, %v21201_v3  ;;  %v14527_v45 = vpop.f32.mrf.mxu0  ;;  %18489 = vmatprep.mubr.bf16.mxu1 %v19476_v6 }
 0x595   :  { %v21397_v60 = vadd.f32 %v14527_v45, %v14239_v21  ;;  %v14248_v40 = vpop.f32.mrf.mxu1 }
 0x596   :  { %v14529_v63 = vpop.f32.mrf.mxu0  ;;  %v19479_v40 = vld [vmem:[#allocation3 + $0x698] ss:$36 sps:$4 sm:$0xff]  }
 0x597   :  { %v14249_v41 = vpop.f32.mrf.mxu1 }
 0x598   :  { %v14250_v61 = vadd.f32 %v14249_v41, %v21204_v28  ;;  %v14530_v52 = vpop.f32.mrf.mxu0  ;;  %v19480_v41 = vld [vmem:[#allocation3 + $0x6e0] ss:$36 sps:$4 sm:$0xff]  }
 0x599   :  { %v21400_v62 = vadd.f32 %v14530_v52, %v14242_v43  ;;  %v14251_v32 = vpop.f32.mrf.mxu1 }
 0x59a   :  { %v14532_v12 = vpop.f32.mrf.mxu0 }
 0x59b   :  { %v14254_v29 = vpop.f32.mrf.mxu1  ;;  %18490 = vmatmul.mubr.bf16.gmra.mxu1 %v19477_v47 }
 0x59c   :  { %v14255_v3 = vadd.f32 %v14254_v29, %v21207_v30  ;;  %v14535_v0 = vpop.f32.mrf.mxu0  ;;  %18493 = vmatprep.mubr.bf16.mxu1 %v19478_v10 }
 0x59d   :  { %v21403_v21 = vadd.f32 %v14535_v0, %v14247_v17  ;;  %v14256_v8 = vpop.f32.mrf.mxu1 }
 0x59e   :  { %v14537_v49 = vpop.f32.mrf.mxu0  ;;  %v19481_v8 = vld [vmem:[#allocation3 + $0x728] ss:$36 sps:$4 sm:$0xff]  }
 0x59f   :  { %v14257_v6 = vpop.f32.mrf.mxu1 }
 0x5a0   :  { %v14258_v28 = vadd.f32 %v14257_v6, %v21210_v35  ;;  %v14538_v48 = vpop.f32.mrf.mxu0  ;;  %v19482_v6 = vld [vmem:[#allocation3 + $0x770] ss:$36 sps:$4 sm:$0xff]  }
 0x5a1   :  { %v21406_v43 = vadd.f32 %v14538_v48, %v14250_v61  ;;  %v14259_v45 = vpop.f32.mrf.mxu1 }
 0x5a2   :  { %v14540_v63 = vpop.f32.mrf.mxu0 }
 0x5a3   :  { %v14262_v52 = vpop.f32.mrf.mxu1  ;;  %18494 = vmatmul.mubr.bf16.gmra.mxu1 %v19479_v40 }
 0x5a4   :  { %v14263_v30 = vadd.f32 %v14262_v52, %v21213_v27  ;;  %v14543_v32 = vpop.f32.mrf.mxu0  ;;  %18497 = vmatprep.mubr.bf16.mxu1 %v19480_v41 }
 0x5a5   :  { %v21409_v17 = vadd.f32 %v14543_v32, %v14255_v3  ;;  %v14264_v47 = vpop.f32.mrf.mxu1 }
 0x5a6   :  { %v14545_v12 = vpop.f32.mrf.mxu0  ;;  %v19483_v47 = vld [vmem:[#allocation3 + $0x7b8] ss:$36 sps:$4 sm:$0xff]  }
 0x5a7   :  { %v14265_v10 = vpop.f32.mrf.mxu1 }
 0x5a8   :  { %v14266_v35 = vadd.f32 %v14265_v10, %v21219_v37  ;;  %v14546_v29 = vpop.f32.mrf.mxu0  ;;  %v19484_v10 = vld [vmem:[#allocation3 + $0x800] ss:$36 sps:$4 sm:$0xff]  }
 0x5a9   :  { %v21412_v61 = vadd.f32 %v14546_v29, %v14258_v28  ;;  %v14267_v0 = vpop.f32.mrf.mxu1 }
 0x5aa   :  { %v14548_v49 = vpop.f32.mrf.mxu0 }
 0x5ab   :  { %v14270_v48 = vpop.f32.mrf.mxu1  ;;  %18498 = vmatmul.mubr.bf16.gmra.mxu1 %v19481_v8 }
 0x5ac   :  { %v14271_v27 = vadd.f32 %v14270_v48, %v21222_v18  ;;  %v14551_v45 = vpop.f32.mrf.mxu0  ;;  %18501 = vmatprep.mubr.bf16.mxu1 %v19482_v6  ;;  %v21786_v48 = vld [vmem:[#allocation25_spill] sm:$0xff] }
 0x5ad   :  { %v21415_v3 = vadd.f32 %v14551_v45, %v14263_v30  ;;  %v14272_v40 = vpop.f32.mrf.mxu1 }
 0x5ae   :  { %v14553_v63 = vpop.f32.mrf.mxu0 }
 0x5af   :  { %v14273_v41 = vpop.f32.mrf.mxu1  ;;  %v19485_v63 = vld [vmem:[#allocation3 + $0x848] ss:$36 sps:$4 sm:$0xff]  }
 0x5b0   :  { %v14274_v37 = vadd.f32 %v14273_v41, %v21225_v39  ;;  %v14554_v52 = vpop.f32.mrf.mxu0 }
 0x5b1   :  { %v21418_v28 = vadd.f32 %v14554_v52, %v14266_v35  ;;  %v14275_v32 = vpop.f32.mrf.mxu1  ;;  %v19486_v52 = vld [vmem:[#allocation3 + $0x890] ss:$36 sps:$4 sm:$0xff]  }
 0x5b2   :  { %v14556_v12 = vpop.f32.mrf.mxu0 }
 0x5b3   :  { %v14278_v29 = vpop.f32.mrf.mxu1  ;;  %18502 = vmatmul.mubr.bf16.gmra.mxu1 %v19483_v47  ;;  %v21788_v47 = vld [vmem:[#allocation26_spill] sm:$0xff] }
 0x5b4   :  { %v14279_v18 = vadd.f32 %v14278_v29, %v21233_v33  ;;  %v14559_v0 = vpop.f32.mrf.mxu0  ;;  %18505 = vmatprep.mubr.bf16.mxu1 %v19484_v10 }
 0x5b5   :  { %v21421_v30 = vadd.f32 %v14559_v0, %v14271_v27  ;;  %v14280_v8 = vpop.f32.mrf.mxu1 }
 0x5b6   :  { %v14561_v49 = vpop.f32.mrf.mxu0  ;;  %v19487_v8 = vld [vmem:[#allocation3 + $0x8d8] ss:$36 sps:$4 sm:$0xff]  }
 0x5b7   :  { %21785 = vst [vmem:[#allocation23_spill] sm:$0xff] %v21421_v30  ;;  %v14281_v6 = vpop.f32.mrf.mxu1  ;;  %v21790_v49 = vld [vmem:[#allocation27_spill] sm:$0xff] }
 0x5b8   :  { %v14282_v39 = vadd.f32 %v14281_v6, %v21786_v48  ;;  %v14562_v45 = vpop.f32.mrf.mxu0 }
 0x5b9   :  { %v21424_v35 = vadd.f32 %v14562_v45, %v14274_v37  ;;  %v14283_v40 = vpop.f32.mrf.mxu1 }
 0x5ba   :  { %v14564_v41 = vpop.f32.mrf.mxu0 }
 0x5bb   :  { %21787 = vst [vmem:[#allocation21_spill] sm:$0xff] %v21424_v35  ;;  %v14286_v32 = vpop.f32.mrf.mxu1  ;;  %18506 = vmatmul.mubr.bf16.gmra.mxu1 %v19485_v63  ;;  %v21791_v63 = vld [vmem:[#allocation28_spill] sm:$0xff] }
 0x5bc   :  { %v14287_v33 = vadd.f32 %v14286_v32, %v21788_v47  ;;  %v14567_v12 = vpop.f32.mrf.mxu0  ;;  %18509 = vmatprep.mubr.bf16.mxu1 %v19486_v52 }
 0x5bd   :  { %v21427_v27 = vadd.f32 %v14567_v12, %v14279_v18  ;;  %v14288_v10 = vpop.f32.mrf.mxu1 }
 0x5be   :  { %v14569_v29 = vpop.f32.mrf.mxu0  ;;  %v21793_v10 = vld [vmem:[#allocation9_spill] sm:$0xff] }
 0x5bf   :  { %21789 = vst [vmem:[#allocation24_spill] sm:$0xff] %v21427_v27  ;;  %v14289_v0 = vpop.f32.mrf.mxu1 }
 0x5c0   :  { %v14290_v6 = vadd.f32 %v14289_v0, %v21790_v49  ;;  %v14570_v37 = vpop.f32.mrf.mxu0 }
 0x5c1   :  { %v21430_v48 = vadd.f32 %v14570_v37, %v14282_v39  ;;  %v14291_v45 = vpop.f32.mrf.mxu1  ;;  %v21795_v37 = vld [vmem:[#allocation7_spill] sm:$0xff] }
 0x5c2   :  { %v14572_v40 = vpop.f32.mrf.mxu0 }
 0x5c3   :  { %v14294_v41 = vpop.f32.mrf.mxu1  ;;  %18510 = vmatmul.mubr.bf16.gmra.mxu1 %v19487_v8 }
 0x5c4   :  { %v14295_v35 = vadd.f32 %v14294_v41, %v21791_v63  ;;  %v14575_v32 = vpop.f32.mrf.mxu0 }
 0x5c5   :  { %v21433_v47 = vadd.f32 %v14575_v32, %v14287_v33  ;;  %v14296_v18 = vpop.f32.mrf.mxu1  ;;  %v21797_v32 = vld [vmem:[#allocation10_spill] sm:$0xff] }
 0x5c6   :  { %v14577_v52 = vpop.f32.mrf.mxu0 }
 0x5c7   :  { %21792 = vst [vmem:[#allocation25_spill] sm:$0xff] %v21433_v47  ;;  %v14297_v12 = vpop.f32.mrf.mxu1 }
 0x5c8   :  { %v14298_v29 = vadd.f32 %v14297_v12, %v21793_v10  ;;  %v14578_v27 = vpop.f32.mrf.mxu0 }
 0x5c9   :  { %v21436_v30 = vadd.f32 %v14578_v27, %v14290_v6  ;;  %v14299_v0 = vpop.f32.mrf.mxu1  ;;  %v21799_v6 = vld [vmem:[#allocation8_spill] sm:$0xff] }
 0x5ca   :  { %v14580_v39 = vpop.f32.mrf.mxu0 }
 0x5cb   :  { %21794 = vst [vmem:[#allocation26_spill] sm:$0xff] %v21436_v30  ;;  %v14302_v49 = vpop.f32.mrf.mxu1 }
 0x5cc   :  { %v14303_v45 = vadd.f32 %v14302_v49, %v21795_v37  ;;  %v14583_v40 = vpop.f32.mrf.mxu0 }
 0x5cd   :  { %v21439_v8 = vadd.f32 %v14583_v40, %v14295_v35  ;;  %v14304_v41 = vpop.f32.mrf.mxu1  ;;  %v21801_v40 = vld [vmem:[#allocation11_spill] sm:$0xff] }
 0x5ce   :  { %v14585_v63 = vpop.f32.mrf.mxu0 }
 0x5cf   :  { %21796 = vst [vmem:[#allocation27_spill] sm:$0xff] %v21439_v8  ;;  %v14305_v33 = vpop.f32.mrf.mxu1 }
 0x5d0   :  { %v14306_v18 = vadd.f32 %v14305_v33, %v21797_v32  ;;  %v14586_v52 = vpop.f32.mrf.mxu0 }
 0x5d1   :  { %v21442_v47 = vadd.f32 %v14586_v52, %v14298_v29  ;;  %v14307_v12 = vpop.f32.mrf.mxu1  ;;  %v21803_v52 = vld [vmem:[#allocation14_spill] sm:$0xff] }
 0x5d2   :  { %v14588_v10 = vpop.f32.mrf.mxu0 }
 0x5d3   :  { %21798 = vst [vmem:[#allocation28_spill] sm:$0xff] %v21442_v47  ;;  %v14310_v27 = vpop.f32.mrf.mxu1 }
 0x5d4   :  { %v14311_v0 = vadd.f32 %v14310_v27, %v21799_v6  ;;  %v14591_v39 = vpop.f32.mrf.mxu0 }
 0x5d5   :  { %v21445_v30 = vadd.f32 %v14591_v39, %v14303_v45  ;;  %v14312_v49 = vpop.f32.mrf.mxu1  ;;  %v21805_v39 = vld [vmem:[#allocation12_spill] sm:$0xff] }
 0x5d6   :  { %v14593_v37 = vpop.f32.mrf.mxu0 }
 0x5d7   :  { %21800 = vst [vmem:[#allocation9_spill] sm:$0xff] %v21445_v30  ;;  %v14313_v35 = vpop.f32.mrf.mxu1 }
 0x5d8   :  { %v14314_v41 = vadd.f32 %v14313_v35, %v21801_v40  ;;  %v14594_v63 = vpop.f32.mrf.mxu0 }
 0x5d9   :  { %v21448_v8 = vadd.f32 %v14594_v63, %v14306_v18  ;;  %v14315_v33 = vpop.f32.mrf.mxu1  ;;  %v21807_v63 = vld [vmem:[#allocation15_spill] sm:$0xff] }
 0x5da   :  { %v14596_v32 = vpop.f32.mrf.mxu0 }
 0x5db   :  { %21802 = vst [vmem:[#allocation7_spill] sm:$0xff] %v21448_v8  ;;  %v14318_v29 = vpop.f32.mrf.mxu1 }
 0x5dc   :  { %v14319_v12 = vadd.f32 %v14318_v29, %v21803_v52  ;;  %v14599_v10 = vpop.f32.mrf.mxu0 }
 0x5dd   :  { %v21451_v47 = vadd.f32 %v14599_v10, %v14311_v0  ;;  %v14320_v27 = vpop.f32.mrf.mxu1  ;;  %v21809_v10 = vld [vmem:[#allocation13_spill] sm:$0xff] }
 0x5de   :  { %v14601_v6 = vpop.f32.mrf.mxu0 }
 0x5df   :  { %21804 = vst [vmem:[#allocation10_spill] sm:$0xff] %v21451_v47  ;;  %v14321_v45 = vpop.f32.mrf.mxu1 }
 0x5e0   :  { %v14322_v49 = vadd.f32 %v14321_v45, %v21805_v39  ;;  %v14602_v37 = vpop.f32.mrf.mxu0 }
 0x5e1   :  { %v21454_v30 = vadd.f32 %v14602_v37, %v14314_v41  ;;  %v14323_v35 = vpop.f32.mrf.mxu1  ;;  %v21811_v37 = vld [vmem:[#allocation18_spill] sm:$0xff] }
 0x5e2   :  { %v14604_v40 = vpop.f32.mrf.mxu0 }
 0x5e3   :  { %21806 = vst [vmem:[#allocation8_spill] sm:$0xff] %v21454_v30  ;;  %v14326_v18 = vpop.f32.mrf.mxu1 }
 0x5e4   :  { %v14327_v33 = vadd.f32 %v14326_v18, %v21807_v63  ;;  %v14607_v32 = vpop.f32.mrf.mxu0 }
 0x5e5   :  { %v21457_v8 = vadd.f32 %v14607_v32, %v14319_v12  ;;  %v14328_v29 = vpop.f32.mrf.mxu1  ;;  %v21813_v32 = vld [vmem:[#allocation16_spill] sm:$0xff] }
 0x5e6   :  { %v14609_v52 = vpop.f32.mrf.mxu0 }
 0x5e7   :  { %21808 = vst [vmem:[#allocation11_spill] sm:$0xff] %v21457_v8  ;;  %v14329_v0 = vpop.f32.mrf.mxu1 }
 0x5e8   :  { %v14330_v27 = vadd.f32 %v14329_v0, %v21809_v10  ;;  %v14610_v6 = vpop.f32.mrf.mxu0 }
 0x5e9   :  { %v21460_v47 = vadd.f32 %v14610_v6, %v14322_v49  ;;  %v14331_v45 = vpop.f32.mrf.mxu1  ;;  %v21815_v6 = vld [vmem:[#allocation19_spill] sm:$0xff] }
 0x5ea   :  { %v14612_v39 = vpop.f32.mrf.mxu0 }
 0x5eb   :  { %21810 = vst [vmem:[#allocation14_spill] sm:$0xff] %v21460_v47  ;;  %v14334_v41 = vpop.f32.mrf.mxu1 }
 0x5ec   :  { %v14335_v35 = vadd.f32 %v14334_v41, %v21811_v37  ;;  %v14615_v40 = vpop.f32.mrf.mxu0 }
 0x5ed   :  { %v21463_v30 = vadd.f32 %v14615_v40, %v14327_v33  ;;  %v14336_v18 = vpop.f32.mrf.mxu1  ;;  %v21817_v40 = vld [vmem:[#allocation17_spill] sm:$0xff] }
 0x5ee   :  { %v14617_v63 = vpop.f32.mrf.mxu0 }
 0x5ef   :  { %21812 = vst [vmem:[#allocation12_spill] sm:$0xff] %v21463_v30  ;;  %v14337_v12 = vpop.f32.mrf.mxu1 }
 0x5f0   :  { %v14338_v29 = vadd.f32 %v14337_v12, %v21813_v32  ;;  %v14618_v52 = vpop.f32.mrf.mxu0 }
 0x5f1   :  { %v21466_v8 = vadd.f32 %v14618_v52, %v14330_v27  ;;  %v14339_v0 = vpop.f32.mrf.mxu1  ;;  %v21818_v52 = vld [vmem:[#allocation22_spill] sm:$0xff] }
 0x5f2   :  { %v14620_v10 = vpop.f32.mrf.mxu0 }
 0x5f3   :  { %21814 = vst [vmem:[#allocation15_spill] sm:$0xff] %v21466_v8  ;;  %v14342_v49 = vpop.f32.mrf.mxu1 }
 0x5f4   :  { %v14343_v45 = vadd.f32 %v14342_v49, %v21815_v6  ;;  %v14623_v39 = vpop.f32.mrf.mxu0 }
 0x5f5   :  { %v21469_v47 = vadd.f32 %v14623_v39, %v14335_v35  ;;  %v14344_v41 = vpop.f32.mrf.mxu1  ;;  %v21819_v39 = vld [vmem:[#allocation20_spill] sm:$0xff] }
 0x5f6   :  { %v14625_v37 = vpop.f32.mrf.mxu0 }
 0x5f7   :  { %21816 = vst [vmem:[#allocation13_spill] sm:$0xff] %v21469_v47  ;;  %v14345_v33 = vpop.f32.mrf.mxu1 }
 0x5f8   :  { %v14346_v18 = vadd.f32 %v14345_v33, %v21817_v40  ;;  %v14626_v63 = vpop.f32.mrf.mxu0 }
 0x5f9   :  { %v21472_v30 = vadd.f32 %v14626_v63, %v14338_v29  ;;  %v14347_v12 = vpop.f32.mrf.mxu1 }
 0x5fa   :  { %v14628_v32 = vpop.f32.mrf.mxu0 }
 0x5fb   :  { %v14350_v27 = vpop.f32.mrf.mxu1 }
 0x5fc   :  { %v14351_v0 = vadd.f32 %v14350_v27, %v21818_v52  ;;  %v14631_v10 = vpop.f32.mrf.mxu0 }
 0x5fd   :  { %v21475_v8 = vadd.f32 %v14631_v10, %v14343_v45  ;;  %v14352_v49 = vpop.f32.mrf.mxu1 }
 0x5fe   :  { %v14633_v6 = vpop.f32.mrf.mxu0 }
 0x5ff   :  { %v14353_v35 = vpop.f32.mrf.mxu1 }
 0x600   :  { %v14354_v41 = vadd.f32 %v14353_v35, %v21819_v39  ;;  %v14634_v37 = vpop.f32.mrf.mxu0 }
 0x601   :  { %v21478_v47 = vadd.f32 %v14634_v37, %v14346_v18  ;;  %v14355_v33 = vpop.f32.mrf.mxu1 }
 0x602   :  { %v14636_v40 = vpop.f32.mrf.mxu0 }
 0x603   :  { %21820 = vst [vmem:[#allocation18_spill] sm:$0xff] %v21478_v47  ;;  %v14358_v29 = vpop.f32.mrf.mxu1 }
 0x604   :  { %v14359_v63 = vadd.f32 %v14358_v29, %v21294_v46  ;;  %v14639_v12 = vpop.f32.mrf.mxu0 }
 0x605   :  { %v21481_v32 = vadd.f32 %v14639_v12, %v14351_v0  ;;  %v14360_v27 = vpop.f32.mrf.mxu1 }
 0x606   :  { %v14641_v52 = vpop.f32.mrf.mxu0 }
 0x607   :  { %v14361_v45 = vpop.f32.mrf.mxu1 }
 0x608   :  { %v14362_v10 = vadd.f32 %v14361_v45, %v21298_v22  ;;  %v14642_v49 = vpop.f32.mrf.mxu0 }
 0x609   :  { %v21484_v6 = vadd.f32 %v14642_v49, %v14354_v41  ;;  %v14363_v35 = vpop.f32.mrf.mxu1 }
 0x60a   :  { %v14644_v39 = vpop.f32.mrf.mxu0 }
 0x60b   :  { %v18451_v18 = vpop.f32.mrf.mxu1 }
 0x60c   :  { %v14647_v37 = vpop.f32.mrf.mxu0  ;;  %v14697_v22 = vadd.f32 %v18451_v18, %v21307_v19 }
 0x60d   :  { %v21486_v33 = vadd.f32 %v14647_v37, %v14359_v63  ;;  %v14688_v40 = vpop.f32.mrf.mxu1 }
 0x60e   :  { %v14649_v47 = vpop.f32.mrf.mxu0  ;;  %v14689_v46 = vadd.f32 %v14688_v40, %v21301_v56 }
 0x60f   :  { %v18452_v0 = vpop.f32.mrf.mxu1  ;;  %v14945_v47 = vmax.f32 %v14697_v22, 0.0 }
 0x610   :  { %v14943_v29 = vmax.f32 %v14689_v46, 0.0  ;;  %v14650_v12 = vpop.f32.mrf.mxu0  ;;  %v14700_v63 = vadd.f32 %v18452_v0, %v21310_v13 }
 0x611   :  { %v21489_v27 = vadd.f32 %v14650_v12, %v14362_v10  ;;  %v14691_v52 = vpop.f32.mrf.mxu1 }
 0x612   :  { %v14692_v41 = vadd.f32 %v14691_v52, %v21304_v36  ;;  %15007 = vxpose.xlu0.b32.start [1/16] (narrow) %v14943_v29, 16  ;;  %v14652_v45 = vpop.f32.mrf.mxu0  ;;  %v14946_v10 = vmax.f32 %v14700_v63, 0.0 }
 0x613   :  { %v18455_v49 = vpop.f32.mrf.mxu1 }
 0x614   :  { %v14944_v35 = vmax.f32 %v14692_v41, 0.0  ;;  %v14713_v19 = vadd.f32 %v18455_v49, %v21319_v42 }
 0x615   :  { %v14704_v39 = vpop.f32.mrf.mxu1 }
 0x616   :  { %v15075_v37 = vadd.f32 %v14944_v35, %v14943_v29  ;;  %v14705_v56 = vadd.f32 %v14704_v39, %v21313_v51  ;;  %15008 = vxpose.xlu0.b32.cont [2/16] (narrow) %v14944_v35, 16  ;;  %v14949_v41 = vmax.f32 %v14713_v19, 0.0 }
 0x617   :  { %v18456_v40 = vpop.f32.mrf.mxu1 }
 0x618   :  { %v15076_v46 = vadd.f32 %v15075_v37, %v14945_v47  ;;  %v14947_v18 = vmax.f32 %v14705_v56, 0.0  ;;  %v14716_v0 = vadd.f32 %v18456_v40, %v21322_v26 }
 0x619   :  { %v14707_v12 = vpop.f32.mrf.mxu1 }
 0x61a   :  { %v15077_v36 = vadd.f32 %v15076_v46, %v14946_v10  ;;  %v14708_v52 = vadd.f32 %v14707_v12, %v21316_v34  ;;  %15009 = vxpose.xlu0.b32.cont [3/16] (narrow) %v14945_v47, 16  ;;  %v14950_v39 = vmax.f32 %v14716_v0, 0.0 }
 0x61b   :  { %v18459_v45 = vpop.f32.mrf.mxu1 }
 0x61c   :  { %v15078_v13 = vadd.f32 %v15077_v36, %v14947_v18  ;;  %v14948_v22 = vmax.f32 %v14708_v52, 0.0  ;;  %v14729_v49 = vadd.f32 %v18459_v45, %v21331_v50 }
 0x61d   :  { %v14720_v29 = vpop.f32.mrf.mxu1 }
 0x61e   :  { %v15079_v51 = vadd.f32 %v15078_v13, %v14948_v22  ;;  %v14721_v35 = vadd.f32 %v14720_v29, %v21325_v7  ;;  %15010 = vxpose.xlu0.b32.cont [4/16] (narrow) %v14946_v10, 16  ;;  %v14953_v7 = vmax.f32 %v14729_v49, 0.0 }
 0x61f   :  { %v18460_v63 = vpop.f32.mrf.mxu1 }
 0x620   :  { %v15080_v37 = vadd.f32 %v15079_v51, %v14949_v41  ;;  %v14951_v56 = vmax.f32 %v14721_v35, 0.0  ;;  %v21502_v40 = vadd.f32 %v18460_v63, %v21334_v4 }
 0x621   :  { %v14723_v42 = vpop.f32.mrf.mxu1 }
 0x622   :  { %v15081_v34 = vadd.f32 %v15080_v37, %v14950_v39  ;;  %v14724_v47 = vadd.f32 %v14723_v42, %v21328_v25  ;;  %15011 = vxpose.xlu0.b32.cont [5/16] (narrow) %v14947_v18, 16  ;;  %v14954_v50 = vmax.f32 %v21502_v40, 0.0 }
 0x623   :  { %v18463_v46 = vpop.f32.mrf.mxu1 }
 0x624   :  { %v15082_v26 = vadd.f32 %v15081_v34, %v14951_v56  ;;  %v14952_v12 = vmax.f32 %v14724_v47, 0.0  ;;  %v21509_v25 = vadd.f32 %v18463_v46, %v21343_v53 }
 0x625   :  { %v14736_v19 = vpop.f32.mrf.mxu1 }
 0x626   :  { %v15083_v10 = vadd.f32 %v15082_v26, %v14952_v12  ;;  %v21505_v36 = vadd.f32 %v14736_v19, %v21337_v5  ;;  %15012 = vxpose.xlu0.b32.cont [6/16] (narrow) %v14948_v22, 16  ;;  %v14957_v63 = vmax.f32 %v21509_v25, 0.0 }
 0x627   :  { %v18464_v52 = vpop.f32.mrf.mxu1 }
 0x628   :  { %v15084_v45 = vadd.f32 %v15083_v10, %v14953_v7  ;;  %v14955_v18 = vmax.f32 %v21505_v36, 0.0  ;;  %v21516_v5 = vadd.f32 %v18464_v52, %v21346_v55 }
 0x629   :  { %v14739_v13 = vpop.f32.mrf.mxu1 }
 0x62a   :  { %v15085_v4 = vadd.f32 %v15084_v45, %v14954_v50  ;;  %v21513_v0 = vadd.f32 %v14739_v13, %v21340_v1  ;;  %15013 = vxpose.xlu0.b32.cont [7/16] (narrow) %v14949_v41, 16  ;;  %v14958_v1 = vmax.f32 %v21516_v5, 0.0 }
 0x62b   :  { %v18467_v29 = vpop.f32.mrf.mxu1 }
 0x62c   :  { %v15086_v51 = vadd.f32 %v15085_v4, %v14955_v18  ;;  %v14956_v22 = vmax.f32 %v21513_v0, 0.0  ;;  %v14761_v34 = vadd.f32 %v18467_v29, %v21355_v58 }
 0x62d   :  { %v14752_v35 = vpop.f32.mrf.mxu1 }
 0x62e   :  { %v15087_v53 = vadd.f32 %v15086_v51, %v14956_v22  ;;  %v14753_v37 = vadd.f32 %v14752_v35, %v21349_v11  ;;  %15014 = vxpose.xlu0.b32.cont [8/16] (narrow) %v14950_v39, 16  ;;  %v14961_v10 = vmax.f32 %v14761_v34, 0.0 }
 0x62f   :  { %v18468_v42 = vpop.f32.mrf.mxu1 }
 0x630   :  { %v15088_v41 = vadd.f32 %v15087_v53, %v14957_v63  ;;  %v14959_v49 = vmax.f32 %v14753_v37, 0.0  ;;  %v14764_v39 = vadd.f32 %v18468_v42, %v21358_v23 }
 0x631   :  { %v14755_v55 = vpop.f32.mrf.mxu1 }
 0x632   :  { %v15089_v47 = vadd.f32 %v15088_v41, %v14958_v1  ;;  %v14756_v46 = vadd.f32 %v14755_v55, %v21352_v44  ;;  %15039 = vxpose.xlu1.b32.start [1/16] (narrow) %v14959_v49, 16  ;;  %15015 = vxpose.xlu0.b32.cont [9/16] (narrow) %v14951_v56, 16  ;;  %v14962_v45 = vmax.f32 %v14764_v39, 0.0 }
 0x633   :  { %v18471_v26 = vpop.f32.mrf.mxu1 }
 0x634   :  { %v15090_v11 = vadd.f32 %v15089_v47, %v14959_v49  ;;  %v14960_v40 = vmax.f32 %v14756_v46, 0.0  ;;  %v14777_v44 = vadd.f32 %v18471_v26, %v21367_v54 }
 0x635   :  { %v14768_v19 = vpop.f32.mrf.mxu1 }
 0x636   :  { %v15091_v36 = vadd.f32 %v15090_v11, %v14960_v40  ;;  %v14769_v52 = vadd.f32 %v14768_v19, %v21361_v14  ;;  %15040 = vxpose.xlu1.b32.cont [2/16] (narrow) %v14960_v40, 16  ;;  %15016 = vxpose.xlu0.b32.cont [10/16] (narrow) %v14952_v12, 16  ;;  %v14965_v42 = vmax.f32 %v14777_v44, 0.0 }
 0x637   :  { %v18472_v58 = vpop.f32.mrf.mxu1 }
 0x638   :  { %v15092_v13 = vadd.f32 %v15091_v36, %v14961_v10  ;;  %v14963_v29 = vmax.f32 %v14769_v52, 0.0  ;;  %v14780_v53 = vadd.f32 %v18472_v58, %v21370_v38 }
 0x639   :  { %v14771_v4 = vpop.f32.mrf.mxu1 }
 0x63a   :  { %v15093_v56 = vadd.f32 %v15092_v13, %v14962_v45  ;;  %v14772_v51 = vadd.f32 %v14771_v4, %v21364_v57  ;;  %15041 = vxpose.xlu1.b32.cont [3/16] (narrow) %v14961_v10, 16  ;;  %15017 = vxpose.xlu0.b32.cont [11/16] (narrow) %v14953_v7, 16  ;;  %v14966_v54 = vmax.f32 %v14780_v53, 0.0 }
 0x63b   :  { %v18475_v23 = vpop.f32.mrf.mxu1 }
 0x63c   :  { %v15094_v35 = vadd.f32 %v15093_v56, %v14963_v29  ;;  %v14964_v37 = vmax.f32 %v14772_v51, 0.0  ;;  %v21537_v57 = vadd.f32 %v18475_v23, %v21379_v2 }
 0x63d   :  { %v14784_v14 = vpop.f32.mrf.mxu1 }
 0x63e   :  { %v15095_v12 = vadd.f32 %v15094_v35, %v14964_v37  ;;  %v14785_v41 = vadd.f32 %v14784_v14, %v21373_v9  ;;  %15042 = vxpose.xlu1.b32.cont [4/16] (narrow) %v14962_v45, 16  ;;  %15018 = vxpose.xlu0.b32.cont [12/16] (narrow) %v14954_v50, 16  ;;  %v14969_v39 = vmax.f32 %v21537_v57, 0.0 }
 0x63f   :  { %v18476_v49 = vpop.f32.mrf.mxu1 }
 0x640   :  { %v15096_v55 = vadd.f32 %v15095_v12, %v14965_v42  ;;  %v14967_v7 = vmax.f32 %v14785_v41, 0.0  ;;  %v21541_v11 = vadd.f32 %v18476_v49, %v21382_v59 }
 0x641   :  { %v14787_v34 = vpop.f32.mrf.mxu1 }
 0x642   :  { %v15097_v47 = vadd.f32 %v15096_v55, %v14966_v54  ;;  %v14788_v46 = vadd.f32 %v14787_v34, %v21376_v16  ;;  %15043 = vxpose.xlu1.b32.cont [5/16] (narrow) %v14963_v29, 16  ;;  %15019 = vxpose.xlu0.b32.cont [13/16] (narrow) %v14955_v18, 16  ;;  %v14970_v2 = vmax.f32 %v21541_v11, 0.0 }
 0x643   :  { %v18479_v38 = vpop.f32.mrf.mxu1 }
 0x644   :  { %v15098_v26 = vadd.f32 %v15097_v47, %v14967_v7  ;;  %v14968_v9 = vmax.f32 %v14788_v46, 0.0  ;;  %v21551_v59 = vadd.f32 %v18479_v38, %v21391_v15  ;;  %v21821_v38 = vld [vmem:[#allocation23_spill] sm:$0xff] }
 0x645   :  { %v14800_v50 = vpop.f32.mrf.mxu1 }
 0x646   :  { %v15099_v40 = vadd.f32 %v15098_v26, %v14968_v9  ;;  %v21545_v19 = vadd.f32 %v14800_v50, %v21385_v20  ;;  %15044 = vxpose.xlu1.b32.cont [6/16] (narrow) %v14964_v37, 16  ;;  %15020 = vxpose.xlu0.b32.cont [14/16] (narrow) %v14956_v22, 16  ;;  %v14973_v15 = vmax.f32 %v21551_v59, 0.0 }
 0x647   :  { %v18480_v16 = vpop.f32.mrf.mxu1 }
 0x648   :  { %v15100_v18 = vadd.f32 %v15099_v40, %v14969_v39  ;;  %v14971_v36 = vmax.f32 %v21545_v19, 0.0  ;;  %v21560_v22 = vadd.f32 %v18480_v16, %v21394_v24  ;;  %v21822_v40 = vld [vmem:[#allocation24_spill] sm:$0xff]  ;;  %v21823_v16 = vld [vmem:[#allocation21_spill] sm:$0xff] }
 0x649   :  { %v14803_v10 = vpop.f32.mrf.mxu1 }
 0x64a   :  { %v15101_v52 = vadd.f32 %v15100_v18, %v14970_v2  ;;  %v21555_v58 = vadd.f32 %v14803_v10, %v21388_v31  ;;  %15045 = vxpose.xlu1.b32.cont [7/16] (narrow) %v14965_v42, 16  ;;  %15021 = vxpose.xlu0.b32.cont [15/16] (narrow) %v14957_v63, 16  ;;  %v14974_v63 = vmax.f32 %v21560_v22, 0.0 }
 0x64b   :  { %v18483_v20 = vpop.f32.mrf.mxu1 }
 0x64c   :  { %v15102_v0 = vadd.f32 %v15101_v52, %v14971_v36  ;;  %v14972_v45 = vmax.f32 %v21555_v58, 0.0  ;;  %v14825_v51 = vadd.f32 %v18483_v20, %v21403_v21 }
 0x64d   :  { %v14816_v13 = vpop.f32.mrf.mxu1 }
 0x64e   :  { %v15103_v4 = vadd.f32 %v15102_v0, %v14972_v45  ;;  %v14817_v31 = vadd.f32 %v14816_v13, %v21397_v60  ;;  %15046 = vxpose.xlu1.b32.cont [8/16] (narrow) %v14966_v54, 16  ;;  %15022 = vxpose.xlu0.b32.end [16/16] (narrow) %v14958_v1, 16  ;;  %v14977_v53 = vmax.f32 %v14825_v51, 0.0 }
 0x64f   :  { %v18484_v25 = vpop.f32.mrf.mxu1 }
 0x650   :  { %v15104_v24 = vadd.f32 %v15103_v4, %v14973_v15  ;;  %v14975_v44 = vmax.f32 %v14817_v31, 0.0  ;;  %v14828_v5 = vadd.f32 %v18484_v25, %v21406_v43  ;;  %v21824_v31 = vld [vmem:[#allocation25_spill] sm:$0xff] }
 0x651   :  { %v14819_v29 = vpop.f32.mrf.mxu1 }
 0x652   :  { %v15105_v56 = vadd.f32 %v15104_v24, %v14974_v63  ;;  %v14820_v23 = vadd.f32 %v14819_v29, %v21400_v62  ;;  %15047 = vxpose.xlu1.b32.cont [9/16] (narrow) %v14967_v7, 16  ;;  %15114 = vxpose.xlu0.b32.start [1/16] (narrow) %v14975_v44, 16  ;;  %v14978_v12 = vmax.f32 %v14828_v5, 0.0 }
 0x653   :  { %v18487_v60 = vpop.f32.mrf.mxu1 }
 0x654   :  { %v14976_v1 = vmax.f32 %v14820_v23, 0.0  ;;  %v14841_v21 = vadd.f32 %v18487_v60, %v21415_v3 }
 0x655   :  { %v14832_v35 = vpop.f32.mrf.mxu1 }
 0x656   :  { %v15183_v37 = vadd.f32 %v14976_v1, %v14975_v44  ;;  %v14833_v14 = vadd.f32 %v14832_v35, %v21409_v17  ;;  %15048 = vxpose.xlu1.b32.cont [10/16] (narrow) %v14968_v9, 16  ;;  %15115 = vxpose.xlu0.b32.cont [2/16] (narrow) %v14976_v1, 16  ;;  %v14981_v47 = vmax.f32 %v14841_v21, 0.0  ;;  %v21826_v1 = vld [vmem:[#allocation26_spill] sm:$0xff] }
 0x657   :  { %v18488_v42 = vpop.f32.mrf.mxu1 }
 0x658   :  { %v15184_v41 = vadd.f32 %v15183_v37, %v14977_v53  ;;  %v14979_v62 = vmax.f32 %v14833_v14, 0.0  ;;  %v14844_v57 = vadd.f32 %v18488_v42, %v21418_v28  ;;  %v15106_v28 = vrot.slane %v15105_v56, 4 }
 0x659   :  { %v14835_v49 = vpop.f32.mrf.mxu1 }
 0x65a   :  { %v15185_v54 = vadd.f32 %v15184_v41, %v14978_v12  ;;  %v14836_v55 = vadd.f32 %v14835_v49, %v21412_v61  ;;  %15049 = vxpose.xlu1.b32.cont [11/16] (narrow) %v14969_v39, 16  ;;  %15116 = vxpose.xlu0.b32.cont [3/16] (narrow) %v14977_v53, 16  ;;  %v14982_v3 = vmax.f32 %v14844_v57, 0.0  ;;  %v21827_v53 = vld [vmem:[#allocation28_spill] sm:$0xff]  ;;  %v21828_v49 = vld [vmem:[#allocation9_spill] sm:$0xff] }
 0x65b   :  { %v18491_v43 = vpop.f32.mrf.mxu1 }
 0x65c   :  { %v15186_v34 = vadd.f32 %v15185_v54, %v14979_v62  ;;  %v14980_v7 = vmax.f32 %v14836_v55, 0.0  ;;  %v21583_v61 = vadd.f32 %v18491_v43, %v21822_v40 }
 0x65d   :  { %v14848_v17 = vpop.f32.mrf.mxu1 }
 0x65e   :  { %v15187_v46 = vadd.f32 %v15186_v34, %v14980_v7  ;;  %v14849_v26 = vadd.f32 %v14848_v17, %v21821_v38  ;;  %15050 = vxpose.xlu1.b32.cont [12/16] (narrow) %v14970_v2, 16  ;;  %15117 = vxpose.xlu0.b32.cont [4/16] (narrow) %v14978_v12, 16  ;;  %v14985_v13 = vmax.f32 %v21583_v61, 0.0  ;;  %v21829_v34 = vld [vmem:[#allocation10_spill] sm:$0xff]  ;;  %v21830_v17 = vld [vmem:[#allocation7_spill] sm:$0xff]  ;;  %v21831_v38 = vld [vmem:[#allocation8_spill] sm:$0xff] }
 0x65f   :  { %v18492_v11 = vpop.f32.mrf.mxu1  ;;  %v21832_v61 = vld [vmem:[#allocation11_spill] sm:$0xff] }
 0x660   :  { %v15188_v9 = vadd.f32 %v15187_v46, %v14981_v47  ;;  %v14983_v39 = vmax.f32 %v14849_v26, 0.0  ;;  %v21587_v20 = vadd.f32 %v18492_v11, %v21430_v48  ;;  %v21825_v48 = vld [vmem:[#allocation27_spill] sm:$0xff] }
 0x661   :  { %v14851_v50 = vpop.f32.mrf.mxu1 }
 0x662   :  { %v15189_v19 = vadd.f32 %v15188_v9, %v14982_v3  ;;  %v14852_v18 = vadd.f32 %v14851_v50, %v21823_v16  ;;  %15051 = vxpose.xlu1.b32.cont [13/16] (narrow) %v14971_v36, 16  ;;  %15118 = vxpose.xlu0.b32.cont [5/16] (narrow) %v14979_v62, 16  ;;  %v15107_v36 = vadd.f32 %v15106_v28, %v15105_v56  ;;  %v14986_v44 = vmax.f32 %v21587_v20, 0.0 }
 0x663   :  { %v18495_v10 = vpop.f32.mrf.mxu1 }
 0x664   :  { %v15190_v52 = vadd.f32 %v15189_v19, %v14983_v39  ;;  %v14984_v2 = vmax.f32 %v14852_v18, 0.0  ;;  %v21597_v23 = vadd.f32 %v18495_v10, %v21825_v48  ;;  %v15108_v58 = vrot.slane %v15107_v36, 2  ;;  %v21835_v48 = vld [vmem:[#allocation15_spill] sm:$0xff] }
 0x665   :  { %v14864_v0 = vpop.f32.mrf.mxu1 }
 0x666   :  { %v15191_v4 = vadd.f32 %v15190_v52, %v14984_v2  ;;  %v21591_v25 = vadd.f32 %v14864_v0, %v21824_v31  ;;  %15052 = vxpose.xlu1.b32.cont [14/16] (narrow) %v14972_v45, 16  ;;  %15119 = vxpose.xlu0.b32.cont [6/16] (narrow) %v14980_v7, 16  ;;  %v14989_v12 = vmax.f32 %v21597_v23, 0.0 }
 0x667   :  { %v18496_v24 = vpop.f32.mrf.mxu1 }
 0x668   :  { %v15192_v29 = vadd.f32 %v15191_v4, %v14985_v13  ;;  %v14987_v60 = vmax.f32 %v21591_v25, 0.0  ;;  %v21610_v37 = vadd.f32 %v18496_v24, %v21827_v53 }
 0x669   :  { %v14867_v51 = vpop.f32.mrf.mxu1 }
 0x66a   :  { %v15193_v5 = vadd.f32 %v15192_v29, %v14986_v44  ;;  %v21603_v35 = vadd.f32 %v14867_v51, %v21826_v1  ;;  %15053 = vxpose.xlu1.b32.cont [15/16] (narrow) %v14973_v15, 16  ;;  %15120 = vxpose.xlu0.b32.cont [7/16] (narrow) %v14981_v47, 16  ;;  %v15109_v15 = vadd.f32 %v15108_v58, %v15107_v36  ;;  %v14990_v62 = vmax.f32 %v21610_v37, 0.0  ;;  %v21834_v36 = vld [vmem:[#allocation14_spill] sm:$0xff] }
 0x66b   :  { %v18499_v45 = vpop.f32.mrf.mxu1 }
 0x66c   :  { %v15194_v56 = vadd.f32 %v15193_v5, %v14987_v60  ;;  %v14988_v14 = vmax.f32 %v21603_v35, 0.0  ;;  %v14889_v57 = vadd.f32 %v18499_v45, %v21829_v34  ;;  %v21837_v34 = vld [vmem:[#allocation18_spill] sm:$0xff] }
 0x66d   :  { %v14880_v42 = vpop.f32.mrf.mxu1 }
 0x66e   :  { %v15195_v41 = vadd.f32 %v15194_v56, %v14988_v14  ;;  %v14881_v59 = vadd.f32 %v14880_v42, %v21828_v49  ;;  %15054 = vxpose.xlu1.b32.end [16/16] (narrow) %v14974_v63, 16  ;;  %15121 = vxpose.xlu0.b32.cont [8/16] (narrow) %v14982_v3, 16  ;;  %v15110_v63 = vrot.slane %v15109_v15, 1  ;;  %v14993_v50 = vmax.f32 %v14889_v57, 0.0  ;;  %v21836_v56 = vld [vmem:[#allocation13_spill] sm:$0xff] }
 0x66f   :  { %v18500_v21 = vpop.f32.mrf.mxu1 }
 0x670   :  { %v15196_v54 = vadd.f32 %v15195_v41, %v14989_v12  ;;  %v14991_v55 = vmax.f32 %v14881_v59, 0.0  ;;  %v14892_v26 = vadd.f32 %v18500_v21, %v21831_v38  ;;  %v15111_v9 = vadd.f32 %v15110_v63, %v15109_v15 }
 0x671   :  { %v14883_v43 = vpop.f32.mrf.mxu1 }
 0x672   :  { %v15197_v7 = vadd.f32 %v15196_v54, %v14990_v62  ;;  %v14884_v47 = vadd.f32 %v14883_v43, %v21830_v17  ;;  %15146 = vxpose.xlu1.b32.start [1/16] (narrow) %v14991_v55, 16  ;;  %15122 = vxpose.xlu0.b32.cont [9/16] (narrow) %v14983_v39, 16  ;;  %v15112_v18 = vmul.f32 0.00390625, %v15111_v9  ;;  %v14994_v28 = vmax.f32 %v14892_v26, 0.0  ;;  %v21833_v39 = vld [vmem:[#allocation12_spill] sm:$0xff] }
 0x673   :  { %v18503_v22 = vpop.f32.mrf.mxu1 }
 0x674   :  { %v15198_v46 = vadd.f32 %v15197_v7, %v14991_v55  ;;  %v14992_v11 = vmax.f32 %v14884_v47, 0.0  ;;  %15113 = vst [vmem:[#allocation4] sm:$0x1] %v15112_v18  ;;  %v14905_v0 = vadd.f32 %v18503_v22, %v21833_v39 }
 0x675   :  { %v14896_v3 = vpop.f32.mrf.mxu1 }
 0x676   :  { %v15199_v40 = vadd.f32 %v15198_v46, %v14992_v11  ;;  %v14897_v19 = vadd.f32 %v14896_v3, %v21832_v61  ;;  %15147 = vxpose.xlu1.b32.cont [2/16] (narrow) %v14992_v11, 16  ;;  %15123 = vxpose.xlu0.b32.cont [10/16] (narrow) %v14984_v2, 16  ;;  %v14997_v58 = vmax.f32 %v14905_v0, 0.0 }
 0x677   :  { %v18504_v16 = vpop.f32.mrf.mxu1 }
 0x678   :  { %v15200_v10 = vadd.f32 %v15199_v40, %v14993_v50  ;;  %v14995_v4 = vmax.f32 %v14897_v19, 0.0  ;;  %v14908_v5 = vadd.f32 %v18504_v16, %v21835_v48 }
 0x679   :  { %v14899_v52 = vpop.f32.mrf.mxu1 }
 0x67a   :  { %v15201_v31 = vadd.f32 %v15200_v10, %v14994_v28  ;;  %v14900_v24 = vadd.f32 %v14899_v52, %v21834_v36  ;;  %15148 = vxpose.xlu1.b32.cont [3/16] (narrow) %v14993_v50, 16  ;;  %15124 = vxpose.xlu0.b32.cont [11/16] (narrow) %v14985_v13, 16  ;;  %v14998_v41 = vmax.f32 %v14908_v5, 0.0 }
 0x67b   :  { %v18507_v29 = vpop.f32.mrf.mxu1 }
 0x67c   :  { %v15202_v51 = vadd.f32 %v15201_v31, %v14995_v4  ;;  %v14996_v1 = vmax.f32 %v14900_v24, 0.0  ;;  %v14921_v13 = vadd.f32 %v18507_v29, %v21475_v8 }
 0x67d   :  { %v14912_v2 = vpop.f32.mrf.mxu1 }
 0x67e   :  { %v15203_v45 = vadd.f32 %v15202_v51, %v14996_v1  ;;  %v14913_v53 = vadd.f32 %v14912_v2, %v21836_v56  ;;  %15149 = vxpose.xlu1.b32.cont [4/16] (narrow) %v14994_v28, 16  ;;  %15125 = vxpose.xlu0.b32.cont [12/16] (narrow) %v14986_v44, 16  ;;  %v15001_v7 = vmax.f32 %v14921_v13, 0.0 }
 0x67f   :  { %v18508_v42 = vpop.f32.mrf.mxu1 }
 0x680   :  { %v15204_v49 = vadd.f32 %v15203_v45, %v14997_v58  ;;  %v14999_v15 = vmax.f32 %v14913_v53, 0.0  ;;  %v14924_v57 = vadd.f32 %v18508_v42, %v21837_v34 }
 0x681   :  { %v14915_v59 = vpop.f32.mrf.mxu1 }
 0x682   :  { %v15205_v21 = vadd.f32 %v15204_v49, %v14998_v41  ;;  %v14916_v54 = vadd.f32 %v14915_v59, %v21472_v30  ;;  %15150 = vxpose.xlu1.b32.cont [5/16] (narrow) %v14995_v4, 16  ;;  %15126 = vxpose.xlu0.b32.cont [13/16] (narrow) %v14987_v60, 16  ;;  %v15002_v30 = vmax.f32 %v14924_v57, 0.0 }
 0x683   :  { %v18511_v55 = vpop.f32.mrf.mxu1 }
 0x684   :  { %v15206_v43 = vadd.f32 %v15205_v21, %v14999_v15  ;;  %v15000_v20 = vmax.f32 %v14916_v54, 0.0  ;;  %v14937_v25 = vadd.f32 %v18511_v55, %v21486_v33 }
 0x685   :  { %v14928_v44 = vpop.f32.mrf.mxu1 }
 0x686   :  { %v15207_v17 = vadd.f32 %v15206_v43, %v15000_v20  ;;  %v14929_v47 = vadd.f32 %v14928_v44, %v21481_v32  ;;  %15151 = vxpose.xlu1.b32.cont [6/16] (narrow) %v14996_v1, 16  ;;  %15127 = vxpose.xlu0.b32.cont [14/16] (narrow) %v14988_v14, 16  ;;  %v15005_v35 = vmax.f32 %v14937_v25, 0.0 }
 0x687   :  { %v18512_v8 = vpop.f32.mrf.mxu1 }
 0x688   :  { %v15208_v22 = vadd.f32 %v15207_v17, %v15001_v7  ;;  %v15003_v60 = vmax.f32 %v14929_v47, 0.0  ;;  %v14940_v32 = vadd.f32 %v18512_v8, %v21489_v27 }
 0x689   :  { %v14931_v63 = vpop.f32.mrf.mxu1 }
 0x68a   :  { %v15209_v46 = vadd.f32 %v15208_v22, %v15002_v30  ;;  %v14932_v38 = vadd.f32 %v14931_v63, %v21484_v6  ;;  %15152 = vxpose.xlu1.b32.cont [7/16] (narrow) %v14997_v58, 16  ;;  %15128 = vxpose.xlu0.b32.cont [15/16] (narrow) %v14989_v12, 16  ;;  %v15006_v6 = vmax.f32 %v14940_v32, 0.0 }
 0x68c   :  { %v15210_v26 = vadd.f32 %v15209_v46, %v15003_v60  ;;  %v15004_v11 = vmax.f32 %v14932_v38, 0.0 }
 0x68e   :  { %v15211_v14 = vadd.f32 %v15210_v26, %v15004_v11  ;;  %15153 = vxpose.xlu1.b32.cont [8/16] (narrow) %v14998_v41, 16  ;;  %15129 = vxpose.xlu0.b32.end [16/16] (narrow) %v14990_v62, 16  ;;  %v15023_v3 = vpop.trf.xlu0 }
 0x68f   :  { %15071 = vst [vmem:[%s21681_s5] sm:$0xff] %v15023_v3 }
 0x690   :  { %v15212_v33 = vadd.f32 %v15211_v14, %v15005_v35 }
 0x692   :  { %v15213_v9 = vadd.f32 %v15212_v33, %v15006_v6  ;;  %15154 = vxpose.xlu1.b32.cont [9/16] (narrow) %v14999_v15, 16  ;;  %v15024_v23 = vpop.trf.xlu0 }
 0x693   :  { %15073 = vst [vmem:[%s21681_s5 + $0x10] sm:$0xff] %v15024_v23 }
 0x694   :  { %v15214_v27 = vrot.slane %v15213_v9, 4 }
 0x696   :  { %v15215_v12 = vadd.f32 %v15214_v27, %v15213_v9  ;;  %15155 = vxpose.xlu1.b32.cont [10/16] (narrow) %v15000_v20, 16 }
 0x698   :  { %v15216_v50 = vrot.slane %v15215_v12, 2 }
 0x69a   :  { %v15217_v37 = vadd.f32 %v15216_v50, %v15215_v12  ;;  %15156 = vxpose.xlu1.b32.cont [11/16] (narrow) %v15001_v7, 16 }
 0x69c   :  { %v15218_v62 = vrot.slane %v15217_v37, 1 }
 0x69e   :  { %15157 = vxpose.xlu1.b32.cont [12/16] (narrow) %v15002_v30, 16  ;;  %v15219_v40 = vadd.f32 %v15218_v62, %v15217_v37 }
 0x6a0   :  { %v15220_v61 = vmul.f32 0.00390625, %v15219_v40 }
 0x6a2   :  { %15158 = vxpose.xlu1.b32.cont [13/16] (narrow) %v15003_v60, 16  ;;  %15222 = vst [vmem:[#allocation4 + $0x1] sm:$0x1] %v15220_v61 }
 0x6a3   :  { %19508 = shalt.err (!%p19505_p4)
}
 0x6a4   :  { %s19523_s9 = smov 16   ;;  %s19524_s10 = smov 1  }
 0x6a5   :  { %15236 = dma.vmem_to_hbm [thread:$0]  %s15231_s7, 32, %s21682_s6, [#allocation5], %s19523_s9, %s19523_s9, %s19524_s10  }
 0x6a6   :  { %15159 = vxpose.xlu1.b32.cont [14/16] (narrow) %v15004_v11, 16 }
 0x6aa   :  { %15160 = vxpose.xlu1.b32.cont [15/16] (narrow) %v15005_v35, 16 }
 0x6ae   :  { %15161 = vxpose.xlu1.b32.end [16/16] (narrow) %v15006_v6, 16  ;;  %v15055_v19 = vpop.trf.xlu1 }
 0x6af   :  { %15072 = vst [vmem:[%s21681_s5 + $0x8] sm:$0xff] %v15055_v19 }
 0x6b2   :  { %v15056_v16 = vpop.trf.xlu1 }
 0x6b3   :  { %15074 = vst [vmem:[%s21681_s5 + $0x18] sm:$0xff] %v15056_v16 }
 0x6ce   :  { %v15130_v18 = vpop.trf.xlu0 }
 0x6cf   :  { %17117 = vst [vmem:[%s21681_s5 + $0x20] sm:$0xff] %v15130_v18 }
 0x6d2   :  { %v15131_v28 = vpop.trf.xlu0 }
 0x6d3   :  { %17119 = vst [vmem:[%s21681_s5 + $0x30] sm:$0xff] %v15131_v28 }
 0x6ee   :  { %v15162_v10 = vpop.trf.xlu1 }
 0x6ef   :  { %17118 = vst [vmem:[%s21681_s5 + $0x28] sm:$0xff] %v15162_v10 }
 0x6f2   :  { %v15163_v52 = vpop.trf.xlu1 }
 0x6f3   :  { %17120 = vst [vmem:[%s21681_s5 + $0x38] sm:$0xff] %v15163_v52 }
 0x6f4   :  { %19517 = dma.done.wait [#allocation5], 32  }
 0x6f5   :  { %19518 = vsyncadd [#allocation5], 4294967264 }
 0x6f6   :  { %15242 = vsyncpa [#allocation5], 1 }

</bundles_post_ra>
